<compile_context>
chip_gen: v5e
topology: v5e:2x2
jax: 0.10.0
libtpu: 0.0.40
codegen_flags: <defaults>
</compile_context>

<pallas_src>
import jax
import jax.numpy as jnp
from jax.experimental import pallas as pl
from jax.experimental.pallas import tpu as pltpu


# (kh, kw, pad_h, pad_w, out_channels) for conv1..conv3 — matches the PyTorch module.
_CONV = [
    (3, 4, 1, 1, 32),
    (2, 2, 1, 0, 64),
    (2, 2, 1, 0, 128),
]
_FC1 = 64


def _geometry(H, W):
    """Per-layer padded / output spatial sizes and the global flattened row stride."""
    dims = []
    h, w = H, W
    for (kh, kw, ph, pw, _c) in _CONV:
        hp, wp = h + 2 * ph, w + 2 * pw
        ho, wo = hp - kh + 1, wp - kw + 1
        dims.append((hp, wp, ho, wo))
        h, w = ho, wo
    # Widths only shrink after conv1, so conv1's padded width (rounded up to a
    # multiple of 8 for aligned sublane stores) works as a global row stride.
    wrow = ((dims[0][1] + 7) // 8) * 8
    assert all(wp <= wrow for (_hp, wp, _ho, _wo) in dims)
    # Layers 2/3 must have zero width padding for the flattened-window trick.
    assert _CONV[1][3] == 0 and _CONV[2][3] == 0
    return dims, wrow


@jax.jit
def cnn_forward(x, params):
    """x: (B, H, W, C) — same input the torch forward receives before its permute."""
    B, H, W, Cin = x.shape
    (kh1, kw1, ph1, pw1, C1), (kh2, kw2, ph2, pw2, C2), (kh3, kw3, ph3, pw3, C3) = _CONV
    dims, Wrow = _geometry(H, W)
    (Hp1, Wp1, Ho1, Wo1), (Hp2, Wp2, Ho2, Wo2), (Hp3, Wp3, Ho3, Wo3) = dims

    S1, S2, S3 = Hp1 * Wrow, Hp2 * Wrow, Hp3 * Wrow          # flattened padded lengths
    L1 = (Ho1 - 1) * Wrow + Wo1                              # flattened conv output spans
    L2 = (Ho2 - 1) * Wrow + Wo2
    L3 = (Ho3 - 1) * Wrow + Wo3
    NC = params["fw2"].shape[1]

    # ---- tiny one-shot wrapper-side prep -----------------------------------------
    # Spatial zero-pad for conv1 + pad width out to the global row stride, then flatten.
    xp = jnp.pad(x, ((0, 0), (ph1, ph1), (pw1, pw1 + (Wrow - Wp1)), (0, 0)))
    xf = xp.reshape(B, S1, Cin).astype(jnp.float32)

    # Weights as (kh*kw, Cin, Cout) bf16 taps (MXU operands); biases as (1, Cout) f32.
    w1r = params["w1"].reshape(kh1 * kw1, Cin, C1).astype(jnp.bfloat16)
    w2r = params["w2"].reshape(kh2 * kw2, C1, C2).astype(jnp.bfloat16)
    w3r = params["w3"].reshape(kh3 * kw3, C2, C3).astype(jnp.bfloat16)
    fw1 = params["fw1"].astype(jnp.bfloat16)
    fw2 = params["fw2"].astype(jnp.bfloat16)
    b1r = params["b1"].reshape(1, C1).astype(jnp.float32)
    b2r = params["b2"].reshape(1, C2).astype(jnp.float32)
    b3r = params["b3"].reshape(1, C3).astype(jnp.float32)
    fb1 = params["fb1"].reshape(1, _FC1).astype(jnp.float32)
    fb2 = params["fb2"].reshape(1, NC).astype(jnp.float32)

    # Pooling mask over the flattened conv3 output: selects the Ho3*Wo3 valid positions
    # (columns < Wo3 of each Wrow-wide row) and folds in AdaptiveAvgPool2d's 1/(Ho3*Wo3).
    cols = jnp.arange(L3, dtype=jnp.int32) % Wrow
    pool_mask = jnp.where(cols < Wo3, 1.0 / float(Ho3 * Wo3), 0.0)
    pool_mask = pool_mask.astype(jnp.float32).reshape(L3, 1)

    # ---- the fused kernel ----------------------------------------------------------
    def kernel(x_ref, w1_ref, b1_ref, w2_ref, b2_ref, w3_ref, b3_ref,
               fw1_ref, fb1_ref, fw2_ref, fb2_ref, mask_ref,
               o_ref, a1_ref, a2_ref):
        # Zero the padded-activation scratch every step: guarantees the zero padding
        # rows read by conv2/conv3 (junk columns stay harmlessly defined).
        a1_ref[...] = jnp.zeros_like(a1_ref)
        a2_ref[...] = jnp.zeros_like(a2_ref)

        def conv(load, w_ref, kh, kw, L):
            # Shifted-window convolution: kh*kw bf16 MXU matmuls, f32 accumulation.
            acc = None
            for i in range(kh):
                for j in range(kw):
                    a = load(i * Wrow + j, L).astype(jnp.bfloat16)        # (L, Cin)
                    p = jnp.dot(a, w_ref[i * kw + j],
                                preferred_element_type=jnp.float32)        # (L, Cout)
                    acc = p if acc is None else acc + p
            return acc

        # conv1 + ReLU -> padded flattened activation a1 (shifted down by ph2 rows).
        acc1 = conv(lambda o, l: x_ref[0, pl.ds(o, l), :], w1_ref, kh1, kw1, L1)
        a1_ref[pl.ds(ph2 * Wrow, L1), :] = jnp.maximum(acc1 + b1_ref[...], 0.0)

        # conv2 + ReLU -> padded flattened activation a2 (shifted down by ph3 rows).
        acc2 = conv(lambda o, l: a1_ref[pl.ds(o, l), :], w2_ref, kh2, kw2, L2)
        a2_ref[pl.ds(ph3 * Wrow, L2), :] = jnp.maximum(acc2 + b2_ref[...], 0.0)

        # conv3 + ReLU + masked global average pool (mask also normalizes).
        acc3 = conv(lambda o, l: a2_ref[pl.ds(o, l), :], w3_ref, kh3, kw3, L3)
        feat = jnp.maximum(acc3 + b3_ref[...], 0.0) * mask_ref[...]
        pooled = jnp.sum(feat, axis=0, keepdims=True)                      # (1, C3) f32

        # fc1 + ReLU, fc2 + sigmoid.
        # TODO(synk): nn.Dropout(p=0.5) is modeled as identity (inference mode).
        h = jnp.dot(pooled.astype(jnp.bfloat16), fw1_ref[...],
                    preferred_element_type=jnp.float32) + fb1_ref[...]
        h = jnp.maximum(h, 0.0)
        logits = jnp.dot(h.astype(jnp.bfloat16), fw2_ref[...],
                         preferred_element_type=jnp.float32) + fb2_ref[...]
        o_ref[0] = jax.nn.sigmoid(logits).astype(o_ref.dtype)

    def full(shape):
        nd = len(shape)

        def imap(b):
            return (0,) * nd

        return pl.BlockSpec(shape, imap)

    grid_spec = pltpu.PrefetchScalarGridSpec(
        num_scalar_prefetch=0,
        grid=(B,),
        in_specs=[
            pl.BlockSpec((1, S1, Cin), lambda b: (b, 0, 0)),
            full(w1r.shape), full(b1r.shape),
            full(w2r.shape), full(b2r.shape),
            full(w3r.shape), full(b3r.shape),
            full(fw1.shape), full(fb1.shape),
            full(fw2.shape), full(fb2.shape),
            full(pool_mask.shape),
        ],
        out_specs=pl.BlockSpec((1, 1, NC), lambda b: (b, 0, 0)),
        scratch_shapes=[
            pltpu.VMEM((S2, C1), jnp.float32),   # padded conv1 activation (flattened)
            pltpu.VMEM((S3, C2), jnp.float32),   # padded conv2 activation (flattened)
        ],
    )

    out = pl.pallas_call(
        kernel,
        grid_spec=grid_spec,
        out_shape=jax.ShapeDtypeStruct((B, 1, NC), jnp.float32),
        compiler_params=pltpu.CompilerParams(
            dimension_semantics=("parallel",),   # batch across TensorCores on v7x
        ),
    )(xf, w1r, b1r, w2r, b2r, w3r, b3r, fw1, fb1, fw2, fb2, pool_mask)
    return out.reshape(B, NC)


# ---- parameters & pure-JAX reference (for a correctness self-check) ----------------
def init_params(key, n_channels, num_classes=1):
    ks = jax.random.split(key, 10)
    s = 0.05
    return {
        "w1": jax.random.normal(ks[0], (3, 4, n_channels, 32), jnp.float32) * s,
        "b1": jax.random.normal(ks[1], (32,), jnp.float32) * s,
        "w2": jax.random.normal(ks[2], (2, 2, 32, 64), jnp.float32) * s,
        "b2": jax.random.normal(ks[3], (64,), jnp.float32) * s,
        "w3": jax.random.normal(ks[4], (2, 2, 64, 128), jnp.float32) * s,
        "b3": jax.random.normal(ks[5], (128,), jnp.float32) * s,
        "fw1": jax.random.normal(ks[6], (128, 64), jnp.float32) * s,
        "fb1": jax.random.normal(ks[7], (64,), jnp.float32) * s,
        "fw2": jax.random.normal(ks[8], (64, num_classes), jnp.float32) * s,
        "fb2": jax.random.normal(ks[9], (num_classes,), jnp.float32) * s,
    }


def cnn_reference(x, params):
    h = x
    for wk, bk, (_kh, _kw, ph, pw, _c) in (("w1", "b1", _CONV[0]),
                                           ("w2", "b2", _CONV[1]),
                                           ("w3", "b3", _CONV[2])):
        dn = jax.lax.conv_dimension_numbers(h.shape, params[wk].shape,
                                            ("NHWC", "HWIO", "NHWC"))
        h = jax.lax.conv_general_dilated(h, params[wk], window_strides=(1, 1),
                                         padding=((ph, ph), (pw, pw)),
                                         dimension_numbers=dn)
        h = jnp.maximum(h + params[bk], 0.0)
    pooled = jnp.mean(h, axis=(1, 2))
    f = jnp.maximum(pooled @ params["fw1"] + params["fb1"], 0.0)
    return jax.nn.sigmoid(f @ params["fw2"] + params["fb2"])


if __name__ == "__main__":
    key = jax.random.PRNGKey(0)
    k_x, k_p = jax.random.split(key)

    B, H, W, C = 2, 16, 16, 4
    x = jax.random.normal(k_x, (B, H, W, C), jnp.float32)
    params = init_params(k_p, n_channels=C, num_classes=1)

    out = cnn_forward(x, params)
    out = jax.block_until_ready(out)

    assert out.shape == (B, 1)
    assert bool(jnp.all(jnp.isfinite(out)))
    assert bool(jnp.all((out >= 0.0) & (out <= 1.0)))          # sigmoid range

    ref = cnn_reference(x, params)                             # f32 reference
    err = float(jnp.max(jnp.abs(out - ref)))
    assert err < 5e-2, f"mismatch vs reference: {err}"

    print("KERNEL_OK")
</pallas_src>

<mosaic_0001>
module attributes {stable_mosaic.version = 11 : i64} {
  func.func @kernel(%arg0: i32, %arg1: memref<1x432x4xf32, #tpu.memory_space<vmem>>, %arg2: memref<12x4x32xbf16, #tpu.memory_space<vmem>>, %arg3: memref<1x32xf32, #tpu.memory_space<vmem>>, %arg4: memref<4x32x64xbf16, #tpu.memory_space<vmem>>, %arg5: memref<1x64xf32, #tpu.memory_space<vmem>>, %arg6: memref<4x64x128xbf16, #tpu.memory_space<vmem>>, %arg7: memref<1x128xf32, #tpu.memory_space<vmem>>, %arg8: memref<128x64xbf16, #tpu.memory_space<vmem>>, %arg9: memref<1x64xf32, #tpu.memory_space<vmem>>, %arg10: memref<64x1xbf16, #tpu.memory_space<vmem>>, %arg11: memref<1x1xf32, #tpu.memory_space<vmem>>, %arg12: memref<421x1xf32, #tpu.memory_space<vmem>>, %arg13: memref<1x1x1xf32, #tpu.memory_space<vmem>>, %arg14: memref<432x32xf32, #tpu.memory_space<vmem>>, %arg15: memref<456x64xf32, #tpu.memory_space<vmem>>) attributes {dimension_semantics = [#tpu.dimension_semantics<parallel>], iteration_bounds = array<i64: 2>, scalar_prefetch = 0 : i64, scratch_operands = 2 : i64, tpu.core_type = #tpu.core_type<tc>, window_params = [{transform_indices = @transform_0, window_bounds = array<i64: 1, 432, 4>}, {pipeline_mode = #tpu.pipeline_mode<synchronous>, transform_indices = @transform_1, window_bounds = array<i64: 12, 4, 32>}, {pipeline_mode = #tpu.pipeline_mode<synchronous>, transform_indices = @transform_2, window_bounds = array<i64: 1, 32>}, {pipeline_mode = #tpu.pipeline_mode<synchronous>, transform_indices = @transform_3, window_bounds = array<i64: 4, 32, 64>}, {pipeline_mode = #tpu.pipeline_mode<synchronous>, transform_indices = @transform_4, window_bounds = array<i64: 1, 64>}, {pipeline_mode = #tpu.pipeline_mode<synchronous>, transform_indices = @transform_5, window_bounds = array<i64: 4, 64, 128>}, {pipeline_mode = #tpu.pipeline_mode<synchronous>, transform_indices = @transform_6, window_bounds = array<i64: 1, 128>}, {pipeline_mode = #tpu.pipeline_mode<synchronous>, transform_indices = @transform_7, window_bounds = array<i64: 128, 64>}, {pipeline_mode = #tpu.pipeline_mode<synchronous>, transform_indices = @transform_8, window_bounds = array<i64: 1, 64>}, {pipeline_mode = #tpu.pipeline_mode<synchronous>, transform_indices = @transform_9, window_bounds = array<i64: 64, 1>}, {pipeline_mode = #tpu.pipeline_mode<synchronous>, transform_indices = @transform_10, window_bounds = array<i64: 1, 1>}, {pipeline_mode = #tpu.pipeline_mode<synchronous>, transform_indices = @transform_11, window_bounds = array<i64: 421, 1>}, {transform_indices = @transform_12, window_bounds = array<i64: 1, 1, 1>}]} {
    %cst = arith.constant 0.000000e+00 : f32
    %0 = vector.broadcast %cst : f32 to vector<432x32xf32>
    %c0 = arith.constant 0 : index
    %c0_0 = arith.constant 0 : index
    %1 = vector.load %arg14[%c0, %c0_0] : memref<432x32xf32, #tpu.memory_space<vmem>>, vector<432x32xf32>
    tpu.vector_store %arg14[%c0, %c0_0], %0 {strides = array<i32>} : memref<432x32xf32, #tpu.memory_space<vmem>>, vector<432x32xf32>,
    %cst_1 = arith.constant 0.000000e+00 : f32
    %2 = vector.broadcast %cst_1 : f32 to vector<456x64xf32>
    %c0_2 = arith.constant 0 : index
    %c0_3 = arith.constant 0 : index
    %3 = vector.load %arg15[%c0_2, %c0_3] : memref<456x64xf32, #tpu.memory_space<vmem>>, vector<456x64xf32>
    tpu.vector_store %arg15[%c0_2, %c0_3], %2 {strides = array<i32>} : memref<456x64xf32, #tpu.memory_space<vmem>>, vector<456x64xf32>,
    %c0_4 = arith.constant 0 : index
    %c0_5 = arith.constant 0 : index
    %c0_6 = arith.constant 0 : index
    %4 = vector.load %arg1[%c0_4, %c0_5, %c0_6] : memref<1x432x4xf32, #tpu.memory_space<vmem>>, vector<1x375x4xf32>
    %5 = vector.shape_cast %4 : vector<1x375x4xf32> to vector<375x4xf32>
    %6 = arith.truncf %5 : vector<375x4xf32> to vector<375x4xbf16>
    %c0_7 = arith.constant 0 : index
    %c0_8 = arith.constant 0 : index
    %c0_9 = arith.constant 0 : index
    %7 = vector.load %arg2[%c0_7, %c0_8, %c0_9] : memref<12x4x32xbf16, #tpu.memory_space<vmem>>, vector<1x4x32xbf16>
    %8 = vector.shape_cast %7 : vector<1x4x32xbf16> to vector<4x32xbf16>
    %cst_10 = arith.constant dense<0.000000e+00> : vector<375x32xf32>
    %9 = tpu.matmul %6, %8, %cst_10 {dimension_numbers = #tpu.dot_dimension_numbers<[1], [0], [0], [1], [0, 0, 1, 1], [], []>} : vector<375x4xbf16>, vector<4x32xbf16>, vector<375x32xf32> -> vector<375x32xf32>
    %c0_11 = arith.constant 0 : index
    %c1 = arith.constant 1 : index
    %c0_12 = arith.constant 0 : index
    %10 = vector.load %arg1[%c0_11, %c1, %c0_12] : memref<1x432x4xf32, #tpu.memory_space<vmem>>, vector<1x375x4xf32>
    %11 = vector.shape_cast %10 : vector<1x375x4xf32> to vector<375x4xf32>
    %12 = arith.truncf %11 : vector<375x4xf32> to vector<375x4xbf16>
    %c1_13 = arith.constant 1 : index
    %c0_14 = arith.constant 0 : index
    %c0_15 = arith.constant 0 : index
    %13 = vector.load %arg2[%c1_13, %c0_14, %c0_15] : memref<12x4x32xbf16, #tpu.memory_space<vmem>>, vector<1x4x32xbf16>
    %14 = vector.shape_cast %13 : vector<1x4x32xbf16> to vector<4x32xbf16>
    %cst_16 = arith.constant dense<0.000000e+00> : vector<375x32xf32>
    %15 = tpu.matmul %12, %14, %cst_16 {dimension_numbers = #tpu.dot_dimension_numbers<[1], [0], [0], [1], [0, 0, 1, 1], [], []>} : vector<375x4xbf16>, vector<4x32xbf16>, vector<375x32xf32> -> vector<375x32xf32>
    %16 = arith.addf %9, %15 : vector<375x32xf32>
    %c0_17 = arith.constant 0 : index
    %c2 = arith.constant 2 : index
    %c0_18 = arith.constant 0 : index
    %17 = vector.load %arg1[%c0_17, %c2, %c0_18] : memref<1x432x4xf32, #tpu.memory_space<vmem>>, vector<1x375x4xf32>
    %18 = vector.shape_cast %17 : vector<1x375x4xf32> to vector<375x4xf32>
    %19 = arith.truncf %18 : vector<375x4xf32> to vector<375x4xbf16>
    %c2_19 = arith.constant 2 : index
    %c0_20 = arith.constant 0 : index
    %c0_21 = arith.constant 0 : index
    %20 = vector.load %arg2[%c2_19, %c0_20, %c0_21] : memref<12x4x32xbf16, #tpu.memory_space<vmem>>, vector<1x4x32xbf16>
    %21 = vector.shape_cast %20 : vector<1x4x32xbf16> to vector<4x32xbf16>
    %cst_22 = arith.constant dense<0.000000e+00> : vector<375x32xf32>
    %22 = tpu.matmul %19, %21, %cst_22 {dimension_numbers = #tpu.dot_dimension_numbers<[1], [0], [0], [1], [0, 0, 1, 1], [], []>} : vector<375x4xbf16>, vector<4x32xbf16>, vector<375x32xf32> -> vector<375x32xf32>
    %23 = arith.addf %16, %22 : vector<375x32xf32>
    %c0_23 = arith.constant 0 : index
    %c3 = arith.constant 3 : index
    %c0_24 = arith.constant 0 : index
    %24 = vector.load %arg1[%c0_23, %c3, %c0_24] : memref<1x432x4xf32, #tpu.memory_space<vmem>>, vector<1x375x4xf32>
    %25 = vector.shape_cast %24 : vector<1x375x4xf32> to vector<375x4xf32>
    %26 = arith.truncf %25 : vector<375x4xf32> to vector<375x4xbf16>
    %c3_25 = arith.constant 3 : index
    %c0_26 = arith.constant 0 : index
    %c0_27 = arith.constant 0 : index
    %27 = vector.load %arg2[%c3_25, %c0_26, %c0_27] : memref<12x4x32xbf16, #tpu.memory_space<vmem>>, vector<1x4x32xbf16>
    %28 = vector.shape_cast %27 : vector<1x4x32xbf16> to vector<4x32xbf16>
    %cst_28 = arith.constant dense<0.000000e+00> : vector<375x32xf32>
    %29 = tpu.matmul %26, %28, %cst_28 {dimension_numbers = #tpu.dot_dimension_numbers<[1], [0], [0], [1], [0, 0, 1, 1], [], []>} : vector<375x4xbf16>, vector<4x32xbf16>, vector<375x32xf32> -> vector<375x32xf32>
    %30 = arith.addf %23, %29 : vector<375x32xf32>
    %c0_29 = arith.constant 0 : index
    %c24 = arith.constant 24 : index
    %c0_30 = arith.constant 0 : index
    %31 = vector.load %arg1[%c0_29, %c24, %c0_30] : memref<1x432x4xf32, #tpu.memory_space<vmem>>, vector<1x375x4xf32>
    %32 = vector.shape_cast %31 : vector<1x375x4xf32> to vector<375x4xf32>
    %33 = arith.truncf %32 : vector<375x4xf32> to vector<375x4xbf16>
    %c4 = arith.constant 4 : index
    %c0_31 = arith.constant 0 : index
    %c0_32 = arith.constant 0 : index
    %34 = vector.load %arg2[%c4, %c0_31, %c0_32] : memref<12x4x32xbf16, #tpu.memory_space<vmem>>, vector<1x4x32xbf16>
    %35 = vector.shape_cast %34 : vector<1x4x32xbf16> to vector<4x32xbf16>
    %cst_33 = arith.constant dense<0.000000e+00> : vector<375x32xf32>
    %36 = tpu.matmul %33, %35, %cst_33 {dimension_numbers = #tpu.dot_dimension_numbers<[1], [0], [0], [1], [0, 0, 1, 1], [], []>} : vector<375x4xbf16>, vector<4x32xbf16>, vector<375x32xf32> -> vector<375x32xf32>
    %37 = arith.addf %30, %36 : vector<375x32xf32>
    %c0_34 = arith.constant 0 : index
    %c25 = arith.constant 25 : index
    %c0_35 = arith.constant 0 : index
    %38 = vector.load %arg1[%c0_34, %c25, %c0_35] : memref<1x432x4xf32, #tpu.memory_space<vmem>>, vector<1x375x4xf32>
    %39 = vector.shape_cast %38 : vector<1x375x4xf32> to vector<375x4xf32>
    %40 = arith.truncf %39 : vector<375x4xf32> to vector<375x4xbf16>
    %c5 = arith.constant 5 : index
    %c0_36 = arith.constant 0 : index
    %c0_37 = arith.constant 0 : index
    %41 = vector.load %arg2[%c5, %c0_36, %c0_37] : memref<12x4x32xbf16, #tpu.memory_space<vmem>>, vector<1x4x32xbf16>
    %42 = vector.shape_cast %41 : vector<1x4x32xbf16> to vector<4x32xbf16>
    %cst_38 = arith.constant dense<0.000000e+00> : vector<375x32xf32>
    %43 = tpu.matmul %40, %42, %cst_38 {dimension_numbers = #tpu.dot_dimension_numbers<[1], [0], [0], [1], [0, 0, 1, 1], [], []>} : vector<375x4xbf16>, vector<4x32xbf16>, vector<375x32xf32> -> vector<375x32xf32>
    %44 = arith.addf %37, %43 : vector<375x32xf32>
    %c0_39 = arith.constant 0 : index
    %c26 = arith.constant 26 : index
    %c0_40 = arith.constant 0 : index
    %45 = vector.load %arg1[%c0_39, %c26, %c0_40] : memref<1x432x4xf32, #tpu.memory_space<vmem>>, vector<1x375x4xf32>
    %46 = vector.shape_cast %45 : vector<1x375x4xf32> to vector<375x4xf32>
    %47 = arith.truncf %46 : vector<375x4xf32> to vector<375x4xbf16>
    %c6 = arith.constant 6 : index
    %c0_41 = arith.constant 0 : index
    %c0_42 = arith.constant 0 : index
    %48 = vector.load %arg2[%c6, %c0_41, %c0_42] : memref<12x4x32xbf16, #tpu.memory_space<vmem>>, vector<1x4x32xbf16>
    %49 = vector.shape_cast %48 : vector<1x4x32xbf16> to vector<4x32xbf16>
    %cst_43 = arith.constant dense<0.000000e+00> : vector<375x32xf32>
    %50 = tpu.matmul %47, %49, %cst_43 {dimension_numbers = #tpu.dot_dimension_numbers<[1], [0], [0], [1], [0, 0, 1, 1], [], []>} : vector<375x4xbf16>, vector<4x32xbf16>, vector<375x32xf32> -> vector<375x32xf32>
    %51 = arith.addf %44, %50 : vector<375x32xf32>
    %c0_44 = arith.constant 0 : index
    %c27 = arith.constant 27 : index
    %c0_45 = arith.constant 0 : index
    %52 = vector.load %arg1[%c0_44, %c27, %c0_45] : memref<1x432x4xf32, #tpu.memory_space<vmem>>, vector<1x375x4xf32>
    %53 = vector.shape_cast %52 : vector<1x375x4xf32> to vector<375x4xf32>
    %54 = arith.truncf %53 : vector<375x4xf32> to vector<375x4xbf16>
    %c7 = arith.constant 7 : index
    %c0_46 = arith.constant 0 : index
    %c0_47 = arith.constant 0 : index
    %55 = vector.load %arg2[%c7, %c0_46, %c0_47] : memref<12x4x32xbf16, #tpu.memory_space<vmem>>, vector<1x4x32xbf16>
    %56 = vector.shape_cast %55 : vector<1x4x32xbf16> to vector<4x32xbf16>
    %cst_48 = arith.constant dense<0.000000e+00> : vector<375x32xf32>
    %57 = tpu.matmul %54, %56, %cst_48 {dimension_numbers = #tpu.dot_dimension_numbers<[1], [0], [0], [1], [0, 0, 1, 1], [], []>} : vector<375x4xbf16>, vector<4x32xbf16>, vector<375x32xf32> -> vector<375x32xf32>
    %58 = arith.addf %51, %57 : vector<375x32xf32>
    %c0_49 = arith.constant 0 : index
    %c48 = arith.constant 48 : index
    %c0_50 = arith.constant 0 : index
    %59 = vector.load %arg1[%c0_49, %c48, %c0_50] : memref<1x432x4xf32, #tpu.memory_space<vmem>>, vector<1x375x4xf32>
    %60 = vector.shape_cast %59 : vector<1x375x4xf32> to vector<375x4xf32>
    %61 = arith.truncf %60 : vector<375x4xf32> to vector<375x4xbf16>
    %c8 = arith.constant 8 : index
    %c0_51 = arith.constant 0 : index
    %c0_52 = arith.constant 0 : index
    %62 = vector.load %arg2[%c8, %c0_51, %c0_52] : memref<12x4x32xbf16, #tpu.memory_space<vmem>>, vector<1x4x32xbf16>
    %63 = vector.shape_cast %62 : vector<1x4x32xbf16> to vector<4x32xbf16>
    %cst_53 = arith.constant dense<0.000000e+00> : vector<375x32xf32>
    %64 = tpu.matmul %61, %63, %cst_53 {dimension_numbers = #tpu.dot_dimension_numbers<[1], [0], [0], [1], [0, 0, 1, 1], [], []>} : vector<375x4xbf16>, vector<4x32xbf16>, vector<375x32xf32> -> vector<375x32xf32>
    %65 = arith.addf %58, %64 : vector<375x32xf32>
    %c0_54 = arith.constant 0 : index
    %c49 = arith.constant 49 : index
    %c0_55 = arith.constant 0 : index
    %66 = vector.load %arg1[%c0_54, %c49, %c0_55] : memref<1x432x4xf32, #tpu.memory_space<vmem>>, vector<1x375x4xf32>
    %67 = vector.shape_cast %66 : vector<1x375x4xf32> to vector<375x4xf32>
    %68 = arith.truncf %67 : vector<375x4xf32> to vector<375x4xbf16>
    %c9 = arith.constant 9 : index
    %c0_56 = arith.constant 0 : index
    %c0_57 = arith.constant 0 : index
    %69 = vector.load %arg2[%c9, %c0_56, %c0_57] : memref<12x4x32xbf16, #tpu.memory_space<vmem>>, vector<1x4x32xbf16>
    %70 = vector.shape_cast %69 : vector<1x4x32xbf16> to vector<4x32xbf16>
    %cst_58 = arith.constant dense<0.000000e+00> : vector<375x32xf32>
    %71 = tpu.matmul %68, %70, %cst_58 {dimension_numbers = #tpu.dot_dimension_numbers<[1], [0], [0], [1], [0, 0, 1, 1], [], []>} : vector<375x4xbf16>, vector<4x32xbf16>, vector<375x32xf32> -> vector<375x32xf32>
    %72 = arith.addf %65, %71 : vector<375x32xf32>
    %c0_59 = arith.constant 0 : index
    %c50 = arith.constant 50 : index
    %c0_60 = arith.constant 0 : index
    %73 = vector.load %arg1[%c0_59, %c50, %c0_60] : memref<1x432x4xf32, #tpu.memory_space<vmem>>, vector<1x375x4xf32>
    %74 = vector.shape_cast %73 : vector<1x375x4xf32> to vector<375x4xf32>
    %75 = arith.truncf %74 : vector<375x4xf32> to vector<375x4xbf16>
    %c10 = arith.constant 10 : index
    %c0_61 = arith.constant 0 : index
    %c0_62 = arith.constant 0 : index
    %76 = vector.load %arg2[%c10, %c0_61, %c0_62] : memref<12x4x32xbf16, #tpu.memory_space<vmem>>, vector<1x4x32xbf16>
    %77 = vector.shape_cast %76 : vector<1x4x32xbf16> to vector<4x32xbf16>
    %cst_63 = arith.constant dense<0.000000e+00> : vector<375x32xf32>
    %78 = tpu.matmul %75, %77, %cst_63 {dimension_numbers = #tpu.dot_dimension_numbers<[1], [0], [0], [1], [0, 0, 1, 1], [], []>} : vector<375x4xbf16>, vector<4x32xbf16>, vector<375x32xf32> -> vector<375x32xf32>
    %79 = arith.addf %72, %78 : vector<375x32xf32>
    %c0_64 = arith.constant 0 : index
    %c51 = arith.constant 51 : index
    %c0_65 = arith.constant 0 : index
    %80 = vector.load %arg1[%c0_64, %c51, %c0_65] : memref<1x432x4xf32, #tpu.memory_space<vmem>>, vector<1x375x4xf32>
    %81 = vector.shape_cast %80 : vector<1x375x4xf32> to vector<375x4xf32>
    %82 = arith.truncf %81 : vector<375x4xf32> to vector<375x4xbf16>
    %c11 = arith.constant 11 : index
    %c0_66 = arith.constant 0 : index
    %c0_67 = arith.constant 0 : index
    %83 = vector.load %arg2[%c11, %c0_66, %c0_67] : memref<12x4x32xbf16, #tpu.memory_space<vmem>>, vector<1x4x32xbf16>
    %84 = vector.shape_cast %83 : vector<1x4x32xbf16> to vector<4x32xbf16>
    %cst_68 = arith.constant dense<0.000000e+00> : vector<375x32xf32>
    %85 = tpu.matmul %82, %84, %cst_68 {dimension_numbers = #tpu.dot_dimension_numbers<[1], [0], [0], [1], [0, 0, 1, 1], [], []>} : vector<375x4xbf16>, vector<4x32xbf16>, vector<375x32xf32> -> vector<375x32xf32>
    %86 = arith.addf %79, %85 : vector<375x32xf32>
    %c0_69 = arith.constant 0 : index
    %c0_70 = arith.constant 0 : index
    %87 = vector.load %arg3[%c0_69, %c0_70] : memref<1x32xf32, #tpu.memory_space<vmem>>, vector<1x32xf32>
    %88 = vector.broadcast %87 : vector<1x32xf32> to vector<375x32xf32>
    %89 = arith.addf %86, %88 : vector<375x32xf32>
    %cst_71 = arith.constant 0.000000e+00 : f32
    %90 = vector.broadcast %cst_71 : f32 to vector<375x32xf32>
    %91 = arith.maximumf %89, %90 : vector<375x32xf32>
    %c24_72 = arith.constant 24 : index
    %c0_73 = arith.constant 0 : index
    %92 = vector.load %arg14[%c24_72, %c0_73] : memref<432x32xf32, #tpu.memory_space<vmem>>, vector<375x32xf32>
    tpu.vector_store %arg14[%c24_72, %c0_73], %91 {strides = array<i32>} : memref<432x32xf32, #tpu.memory_space<vmem>>, vector<375x32xf32>,
    %c0_74 = arith.constant 0 : index
    %c0_75 = arith.constant 0 : index
    %93 = vector.load %arg14[%c0_74, %c0_75] : memref<432x32xf32, #tpu.memory_space<vmem>>, vector<398x32xf32>
    %94 = arith.truncf %93 : vector<398x32xf32> to vector<398x32xbf16>
    %c0_76 = arith.constant 0 : index
    %c0_77 = arith.constant 0 : index
    %c0_78 = arith.constant 0 : index
    %95 = vector.load %arg4[%c0_76, %c0_77, %c0_78] : memref<4x32x64xbf16, #tpu.memory_space<vmem>>, vector<1x32x64xbf16>
    %96 = vector.shape_cast %95 : vector<1x32x64xbf16> to vector<32x64xbf16>
    %cst_79 = arith.constant dense<0.000000e+00> : vector<398x64xf32>
    %97 = tpu.matmul %94, %96, %cst_79 {dimension_numbers = #tpu.dot_dimension_numbers<[1], [0], [0], [1], [0, 0, 1, 1], [], []>} : vector<398x32xbf16>, vector<32x64xbf16>, vector<398x64xf32> -> vector<398x64xf32>
    %c1_80 = arith.constant 1 : index
    %c0_81 = arith.constant 0 : index
    %98 = vector.load %arg14[%c1_80, %c0_81] : memref<432x32xf32, #tpu.memory_space<vmem>>, vector<398x32xf32>
    %99 = arith.truncf %98 : vector<398x32xf32> to vector<398x32xbf16>
    %c1_82 = arith.constant 1 : index
    %c0_83 = arith.constant 0 : index
    %c0_84 = arith.constant 0 : index
    %100 = vector.load %arg4[%c1_82, %c0_83, %c0_84] : memref<4x32x64xbf16, #tpu.memory_space<vmem>>, vector<1x32x64xbf16>
    %101 = vector.shape_cast %100 : vector<1x32x64xbf16> to vector<32x64xbf16>
    %cst_85 = arith.constant dense<0.000000e+00> : vector<398x64xf32>
    %102 = tpu.matmul %99, %101, %cst_85 {dimension_numbers = #tpu.dot_dimension_numbers<[1], [0], [0], [1], [0, 0, 1, 1], [], []>} : vector<398x32xbf16>, vector<32x64xbf16>, vector<398x64xf32> -> vector<398x64xf32>
    %103 = arith.addf %97, %102 : vector<398x64xf32>
    %c24_86 = arith.constant 24 : index
    %c0_87 = arith.constant 0 : index
    %104 = vector.load %arg14[%c24_86, %c0_87] : memref<432x32xf32, #tpu.memory_space<vmem>>, vector<398x32xf32>
    %105 = arith.truncf %104 : vector<398x32xf32> to vector<398x32xbf16>
    %c2_88 = arith.constant 2 : index
    %c0_89 = arith.constant 0 : index
    %c0_90 = arith.constant 0 : index
    %106 = vector.load %arg4[%c2_88, %c0_89, %c0_90] : memref<4x32x64xbf16, #tpu.memory_space<vmem>>, vector<1x32x64xbf16>
    %107 = vector.shape_cast %106 : vector<1x32x64xbf16> to vector<32x64xbf16>
    %cst_91 = arith.constant dense<0.000000e+00> : vector<398x64xf32>
    %108 = tpu.matmul %105, %107, %cst_91 {dimension_numbers = #tpu.dot_dimension_numbers<[1], [0], [0], [1], [0, 0, 1, 1], [], []>} : vector<398x32xbf16>, vector<32x64xbf16>, vector<398x64xf32> -> vector<398x64xf32>
    %109 = arith.addf %103, %108 : vector<398x64xf32>
    %c25_92 = arith.constant 25 : index
    %c0_93 = arith.constant 0 : index
    %110 = vector.load %arg14[%c25_92, %c0_93] : memref<432x32xf32, #tpu.memory_space<vmem>>, vector<398x32xf32>
    %111 = arith.truncf %110 : vector<398x32xf32> to vector<398x32xbf16>
    %c3_94 = arith.constant 3 : index
    %c0_95 = arith.constant 0 : index
    %c0_96 = arith.constant 0 : index
    %112 = vector.load %arg4[%c3_94, %c0_95, %c0_96] : memref<4x32x64xbf16, #tpu.memory_space<vmem>>, vector<1x32x64xbf16>
    %113 = vector.shape_cast %112 : vector<1x32x64xbf16> to vector<32x64xbf16>
    %cst_97 = arith.constant dense<0.000000e+00> : vector<398x64xf32>
    %114 = tpu.matmul %111, %113, %cst_97 {dimension_numbers = #tpu.dot_dimension_numbers<[1], [0], [0], [1], [0, 0, 1, 1], [], []>} : vector<398x32xbf16>, vector<32x64xbf16>, vector<398x64xf32> -> vector<398x64xf32>
    %115 = arith.addf %109, %114 : vector<398x64xf32>
    %c0_98 = arith.constant 0 : index
    %c0_99 = arith.constant 0 : index
    %116 = vector.load %arg5[%c0_98, %c0_99] : memref<1x64xf32, #tpu.memory_space<vmem>>, vector<1x64xf32>
    %117 = vector.broadcast %116 : vector<1x64xf32> to vector<398x64xf32>
    %118 = arith.addf %115, %117 : vector<398x64xf32>
    %cst_100 = arith.constant 0.000000e+00 : f32
    %119 = vector.broadcast %cst_100 : f32 to vector<398x64xf32>
    %120 = arith.maximumf %118, %119 : vector<398x64xf32>
    %c24_101 = arith.constant 24 : index
    %c0_102 = arith.constant 0 : index
    %121 = vector.load %arg15[%c24_101, %c0_102] : memref<456x64xf32, #tpu.memory_space<vmem>>, vector<398x64xf32>
    tpu.vector_store %arg15[%c24_101, %c0_102], %120 {strides = array<i32>} : memref<456x64xf32, #tpu.memory_space<vmem>>, vector<398x64xf32>,
    %c0_103 = arith.constant 0 : index
    %c0_104 = arith.constant 0 : index
    %122 = vector.load %arg15[%c0_103, %c0_104] : memref<456x64xf32, #tpu.memory_space<vmem>>, vector<421x64xf32>
    %123 = arith.truncf %122 : vector<421x64xf32> to vector<421x64xbf16>
    %c0_105 = arith.constant 0 : index
    %c0_106 = arith.constant 0 : index
    %c0_107 = arith.constant 0 : index
    %124 = vector.load %arg6[%c0_105, %c0_106, %c0_107] : memref<4x64x128xbf16, #tpu.memory_space<vmem>>, vector<1x64x128xbf16>
    %125 = vector.shape_cast %124 : vector<1x64x128xbf16> to vector<64x128xbf16>
    %cst_108 = arith.constant dense<0.000000e+00> : vector<421x128xf32>
    %126 = tpu.matmul %123, %125, %cst_108 {dimension_numbers = #tpu.dot_dimension_numbers<[1], [0], [0], [1], [0, 0, 1, 1], [], []>} : vector<421x64xbf16>, vector<64x128xbf16>, vector<421x128xf32> -> vector<421x128xf32>
    %c1_109 = arith.constant 1 : index
    %c0_110 = arith.constant 0 : index
    %127 = vector.load %arg15[%c1_109, %c0_110] : memref<456x64xf32, #tpu.memory_space<vmem>>, vector<421x64xf32>
    %128 = arith.truncf %127 : vector<421x64xf32> to vector<421x64xbf16>
    %c1_111 = arith.constant 1 : index
    %c0_112 = arith.constant 0 : index
    %c0_113 = arith.constant 0 : index
    %129 = vector.load %arg6[%c1_111, %c0_112, %c0_113] : memref<4x64x128xbf16, #tpu.memory_space<vmem>>, vector<1x64x128xbf16>
    %130 = vector.shape_cast %129 : vector<1x64x128xbf16> to vector<64x128xbf16>
    %cst_114 = arith.constant dense<0.000000e+00> : vector<421x128xf32>
    %131 = tpu.matmul %128, %130, %cst_114 {dimension_numbers = #tpu.dot_dimension_numbers<[1], [0], [0], [1], [0, 0, 1, 1], [], []>} : vector<421x64xbf16>, vector<64x128xbf16>, vector<421x128xf32> -> vector<421x128xf32>
    %132 = arith.addf %126, %131 : vector<421x128xf32>
    %c24_115 = arith.constant 24 : index
    %c0_116 = arith.constant 0 : index
    %133 = vector.load %arg15[%c24_115, %c0_116] : memref<456x64xf32, #tpu.memory_space<vmem>>, vector<421x64xf32>
    %134 = arith.truncf %133 : vector<421x64xf32> to vector<421x64xbf16>
    %c2_117 = arith.constant 2 : index
    %c0_118 = arith.constant 0 : index
    %c0_119 = arith.constant 0 : index
    %135 = vector.load %arg6[%c2_117, %c0_118, %c0_119] : memref<4x64x128xbf16, #tpu.memory_space<vmem>>, vector<1x64x128xbf16>
    %136 = vector.shape_cast %135 : vector<1x64x128xbf16> to vector<64x128xbf16>
    %cst_120 = arith.constant dense<0.000000e+00> : vector<421x128xf32>
    %137 = tpu.matmul %134, %136, %cst_120 {dimension_numbers = #tpu.dot_dimension_numbers<[1], [0], [0], [1], [0, 0, 1, 1], [], []>} : vector<421x64xbf16>, vector<64x128xbf16>, vector<421x128xf32> -> vector<421x128xf32>
    %138 = arith.addf %132, %137 : vector<421x128xf32>
    %c25_121 = arith.constant 25 : index
    %c0_122 = arith.constant 0 : index
    %139 = vector.load %arg15[%c25_121, %c0_122] : memref<456x64xf32, #tpu.memory_space<vmem>>, vector<421x64xf32>
    %140 = arith.truncf %139 : vector<421x64xf32> to vector<421x64xbf16>
    %c3_123 = arith.constant 3 : index
    %c0_124 = arith.constant 0 : index
    %c0_125 = arith.constant 0 : index
    %141 = vector.load %arg6[%c3_123, %c0_124, %c0_125] : memref<4x64x128xbf16, #tpu.memory_space<vmem>>, vector<1x64x128xbf16>
    %142 = vector.shape_cast %141 : vector<1x64x128xbf16> to vector<64x128xbf16>
    %cst_126 = arith.constant dense<0.000000e+00> : vector<421x128xf32>
    %143 = tpu.matmul %140, %142, %cst_126 {dimension_numbers = #tpu.dot_dimension_numbers<[1], [0], [0], [1], [0, 0, 1, 1], [], []>} : vector<421x64xbf16>, vector<64x128xbf16>, vector<421x128xf32> -> vector<421x128xf32>
    %144 = arith.addf %138, %143 : vector<421x128xf32>
    %c0_127 = arith.constant 0 : index
    %c0_128 = arith.constant 0 : index
    %145 = vector.load %arg7[%c0_127, %c0_128] : memref<1x128xf32, #tpu.memory_space<vmem>>, vector<1x128xf32>
    %146 = vector.broadcast %145 : vector<1x128xf32> to vector<421x128xf32>
    %147 = arith.addf %144, %146 : vector<421x128xf32>
    %cst_129 = arith.constant 0.000000e+00 : f32
    %148 = vector.broadcast %cst_129 : f32 to vector<421x128xf32>
    %149 = arith.maximumf %147, %148 : vector<421x128xf32>
    %c0_130 = arith.constant 0 : index
    %c0_131 = arith.constant 0 : index
    %150 = vector.load %arg12[%c0_130, %c0_131] : memref<421x1xf32, #tpu.memory_space<vmem>>, vector<421x1xf32>
    %151 = vector.broadcast %150 : vector<421x1xf32> to vector<421x128xf32>
    %152 = arith.mulf %149, %151 : vector<421x128xf32>
    %cst_132 = arith.constant dense<0.000000e+00> : vector<128xf32>
    %153 = vector.multi_reduction <add>, %152, %cst_132 [0] : vector<421x128xf32> to vector<128xf32>
    %154 = vector.shape_cast %153 : vector<128xf32> to vector<1x128xf32>
    %155 = arith.truncf %154 : vector<1x128xf32> to vector<1x128xbf16>
    %c0_133 = arith.constant 0 : index
    %c0_134 = arith.constant 0 : index
    %156 = vector.load %arg8[%c0_133, %c0_134] : memref<128x64xbf16, #tpu.memory_space<vmem>>, vector<128x64xbf16>
    %cst_135 = arith.constant dense<0.000000e+00> : vector<1x64xf32>
    %157 = tpu.matmul %155, %156, %cst_135 {dimension_numbers = #tpu.dot_dimension_numbers<[1], [0], [0], [1], [0, 0, 1, 1], [], []>} : vector<1x128xbf16>, vector<128x64xbf16>, vector<1x64xf32> -> vector<1x64xf32>
    %c0_136 = arith.constant 0 : index
    %c0_137 = arith.constant 0 : index
    %158 = vector.load %arg9[%c0_136, %c0_137] : memref<1x64xf32, #tpu.memory_space<vmem>>, vector<1x64xf32>
    %159 = arith.addf %157, %158 : vector<1x64xf32>
    %cst_138 = arith.constant 0.000000e+00 : f32
    %160 = vector.broadcast %cst_138 : f32 to vector<1x64xf32>
    %161 = arith.maximumf %159, %160 : vector<1x64xf32>
    %162 = arith.truncf %161 : vector<1x64xf32> to vector<1x64xbf16>
    %c0_139 = arith.constant 0 : index
    %c0_140 = arith.constant 0 : index
    %163 = vector.load %arg10[%c0_139, %c0_140] : memref<64x1xbf16, #tpu.memory_space<vmem>>, vector<64x1xbf16>
    %cst_141 = arith.constant dense<0.000000e+00> : vector<1x1xf32>
    %164 = tpu.matmul %162, %163, %cst_141 {dimension_numbers = #tpu.dot_dimension_numbers<[1], [0], [0], [1], [0, 0, 1, 1], [], []>} : vector<1x64xbf16>, vector<64x1xbf16>, vector<1x1xf32> -> vector<1x1xf32>
    %c0_142 = arith.constant 0 : index
    %c0_143 = arith.constant 0 : index
    %165 = vector.load %arg11[%c0_142, %c0_143] : memref<1x1xf32, #tpu.memory_space<vmem>>, vector<1x1xf32>
    %166 = arith.addf %164, %165 : vector<1x1xf32>
    %167 = arith.negf %166 : vector<1x1xf32>
    %168 = math.exp %167 : vector<1x1xf32>
    %cst_144 = arith.constant 1.000000e+00 : f32
    %169 = vector.broadcast %cst_144 : f32 to vector<1x1xf32>
    %170 = arith.addf %169, %168 : vector<1x1xf32>
    %171 = arith.divf %169, %170 : vector<1x1xf32>
    %c0_145 = arith.constant 0 : index
    %c0_146 = arith.constant 0 : index
    %c0_147 = arith.constant 0 : index
    %172 = vector.load %arg13[%c0_145, %c0_146, %c0_147] : memref<1x1x1xf32, #tpu.memory_space<vmem>>, vector<1x1x1xf32>
    %173 = vector.shape_cast %172 : vector<1x1x1xf32> to vector<1x1xf32>
    %174 = vector.shape_cast %171 : vector<1x1xf32> to vector<1x1x1xf32>
    tpu.vector_store %arg13[%c0_145, %c0_146, %c0_147], %174 {strides = array<i32>} : memref<1x1x1xf32, #tpu.memory_space<vmem>>, vector<1x1x1xf32>,
    return
  }
  func.func @transform_0(%arg0: i32) -> (i32, i32, i32) {
    %c0_i32 = arith.constant 0 : i32
    %c0_i32_0 = arith.constant 0 : i32
    %c0_i32_1 = arith.constant 0 : i32
    return %arg0, %c0_i32, %c0_i32_0 : i32, i32, i32
  }
  func.func @transform_1(%arg0: i32) -> (i32, i32, i32) {
    %c0_i32 = arith.constant 0 : i32
    %c0_i32_0 = arith.constant 0 : i32
    %c0_i32_1 = arith.constant 0 : i32
    %c0_i32_2 = arith.constant 0 : i32
    return %c0_i32, %c0_i32_0, %c0_i32_1 : i32, i32, i32
  }
  func.func @transform_2(%arg0: i32) -> (i32, i32) {
    %c0_i32 = arith.constant 0 : i32
    %c0_i32_0 = arith.constant 0 : i32
    %c0_i32_1 = arith.constant 0 : i32
    return %c0_i32, %c0_i32_0 : i32, i32
  }
  func.func @transform_3(%arg0: i32) -> (i32, i32, i32) {
    %c0_i32 = arith.constant 0 : i32
    %c0_i32_0 = arith.constant 0 : i32
    %c0_i32_1 = arith.constant 0 : i32
    %c0_i32_2 = arith.constant 0 : i32
    return %c0_i32, %c0_i32_0, %c0_i32_1 : i32, i32, i32
  }
  func.func @transform_4(%arg0: i32) -> (i32, i32) {
    %c0_i32 = arith.constant 0 : i32
    %c0_i32_0 = arith.constant 0 : i32
    %c0_i32_1 = arith.constant 0 : i32
    return %c0_i32, %c0_i32_0 : i32, i32
  }
  func.func @transform_5(%arg0: i32) -> (i32, i32, i32) {
    %c0_i32 = arith.constant 0 : i32
    %c0_i32_0 = arith.constant 0 : i32
    %c0_i32_1 = arith.constant 0 : i32
    %c0_i32_2 = arith.constant 0 : i32
    return %c0_i32, %c0_i32_0, %c0_i32_1 : i32, i32, i32
  }
  func.func @transform_6(%arg0: i32) -> (i32, i32) {
    %c0_i32 = arith.constant 0 : i32
    %c0_i32_0 = arith.constant 0 : i32
    %c0_i32_1 = arith.constant 0 : i32
    return %c0_i32, %c0_i32_0 : i32, i32
  }
  func.func @transform_7(%arg0: i32) -> (i32, i32) {
    %c0_i32 = arith.constant 0 : i32
    %c0_i32_0 = arith.constant 0 : i32
    %c0_i32_1 = arith.constant 0 : i32
    return %c0_i32, %c0_i32_0 : i32, i32
  }
  func.func @transform_8(%arg0: i32) -> (i32, i32) {
    %c0_i32 = arith.constant 0 : i32
    %c0_i32_0 = arith.constant 0 : i32
    %c0_i32_1 = arith.constant 0 : i32
    return %c0_i32, %c0_i32_0 : i32, i32
  }
  func.func @transform_9(%arg0: i32) -> (i32, i32) {
    %c0_i32 = arith.constant 0 : i32
    %c0_i32_0 = arith.constant 0 : i32
    %c0_i32_1 = arith.constant 0 : i32
    return %c0_i32, %c0_i32_0 : i32, i32
  }
  func.func @transform_10(%arg0: i32) -> (i32, i32) {
    %c0_i32 = arith.constant 0 : i32
    %c0_i32_0 = arith.constant 0 : i32
    %c0_i32_1 = arith.constant 0 : i32
    return %c0_i32, %c0_i32_0 : i32, i32
  }
  func.func @transform_11(%arg0: i32) -> (i32, i32) {
    %c0_i32 = arith.constant 0 : i32
    %c0_i32_0 = arith.constant 0 : i32
    %c0_i32_1 = arith.constant 0 : i32
    return %c0_i32, %c0_i32_0 : i32, i32
  }
  func.func @transform_12(%arg0: i32) -> (i32, i32, i32) {
    %c0_i32 = arith.constant 0 : i32
    %c0_i32_0 = arith.constant 0 : i32
    %c0_i32_1 = arith.constant 0 : i32
    return %arg0, %c0_i32, %c0_i32_0 : i32, i32, i32
  }
}

</mosaic_0001>

<bundles_post_ra>
// kernel: cnn_forward.1
= control target key start
LH: loop header
LB: loop body
LE: loop exit
PB: predicated region body
PF: predicated region fallthrough
CT: control target
= control target key end

     0   :  { %s8940_s23 = smov 0   ;;  %s11496_s0 = inlined_call_operand.vmem [shape: f32[2,432,4], index: 0, kind: input, shape index: {}]   ;;  %s11497_s1 = inlined_call_operand.vmem [shape: bf16[12,4,32], index: 1, kind: input, shape index: {}]   ;;  %s11498_s2 = inlined_call_operand.vmem [shape: f32[1,32], index: 2, kind: input, shape index: {}]   ;;  %s11499_s3 = inlined_call_operand.vmem [shape: bf16[4,32,64], index: 3, kind: input, shape index: {}]   ;;  %s11500_s4 = inlined_call_operand.vmem [shape: f32[1,64], index: 4, kind: input, shape index: {}]   ;;  %s11501_s5 = inlined_call_operand.vmem [shape: bf16[4,64,128], index: 5, kind: input, shape index: {}]   ;;  %s11502_s6 = inlined_call_operand.vmem [shape: f32[1,128], index: 6, kind: input, shape index: {}]   ;;  %s11503_s7 = inlined_call_operand.vmem [shape: bf16[128,64], index: 7, kind: input, shape index: {}]   ;;  %s11504_s8 = inlined_call_operand.vmem [shape: f32[1,64], index: 8, kind: input, shape index: {}]   ;;  %s11505_s9 = inlined_call_operand.vmem [shape: bf16[64,1], index: 9, kind: input, shape index: {}]   ;;  %s11506_s10 = inlined_call_operand.<no memory space> [shape: f32[1,1], index: 10, kind: input, shape index: {}]   ;;  %s11507_s11 = inlined_call_operand.vmem [shape: f32[421,1], index: 11, kind: input, shape index: {}]   ;;  %s11508_s12 = inlined_call_operand.vmem [shape: f32[2,1,1], index: 12, kind: output, shape index: {}]  }
   0x1   :  { %v17_v0 = vstv %s11506_s10 }
   0x2   :  { %18 = vst [vmem:[#allocation4] sm:$0x1] %v17_v0 }
   0x3 LB: > { %s8105_s24 = sadd.s32 4294967295, %s8868_s23   ;;  %p8109_p0 = scmp.ge.s32.totalorder %s8868_s23, 1  ;;  %s8868_s23 = sphi %s8940_s23, %s24_s23  }
   0x4   : > { %p364_p1 = scmp.lt.s32.totalorder %s8868_s23, 3 }
   0x6   : > { %p365_p2 = pnand %p8109_p0, %p364_p1 }
   0x8   : > { %368 = sbr.rel (%p365_p2) target bundleno = 2440 (0x988), region = 68 }
   0xd   : > { %v8111_v1 = vld [vmem:[%s11497_s1 + $0x2] sm:$0x3]  ;;  %vm744_vm0 = vcmask 1041408   ;;  %v597_v2 = vld [vmem:[%s11497_s1] sm:$0x3]  ;;  %p404_p3 = scmp.lt.s32.totalorder %s8105_s24, 1 }
   0xe   : > { %v746_v3 = vsel %vm744_vm0, %v8111_v1, 0  ;;  %v949_v4 = vsel %vm744_vm0, %v597_v2, 0  ;;  %v8160_v5 = vld [vmem:[%s11497_s1 + $0x4] sm:$0x3]  ;;  %v8185_v6 = vld [vmem:[%s11497_s1 + $0x6] sm:$0x3] }
   0xf   : > { %755 = vmatpush.bf16.msra.mxu0 %v746_v3  ;;  %958 = vmatpush.bf16.msra.mxu1 %v949_v4  ;;  %v1225_v7 = vsel %vm744_vm0, %v8160_v5, 0  ;;  %v1548_v8 = vsel %vm744_vm0, %v8185_v6, 0  ;;  %s11531_s24 = smov (!%p404_p3, %s8105_s24), 1  ;;  %v8260_v9 = vld [vmem:[%s11497_s1 + $0xc] sm:$0x3]  ;;  %vm671_vm1 = vcmask 31744  }
  0x10   : > { %1234 = vmatpush.bf16.msra.mxu2 %v1225_v7  ;;  %1557 = vmatpush.bf16.msra.mxu3 %v1548_v8  ;;  %v2517_v10 = vsel %vm744_vm0, %v8260_v9, 0  ;;  %v8285_v11 = vld [vmem:[%s11497_s1 + $0xe] sm:$0x3]  ;;  %v8210_v12 = vld [vmem:[%s11497_s1 + $0x8] sm:$0x3]  ;;  %s8838_s20 = smul.u32 432, %s11531_s24  ;;  %s411_s27 = scalar_lea.vmem %s11508_s12, %s11531_s24 }
  0x11   : > { %v2840_v13 = vsel %vm744_vm0, %v8285_v11, 0  ;;  %v1871_v14 = vsel %vm744_vm0, %v8210_v12, 0  ;;  %v8235_v15 = vld [vmem:[%s11497_s1 + $0xa] sm:$0x3]  ;;  %vm413_vm2 = vcmask 261120   ;;  %vm468_vm3 = vcmask 523264  }
  0x12   : > { %v2194_v16 = vsel %vm744_vm0, %v8235_v15, 0  ;;  %s8986_s10 = scalar_lea.vmem %s11496_s0, %s8838_s20  ;;  %vm4453_vm4 = vcmask 260096   ;;  %vm5911_vm5 = vcmask 521216   ;;  %vm7898_vm6 = vcmask 1044480  }
  0x13   : > { %1880 = vmatpush.bf16.msrb.mxu0 %v1871_v14  ;;  %2203 = vmatpush.bf16.msrb.mxu1 %v2194_v16  ;;  %v598_v17 = vld [vmem:[%s8986_s10 + $0x1] sm:$0xff]  ;;  %v599_v18 = vld [vmem:[%s8986_s10 + $0x9] sm:$0xff]  ;;  %v600_v29 = vld [vmem:[%s8986_s10 + $0x11] sm:$0xff]  ;;  %vm8056_vm10 = vcmask 0  }
  0x14   : > { %2526 = vmatpush.bf16.msrb.mxu2 %v2517_v10  ;;  %2849 = vmatpush.bf16.msrb.mxu3 %v2840_v13  ;;  %v526_v19 = vld [vmem:[%s8986_s10] sm:$0xff]  ;;  %v645_v20 = vpack.c.bf16 %v599_v18, %v598_v17  ;;  %v527_v21 = vld [vmem:[%s8986_s10 + $0x8] sm:$0xff]  ;;  %v528_v31 = vld [vmem:[%s8986_s10 + $0x10] sm:$0xff] }
  0x15   : > { %v1079_v22 = vld [vmem:[%s8986_s10 + $0x2] sm:$0xff]  ;;  %v1080_v23 = vld [vmem:[%s8986_s10 + $0xa] sm:$0xff]  ;;  %v573_v24 = vpack.c.bf16 %v527_v21, %v526_v19  ;;  %v601_v30 = vld [vmem:[%s8986_s10 + $0x19] sm:$0xff] }
  0x16   : > { %v1126_v25 = vpack.c.bf16 %v1080_v23, %v1079_v22  ;;  %v1402_v26 = vld [vmem:[%s8986_s10 + $0x3] sm:$0xff]  ;;  %v1403_v27 = vld [vmem:[%s8986_s10 + $0xb] sm:$0xff]  ;;  %8112 = vmatmul.msk.bf16.vlgmr.msra.gmra.mxu0 %vm671_vm1, %v645_v20  ;;  %v529_v32 = vld [vmem:[%s8986_s10 + $0x18] sm:$0xff]  ;;  %v646_v37 = vpack.c.bf16 %v601_v30, %v600_v29 }
  0x17   : > { %v1449_v28 = vpack.c.bf16 %v1403_v27, %v1402_v26  ;;  %8136 = vmatmul.msk.bf16.vlgmr.msra.gmra.mxu1 %vm671_vm1, %v573_v24  ;;  %v1081_v33 = vld [vmem:[%s8986_s10 + $0x12] sm:$0xff]  ;;  %v1082_v34 = vld [vmem:[%s8986_s10 + $0x1a] sm:$0xff]  ;;  %v574_v38 = vpack.c.bf16 %v529_v32, %v528_v31  ;;  %v603_v42 = vld [vmem:[%s8986_s10 + $0x29] sm:$0xff] }
  0x18   : > { %8161 = vmatmul.msk.bf16.vlgmr.msra.gmra.mxu2 %vm671_vm1, %v1126_v25  ;;  %v1404_v35 = vld [vmem:[%s8986_s10 + $0x13] sm:$0xff]  ;;  %v1405_v36 = vld [vmem:[%s8986_s10 + $0x1b] sm:$0xff]  ;;  %v1127_v39 = vpack.c.bf16 %v1082_v34, %v1081_v33  ;;  %v531_v44 = vld [vmem:[%s8986_s10 + $0x28] sm:$0xff] }
  0x19   : > { %8186 = vmatmul.msk.bf16.vlgmr.msra.gmra.mxu3 %vm671_vm1, %v1449_v28  ;;  %v1450_v40 = vpack.c.bf16 %v1405_v36, %v1404_v35  ;;  %v602_v41 = vld [vmem:[%s8986_s10 + $0x21] sm:$0xff]  ;;  %v1084_v46 = vld [vmem:[%s8986_s10 + $0x2a] sm:$0xff]  ;;  %v605_v54 = vld [vmem:[%s8986_s10 + $0x39] sm:$0xff] }
  0x1a   : > { %v530_v43 = vld [vmem:[%s8986_s10 + $0x20] sm:$0xff]  ;;  %v1407_v48 = vld [vmem:[%s8986_s10 + $0x2b] sm:$0xff]  ;;  %v647_v49 = vpack.c.bf16 %v603_v42, %v602_v41  ;;  %v533_v56 = vld [vmem:[%s8986_s10 + $0x38] sm:$0xff] }
  0x1b   : > { %v1083_v45 = vld [vmem:[%s8986_s10 + $0x22] sm:$0xff]  ;;  %v575_v50 = vpack.c.bf16 %v531_v44, %v530_v43  ;;  %v604_v53 = vld [vmem:[%s8986_s10 + $0x31] sm:$0xff]  ;;  %v1086_v58 = vld [vmem:[%s8986_s10 + $0x3a] sm:$0xff] }
  0x1c   : > { %v1406_v47 = vld [vmem:[%s8986_s10 + $0x23] sm:$0xff]  ;;  %v1128_v51 = vpack.c.bf16 %v1084_v46, %v1083_v45  ;;  %v532_v55 = vld [vmem:[%s8986_s10 + $0x30] sm:$0xff]  ;;  %v1409_v60 = vld [vmem:[%s8986_s10 + $0x3b] sm:$0xff]  ;;  %v648_v61 = vpack.c.bf16 %v605_v54, %v604_v53 }
  0x1d   : > { %v1451_v52 = vpack.c.bf16 %v1407_v48, %v1406_v47  ;;  %v1085_v57 = vld [vmem:[%s8986_s10 + $0x32] sm:$0xff]  ;;  %v576_v62 = vpack.c.bf16 %v533_v56, %v532_v55  ;;  %v606_v1 = vld [vmem:[%s8986_s10 + $0x41] sm:$0xff]  ;;  %v607_v2 = vld [vmem:[%s8986_s10 + $0x49] sm:$0xff] }
  0x1e   : > { %v1408_v59 = vld [vmem:[%s8986_s10 + $0x33] sm:$0xff]  ;;  %v1129_v63 = vpack.c.bf16 %v1086_v58, %v1085_v57  ;;  %v534_v3 = vld [vmem:[%s8986_s10 + $0x40] sm:$0xff]  ;;  %v535_v4 = vld [vmem:[%s8986_s10 + $0x48] sm:$0xff]  ;;  %v649_v9 = vpack.c.bf16 %v607_v2, %v606_v1 }
  0x1f   : > { %v1452_v0 = vpack.c.bf16 %v1409_v60, %v1408_v59  ;;  %v1087_v5 = vld [vmem:[%s8986_s10 + $0x42] sm:$0xff]  ;;  %v1088_v6 = vld [vmem:[%s8986_s10 + $0x4a] sm:$0xff]  ;;  %v577_v10 = vpack.c.bf16 %v535_v4, %v534_v3  ;;  %v609_v14 = vld [vmem:[%s8986_s10 + $0x59] sm:$0xff] }
  0x20   : > { %v1410_v7 = vld [vmem:[%s8986_s10 + $0x43] sm:$0xff]  ;;  %v1411_v8 = vld [vmem:[%s8986_s10 + $0x4b] sm:$0xff]  ;;  %v1130_v11 = vpack.c.bf16 %v1088_v6, %v1087_v5  ;;  %v537_v16 = vld [vmem:[%s8986_s10 + $0x58] sm:$0xff] }
  0x21   : > { %v1453_v12 = vpack.c.bf16 %v1411_v8, %v1410_v7  ;;  %v608_v13 = vld [vmem:[%s8986_s10 + $0x51] sm:$0xff]  ;;  %v1090_v18 = vld [vmem:[%s8986_s10 + $0x5a] sm:$0xff]  ;;  %v611_v26 = vld [vmem:[%s8986_s10 + $0x69] sm:$0xff] }
  0x22   : > { %v536_v15 = vld [vmem:[%s8986_s10 + $0x50] sm:$0xff]  ;;  %v1413_v20 = vld [vmem:[%s8986_s10 + $0x5b] sm:$0xff]  ;;  %v650_v21 = vpack.c.bf16 %v609_v14, %v608_v13  ;;  %v539_v28 = vld [vmem:[%s8986_s10 + $0x68] sm:$0xff] }
  0x23   : > { %v1089_v17 = vld [vmem:[%s8986_s10 + $0x52] sm:$0xff]  ;;  %v578_v22 = vpack.c.bf16 %v537_v16, %v536_v15  ;;  %v610_v25 = vld [vmem:[%s8986_s10 + $0x61] sm:$0xff]  ;;  %v1092_v30 = vld [vmem:[%s8986_s10 + $0x6a] sm:$0xff] }
  0x24   : > { %v1412_v19 = vld [vmem:[%s8986_s10 + $0x53] sm:$0xff]  ;;  %v1131_v23 = vpack.c.bf16 %v1090_v18, %v1089_v17  ;;  %v538_v27 = vld [vmem:[%s8986_s10 + $0x60] sm:$0xff]  ;;  %v1415_v32 = vld [vmem:[%s8986_s10 + $0x6b] sm:$0xff]  ;;  %v651_v33 = vpack.c.bf16 %v611_v26, %v610_v25 }
  0x25   : > { %v1454_v24 = vpack.c.bf16 %v1413_v20, %v1412_v19  ;;  %v1091_v29 = vld [vmem:[%s8986_s10 + $0x62] sm:$0xff]  ;;  %v579_v34 = vpack.c.bf16 %v539_v28, %v538_v27  ;;  %v1093_v41 = vld [vmem:[%s8986_s10 + $0x72] sm:$0xff]  ;;  %v1094_v42 = vld [vmem:[%s8986_s10 + $0x7a] sm:$0xff] }
  0x26   : > { %8113 = vmatmul.msk.bf16.gmra.mxu0 %vm671_vm1, %v646_v37  ;;  %v1414_v31 = vld [vmem:[%s8986_s10 + $0x63] sm:$0xff]  ;;  %v1132_v35 = vpack.c.bf16 %v1092_v30, %v1091_v29  ;;  %v612_v37 = vld [vmem:[%s8986_s10 + $0x71] sm:$0xff]  ;;  %v1417_v44 = vld [vmem:[%s8986_s10 + $0x7b] sm:$0xff]  ;;  %v1133_v47 = vpack.c.bf16 %v1094_v42, %v1093_v41 }
  0x27   : > { %8137 = vmatmul.msk.bf16.gmra.mxu1 %vm671_vm1, %v574_v38  ;;  %v1455_v36 = vpack.c.bf16 %v1415_v32, %v1414_v31  ;;  %v613_v38 = vld [vmem:[%s8986_s10 + $0x79] sm:$0xff]  ;;  %v1095_v53 = vld [vmem:[%s8986_s10 + $0x82] sm:$0xff]  ;;  %v1096_v54 = vld [vmem:[%s8986_s10 + $0x8a] sm:$0xff] }
  0x28   : > { %8162 = vmatmul.msk.bf16.gmra.mxu2 %vm671_vm1, %v1127_v39  ;;  %v540_v39 = vld [vmem:[%s8986_s10 + $0x70] sm:$0xff]  ;;  %v652_v45 = vpack.c.bf16 %v613_v38, %v612_v37  ;;  %v1418_v55 = vld [vmem:[%s8986_s10 + $0x83] sm:$0xff]  ;;  %v1134_v60 = vpack.c.bf16 %v1096_v54, %v1095_v53  ;;  %v617_v8 = vld [vmem:[%s8986_s10 + $0x99] sm:$0xff] }
  0x29   : > { %8187 = vmatmul.msk.bf16.gmra.mxu3 %vm671_vm1, %v1450_v40  ;;  %v541_v40 = vld [vmem:[%s8986_s10 + $0x78] sm:$0xff]  ;;  %v1419_v56 = vld [vmem:[%s8986_s10 + $0x8b] sm:$0xff]  ;;  %v1099_v37 = vld [vmem:[%s8986_s10 + $0xa2] sm:$0xff] }
  0x2a   : > { %v1416_v43 = vld [vmem:[%s8986_s10 + $0x73] sm:$0xff]  ;;  %v580_v46 = vpack.c.bf16 %v541_v40, %v540_v39  ;;  %v1421_v14 = vld [vmem:[%s8986_s10 + $0x9b] sm:$0xff]  ;;  %v1100_v38 = vld [vmem:[%s8986_s10 + $0xaa] sm:$0xff] }
  0x2b   : > { %v1456_v48 = vpack.c.bf16 %v1417_v44, %v1416_v43  ;;  %v616_v7 = vld [vmem:[%s8986_s10 + $0x91] sm:$0xff]  ;;  %v1422_v39 = vld [vmem:[%s8986_s10 + $0xa3] sm:$0xff] }
  0x2c   : > { %v1420_v13 = vld [vmem:[%s8986_s10 + $0x93] sm:$0xff]  ;;  %v654_v16 = vpack.c.bf16 %v617_v8, %v616_v7  ;;  %v1423_v40 = vld [vmem:[%s8986_s10 + $0xab] sm:$0xff] }
  0x36   : > { %8114 = vmatmul.msk.bf16.gmra.mxu0 %vm671_vm1, %v647_v49  ;;  %v614_v49 = vld [vmem:[%s8986_s10 + $0x81] sm:$0xff] }
  0x37   : > { %8138 = vmatmul.msk.bf16.gmra.mxu1 %vm671_vm1, %v575_v50  ;;  %v615_v50 = vld [vmem:[%s8986_s10 + $0x89] sm:$0xff] }
  0x38   : > { %8163 = vmatmul.msk.bf16.gmra.mxu2 %vm671_vm1, %v1128_v51  ;;  %v542_v51 = vld [vmem:[%s8986_s10 + $0x80] sm:$0xff]  ;;  %v653_v57 = vpack.c.bf16 %v615_v50, %v614_v49  ;;  %v1459_v49 = vpack.c.bf16 %v1423_v40, %v1422_v39 }
  0x39   : > { %8188 = vmatmul.msk.bf16.gmra.mxu3 %vm671_vm1, %v1451_v52  ;;  %v543_v52 = vld [vmem:[%s8986_s10 + $0x88] sm:$0xff] }
  0x3a   : > { %v581_v59 = vpack.c.bf16 %v543_v52, %v542_v51 }
  0x46   : > { %8115 = vmatmul.msk.bf16.gmra.mxu0 %vm671_vm1, %v648_v61 }
  0x47   : > { %8139 = vmatmul.msk.bf16.gmra.mxu1 %vm671_vm1, %v576_v62  ;;  %v1457_v62 = vpack.c.bf16 %v1419_v56, %v1418_v55 }
  0x48   : > { %8164 = vmatmul.msk.bf16.gmra.mxu2 %vm671_vm1, %v1129_v63 }
  0x49   : > { %8189 = vmatmul.msk.bf16.gmra.mxu3 %vm671_vm1, %v1452_v0 }
  0x56   : > { %8116 = vmatmul.msk.bf16.gmra.mxu0 %vm671_vm1, %v649_v9  ;;  %v544_v9 = vld [vmem:[%s8986_s10 + $0x90] sm:$0xff] }
  0x57   : > { %8140 = vmatmul.msk.bf16.gmra.mxu1 %vm671_vm1, %v577_v10  ;;  %v545_v10 = vld [vmem:[%s8986_s10 + $0x98] sm:$0xff] }
  0x58   : > { %8165 = vmatmul.msk.bf16.gmra.mxu2 %vm671_vm1, %v1130_v11  ;;  %v1097_v11 = vld [vmem:[%s8986_s10 + $0x92] sm:$0xff]  ;;  %v582_v20 = vpack.c.bf16 %v545_v10, %v544_v9 }
  0x59   : > { %8190 = vmatmul.msk.bf16.gmra.mxu3 %vm671_vm1, %v1453_v12  ;;  %v1098_v12 = vld [vmem:[%s8986_s10 + $0x9a] sm:$0xff] }
  0x66   : > { %8117 = vmatmul.msk.bf16.gmra.mxu0 %vm671_vm1, %v650_v21  ;;  %v1135_v21 = vpack.c.bf16 %v1098_v12, %v1097_v11 }
  0x67   : > { %8141 = vmatmul.msk.bf16.gmra.mxu1 %vm671_vm1, %v578_v22 }
  0x68   : > { %8166 = vmatmul.msk.bf16.gmra.mxu2 %vm671_vm1, %v1131_v23  ;;  %v1458_v23 = vpack.c.bf16 %v1421_v14, %v1420_v13 }
  0x69   : > { %8191 = vmatmul.msk.bf16.gmra.mxu3 %vm671_vm1, %v1454_v24 }
  0x76   : > { %8118 = vmatmul.msk.bf16.gmra.mxu0 %vm671_vm1, %v651_v33  ;;  %v618_v33 = vld [vmem:[%s8986_s10 + $0xa1] sm:$0xff] }
  0x77   : > { %8142 = vmatmul.msk.bf16.gmra.mxu1 %vm671_vm1, %v579_v34  ;;  %v619_v34 = vld [vmem:[%s8986_s10 + $0xa9] sm:$0xff] }
  0x78   : > { %8167 = vmatmul.msk.bf16.gmra.mxu2 %vm671_vm1, %v1132_v35  ;;  %v546_v35 = vld [vmem:[%s8986_s10 + $0xa0] sm:$0xff]  ;;  %v655_v42 = vpack.c.bf16 %v619_v34, %v618_v33 }
  0x79   : > { %8192 = vmatmul.msk.bf16.gmra.mxu3 %vm671_vm1, %v1455_v36  ;;  %v547_v36 = vld [vmem:[%s8986_s10 + $0xa8] sm:$0xff] }
  0x86   : > { %8119 = vmatmul.msk.bf16.gmra.mxu0 %vm671_vm1, %v652_v45 }
  0x87   : > { %8143 = vmatmul.msk.bf16.gmra.mxu1 %vm671_vm1, %v580_v46  ;;  %v583_v46 = vpack.c.bf16 %v547_v36, %v546_v35 }
  0x88   : > { %8168 = vmatmul.msk.bf16.gmra.mxu2 %vm671_vm1, %v1133_v47  ;;  %v1136_v47 = vpack.c.bf16 %v1100_v38, %v1099_v37 }
  0x89   : > { %8193 = vmatmul.msk.bf16.gmra.mxu3 %vm671_vm1, %v1456_v48 }
  0x93   : > { %v757_v58 = vpop.f32.mrf.mxu0 }
  0x94   : > { %v960_v61 = vpop.f32.mrf.mxu1 }
  0x95   : > { %v961_v63 = vadd.f32 %v960_v61, %v757_v58  ;;  %v548_v61 = vld [vmem:[%s8986_s10 + $0xb0] sm:$0xff] }
  0x96   : > { %8120 = vmatmul.msk.bf16.gmra.mxu0 %vm671_vm1, %v653_v57 }
  0x97   : > { %8144 = vmatmul.msk.bf16.gmra.mxu1 %vm671_vm1, %v581_v59  ;;  %v620_v59 = vld [vmem:[%s8986_s10 + $0xb1] sm:$0xff] }
  0x98   : > { %8169 = vmatmul.msk.bf16.gmra.mxu2 %vm671_vm1, %v1134_v60  ;;  %v621_v60 = vld [vmem:[%s8986_s10 + $0xb9] sm:$0xff] }
  0x99   : > { %8194 = vmatmul.msk.bf16.gmra.mxu3 %vm671_vm1, %v1457_v62  ;;  %v549_v62 = vld [vmem:[%s8986_s10 + $0xb8] sm:$0xff] }
  0x9a   : > { %v584_v9 = vpack.c.bf16 %v549_v62, %v548_v61 }
  0x9b   : > { %v1236_v0 = vpop.f32.mrf.mxu2  ;;  %v759_v3 = vpop.f32.mrf.mxu0 }
  0x9c   : > { %v1355_v1 = vadd.f32 %v1236_v0, %v961_v63  ;;  %v1559_v2 = vpop.f32.mrf.mxu3  ;;  %v962_v4 = vpop.f32.mrf.mxu1  ;;  %v1101_v63 = vld [vmem:[%s8986_s10 + $0xb2] sm:$0xff]  ;;  %v1102_v0 = vld [vmem:[%s8986_s10 + $0xba] sm:$0xff] }
  0x9d   : > { %v963_v6 = vadd.f32 %v962_v4, %v759_v3  ;;  %v656_v4 = vpack.c.bf16 %v621_v60, %v620_v59  ;;  %v1137_v10 = vpack.c.bf16 %v1102_v0, %v1101_v63  ;;  %v1429_v59 = vld [vmem:[%s8986_s10 + $0xdb] sm:$0xff] }
  0x9e   : > { %v9096_v5 = vadd.f32 %v1559_v2, %v1355_v1  ;;  %v1424_v1 = vld [vmem:[%s8986_s10 + $0xb3] sm:$0xff]  ;;  %v1425_v2 = vld [vmem:[%s8986_s10 + $0xbb] sm:$0xff] }
  0x9f   : > { %v1460_v12 = vpack.c.bf16 %v1425_v2, %v1424_v1 }
  0xa3   : > { %v1238_v15 = vpop.f32.mrf.mxu2  ;;  %v762_v19 = vpop.f32.mrf.mxu0 }
  0xa4   : > { %v1356_v17 = vadd.f32 %v1238_v15, %v963_v6  ;;  %v1561_v18 = vpop.f32.mrf.mxu3  ;;  %v965_v22 = vpop.f32.mrf.mxu1 }
  0xa5   : > { %v966_v25 = vadd.f32 %v965_v22, %v762_v19  ;;  %v622_v22 = vld [vmem:[%s8986_s10 + $0xc1] sm:$0xff] }
  0xa6   : > { %v9106_v24 = vadd.f32 %v1561_v18, %v1356_v17  ;;  %8121 = vmatmul.msk.bf16.gmra.mxu0 %vm671_vm1, %v654_v16 }
  0xa7   : > { %8145 = vmatmul.msk.bf16.gmra.mxu1 %vm671_vm1, %v582_v20 }
  0xa8   : > { %8170 = vmatmul.msk.bf16.gmra.mxu2 %vm671_vm1, %v1135_v21 }
  0xa9   : > { %8195 = vmatmul.msk.bf16.gmra.mxu3 %vm671_vm1, %v1458_v23  ;;  %v623_v23 = vld [vmem:[%s8986_s10 + $0xc9] sm:$0xff] }
  0xaa   : > { %v657_v33 = vpack.c.bf16 %v623_v23, %v622_v22  ;;  %v1108_v22 = vld [vmem:[%s8986_s10 + $0xea] sm:$0xff] }
  0xab   : > { %v1241_v26 = vpop.f32.mrf.mxu2  ;;  %v764_v29 = vpop.f32.mrf.mxu0  ;;  %v1430_v23 = vld [vmem:[%s8986_s10 + $0xe3] sm:$0xff] }
  0xac   : > { %v1357_v27 = vadd.f32 %v1241_v26, %v966_v25  ;;  %v1564_v28 = vpop.f32.mrf.mxu3  ;;  %v967_v30 = vpop.f32.mrf.mxu1  ;;  %v550_v25 = vld [vmem:[%s8986_s10 + $0xc0] sm:$0xff]  ;;  %v551_v26 = vld [vmem:[%s8986_s10 + $0xc8] sm:$0xff] }
  0xad   : > { %v968_v32 = vadd.f32 %v967_v30, %v764_v29  ;;  %v1426_v29 = vld [vmem:[%s8986_s10 + $0xc3] sm:$0xff]  ;;  %v1427_v30 = vld [vmem:[%s8986_s10 + $0xcb] sm:$0xff]  ;;  %v585_v37 = vpack.c.bf16 %v551_v26, %v550_v25 }
  0xae   : > { %v9112_v31 = vadd.f32 %v1564_v28, %v1357_v27  ;;  %v1103_v27 = vld [vmem:[%s8986_s10 + $0xc2] sm:$0xff]  ;;  %v1104_v28 = vld [vmem:[%s8986_s10 + $0xca] sm:$0xff]  ;;  %v1461_v40 = vpack.c.bf16 %v1427_v30, %v1426_v29 }
  0xaf   : > { %v1138_v38 = vpack.c.bf16 %v1104_v28, %v1103_v27  ;;  %v1431_v25 = vld [vmem:[%s8986_s10 + $0xeb] sm:$0xff] }
  0xb3   : > { %v1243_v41 = vpop.f32.mrf.mxu2  ;;  %v767_v45 = vpop.f32.mrf.mxu0 }
  0xb4   : > { %v1358_v43 = vadd.f32 %v1243_v41, %v968_v32  ;;  %v1566_v44 = vpop.f32.mrf.mxu3  ;;  %v970_v48 = vpop.f32.mrf.mxu1 }
  0xb5   : > { %v971_v51 = vadd.f32 %v970_v48, %v767_v45 }
  0xb6   : > { %v9122_v50 = vadd.f32 %v1566_v44, %v1358_v43  ;;  %8122 = vmatmul.msk.bf16.gmra.mxu0 %vm671_vm1, %v655_v42 }
  0xb7   : > { %8146 = vmatmul.msk.bf16.gmra.mxu1 %vm671_vm1, %v583_v46 }
  0xb8   : > { %8171 = vmatmul.msk.bf16.gmra.mxu2 %vm671_vm1, %v1136_v47 }
  0xb9   : > { %8196 = vmatmul.msk.bf16.gmra.mxu3 %vm671_vm1, %v1459_v49 }
  0xbb   : > { %v1246_v52 = vpop.f32.mrf.mxu2  ;;  %v769_v55 = vpop.f32.mrf.mxu0 }
  0xbc   : > { %v1359_v53 = vadd.f32 %v1246_v52, %v971_v51  ;;  %v1569_v54 = vpop.f32.mrf.mxu3  ;;  %v972_v56 = vpop.f32.mrf.mxu1  ;;  %v624_v51 = vld [vmem:[%s8986_s10 + $0xd1] sm:$0xff]  ;;  %v625_v52 = vld [vmem:[%s8986_s10 + $0xd9] sm:$0xff] }
  0xbd   : > { %v973_v58 = vadd.f32 %v972_v56, %v769_v55  ;;  %v1105_v55 = vld [vmem:[%s8986_s10 + $0xd2] sm:$0xff]  ;;  %v1106_v56 = vld [vmem:[%s8986_s10 + $0xda] sm:$0xff]  ;;  %v658_v61 = vpack.c.bf16 %v625_v52, %v624_v51 }
  0xbe   : > { %v9128_v57 = vadd.f32 %v1569_v54, %v1359_v53  ;;  %v552_v53 = vld [vmem:[%s8986_s10 + $0xd0] sm:$0xff]  ;;  %v553_v54 = vld [vmem:[%s8986_s10 + $0xd8] sm:$0xff]  ;;  %v1139_v2 = vpack.c.bf16 %v1106_v56, %v1105_v55 }
  0xbf   : > { %v586_v1 = vpack.c.bf16 %v553_v54, %v552_v53  ;;  %v557_v51 = vld [vmem:[%s8986_s10 + $0xf8] sm:$0xff] }
  0xc0   : > { %v1109_v52 = vld [vmem:[%s8986_s10 + $0xf2] sm:$0xff]  ;;  %v1110_v53 = vld [vmem:[%s8986_s10 + $0xfa] sm:$0xff] }
  0xc1   : > { %v1432_v54 = vld [vmem:[%s8986_s10 + $0xf3] sm:$0xff]  ;;  %v1433_v55 = vld [vmem:[%s8986_s10 + $0xfb] sm:$0xff] }
  0xc3   : > { %v1248_v3 = vpop.f32.mrf.mxu2  ;;  %v772_v8 = vpop.f32.mrf.mxu0 }
  0xc4   : > { %v1360_v6 = vadd.f32 %v1248_v3, %v973_v58  ;;  %v1571_v7 = vpop.f32.mrf.mxu3  ;;  %v975_v11 = vpop.f32.mrf.mxu1  ;;  %v1428_v58 = vld [vmem:[%s8986_s10 + $0xd3] sm:$0xff] }
  0xc5   : > { %v976_v14 = vadd.f32 %v975_v11, %v772_v8 }
  0xc6   : > { %v9138_v13 = vadd.f32 %v1571_v7, %v1360_v6  ;;  %8123 = vmatmul.msk.bf16.gmra.mxu0 %vm671_vm1, %v656_v4  ;;  %v1462_v4 = vpack.c.bf16 %v1429_v59, %v1428_v58 }
  0xc7   : > { %8147 = vmatmul.msk.bf16.gmra.mxu1 %vm671_vm1, %v584_v9 }
  0xc8   : > { %8172 = vmatmul.msk.bf16.gmra.mxu2 %vm671_vm1, %v1137_v10 }
  0xc9   : > { %8197 = vmatmul.msk.bf16.gmra.mxu3 %vm671_vm1, %v1460_v12 }
  0xcb   : > { %v1251_v15 = vpop.f32.mrf.mxu2  ;;  %v774_v18 = vpop.f32.mrf.mxu0 }
  0xcc   : > { %v1361_v16 = vadd.f32 %v1251_v15, %v976_v14  ;;  %v1574_v17 = vpop.f32.mrf.mxu3  ;;  %v977_v19 = vpop.f32.mrf.mxu1 }
  0xcd   : > { %v978_v21 = vadd.f32 %v977_v19, %v774_v18  ;;  %v554_v18 = vld [vmem:[%s8986_s10 + $0xe0] sm:$0xff]  ;;  %v555_v19 = vld [vmem:[%s8986_s10 + $0xe8] sm:$0xff] }
  0xce   : > { %v9144_v20 = vadd.f32 %v1574_v17, %v1361_v16  ;;  %v626_v16 = vld [vmem:[%s8986_s10 + $0xe1] sm:$0xff]  ;;  %v627_v17 = vld [vmem:[%s8986_s10 + $0xe9] sm:$0xff] }
  0xcf   : > { %v659_v27 = vpack.c.bf16 %v627_v17, %v626_v16  ;;  %v631_v16 = vld [vmem:[%s8986_s10 + $0x109] sm:$0xff]  ;;  %v558_v17 = vld [vmem:[%s8986_s10 + $0x100] sm:$0xff] }
  0xd3   : > { %v1253_v32 = vpop.f32.mrf.mxu2  ;;  %v777_v36 = vpop.f32.mrf.mxu0 }
  0xd4   : > { %v1362_v34 = vadd.f32 %v1253_v32, %v978_v21  ;;  %v1576_v35 = vpop.f32.mrf.mxu3  ;;  %v980_v39 = vpop.f32.mrf.mxu1  ;;  %v1107_v21 = vld [vmem:[%s8986_s10 + $0xe2] sm:$0xff]  ;;  %v587_v32 = vpack.c.bf16 %v555_v19, %v554_v18 }
  0xd5   : > { %v981_v42 = vadd.f32 %v980_v39, %v777_v36  ;;  %v559_v18 = vld [vmem:[%s8986_s10 + $0x108] sm:$0xff] }
  0xd6   : > { %v9154_v41 = vadd.f32 %v1576_v35, %v1362_v34  ;;  %8124 = vmatmul.msk.bf16.gmra.mxu0 %vm671_vm1, %v657_v33  ;;  %v1140_v33 = vpack.c.bf16 %v1108_v22, %v1107_v21  ;;  %v1463_v35 = vpack.c.bf16 %v1431_v25, %v1430_v23  ;;  %v1111_v19 = vld [vmem:[%s8986_s10 + $0x102] sm:$0xff]  ;;  %v1112_v21 = vld [vmem:[%s8986_s10 + $0x10a] sm:$0xff] }
  0xd7   : > { %8148 = vmatmul.msk.bf16.gmra.mxu1 %vm671_vm1, %v585_v37  ;;  %v1434_v22 = vld [vmem:[%s8986_s10 + $0x103] sm:$0xff]  ;;  %v1435_v23 = vld [vmem:[%s8986_s10 + $0x10b] sm:$0xff] }
  0xd8   : > { %8173 = vmatmul.msk.bf16.gmra.mxu2 %vm671_vm1, %v1138_v38 }
  0xd9   : > { %8198 = vmatmul.msk.bf16.gmra.mxu3 %vm671_vm1, %v1461_v40 }
  0xdb   : > { %v1256_v43 = vpop.f32.mrf.mxu2  ;;  %v779_v46 = vpop.f32.mrf.mxu0 }
  0xdc   : > { %v1363_v44 = vadd.f32 %v1256_v43, %v981_v42  ;;  %v1579_v45 = vpop.f32.mrf.mxu3  ;;  %v982_v47 = vpop.f32.mrf.mxu1 }
  0xdd   : > { %v983_v49 = vadd.f32 %v982_v47, %v779_v46  ;;  %v628_v46 = vld [vmem:[%s8986_s10 + $0xf1] sm:$0xff]  ;;  %v629_v47 = vld [vmem:[%s8986_s10 + $0xf9] sm:$0xff] }
  0xde   : > { %v9160_v48 = vadd.f32 %v1579_v45, %v1363_v44  ;;  %v660_v58 = vpack.c.bf16 %v629_v47, %v628_v46  ;;  %v632_v47 = vld [vmem:[%s8986_s10 + $0x111] sm:$0xff] }
  0xe3   : > { %v1258_v60 = vpop.f32.mrf.mxu2  ;;  %v782_v0 = vpop.f32.mrf.mxu0 }
  0xe4   : > { %v1364_v62 = vadd.f32 %v1258_v60, %v983_v49  ;;  %v1581_v63 = vpop.f32.mrf.mxu3  ;;  %v985_v3 = vpop.f32.mrf.mxu1  ;;  %v556_v49 = vld [vmem:[%s8986_s10 + $0xf0] sm:$0xff] }
  0xe5   : > { %v986_v7 = vadd.f32 %v985_v3, %v782_v0 }
  0xe6   : > { %v9170_v6 = vadd.f32 %v1581_v63, %v1364_v62  ;;  %8125 = vmatmul.msk.bf16.gmra.mxu0 %vm671_vm1, %v658_v61  ;;  %v588_v62 = vpack.c.bf16 %v557_v51, %v556_v49  ;;  %v1141_v63 = vpack.c.bf16 %v1110_v53, %v1109_v52  ;;  %v633_v49 = vld [vmem:[%s8986_s10 + $0x119] sm:$0xff]  ;;  %v560_v51 = vld [vmem:[%s8986_s10 + $0x110] sm:$0xff] }
  0xe7   : > { %8149 = vmatmul.msk.bf16.gmra.mxu1 %vm671_vm1, %v586_v1  ;;  %v1464_v1 = vpack.c.bf16 %v1433_v55, %v1432_v54  ;;  %v561_v52 = vld [vmem:[%s8986_s10 + $0x118] sm:$0xff] }
  0xe8   : > { %8174 = vmatmul.msk.bf16.gmra.mxu2 %vm671_vm1, %v1139_v2  ;;  %v1113_v53 = vld [vmem:[%s8986_s10 + $0x112] sm:$0xff]  ;;  %v1114_v54 = vld [vmem:[%s8986_s10 + $0x11a] sm:$0xff] }
  0xe9   : > { %8199 = vmatmul.msk.bf16.gmra.mxu3 %vm671_vm1, %v1462_v4  ;;  %v1436_v55 = vld [vmem:[%s8986_s10 + $0x113] sm:$0xff] }
  0xeb   : > { %v1261_v8 = vpop.f32.mrf.mxu2  ;;  %v784_v11 = vpop.f32.mrf.mxu0 }
  0xec   : > { %v1365_v9 = vadd.f32 %v1261_v8, %v986_v7  ;;  %v1584_v10 = vpop.f32.mrf.mxu3  ;;  %v987_v12 = vpop.f32.mrf.mxu1 }
  0xed   : > { %v988_v15 = vadd.f32 %v987_v12, %v784_v11 }
  0xee   : > { %v9176_v14 = vadd.f32 %v1584_v10, %v1365_v9 }
  0xf3   : > { %v1263_v26 = vpop.f32.mrf.mxu2  ;;  %v787_v30 = vpop.f32.mrf.mxu0 }
  0xf4   : > { %v1366_v28 = vadd.f32 %v1263_v26, %v988_v15  ;;  %v1586_v29 = vpop.f32.mrf.mxu3  ;;  %v990_v34 = vpop.f32.mrf.mxu1  ;;  %v630_v15 = vld [vmem:[%s8986_s10 + $0x101] sm:$0xff] }
  0xf5   : > { %v991_v37 = vadd.f32 %v990_v34, %v787_v30  ;;  %v661_v26 = vpack.c.bf16 %v631_v16, %v630_v15  ;;  %v589_v30 = vpack.c.bf16 %v559_v18, %v558_v17  ;;  %v1465_v34 = vpack.c.bf16 %v1435_v23, %v1434_v22  ;;  %v634_v18 = vld [vmem:[%s8986_s10 + $0x121] sm:$0xff] }
  0xf6   : > { %v9186_v36 = vadd.f32 %v1586_v29, %v1366_v28  ;;  %8126 = vmatmul.msk.bf16.gmra.mxu0 %vm671_vm1, %v659_v27  ;;  %v563_v22 = vld [vmem:[%s8986_s10 + $0x128] sm:$0xff] }
  0xf7   : > { %8150 = vmatmul.msk.bf16.gmra.mxu1 %vm671_vm1, %v587_v32  ;;  %v1142_v32 = vpack.c.bf16 %v1112_v21, %v1111_v19  ;;  %v635_v19 = vld [vmem:[%s8986_s10 + $0x129] sm:$0xff]  ;;  %v562_v21 = vld [vmem:[%s8986_s10 + $0x120] sm:$0xff] }
  0xf8   : > { %8175 = vmatmul.msk.bf16.gmra.mxu2 %vm671_vm1, %v1140_v33  ;;  %v1115_v23 = vld [vmem:[%s8986_s10 + $0x122] sm:$0xff] }
  0xf9   : > { %8200 = vmatmul.msk.bf16.gmra.mxu3 %vm671_vm1, %v1463_v35 }
  0xfb   : > { %v1266_v38 = vpop.f32.mrf.mxu2  ;;  %v789_v42 = vpop.f32.mrf.mxu0 }
  0xfc   : > { %v1367_v39 = vadd.f32 %v1266_v38, %v991_v37  ;;  %v1589_v40 = vpop.f32.mrf.mxu3  ;;  %v992_v43 = vpop.f32.mrf.mxu1 }
  0xfd   : > { %v993_v45 = vadd.f32 %v992_v43, %v789_v42 }
  0xfe   : > { %v9192_v44 = vadd.f32 %v1589_v40, %v1367_v39 }
 0x103   : > { %v1268_v56 = vpop.f32.mrf.mxu2  ;;  %v792_v61 = vpop.f32.mrf.mxu0 }
 0x104   : > { %v1368_v59 = vadd.f32 %v1268_v56, %v993_v45  ;;  %v1591_v60 = vpop.f32.mrf.mxu3  ;;  %v995_v0 = vpop.f32.mrf.mxu1  ;;  %v1437_v56 = vld [vmem:[%s8986_s10 + $0x11b] sm:$0xff] }
 0x105   : > { %v996_v3 = vadd.f32 %v995_v0, %v792_v61  ;;  %v1143_v0 = vpack.c.bf16 %v1114_v54, %v1113_v53  ;;  %v636_v54 = vld [vmem:[%s8986_s10 + $0x131] sm:$0xff] }
 0x106   : > { %v9202_v2 = vadd.f32 %v1591_v60, %v1368_v59  ;;  %8127 = vmatmul.msk.bf16.gmra.mxu0 %vm671_vm1, %v660_v58  ;;  %v662_v59 = vpack.c.bf16 %v633_v49, %v632_v47 }
 0x107   : > { %8151 = vmatmul.msk.bf16.gmra.mxu1 %vm671_vm1, %v588_v62 }
 0x108   : > { %8176 = vmatmul.msk.bf16.gmra.mxu2 %vm671_vm1, %v1141_v63  ;;  %v590_v63 = vpack.c.bf16 %v561_v52, %v560_v51 }
 0x109   : > { %8201 = vmatmul.msk.bf16.gmra.mxu3 %vm671_vm1, %v1464_v1 }
 0x10b   : > { %v1271_v4 = vpop.f32.mrf.mxu2  ;;  %v794_v9 = vpop.f32.mrf.mxu0 }
 0x10c   : > { %v1369_v7 = vadd.f32 %v1271_v4, %v996_v3  ;;  %v1594_v8 = vpop.f32.mrf.mxu3  ;;  %v997_v10 = vpop.f32.mrf.mxu1  ;;  %v1466_v3 = vpack.c.bf16 %v1437_v56, %v1436_v55  ;;  %v637_v55 = vld [vmem:[%s8986_s10 + $0x139] sm:$0xff]  ;;  %v564_v56 = vld [vmem:[%s8986_s10 + $0x130] sm:$0xff] }
 0x10d   : > { %v998_v12 = vadd.f32 %v997_v10, %v794_v9 }
 0x10e   : > { %v9208_v11 = vadd.f32 %v1594_v8, %v1369_v7 }
 0x113   : > { %v1273_v25 = vpop.f32.mrf.mxu2  ;;  %v797_v29 = vpop.f32.mrf.mxu0 }
 0x114   : > { %v1370_v27 = vadd.f32 %v1273_v25, %v998_v12  ;;  %v1596_v28 = vpop.f32.mrf.mxu3  ;;  %v1000_v33 = vpop.f32.mrf.mxu1  ;;  %v1116_v25 = vld [vmem:[%s8986_s10 + $0x12a] sm:$0xff] }
 0x115   : > { %v1001_v37 = vadd.f32 %v1000_v33, %v797_v29  ;;  %v663_v29 = vpack.c.bf16 %v635_v19, %v634_v18 }
 0x116   : > { %v9218_v35 = vadd.f32 %v1596_v28, %v1370_v27  ;;  %8128 = vmatmul.msk.bf16.gmra.mxu0 %vm671_vm1, %v661_v26  ;;  %v1438_v26 = vld [vmem:[%s8986_s10 + $0x123] sm:$0xff]  ;;  %v1439_v27 = vld [vmem:[%s8986_s10 + $0x12b] sm:$0xff] }
 0x117   : > { %8152 = vmatmul.msk.bf16.gmra.mxu1 %vm671_vm1, %v589_v30 }
 0x118   : > { %8177 = vmatmul.msk.bf16.gmra.mxu2 %vm671_vm1, %v1142_v32 }
 0x119   : > { %8202 = vmatmul.msk.bf16.gmra.mxu3 %vm671_vm1, %v1465_v34  ;;  %v591_v34 = vpack.c.bf16 %v563_v22, %v562_v21 }
 0x11b   : > { %v1276_v38 = vpop.f32.mrf.mxu2  ;;  %v799_v42 = vpop.f32.mrf.mxu0 }
 0x11c   : > { %v1371_v39 = vadd.f32 %v1276_v38, %v1001_v37  ;;  %v1599_v40 = vpop.f32.mrf.mxu3  ;;  %v1002_v43 = vpop.f32.mrf.mxu1  ;;  %v1144_v37 = vpack.c.bf16 %v1116_v25, %v1115_v23 }
 0x11d   : > { %v1003_v46 = vadd.f32 %v1002_v43, %v799_v42 }
 0x11e   : > { %v9224_v45 = vadd.f32 %v1599_v40, %v1371_v39  ;;  %v1467_v39 = vpack.c.bf16 %v1439_v27, %v1438_v26  ;;  %v638_v27 = vld [vmem:[%s8986_s10 + $0x141] sm:$0xff] }
 0x123   : > { %v1278_v58 = vpop.f32.mrf.mxu2  ;;  %v802_v62 = vpop.f32.mrf.mxu0 }
 0x124   : > { %v1372_v60 = vadd.f32 %v1278_v58, %v1003_v46  ;;  %v1601_v61 = vpop.f32.mrf.mxu3  ;;  %v1005_v1 = vpop.f32.mrf.mxu1  ;;  %v565_v58 = vld [vmem:[%s8986_s10 + $0x138] sm:$0xff] }
 0x125   : > { %v1006_v7 = vadd.f32 %v1005_v1, %v802_v62  ;;  %v1441_v62 = vld [vmem:[%s8986_s10 + $0x13b] sm:$0xff] }
 0x126   : > { %v9234_v4 = vadd.f32 %v1601_v61, %v1372_v60  ;;  %8129 = vmatmul.msk.bf16.gmra.mxu0 %vm671_vm1, %v662_v59  ;;  %v1117_v59 = vld [vmem:[%s8986_s10 + $0x132] sm:$0xff]  ;;  %v1118_v60 = vld [vmem:[%s8986_s10 + $0x13a] sm:$0xff] }
 0x127   : > { %8153 = vmatmul.msk.bf16.gmra.mxu1 %vm671_vm1, %v590_v63  ;;  %v1440_v61 = vld [vmem:[%s8986_s10 + $0x133] sm:$0xff] }
 0x128   : > { %8178 = vmatmul.msk.bf16.gmra.mxu2 %vm671_vm1, %v1143_v0  ;;  %v664_v0 = vpack.c.bf16 %v637_v55, %v636_v54 }
 0x129   : > { %8203 = vmatmul.msk.bf16.gmra.mxu3 %vm671_vm1, %v1466_v3 }
 0x12b   : > { %v1281_v8 = vpop.f32.mrf.mxu2  ;;  %v804_v12 = vpop.f32.mrf.mxu0 }
 0x12c   : > { %v1373_v9 = vadd.f32 %v1281_v8, %v1006_v7  ;;  %v1604_v10 = vpop.f32.mrf.mxu3  ;;  %v1007_v15 = vpop.f32.mrf.mxu1  ;;  %v592_v8 = vpack.c.bf16 %v565_v58, %v564_v56 }
 0x12d   : > { %v1008_v17 = vadd.f32 %v1007_v15, %v804_v12  ;;  %v1468_v12 = vpack.c.bf16 %v1441_v62, %v1440_v61 }
 0x12e   : > { %v9240_v16 = vadd.f32 %v1604_v10, %v1373_v9  ;;  %v1145_v9 = vpack.c.bf16 %v1118_v60, %v1117_v59 }
 0x133   : > { %v1283_v28 = vpop.f32.mrf.mxu2  ;;  %v807_v33 = vpop.f32.mrf.mxu0 }
 0x134   : > { %v1374_v30 = vadd.f32 %v1283_v28, %v1008_v17  ;;  %v1606_v32 = vpop.f32.mrf.mxu3  ;;  %v1010_v38 = vpop.f32.mrf.mxu1  ;;  %v639_v28 = vld [vmem:[%s8986_s10 + $0x149] sm:$0xff] }
 0x135   : > { %v1011_v42 = vadd.f32 %v1010_v38, %v807_v33  ;;  %v1120_v33 = vld [vmem:[%s8986_s10 + $0x14a] sm:$0xff] }
 0x136   : > { %v9250_v40 = vadd.f32 %v1606_v32, %v1374_v30  ;;  %8130 = vmatmul.msk.bf16.gmra.mxu0 %vm671_vm1, %v663_v29  ;;  %v566_v29 = vld [vmem:[%s8986_s10 + $0x140] sm:$0xff]  ;;  %v567_v30 = vld [vmem:[%s8986_s10 + $0x148] sm:$0xff] }
 0x137   : > { %8154 = vmatmul.msk.bf16.gmra.mxu1 %vm671_vm1, %v591_v34  ;;  %v1119_v32 = vld [vmem:[%s8986_s10 + $0x142] sm:$0xff] }
 0x138   : > { %8179 = vmatmul.msk.bf16.gmra.mxu2 %vm671_vm1, %v1144_v37  ;;  %v1442_v34 = vld [vmem:[%s8986_s10 + $0x143] sm:$0xff]  ;;  %v1443_v37 = vld [vmem:[%s8986_s10 + $0x14b] sm:$0xff] }
 0x139   : > { %8204 = vmatmul.msk.bf16.gmra.mxu3 %vm671_vm1, %v1467_v39  ;;  %v665_v39 = vpack.c.bf16 %v639_v28, %v638_v27 }
 0x13b   : > { %v1286_v43 = vpop.f32.mrf.mxu2  ;;  %v809_v49 = vpop.f32.mrf.mxu0 }
 0x13c   : > { %v1375_v46 = vadd.f32 %v1286_v43, %v1011_v42  ;;  %v1609_v47 = vpop.f32.mrf.mxu3  ;;  %v1012_v51 = vpop.f32.mrf.mxu1 }
 0x13d   : > { %v1013_v53 = vadd.f32 %v1012_v51, %v809_v49  ;;  %v1146_v49 = vpack.c.bf16 %v1120_v33, %v1119_v32 }
 0x13e   : > { %v9256_v52 = vadd.f32 %v1609_v47, %v1375_v46  ;;  %v593_v47 = vpack.c.bf16 %v567_v30, %v566_v29 }
 0x143   : > { %v1288_v63 = vpop.f32.mrf.mxu2  ;;  %v812_v7 = vpop.f32.mrf.mxu0 }
 0x144   : > { %v1376_v1 = vadd.f32 %v1288_v63, %v1013_v53  ;;  %v1611_v3 = vpop.f32.mrf.mxu3  ;;  %v1015_v10 = vpop.f32.mrf.mxu1  ;;  %v1469_v53 = vpack.c.bf16 %v1443_v37, %v1442_v34 }
 0x145   : > { %v1016_v17 = vadd.f32 %v1015_v10, %v812_v7  ;;  %v569_v7 = vld [vmem:[%s8986_s10 + $0x158] sm:$0xff] }
 0x146   : > { %v9266_v15 = vadd.f32 %v1611_v3, %v1376_v1  ;;  %8131 = vmatmul.msk.bf16.gmra.mxu0 %vm671_vm1, %v664_v0  ;;  %v640_v0 = vld [vmem:[%s8986_s10 + $0x151] sm:$0xff]  ;;  %v641_v1 = vld [vmem:[%s8986_s10 + $0x159] sm:$0xff] }
 0x147   : > { %8155 = vmatmul.msk.bf16.gmra.mxu1 %vm671_vm1, %v592_v8  ;;  %v568_v3 = vld [vmem:[%s8986_s10 + $0x150] sm:$0xff] }
 0x148   : > { %8180 = vmatmul.msk.bf16.gmra.mxu2 %vm671_vm1, %v1145_v9  ;;  %v1121_v8 = vld [vmem:[%s8986_s10 + $0x152] sm:$0xff]  ;;  %v1122_v9 = vld [vmem:[%s8986_s10 + $0x15a] sm:$0xff] }
 0x149   : > { %8205 = vmatmul.msk.bf16.gmra.mxu3 %vm671_vm1, %v1468_v12  ;;  %v1444_v10 = vld [vmem:[%s8986_s10 + $0x153] sm:$0xff]  ;;  %v1445_v12 = vld [vmem:[%s8986_s10 + $0x15b] sm:$0xff] }
 0x14a   : > { %v1470_v28 = vpack.c.bf16 %v1445_v12, %v1444_v10  ;;  %v8360_v10 = vld [vmem:[%s11497_s1 + $0x14] sm:$0x3]  ;;  %v8385_v12 = vld [vmem:[%s11497_s1 + $0x16] sm:$0x3] }
 0x14b   : > { %v1291_v18 = vpop.f32.mrf.mxu2  ;;  %v814_v22 = vpop.f32.mrf.mxu0 }
 0x14c   : > { %v1377_v19 = vadd.f32 %v1291_v18, %v1016_v17  ;;  %v1614_v21 = vpop.f32.mrf.mxu3  ;;  %v1017_v23 = vpop.f32.mrf.mxu1  ;;  %v666_v18 = vpack.c.bf16 %v641_v1, %v640_v0 }
 0x14d   : > { %v1018_v26 = vadd.f32 %v1017_v23, %v814_v22  ;;  %v594_v23 = vpack.c.bf16 %v569_v7, %v568_v3 }
 0x14e   : > { %v9272_v25 = vadd.f32 %v1614_v21, %v1377_v19 }
 0x153   : > { %v1293_v38 = vpop.f32.mrf.mxu2  ;;  %v817_v46 = vpop.f32.mrf.mxu0 }
 0x154   : > { %v1378_v42 = vadd.f32 %v1293_v38, %v1018_v26  ;;  %v1616_v43 = vpop.f32.mrf.mxu3  ;;  %v1020_v51 = vpop.f32.mrf.mxu1  ;;  %v1147_v26 = vpack.c.bf16 %v1122_v9, %v1121_v8 }
 0x155   : > { %v1021_v55 = vadd.f32 %v1020_v51, %v817_v46  ;;  %v643_v46 = vld [vmem:[%s8986_s10 + $0x169] sm:$0xff] }
 0x156   : > { %v9282_v54 = vadd.f32 %v1616_v43, %v1378_v42  ;;  %8132 = vmatmul.msk.bf16.gmra.mxu0 %vm671_vm1, %v665_v39  ;;  %v642_v43 = vld [vmem:[%s8986_s10 + $0x161] sm:$0xff] }
 0x157   : > { %8156 = vmatmul.msk.bf16.gmra.mxu1 %vm671_vm1, %v593_v47  ;;  %v570_v47 = vld [vmem:[%s8986_s10 + $0x160] sm:$0xff] }
 0x158   : > { %8181 = vmatmul.msk.bf16.gmra.mxu2 %vm671_vm1, %v1146_v49  ;;  %v571_v49 = vld [vmem:[%s8986_s10 + $0x168] sm:$0xff] }
 0x159   : > { %8206 = vmatmul.msk.bf16.gmra.mxu3 %vm671_vm1, %v1469_v53  ;;  %v1123_v51 = vld [vmem:[%s8986_s10 + $0x162] sm:$0xff]  ;;  %v1124_v53 = vld [vmem:[%s8986_s10 + $0x16a] sm:$0xff]  ;;  %v595_v0 = vpack.c.bf16 %v571_v49, %v570_v47 }
 0x15a   : > { %v1148_v1 = vpack.c.bf16 %v1124_v53, %v1123_v51 }
 0x15b   : > { %v1296_v56 = vpop.f32.mrf.mxu2  ;;  %v819_v60 = vpop.f32.mrf.mxu0 }
 0x15c   : > { %v1379_v58 = vadd.f32 %v1296_v56, %v1021_v55  ;;  %v1619_v59 = vpop.f32.mrf.mxu3  ;;  %v1022_v61 = vpop.f32.mrf.mxu1  ;;  %v1446_v55 = vld [vmem:[%s8986_s10 + $0x163] sm:$0xff]  ;;  %v1447_v56 = vld [vmem:[%s8986_s10 + $0x16b] sm:$0xff] }
 0x15d   : > { %v1023_v63 = vadd.f32 %v1022_v61, %v819_v60  ;;  %v1471_v7 = vpack.c.bf16 %v1447_v56, %v1446_v55 }
 0x15e   : > { %v9288_v62 = vadd.f32 %v1619_v59, %v1379_v58  ;;  %v667_v59 = vpack.c.bf16 %v643_v46, %v642_v43  ;;  %v1448_v43 = vld [vmem:[%s8986_s10 + $0x173] sm:$0x7f] }
 0x163   : > { %v1298_v17 = vpop.f32.mrf.mxu2  ;;  %v822_v22 = vpop.f32.mrf.mxu0 }
 0x164   : > { %v1380_v19 = vadd.f32 %v1298_v17, %v1023_v63  ;;  %v1621_v21 = vpop.f32.mrf.mxu3  ;;  %v1025_v27 = vpop.f32.mrf.mxu1  ;;  %v3809_v17 = vsel %vm744_vm0, %v8360_v10, 0 }
 0x165   : > { %v1026_v30 = vadd.f32 %v1025_v27, %v822_v22  ;;  %3818 = vmatpush.bf16.msra.mxu2 %v3809_v17  ;;  %v1726_v17 = vld [vmem:[%s8986_s10 + $0x20] sm:$0xff] }
 0x166   : > { %v9298_v29 = vadd.f32 %v1621_v21, %v1380_v19  ;;  %8133 = vmatmul.msk.bf16.gmra.mxu0 %vm671_vm1, %v666_v18  ;;  %v4132_v18 = vsel %vm744_vm0, %v8385_v12, 0  ;;  %v1725_v12 = vld [vmem:[%s8986_s10 + $0x18] sm:$0xff] }
 0x167   : > { %8157 = vmatmul.msk.bf16.gmra.mxu1 %vm671_vm1, %v594_v23  ;;  %4141 = vmatpush.bf16.msra.mxu3 %v4132_v18  ;;  %v2048_v18 = vld [vmem:[%s8986_s10 + $0x19] sm:$0xff] }
 0x168   : > { %8182 = vmatmul.msk.bf16.gmra.mxu2 %vm671_vm1, %v1147_v26 }
 0x169   : > { %8207 = vmatmul.msk.bf16.gmra.mxu3 %vm671_vm1, %v1470_v28 }
 0x16b   : > { %v1301_v32 = vpop.f32.mrf.mxu2  ;;  %v824_v37 = vpop.f32.mrf.mxu0 }
 0x16c   : > { %v1381_v33 = vadd.f32 %v1301_v32, %v1026_v30  ;;  %v1624_v34 = vpop.f32.mrf.mxu3  ;;  %v1027_v38 = vpop.f32.mrf.mxu1  ;;  %v8310_v30 = vld [vmem:[%s11497_s1 + $0x10] sm:$0x3]  ;;  %v8335_v32 = vld [vmem:[%s11497_s1 + $0x12] sm:$0x3] }
 0x16d   : > { %v1028_v42 = vadd.f32 %v1027_v38, %v824_v37  ;;  %v644_v37 = vld [vmem:[%s8986_s10 + $0x171] sm:$0x7f] }
 0x16e   : > { %v9304_v39 = vadd.f32 %v1624_v34, %v1381_v33  ;;  %v3163_v33 = vsel %vm744_vm0, %v8310_v30, 0  ;;  %v3486_v34 = vsel %vm744_vm0, %v8335_v32, 0  ;;  %v572_v38 = vld [vmem:[%s8986_s10 + $0x170] sm:$0x7f]  ;;  %v668_v47 = vpack.c.bf16 %v644_v37, %v644_v37 }
 0x16f   : > { %3172 = vmatpush.bf16.msra.mxu0 %v3163_v33  ;;  %3495 = vmatpush.bf16.msra.mxu1 %v3486_v34  ;;  %v596_v55 = vpack.c.bf16 %v572_v38, %v572_v38  ;;  %v1772_v30 = vpack.c.bf16 %v1726_v17, %v1725_v12  ;;  %v2697_v12 = vld [vmem:[%s8986_s10 + $0x33] sm:$0xff] }
 0x173   : > { %v1303_v58 = vpop.f32.mrf.mxu2  ;;  %v827_v63 = vpop.f32.mrf.mxu0 }
 0x174   : > { %v1382_v60 = vadd.f32 %v1303_v58, %v1028_v42  ;;  %v1626_v61 = vpop.f32.mrf.mxu3  ;;  %v1030_v3 = vpop.f32.mrf.mxu1  ;;  %v1125_v42 = vld [vmem:[%s8986_s10 + $0x172] sm:$0x7f] }
 0x175   : > { %v1031_v9 = vadd.f32 %v1030_v3, %v827_v63  ;;  %v1149_v56 = vpack.c.bf16 %v1125_v42, %v1125_v42 }
 0x176   : > { %v9314_v8 = vadd.f32 %v1626_v61, %v1382_v60  ;;  %8134 = vmatmul.msk.bf16.gmra.mxu0 %vm671_vm1, %v667_v59  ;;  %v1472_v59 = vpack.c.bf16 %v1448_v43, %v1448_v43 }
 0x177   : > { %8158 = vmatmul.msk.bf16.gmra.mxu1 %vm671_vm1, %v595_v0 }
 0x178   : > { %8183 = vmatmul.msk.bf16.gmra.mxu2 %vm671_vm1, %v1148_v1 }
 0x179   : > { %8208 = vmatmul.msk.bf16.gmra.mxu3 %vm671_vm1, %v1471_v7 }
 0x17b   : > { %v1306_v19 = vpop.f32.mrf.mxu2  ;;  %v829_v23 = vpop.f32.mrf.mxu0 }
 0x17c   : > { %v1383_v21 = vadd.f32 %v1306_v19, %v1031_v9  ;;  %v1629_v22 = vpop.f32.mrf.mxu3  ;;  %v1032_v26 = vpop.f32.mrf.mxu1  ;;  %v2049_v19 = vld [vmem:[%s8986_s10 + $0x21] sm:$0xff] }
 0x17d   : > { %v1033_v28 = vadd.f32 %v1032_v26, %v829_v23  ;;  %v2694_v23 = vld [vmem:[%s8986_s10 + $0x1b] sm:$0xff]  ;;  %v2695_v26 = vld [vmem:[%s8986_s10 + $0x23] sm:$0xff]  ;;  %v2095_v37 = vpack.c.bf16 %v2049_v19, %v2048_v18 }
 0x17e   : > { %v9328_v27 = vadd.f32 %v1629_v22, %v1383_v21  ;;  %v2371_v21 = vld [vmem:[%s8986_s10 + $0x1a] sm:$0xff]  ;;  %v2372_v22 = vld [vmem:[%s8986_s10 + $0x22] sm:$0xff]  ;;  %v2741_v43 = vpack.c.bf16 %v2695_v26, %v2694_v23 }
 0x17f   : > { %v2418_v38 = vpack.c.bf16 %v2372_v22, %v2371_v21 }
 0x183   : > { %v1308_v46 = vpop.f32.mrf.mxu2  ;;  %v832_v53 = vpop.f32.mrf.mxu0 }
 0x184   : > { %v1384_v49 = vadd.f32 %v1308_v46, %v1033_v28  ;;  %v1631_v51 = vpop.f32.mrf.mxu3  ;;  %v1035_v58 = vpop.f32.mrf.mxu1 }
 0x185   : > { %v1036_v61 = vadd.f32 %v1035_v58, %v832_v53 }
 0x186   : > { %v9342_v60 = vadd.f32 %v1631_v51, %v1384_v49  ;;  %8135 = vmatmul.msk.bf16.gmra.mxu0 %vm671_vm1, %v668_v47 }
 0x187   : > { %8159 = vmatmul.msk.bf16.gmra.mxu1 %vm671_vm1, %v596_v55 }
 0x188   : > { %8184 = vmatmul.msk.bf16.gmra.mxu2 %vm671_vm1, %v1149_v56 }
 0x189   : > { %8209 = vmatmul.msk.bf16.gmra.mxu3 %vm671_vm1, %v1472_v59 }
 0x18b   : > { %v1311_v63 = vpop.f32.mrf.mxu2  ;;  %v834_v3 = vpop.f32.mrf.mxu0 }
 0x18c   : > { %v1385_v0 = vadd.f32 %v1311_v63, %v1036_v61  ;;  %v1634_v1 = vpop.f32.mrf.mxu3  ;;  %v1037_v7 = vpop.f32.mrf.mxu1  ;;  %v1727_v61 = vld [vmem:[%s8986_s10 + $0x28] sm:$0xff]  ;;  %v1728_v63 = vld [vmem:[%s8986_s10 + $0x30] sm:$0xff] }
 0x18d   : > { %v1038_v10 = vadd.f32 %v1037_v7, %v834_v3  ;;  %v2373_v3 = vld [vmem:[%s8986_s10 + $0x2a] sm:$0xff]  ;;  %v2374_v7 = vld [vmem:[%s8986_s10 + $0x32] sm:$0xff]  ;;  %v1773_v18 = vpack.c.bf16 %v1728_v63, %v1727_v61  ;;  %v2376_v61 = vld [vmem:[%s8986_s10 + $0x42] sm:$0xff] }
 0x18e   : > { %v9348_v9 = vadd.f32 %v1634_v1, %v1385_v0  ;;  %v2050_v0 = vld [vmem:[%s8986_s10 + $0x29] sm:$0xff]  ;;  %v2051_v1 = vld [vmem:[%s8986_s10 + $0x31] sm:$0xff]  ;;  %v2419_v26 = vpack.c.bf16 %v2374_v7, %v2373_v3  ;;  %v2698_v63 = vld [vmem:[%s8986_s10 + $0x3b] sm:$0xff] }
 0x18f   : > { %v2096_v23 = vpack.c.bf16 %v2051_v1, %v2050_v0  ;;  %v2699_v0 = vld [vmem:[%s8986_s10 + $0x43] sm:$0xff] }
 0x193   : > { %v1313_v28 = vpop.f32.mrf.mxu2  ;;  %v837_v34 = vpop.f32.mrf.mxu0 }
 0x194   : > { %v1386_v32 = vadd.f32 %v1313_v28, %v1038_v10  ;;  %v1636_v33 = vpop.f32.mrf.mxu3  ;;  %v1040_v42 = vpop.f32.mrf.mxu1  ;;  %v2696_v10 = vld [vmem:[%s8986_s10 + $0x2b] sm:$0xff] }
 0x195   : > { %v1041_v47 = vadd.f32 %v1040_v42, %v837_v34 }
 0x196   : > { %v9358_v46 = vadd.f32 %v1636_v33, %v1386_v32  ;;  %8211 = vmatmul.msk.bf16.vlgmr.msrb.gmra.mxu0 %vm671_vm1, %v1772_v30  ;;  %v2742_v30 = vpack.c.bf16 %v2697_v12, %v2696_v10 }
 0x197   : > { %8236 = vmatmul.msk.bf16.vlgmr.msrb.gmra.mxu1 %vm671_vm1, %v2095_v37 }
 0x198   : > { %8261 = vmatmul.msk.bf16.vlgmr.msrb.gmra.mxu2 %vm671_vm1, %v2418_v38 }
 0x199   : > { %8286 = vmatmul.msk.bf16.vlgmr.msrb.gmra.mxu3 %vm671_vm1, %v2741_v43 }
 0x19b   : > { %v1316_v49 = vpop.f32.mrf.mxu2  ;;  %v839_v55 = vpop.f32.mrf.mxu0 }
 0x19c   : > { %v1387_v51 = vadd.f32 %v1316_v49, %v1041_v47  ;;  %v1639_v53 = vpop.f32.mrf.mxu3  ;;  %v1042_v56 = vpop.f32.mrf.mxu1 }
 0x19d   : > { %v1043_v59 = vadd.f32 %v1042_v56, %v839_v55  ;;  %v2052_v55 = vld [vmem:[%s8986_s10 + $0x39] sm:$0xff]  ;;  %v2053_v56 = vld [vmem:[%s8986_s10 + $0x41] sm:$0xff] }
 0x19e   : > { %v9364_v58 = vadd.f32 %v1639_v53, %v1387_v51  ;;  %v1729_v51 = vld [vmem:[%s8986_s10 + $0x38] sm:$0xff]  ;;  %v1730_v53 = vld [vmem:[%s8986_s10 + $0x40] sm:$0xff] }
 0x19f   : > { %v1774_v3 = vpack.c.bf16 %v1730_v53, %v1729_v51  ;;  %v2055_v51 = vld [vmem:[%s8986_s10 + $0x51] sm:$0xff] }
 0x1a0   : > { %v2377_v53 = vld [vmem:[%s8986_s10 + $0x4a] sm:$0xff] }
 0x1a3   : > { %v1318_v17 = vpop.f32.mrf.mxu2  ;;  %v842_v22 = vpop.f32.mrf.mxu0 }
 0x1a4   : > { %v1388_v19 = vadd.f32 %v1318_v17, %v1043_v59  ;;  %v1641_v21 = vpop.f32.mrf.mxu3  ;;  %v1045_v28 = vpop.f32.mrf.mxu1  ;;  %v2375_v59 = vld [vmem:[%s8986_s10 + $0x3a] sm:$0xff]  ;;  %v2097_v17 = vpack.c.bf16 %v2053_v56, %v2052_v55  ;;  %v2378_v55 = vld [vmem:[%s8986_s10 + $0x52] sm:$0xff] }
 0x1a5   : > { %v1046_v33 = vadd.f32 %v1045_v28, %v842_v22  ;;  %v2700_v56 = vld [vmem:[%s8986_s10 + $0x4b] sm:$0xff] }
 0x1a6   : > { %v9374_v32 = vadd.f32 %v1641_v21, %v1388_v19  ;;  %8212 = vmatmul.msk.bf16.gmra.mxu0 %vm671_vm1, %v1773_v18  ;;  %v2420_v18 = vpack.c.bf16 %v2376_v61, %v2375_v59  ;;  %v2743_v21 = vpack.c.bf16 %v2699_v0, %v2698_v63  ;;  %v2701_v59 = vld [vmem:[%s8986_s10 + $0x53] sm:$0xff] }
 0x1a7   : > { %8237 = vmatmul.msk.bf16.gmra.mxu1 %vm671_vm1, %v2096_v23 }
 0x1a8   : > { %8262 = vmatmul.msk.bf16.gmra.mxu2 %vm671_vm1, %v2419_v26 }
 0x1a9   : > { %8287 = vmatmul.msk.bf16.gmra.mxu3 %vm671_vm1, %v2742_v30 }
 0x1ab   : > { %v1321_v34 = vpop.f32.mrf.mxu2  ;;  %v844_v42 = vpop.f32.mrf.mxu0 }
 0x1ac   : > { %v1389_v37 = vadd.f32 %v1321_v34, %v1046_v33  ;;  %v1644_v38 = vpop.f32.mrf.mxu3  ;;  %v1047_v43 = vpop.f32.mrf.mxu1 }
 0x1ad   : > { %v1048_v49 = vadd.f32 %v1047_v43, %v844_v42  ;;  %v1731_v42 = vld [vmem:[%s8986_s10 + $0x48] sm:$0xff]  ;;  %v1732_v43 = vld [vmem:[%s8986_s10 + $0x50] sm:$0xff] }
 0x1ae   : > { %v9380_v47 = vadd.f32 %v1644_v38, %v1389_v37  ;;  %v1775_v63 = vpack.c.bf16 %v1732_v43, %v1731_v42  ;;  %v1734_v42 = vld [vmem:[%s8986_s10 + $0x60] sm:$0xff] }
 0x1af   : > { %v2056_v43 = vld [vmem:[%s8986_s10 + $0x59] sm:$0xff] }
 0x1b3   : > { %v1323_v1 = vpop.f32.mrf.mxu2  ;;  %v847_v12 = vpop.f32.mrf.mxu0 }
 0x1b4   : > { %v1390_v7 = vadd.f32 %v1323_v1, %v1048_v49  ;;  %v1646_v10 = vpop.f32.mrf.mxu3  ;;  %v1050_v19 = vpop.f32.mrf.mxu1  ;;  %v2054_v49 = vld [vmem:[%s8986_s10 + $0x49] sm:$0xff] }
 0x1b5   : > { %v1051_v23 = vadd.f32 %v1050_v19, %v847_v12 }
 0x1b6   : > { %v9390_v22 = vadd.f32 %v1646_v10, %v1390_v7  ;;  %8213 = vmatmul.msk.bf16.gmra.mxu0 %vm671_vm1, %v1774_v3  ;;  %v2098_v7 = vpack.c.bf16 %v2055_v51, %v2054_v49  ;;  %v2421_v10 = vpack.c.bf16 %v2378_v55, %v2377_v53  ;;  %v2057_v49 = vld [vmem:[%s8986_s10 + $0x61] sm:$0xff] }
 0x1b7   : > { %8238 = vmatmul.msk.bf16.gmra.mxu1 %vm671_vm1, %v2097_v17  ;;  %v2744_v17 = vpack.c.bf16 %v2701_v59, %v2700_v56  ;;  %v2379_v51 = vld [vmem:[%s8986_s10 + $0x5a] sm:$0xff]  ;;  %v2380_v53 = vld [vmem:[%s8986_s10 + $0x62] sm:$0xff] }
 0x1b8   : > { %8263 = vmatmul.msk.bf16.gmra.mxu2 %vm671_vm1, %v2420_v18  ;;  %v2702_v55 = vld [vmem:[%s8986_s10 + $0x5b] sm:$0xff]  ;;  %v2703_v56 = vld [vmem:[%s8986_s10 + $0x63] sm:$0xff] }
 0x1b9   : > { %8288 = vmatmul.msk.bf16.gmra.mxu3 %vm671_vm1, %v2743_v21 }
 0x1bb   : > { %v1326_v26 = vpop.f32.mrf.mxu2  ;;  %v849_v33 = vpop.f32.mrf.mxu0 }
 0x1bc   : > { %v1391_v28 = vadd.f32 %v1326_v26, %v1051_v23  ;;  %v1649_v30 = vpop.f32.mrf.mxu3  ;;  %v1052_v34 = vpop.f32.mrf.mxu1 }
 0x1bd   : > { %v1053_v38 = vadd.f32 %v1052_v34, %v849_v33 }
 0x1be   : > { %v9396_v37 = vadd.f32 %v1649_v30, %v1391_v28 }
 0x1c3   : > { %v1328_v61 = vpop.f32.mrf.mxu2  ;;  %v852_v3 = vpop.f32.mrf.mxu0 }
 0x1c4   : > { %v1392_v0 = vadd.f32 %v1328_v61, %v1053_v38  ;;  %v1651_v1 = vpop.f32.mrf.mxu3  ;;  %v1055_v12 = vpop.f32.mrf.mxu1  ;;  %v1733_v38 = vld [vmem:[%s8986_s10 + $0x58] sm:$0xff] }
 0x1c5   : > { %v1056_v19 = vadd.f32 %v1055_v12, %v852_v3  ;;  %v1776_v61 = vpack.c.bf16 %v1734_v42, %v1733_v38  ;;  %v2099_v3 = vpack.c.bf16 %v2057_v49, %v2056_v43  ;;  %v2745_v12 = vpack.c.bf16 %v2703_v56, %v2702_v55  ;;  %v1735_v42 = vld [vmem:[%s8986_s10 + $0x68] sm:$0xff]  ;;  %v1736_v43 = vld [vmem:[%s8986_s10 + $0x70] sm:$0xff] }
 0x1c6   : > { %v9406_v18 = vadd.f32 %v1651_v1, %v1392_v0  ;;  %8214 = vmatmul.msk.bf16.gmra.mxu0 %vm671_vm1, %v1775_v63  ;;  %v2058_v49 = vld [vmem:[%s8986_s10 + $0x69] sm:$0xff]  ;;  %v2382_v55 = vld [vmem:[%s8986_s10 + $0x72] sm:$0xff] }
 0x1c7   : > { %8239 = vmatmul.msk.bf16.gmra.mxu1 %vm671_vm1, %v2098_v7  ;;  %v2422_v7 = vpack.c.bf16 %v2380_v53, %v2379_v51  ;;  %v2059_v51 = vld [vmem:[%s8986_s10 + $0x71] sm:$0xff] }
 0x1c8   : > { %8264 = vmatmul.msk.bf16.gmra.mxu2 %vm671_vm1, %v2421_v10  ;;  %v2381_v53 = vld [vmem:[%s8986_s10 + $0x6a] sm:$0xff] }
 0x1c9   : > { %8289 = vmatmul.msk.bf16.gmra.mxu3 %vm671_vm1, %v2744_v17  ;;  %v2704_v56 = vld [vmem:[%s8986_s10 + $0x6b] sm:$0xff] }
 0x1cb   : > { %v1331_v21 = vpop.f32.mrf.mxu2  ;;  %v854_v28 = vpop.f32.mrf.mxu0 }
 0x1cc   : > { %v1393_v23 = vadd.f32 %v1331_v21, %v1056_v19  ;;  %v1654_v26 = vpop.f32.mrf.mxu3  ;;  %v1057_v30 = vpop.f32.mrf.mxu1 }
 0x1cd   : > { %v1058_v34 = vadd.f32 %v1057_v30, %v854_v28 }
 0x1ce   : > { %v9412_v33 = vadd.f32 %v1654_v26, %v1393_v23 }
 0x1d3   : > { %v1333_v59 = vpop.f32.mrf.mxu2  ;;  %v857_v1 = vpop.f32.mrf.mxu0 }
 0x1d4   : > { %v1394_v63 = vadd.f32 %v1333_v59, %v1058_v34  ;;  %v1656_v0 = vpop.f32.mrf.mxu3  ;;  %v1060_v10 = vpop.f32.mrf.mxu1  ;;  %v2705_v59 = vld [vmem:[%s8986_s10 + $0x73] sm:$0xff] }
 0x1d5   : > { %v1061_v19 = vadd.f32 %v1060_v10, %v857_v1  ;;  %v2423_v10 = vpack.c.bf16 %v2382_v55, %v2381_v53  ;;  %v1738_v53 = vld [vmem:[%s8986_s10 + $0x80] sm:$0xff] }
 0x1d6   : > { %v9422_v17 = vadd.f32 %v1656_v0, %v1394_v63  ;;  %8215 = vmatmul.msk.bf16.gmra.mxu0 %vm671_vm1, %v1776_v61  ;;  %v1777_v63 = vpack.c.bf16 %v1736_v43, %v1735_v42  ;;  %v2060_v55 = vld [vmem:[%s8986_s10 + $0x79] sm:$0xff] }
 0x1d7   : > { %8240 = vmatmul.msk.bf16.gmra.mxu1 %vm671_vm1, %v2099_v3 }
 0x1d8   : > { %8265 = vmatmul.msk.bf16.gmra.mxu2 %vm671_vm1, %v2422_v7  ;;  %v2100_v7 = vpack.c.bf16 %v2059_v51, %v2058_v49  ;;  %v1737_v51 = vld [vmem:[%s8986_s10 + $0x78] sm:$0xff] }
 0x1d9   : > { %8290 = vmatmul.msk.bf16.gmra.mxu3 %vm671_vm1, %v2745_v12 }
 0x1db   : > { %v1336_v21 = vpop.f32.mrf.mxu2  ;;  %v859_v28 = vpop.f32.mrf.mxu0 }
 0x1dc   : > { %v1395_v23 = vadd.f32 %v1336_v21, %v1061_v19  ;;  %v1659_v26 = vpop.f32.mrf.mxu3  ;;  %v1062_v30 = vpop.f32.mrf.mxu1  ;;  %v2746_v19 = vpack.c.bf16 %v2705_v59, %v2704_v56  ;;  %v2061_v56 = vld [vmem:[%s8986_s10 + $0x81] sm:$0xff] }
 0x1dd   : > { %v1063_v38 = vadd.f32 %v1062_v30, %v859_v28  ;;  %v2383_v59 = vld [vmem:[%s8986_s10 + $0x7a] sm:$0xff] }
 0x1de   : > { %v9428_v34 = vadd.f32 %v1659_v26, %v1395_v23 }
 0x1e3   : > { %v1338_v61 = vpop.f32.mrf.mxu2  ;;  %v862_v3 = vpop.f32.mrf.mxu0 }
 0x1e4   : > { %v1396_v0 = vadd.f32 %v1338_v61, %v1063_v38  ;;  %v1661_v1 = vpop.f32.mrf.mxu3  ;;  %v1065_v12 = vpop.f32.mrf.mxu1  ;;  %v2384_v61 = vld [vmem:[%s8986_s10 + $0x82] sm:$0xff] }
 0x1e5   : > { %v1066_v23 = vadd.f32 %v1065_v12, %v862_v3  ;;  %v1778_v3 = vpack.c.bf16 %v1738_v53, %v1737_v51 }
 0x1e6   : > { %v9438_v21 = vadd.f32 %v1661_v1, %v1396_v0  ;;  %8216 = vmatmul.msk.bf16.gmra.mxu0 %vm671_vm1, %v1777_v63  ;;  %v2706_v63 = vld [vmem:[%s8986_s10 + $0x7b] sm:$0xff]  ;;  %v2707_v0 = vld [vmem:[%s8986_s10 + $0x83] sm:$0xff] }
 0x1e7   : > { %8241 = vmatmul.msk.bf16.gmra.mxu1 %vm671_vm1, %v2100_v7 }
 0x1e8   : > { %8266 = vmatmul.msk.bf16.gmra.mxu2 %vm671_vm1, %v2423_v10 }
 0x1e9   : > { %8291 = vmatmul.msk.bf16.gmra.mxu3 %vm671_vm1, %v2746_v19  ;;  %v2101_v19 = vpack.c.bf16 %v2061_v56, %v2060_v55 }
 0x1eb   : > { %v1341_v26 = vpop.f32.mrf.mxu2  ;;  %v864_v38 = vpop.f32.mrf.mxu0 }
 0x1ec   : > { %v1397_v28 = vadd.f32 %v1341_v26, %v1066_v23  ;;  %v1664_v30 = vpop.f32.mrf.mxu3  ;;  %v1067_v42 = vpop.f32.mrf.mxu1  ;;  %v2424_v23 = vpack.c.bf16 %v2384_v61, %v2383_v59  ;;  %v1739_v61 = vld [vmem:[%s8986_s10 + $0x88] sm:$0xff] }
 0x1ed   : > { %v1068_v49 = vadd.f32 %v1067_v42, %v864_v38 }
 0x1ee   : > { %v9444_v43 = vadd.f32 %v1664_v30, %v1397_v28  ;;  %v2747_v28 = vpack.c.bf16 %v2707_v0, %v2706_v63  ;;  %v1740_v63 = vld [vmem:[%s8986_s10 + $0x90] sm:$0xff] }
 0x1ef   : > { %v2062_v0 = vld [vmem:[%s8986_s10 + $0x89] sm:$0xff] }
 0x1f3   : > { %v1343_v1 = vpop.f32.mrf.mxu2  ;;  %v867_v12 = vpop.f32.mrf.mxu0 }
 0x1f4   : > { %v1398_v7 = vadd.f32 %v1343_v1, %v1068_v49  ;;  %v1666_v10 = vpop.f32.mrf.mxu3  ;;  %v1070_v26 = vpop.f32.mrf.mxu1  ;;  %v2063_v1 = vld [vmem:[%s8986_s10 + $0x91] sm:$0xff] }
 0x1f5   : > { %v1071_v38 = vadd.f32 %v1070_v26, %v867_v12  ;;  %v2709_v12 = vld [vmem:[%s8986_s10 + $0x93] sm:$0xff] }
 0x1f6   : > { %v9454_v30 = vadd.f32 %v1666_v10, %v1398_v7  ;;  %8217 = vmatmul.msk.bf16.gmra.mxu0 %vm671_vm1, %v1778_v3  ;;  %v2385_v3 = vld [vmem:[%s8986_s10 + $0x8a] sm:$0xff]  ;;  %v2386_v7 = vld [vmem:[%s8986_s10 + $0x92] sm:$0xff] }
 0x1f7   : > { %8242 = vmatmul.msk.bf16.gmra.mxu1 %vm671_vm1, %v2101_v19  ;;  %v2708_v10 = vld [vmem:[%s8986_s10 + $0x8b] sm:$0xff] }
 0x1f8   : > { %11511 = vst [vmem:[#allocation5_spill] sm:$0xff] %v9454_v30  ;;  %8267 = vmatmul.msk.bf16.gmra.mxu2 %vm671_vm1, %v2424_v23  ;;  %v1779_v23 = vpack.c.bf16 %v1740_v63, %v1739_v61 }
 0x1f9   : > { %8292 = vmatmul.msk.bf16.gmra.mxu3 %vm671_vm1, %v2747_v28 }
 0x1fb   : > { %v1346_v42 = vpop.f32.mrf.mxu2  ;;  %v869_v53 = vpop.f32.mrf.mxu0 }
 0x1fc   : > { %v1399_v49 = vadd.f32 %v1346_v42, %v1071_v38  ;;  %v1669_v51 = vpop.f32.mrf.mxu3  ;;  %v1072_v55 = vpop.f32.mrf.mxu1  ;;  %v2102_v38 = vpack.c.bf16 %v2063_v1, %v2062_v0  ;;  %v2425_v42 = vpack.c.bf16 %v2386_v7, %v2385_v3  ;;  %v1741_v7 = vld [vmem:[%s8986_s10 + $0x98] sm:$0xff] }
 0x1fd   : > { %v1073_v59 = vadd.f32 %v1072_v55, %v869_v53 }
 0x1fe   : > { %v9460_v56 = vadd.f32 %v1669_v51, %v1399_v49  ;;  %v2748_v51 = vpack.c.bf16 %v2709_v12, %v2708_v10  ;;  %v2064_v10 = vld [vmem:[%s8986_s10 + $0x99] sm:$0xff]  ;;  %v2065_v12 = vld [vmem:[%s8986_s10 + $0xa1] sm:$0xff] }
 0x200   : > { %11512 = vst [vmem:[#allocation6_spill] sm:$0xff] %v9460_v56 }
 0x203   : > { %v1348_v19 = vpop.f32.mrf.mxu2  ;;  %v872_v30 = vpop.f32.mrf.mxu0 }
 0x204   : > { %v1400_v26 = vadd.f32 %v1348_v19, %v1073_v59  ;;  %v1671_v28 = vpop.f32.mrf.mxu3  ;;  %v1075_v49 = vpop.f32.mrf.mxu1  ;;  %v2387_v19 = vld [vmem:[%s8986_s10 + $0x9a] sm:$0xff] }
 0x205   : > { %v1076_v55 = vadd.f32 %v1075_v49, %v872_v30  ;;  %v1742_v30 = vld [vmem:[%s8986_s10 + $0xa0] sm:$0xff] }
 0x206   : > { %v9470_v53 = vadd.f32 %v1671_v28, %v1400_v26  ;;  %8218 = vmatmul.msk.bf16.gmra.mxu0 %vm671_vm1, %v1779_v23  ;;  %v2388_v23 = vld [vmem:[%s8986_s10 + $0xa2] sm:$0xff]  ;;  %v1780_v49 = vpack.c.bf16 %v1742_v30, %v1741_v7 }
 0x207   : > { %8243 = vmatmul.msk.bf16.gmra.mxu1 %vm671_vm1, %v2102_v38  ;;  %v2710_v26 = vld [vmem:[%s8986_s10 + $0x9b] sm:$0xff]  ;;  %v2711_v28 = vld [vmem:[%s8986_s10 + $0xa3] sm:$0xff]  ;;  %v2426_v56 = vpack.c.bf16 %v2388_v23, %v2387_v19  ;;  %v1744_v23 = vld [vmem:[%s8986_s10 + $0xb0] sm:$0xff] }
 0x208   : > { %11513 = vst [vmem:[#allocation7_spill] sm:$0xff] %v9470_v53  ;;  %8268 = vmatmul.msk.bf16.gmra.mxu2 %vm671_vm1, %v2425_v42  ;;  %v1743_v19 = vld [vmem:[%s8986_s10 + $0xa8] sm:$0xff] }
 0x209   : > { %8293 = vmatmul.msk.bf16.gmra.mxu3 %vm671_vm1, %v2748_v51  ;;  %v2103_v51 = vpack.c.bf16 %v2065_v12, %v2064_v10 }
 0x20b   : > { %v1351_v59 = vpop.f32.mrf.mxu2  ;;  %v874_v0 = vpop.f32.mrf.mxu0 }
 0x20c   : > { %v1401_v61 = vadd.f32 %v1351_v59, %v1076_v55  ;;  %v1674_v63 = vpop.f32.mrf.mxu3  ;;  %v1077_v1 = vpop.f32.mrf.mxu1 }
 0x20e   : > { %v9476_v3 = vadd.f32 %v1674_v63, %v1401_v61  ;;  %v2749_v61 = vpack.c.bf16 %v2711_v28, %v2710_v26  ;;  %v2066_v26 = vld [vmem:[%s8986_s10 + $0xa9] sm:$0xff]  ;;  %v2067_v28 = vld [vmem:[%s8986_s10 + $0xb1] sm:$0xff] }
 0x210   : > { %11514 = vst [vmem:[#allocation8_spill] sm:$0xff] %v9476_v3 }
 0x213   : > { %v1353_v38 = vpop.f32.mrf.mxu2  ;;  %v1882_v53 = vpop.f32.mrf.mxu0 }
 0x214   : > { %v1676_v42 = vpop.f32.mrf.mxu3  ;;  %v2001_v55 = vadd.f32 %v1882_v53, %v9096_v5  ;;  %v2205_v59 = vpop.f32.mrf.mxu1  ;;  %v2389_v38 = vld [vmem:[%s8986_s10 + $0xaa] sm:$0xff] }
 0x215   : > { %v2713_v42 = vld [vmem:[%s8986_s10 + $0xb3] sm:$0xff] }
 0x216   : > { %v2324_v63 = vadd.f32 %v2205_v59, %v2001_v55  ;;  %8219 = vmatmul.msk.bf16.gmra.mxu0 %vm671_vm1, %v1780_v49  ;;  %v2712_v49 = vld [vmem:[%s8986_s10 + $0xab] sm:$0xff]  ;;  %v1781_v55 = vpack.c.bf16 %v1744_v23, %v1743_v19 }
 0x217   : > { %8244 = vmatmul.msk.bf16.gmra.mxu1 %vm671_vm1, %v2103_v51 }
 0x218   : > { %8269 = vmatmul.msk.bf16.gmra.mxu2 %vm671_vm1, %v2426_v56  ;;  %v2390_v56 = vld [vmem:[%s8986_s10 + $0xb2] sm:$0xff] }
 0x219   : > { %8294 = vmatmul.msk.bf16.gmra.mxu3 %vm671_vm1, %v2749_v61  ;;  %v2427_v3 = vpack.c.bf16 %v2390_v56, %v2389_v38  ;;  %v1745_v56 = vld [vmem:[%s8986_s10 + $0xb8] sm:$0xff] }
 0x21b   : > { %v2528_v5 = vpop.f32.mrf.mxu2  ;;  %v1884_v1 = vpop.f32.mrf.mxu0 }
 0x21c   : > { %v2647_v53 = vadd.f32 %v2528_v5, %v2324_v63  ;;  %v2851_v0 = vpop.f32.mrf.mxu3  ;;  %v2002_v7 = vadd.f32 %v1884_v1, %v9106_v24  ;;  %v2207_v30 = vpop.f32.mrf.mxu1  ;;  %v2104_v5 = vpack.c.bf16 %v2067_v28, %v2066_v26 }
 0x21e   : > { %v9492_v10 = vadd.f32 %v2851_v0, %v2647_v53  ;;  %v2325_v12 = vadd.f32 %v2207_v30, %v2002_v7  ;;  %v2750_v0 = vpack.c.bf16 %v2713_v42, %v2712_v49  ;;  %v1746_v49 = vld [vmem:[%s8986_s10 + $0xc0] sm:$0xff] }
 0x21f   : > { %v2068_v42 = vld [vmem:[%s8986_s10 + $0xb9] sm:$0xff] }
 0x223   : > { %v2530_v51 = vpop.f32.mrf.mxu2  ;;  %v1887_v63 = vpop.f32.mrf.mxu0 }
 0x224   : > { %v2648_v59 = vadd.f32 %v2530_v51, %v2325_v12  ;;  %v2853_v61 = vpop.f32.mrf.mxu3  ;;  %v2003_v24 = vadd.f32 %v1887_v63, %v9112_v31  ;;  %v2210_v53 = vpop.f32.mrf.mxu1  ;;  %v2069_v51 = vld [vmem:[%s8986_s10 + $0xc1] sm:$0xff] }
 0x226   : > { %v9503_v1 = vadd.f32 %v2853_v61, %v2648_v59  ;;  %v2326_v7 = vadd.f32 %v2210_v53, %v2003_v24  ;;  %8220 = vmatmul.msk.bf16.gmra.mxu0 %vm671_vm1, %v1781_v55  ;;  %v2391_v55 = vld [vmem:[%s8986_s10 + $0xba] sm:$0xff]  ;;  %v2715_v61 = vld [vmem:[%s8986_s10 + $0xc3] sm:$0xff] }
 0x227   : > { %8245 = vmatmul.msk.bf16.gmra.mxu1 %vm671_vm1, %v2104_v5  ;;  %v2714_v59 = vld [vmem:[%s8986_s10 + $0xbb] sm:$0xff]  ;;  %v1782_v5 = vpack.c.bf16 %v1746_v49, %v1745_v56 }
 0x228   : > { %8270 = vmatmul.msk.bf16.gmra.mxu2 %vm671_vm1, %v2427_v3  ;;  %v2392_v3 = vld [vmem:[%s8986_s10 + $0xc2] sm:$0xff] }
 0x229   : > { %8295 = vmatmul.msk.bf16.gmra.mxu3 %vm671_vm1, %v2750_v0 }
 0x22b   : > { %v2533_v31 = vpop.f32.mrf.mxu2  ;;  %v1889_v19 = vpop.f32.mrf.mxu0 }
 0x22c   : > { %v2649_v30 = vadd.f32 %v2533_v31, %v2326_v7  ;;  %v2856_v12 = vpop.f32.mrf.mxu3  ;;  %v2004_v23 = vadd.f32 %v1889_v19, %v9122_v50  ;;  %v2212_v26 = vpop.f32.mrf.mxu1  ;;  %v2105_v7 = vpack.c.bf16 %v2069_v51, %v2068_v42  ;;  %v2428_v31 = vpack.c.bf16 %v2392_v3, %v2391_v55  ;;  %v1747_v3 = vld [vmem:[%s8986_s10 + $0xc8] sm:$0xff] }
 0x22e   : > { %v9510_v28 = vadd.f32 %v2856_v12, %v2649_v30  ;;  %v2327_v38 = vadd.f32 %v2212_v26, %v2004_v23  ;;  %v2751_v12 = vpack.c.bf16 %v2715_v61, %v2714_v59  ;;  %v1748_v59 = vld [vmem:[%s8986_s10 + $0xd0] sm:$0xff] }
 0x22f   : > { %v2070_v61 = vld [vmem:[%s8986_s10 + $0xc9] sm:$0xff] }
 0x233   : > { %v2535_v63 = vpop.f32.mrf.mxu2  ;;  %v1892_v0 = vpop.f32.mrf.mxu0 }
 0x234   : > { %v2650_v24 = vadd.f32 %v2535_v63, %v2327_v38  ;;  %v2858_v53 = vpop.f32.mrf.mxu3  ;;  %v2005_v50 = vadd.f32 %v1892_v0, %v9128_v57  ;;  %v2215_v30 = vpop.f32.mrf.mxu1  ;;  %v2071_v63 = vld [vmem:[%s8986_s10 + $0xd1] sm:$0xff] }
 0x235   : > { %v2717_v0 = vld [vmem:[%s8986_s10 + $0xd3] sm:$0xff] }
 0x236   : > { %v9521_v19 = vadd.f32 %v2858_v53, %v2650_v24  ;;  %v2328_v23 = vadd.f32 %v2215_v30, %v2005_v50  ;;  %8221 = vmatmul.msk.bf16.gmra.mxu0 %vm671_vm1, %v1782_v5  ;;  %v2393_v5 = vld [vmem:[%s8986_s10 + $0xca] sm:$0xff]  ;;  %v2394_v24 = vld [vmem:[%s8986_s10 + $0xd2] sm:$0xff] }
 0x237   : > { %8246 = vmatmul.msk.bf16.gmra.mxu1 %vm671_vm1, %v2105_v7  ;;  %v2716_v53 = vld [vmem:[%s8986_s10 + $0xcb] sm:$0xff] }
 0x238   : > { %8271 = vmatmul.msk.bf16.gmra.mxu2 %vm671_vm1, %v2428_v31  ;;  %v1783_v31 = vpack.c.bf16 %v1748_v59, %v1747_v3 }
 0x239   : > { %8296 = vmatmul.msk.bf16.gmra.mxu3 %vm671_vm1, %v2751_v12 }
 0x23b   : > { %v2538_v57 = vpop.f32.mrf.mxu2  ;;  %v1894_v56 = vpop.f32.mrf.mxu0 }
 0x23c   : > { %v2651_v26 = vadd.f32 %v2538_v57, %v2328_v23  ;;  %v2861_v38 = vpop.f32.mrf.mxu3  ;;  %v2006_v49 = vadd.f32 %v1894_v56, %v9138_v13  ;;  %v2217_v42 = vpop.f32.mrf.mxu1  ;;  %v2106_v23 = vpack.c.bf16 %v2071_v63, %v2070_v61  ;;  %v2429_v57 = vpack.c.bf16 %v2394_v24, %v2393_v5  ;;  %v1749_v24 = vld [vmem:[%s8986_s10 + $0xd8] sm:$0xff] }
 0x23e   : > { %v9528_v51 = vadd.f32 %v2861_v38, %v2651_v26  ;;  %v2329_v55 = vadd.f32 %v2217_v42, %v2006_v49  ;;  %v2752_v38 = vpack.c.bf16 %v2717_v0, %v2716_v53  ;;  %v1750_v53 = vld [vmem:[%s8986_s10 + $0xe0] sm:$0xff] }
 0x23f   : > { %v2072_v0 = vld [vmem:[%s8986_s10 + $0xd9] sm:$0xff] }
 0x243   : > { %v2540_v7 = vpop.f32.mrf.mxu2  ;;  %v1897_v12 = vpop.f32.mrf.mxu0 }
 0x244   : > { %v2652_v50 = vadd.f32 %v2540_v7, %v2329_v55  ;;  %v2863_v30 = vpop.f32.mrf.mxu3  ;;  %v2007_v13 = vadd.f32 %v1897_v12, %v9144_v20  ;;  %v2220_v26 = vpop.f32.mrf.mxu1  ;;  %v2073_v7 = vld [vmem:[%s8986_s10 + $0xe1] sm:$0xff] }
 0x245   : > { %v2719_v12 = vld [vmem:[%s8986_s10 + $0xe3] sm:$0xff] }
 0x246   : > { %v9539_v56 = vadd.f32 %v2863_v30, %v2652_v50  ;;  %v2330_v49 = vadd.f32 %v2220_v26, %v2007_v13  ;;  %8222 = vmatmul.msk.bf16.gmra.mxu0 %vm671_vm1, %v1783_v31  ;;  %v2395_v31 = vld [vmem:[%s8986_s10 + $0xda] sm:$0xff]  ;;  %v2396_v50 = vld [vmem:[%s8986_s10 + $0xe2] sm:$0xff] }
 0x247   : > { %8247 = vmatmul.msk.bf16.gmra.mxu1 %vm671_vm1, %v2106_v23  ;;  %v2718_v30 = vld [vmem:[%s8986_s10 + $0xdb] sm:$0xff] }
 0x248   : > { %8272 = vmatmul.msk.bf16.gmra.mxu2 %vm671_vm1, %v2429_v57  ;;  %v1784_v57 = vpack.c.bf16 %v1750_v53, %v1749_v24 }
 0x249   : > { %8297 = vmatmul.msk.bf16.gmra.mxu3 %vm671_vm1, %v2752_v38 }
 0x24b   : > { %v2543_v20 = vpop.f32.mrf.mxu2  ;;  %v1899_v3 = vpop.f32.mrf.mxu0 }
 0x24c   : > { %v2653_v42 = vadd.f32 %v2543_v20, %v2330_v49  ;;  %v2866_v55 = vpop.f32.mrf.mxu3  ;;  %v2008_v59 = vadd.f32 %v1899_v3, %v9154_v41  ;;  %v2222_v61 = vpop.f32.mrf.mxu1  ;;  %v2107_v49 = vpack.c.bf16 %v2073_v7, %v2072_v0  ;;  %v2430_v20 = vpack.c.bf16 %v2396_v50, %v2395_v31  ;;  %v1751_v50 = vld [vmem:[%s8986_s10 + $0xe8] sm:$0xff] }
 0x24e   : > { %v9546_v63 = vadd.f32 %v2866_v55, %v2653_v42  ;;  %v2331_v5 = vadd.f32 %v2222_v61, %v2008_v59  ;;  %v2753_v55 = vpack.c.bf16 %v2719_v12, %v2718_v30  ;;  %v1752_v30 = vld [vmem:[%s8986_s10 + $0xf0] sm:$0xff] }
 0x24f   : > { %v2074_v12 = vld [vmem:[%s8986_s10 + $0xe9] sm:$0xff] }
 0x253   : > { %v2545_v23 = vpop.f32.mrf.mxu2  ;;  %v1902_v38 = vpop.f32.mrf.mxu0 }
 0x254   : > { %v2654_v13 = vadd.f32 %v2545_v23, %v2331_v5  ;;  %v2868_v26 = vpop.f32.mrf.mxu3  ;;  %v2009_v41 = vadd.f32 %v1902_v38, %v9160_v48  ;;  %v2225_v42 = vpop.f32.mrf.mxu1  ;;  %v2075_v23 = vld [vmem:[%s8986_s10 + $0xf1] sm:$0xff] }
 0x255   : > { %v2721_v38 = vld [vmem:[%s8986_s10 + $0xf3] sm:$0xff] }
 0x256   : > { %v9557_v3 = vadd.f32 %v2868_v26, %v2654_v13  ;;  %v2332_v59 = vadd.f32 %v2225_v42, %v2009_v41  ;;  %8223 = vmatmul.msk.bf16.gmra.mxu0 %vm671_vm1, %v1784_v57  ;;  %v2397_v57 = vld [vmem:[%s8986_s10 + $0xea] sm:$0xff]  ;;  %v2398_v13 = vld [vmem:[%s8986_s10 + $0xf2] sm:$0xff] }
 0x257   : > { %8248 = vmatmul.msk.bf16.gmra.mxu1 %vm671_vm1, %v2107_v49  ;;  %v2720_v26 = vld [vmem:[%s8986_s10 + $0xeb] sm:$0xff] }
 0x258   : > { %8273 = vmatmul.msk.bf16.gmra.mxu2 %vm671_vm1, %v2430_v20  ;;  %v1785_v20 = vpack.c.bf16 %v1752_v30, %v1751_v50 }
 0x259   : > { %8298 = vmatmul.msk.bf16.gmra.mxu3 %vm671_vm1, %v2753_v55 }
 0x25b   : > { %v2548_v48 = vpop.f32.mrf.mxu2  ;;  %v1904_v24 = vpop.f32.mrf.mxu0 }
 0x25c   : > { %v2655_v61 = vadd.f32 %v2548_v48, %v2332_v59  ;;  %v2871_v5 = vpop.f32.mrf.mxu3  ;;  %v2010_v53 = vadd.f32 %v1904_v24, %v9170_v6  ;;  %v2227_v0 = vpop.f32.mrf.mxu1  ;;  %v2108_v59 = vpack.c.bf16 %v2075_v23, %v2074_v12  ;;  %v2431_v48 = vpack.c.bf16 %v2398_v13, %v2397_v57  ;;  %v1753_v13 = vld [vmem:[%s8986_s10 + $0xf8] sm:$0xff] }
 0x25e   : > { %v9564_v7 = vadd.f32 %v2871_v5, %v2655_v61  ;;  %v2333_v31 = vadd.f32 %v2227_v0, %v2010_v53  ;;  %v2754_v5 = vpack.c.bf16 %v2721_v38, %v2720_v26  ;;  %v1754_v26 = vld [vmem:[%s8986_s10 + $0x100] sm:$0xff] }
 0x25f   : > { %v2076_v38 = vld [vmem:[%s8986_s10 + $0xf9] sm:$0xff] }
 0x263   : > { %v2550_v49 = vpop.f32.mrf.mxu2  ;;  %v1907_v55 = vpop.f32.mrf.mxu0 }
 0x264   : > { %v2656_v41 = vadd.f32 %v2550_v49, %v2333_v31  ;;  %v2873_v42 = vpop.f32.mrf.mxu3  ;;  %v2011_v6 = vadd.f32 %v1907_v55, %v9176_v14  ;;  %v2230_v61 = vpop.f32.mrf.mxu1  ;;  %v2077_v49 = vld [vmem:[%s8986_s10 + $0x101] sm:$0xff] }
 0x265   : > { %v2723_v55 = vld [vmem:[%s8986_s10 + $0x103] sm:$0xff] }
 0x266   : > { %v9575_v24 = vadd.f32 %v2873_v42, %v2656_v41  ;;  %v2334_v53 = vadd.f32 %v2230_v61, %v2011_v6  ;;  %8224 = vmatmul.msk.bf16.gmra.mxu0 %vm671_vm1, %v1785_v20  ;;  %v2399_v20 = vld [vmem:[%s8986_s10 + $0xfa] sm:$0xff]  ;;  %v2400_v41 = vld [vmem:[%s8986_s10 + $0x102] sm:$0xff] }
 0x267   : > { %8249 = vmatmul.msk.bf16.gmra.mxu1 %vm671_vm1, %v2108_v59  ;;  %v2722_v42 = vld [vmem:[%s8986_s10 + $0xfb] sm:$0xff] }
 0x268   : > { %8274 = vmatmul.msk.bf16.gmra.mxu2 %vm671_vm1, %v2431_v48  ;;  %v1786_v48 = vpack.c.bf16 %v1754_v26, %v1753_v13 }
 0x269   : > { %8299 = vmatmul.msk.bf16.gmra.mxu3 %vm671_vm1, %v2754_v5 }
 0x26b   : > { %v2553_v14 = vpop.f32.mrf.mxu2  ;;  %v1909_v50 = vpop.f32.mrf.mxu0 }
 0x26c   : > { %v2657_v0 = vadd.f32 %v2553_v14, %v2334_v53  ;;  %v2876_v31 = vpop.f32.mrf.mxu3  ;;  %v2012_v30 = vadd.f32 %v1909_v50, %v9186_v36  ;;  %v2232_v12 = vpop.f32.mrf.mxu1  ;;  %v2109_v53 = vpack.c.bf16 %v2077_v49, %v2076_v38  ;;  %v2432_v14 = vpack.c.bf16 %v2400_v41, %v2399_v20  ;;  %v1755_v41 = vld [vmem:[%s8986_s10 + $0x108] sm:$0xff] }
 0x26e   : > { %v9582_v23 = vadd.f32 %v2876_v31, %v2657_v0  ;;  %v2335_v57 = vadd.f32 %v2232_v12, %v2012_v30  ;;  %v2755_v31 = vpack.c.bf16 %v2723_v55, %v2722_v42  ;;  %v1756_v42 = vld [vmem:[%s8986_s10 + $0x110] sm:$0xff] }
 0x26f   : > { %v2078_v55 = vld [vmem:[%s8986_s10 + $0x109] sm:$0xff] }
 0x273   : > { %v2555_v59 = vpop.f32.mrf.mxu2  ;;  %v1912_v5 = vpop.f32.mrf.mxu0 }
 0x274   : > { %v2658_v6 = vadd.f32 %v2555_v59, %v2335_v57  ;;  %v2878_v61 = vpop.f32.mrf.mxu3  ;;  %v2013_v36 = vadd.f32 %v1912_v5, %v9192_v44  ;;  %v2235_v0 = vpop.f32.mrf.mxu1  ;;  %v2079_v59 = vld [vmem:[%s8986_s10 + $0x111] sm:$0xff] }
 0x275   : > { %v2725_v5 = vld [vmem:[%s8986_s10 + $0x113] sm:$0xff] }
 0x276   : > { %v9593_v50 = vadd.f32 %v2878_v61, %v2658_v6  ;;  %v2336_v30 = vadd.f32 %v2235_v0, %v2013_v36  ;;  %8225 = vmatmul.msk.bf16.gmra.mxu0 %vm671_vm1, %v1786_v48  ;;  %v2401_v48 = vld [vmem:[%s8986_s10 + $0x10a] sm:$0xff]  ;;  %v2402_v6 = vld [vmem:[%s8986_s10 + $0x112] sm:$0xff] }
 0x277   : > { %8250 = vmatmul.msk.bf16.gmra.mxu1 %vm671_vm1, %v2109_v53  ;;  %v2724_v61 = vld [vmem:[%s8986_s10 + $0x10b] sm:$0xff] }
 0x278   : > { %8275 = vmatmul.msk.bf16.gmra.mxu2 %vm671_vm1, %v2432_v14  ;;  %v1787_v14 = vpack.c.bf16 %v1756_v42, %v1755_v41 }
 0x279   : > { %8300 = vmatmul.msk.bf16.gmra.mxu3 %vm671_vm1, %v2755_v31 }
 0x27b   : > { %v2558_v44 = vpop.f32.mrf.mxu2  ;;  %v1914_v13 = vpop.f32.mrf.mxu0 }
 0x27c   : > { %v2659_v12 = vadd.f32 %v2558_v44, %v2336_v30  ;;  %v2881_v57 = vpop.f32.mrf.mxu3  ;;  %v2014_v26 = vadd.f32 %v1914_v13, %v9202_v2  ;;  %v2237_v38 = vpop.f32.mrf.mxu1  ;;  %v2110_v30 = vpack.c.bf16 %v2079_v59, %v2078_v55  ;;  %v2433_v44 = vpack.c.bf16 %v2402_v6, %v2401_v48  ;;  %v1757_v6 = vld [vmem:[%s8986_s10 + $0x118] sm:$0xff] }
 0x27e   : > { %v9600_v49 = vadd.f32 %v2881_v57, %v2659_v12  ;;  %v2337_v20 = vadd.f32 %v2237_v38, %v2014_v26  ;;  %v2756_v57 = vpack.c.bf16 %v2725_v5, %v2724_v61  ;;  %v1758_v61 = vld [vmem:[%s8986_s10 + $0x120] sm:$0xff] }
 0x27f   : > { %v2080_v5 = vld [vmem:[%s8986_s10 + $0x119] sm:$0xff] }
 0x283   : > { %v2560_v53 = vpop.f32.mrf.mxu2  ;;  %v1917_v31 = vpop.f32.mrf.mxu0 }
 0x284   : > { %v2660_v36 = vadd.f32 %v2560_v53, %v2337_v20  ;;  %v2883_v0 = vpop.f32.mrf.mxu3  ;;  %v2015_v2 = vadd.f32 %v1917_v31, %v9208_v11  ;;  %v2240_v12 = vpop.f32.mrf.mxu1  ;;  %v2081_v53 = vld [vmem:[%s8986_s10 + $0x121] sm:$0xff] }
 0x285   : > { %v2727_v31 = vld [vmem:[%s8986_s10 + $0x123] sm:$0xff] }
 0x286   : > { %v9611_v13 = vadd.f32 %v2883_v0, %v2660_v36  ;;  %v2338_v26 = vadd.f32 %v2240_v12, %v2015_v2  ;;  %8226 = vmatmul.msk.bf16.gmra.mxu0 %vm671_vm1, %v1787_v14  ;;  %v2403_v14 = vld [vmem:[%s8986_s10 + $0x11a] sm:$0xff]  ;;  %v2404_v36 = vld [vmem:[%s8986_s10 + $0x122] sm:$0xff] }
 0x287   : > { %8251 = vmatmul.msk.bf16.gmra.mxu1 %vm671_vm1, %v2110_v30  ;;  %v2726_v0 = vld [vmem:[%s8986_s10 + $0x11b] sm:$0xff] }
 0x288   : > { %8276 = vmatmul.msk.bf16.gmra.mxu2 %vm671_vm1, %v2433_v44  ;;  %v1788_v44 = vpack.c.bf16 %v1758_v61, %v1757_v6 }
 0x289   : > { %8301 = vmatmul.msk.bf16.gmra.mxu3 %vm671_vm1, %v2756_v57 }
 0x28b   : > { %v2563_v11 = vpop.f32.mrf.mxu2  ;;  %v1919_v41 = vpop.f32.mrf.mxu0 }
 0x28c   : > { %v2661_v38 = vadd.f32 %v2563_v11, %v2338_v26  ;;  %v2886_v20 = vpop.f32.mrf.mxu3  ;;  %v2016_v42 = vadd.f32 %v1919_v41, %v9218_v35  ;;  %v2242_v55 = vpop.f32.mrf.mxu1  ;;  %v2111_v26 = vpack.c.bf16 %v2081_v53, %v2080_v5  ;;  %v2434_v11 = vpack.c.bf16 %v2404_v36, %v2403_v14  ;;  %v1759_v36 = vld [vmem:[%s8986_s10 + $0x128] sm:$0xff] }
 0x28e   : > { %v9618_v59 = vadd.f32 %v2886_v20, %v2661_v38  ;;  %v2339_v48 = vadd.f32 %v2242_v55, %v2016_v42  ;;  %v2757_v20 = vpack.c.bf16 %v2727_v31, %v2726_v0  ;;  %v1760_v0 = vld [vmem:[%s8986_s10 + $0x130] sm:$0xff] }
 0x28f   : > { %v2082_v31 = vld [vmem:[%s8986_s10 + $0x129] sm:$0xff] }
 0x293   : > { %v2565_v30 = vpop.f32.mrf.mxu2  ;;  %v1922_v57 = vpop.f32.mrf.mxu0 }
 0x294   : > { %v2662_v2 = vadd.f32 %v2565_v30, %v2339_v48  ;;  %v2888_v12 = vpop.f32.mrf.mxu3  ;;  %v2017_v35 = vadd.f32 %v1922_v57, %v9224_v45  ;;  %v2245_v38 = vpop.f32.mrf.mxu1  ;;  %v2083_v30 = vld [vmem:[%s8986_s10 + $0x131] sm:$0xff] }
 0x295   : > { %v2729_v57 = vld [vmem:[%s8986_s10 + $0x133] sm:$0xff] }
 0x296   : > { %v9629_v41 = vadd.f32 %v2888_v12, %v2662_v2  ;;  %v2340_v42 = vadd.f32 %v2245_v38, %v2017_v35  ;;  %8227 = vmatmul.msk.bf16.gmra.mxu0 %vm671_vm1, %v1788_v44  ;;  %v2405_v44 = vld [vmem:[%s8986_s10 + $0x12a] sm:$0xff]  ;;  %v2406_v2 = vld [vmem:[%s8986_s10 + $0x132] sm:$0xff] }
 0x297   : > { %8252 = vmatmul.msk.bf16.gmra.mxu1 %vm671_vm1, %v2111_v26  ;;  %v2728_v12 = vld [vmem:[%s8986_s10 + $0x12b] sm:$0xff] }
 0x298   : > { %8277 = vmatmul.msk.bf16.gmra.mxu2 %vm671_vm1, %v2434_v11  ;;  %v1789_v11 = vpack.c.bf16 %v1760_v0, %v1759_v36 }
 0x299   : > { %8302 = vmatmul.msk.bf16.gmra.mxu3 %vm671_vm1, %v2757_v20 }
 0x29b   : > { %v2568_v45 = vpop.f32.mrf.mxu2  ;;  %v1924_v6 = vpop.f32.mrf.mxu0 }
 0x29c   : > { %v2663_v55 = vadd.f32 %v2568_v45, %v2340_v42  ;;  %v2891_v48 = vpop.f32.mrf.mxu3  ;;  %v2018_v61 = vadd.f32 %v1924_v6, %v9234_v4  ;;  %v2247_v5 = vpop.f32.mrf.mxu1  ;;  %v2112_v42 = vpack.c.bf16 %v2083_v30, %v2082_v31  ;;  %v2435_v45 = vpack.c.bf16 %v2406_v2, %v2405_v44  ;;  %v1761_v2 = vld [vmem:[%s8986_s10 + $0x138] sm:$0xff] }
 0x29e   : > { %v9636_v53 = vadd.f32 %v2891_v48, %v2663_v55  ;;  %v2341_v14 = vadd.f32 %v2247_v5, %v2018_v61  ;;  %v2758_v48 = vpack.c.bf16 %v2729_v57, %v2728_v12  ;;  %v1762_v12 = vld [vmem:[%s8986_s10 + $0x140] sm:$0xff] }
 0x29f   : > { %v2084_v57 = vld [vmem:[%s8986_s10 + $0x139] sm:$0xff] }
 0x2a3   : > { %v2570_v26 = vpop.f32.mrf.mxu2  ;;  %v1927_v20 = vpop.f32.mrf.mxu0 }
 0x2a4   : > { %v2664_v35 = vadd.f32 %v2570_v26, %v2341_v14  ;;  %v2893_v38 = vpop.f32.mrf.mxu3  ;;  %v2019_v4 = vadd.f32 %v1927_v20, %v9240_v16  ;;  %v2250_v55 = vpop.f32.mrf.mxu1  ;;  %v2085_v26 = vld [vmem:[%s8986_s10 + $0x141] sm:$0xff] }
 0x2a5   : > { %v2731_v20 = vld [vmem:[%s8986_s10 + $0x143] sm:$0xff] }
 0x2a6   : > { %v9647_v6 = vadd.f32 %v2893_v38, %v2664_v35  ;;  %v2342_v61 = vadd.f32 %v2250_v55, %v2019_v4  ;;  %8228 = vmatmul.msk.bf16.gmra.mxu0 %vm671_vm1, %v1789_v11  ;;  %v2407_v11 = vld [vmem:[%s8986_s10 + $0x13a] sm:$0xff]  ;;  %v2408_v35 = vld [vmem:[%s8986_s10 + $0x142] sm:$0xff] }
 0x2a7   : > { %8253 = vmatmul.msk.bf16.gmra.mxu1 %vm671_vm1, %v2112_v42  ;;  %v2730_v38 = vld [vmem:[%s8986_s10 + $0x13b] sm:$0xff] }
 0x2a8   : > { %8278 = vmatmul.msk.bf16.gmra.mxu2 %vm671_vm1, %v2435_v45  ;;  %v1790_v45 = vpack.c.bf16 %v1762_v12, %v1761_v2 }
 0x2a9   : > { %8303 = vmatmul.msk.bf16.gmra.mxu3 %vm671_vm1, %v2758_v48 }
 0x2ab   : > { %v2573_v16 = vpop.f32.mrf.mxu2  ;;  %v1929_v36 = vpop.f32.mrf.mxu0 }
 0x2ac   : > { %v2665_v5 = vadd.f32 %v2573_v16, %v2342_v61  ;;  %v2896_v14 = vpop.f32.mrf.mxu3  ;;  %v2020_v0 = vadd.f32 %v1929_v36, %v9250_v40  ;;  %v2252_v31 = vpop.f32.mrf.mxu1  ;;  %v2113_v61 = vpack.c.bf16 %v2085_v26, %v2084_v57  ;;  %v2436_v16 = vpack.c.bf16 %v2408_v35, %v2407_v11  ;;  %v1763_v35 = vld [vmem:[%s8986_s10 + $0x148] sm:$0xff] }
 0x2ae   : > { %v9654_v30 = vadd.f32 %v2896_v14, %v2665_v5  ;;  %v2343_v44 = vadd.f32 %v2252_v31, %v2020_v0  ;;  %v2759_v14 = vpack.c.bf16 %v2731_v20, %v2730_v38  ;;  %v1764_v38 = vld [vmem:[%s8986_s10 + $0x150] sm:$0xff] }
 0x2af   : > { %v2086_v20 = vld [vmem:[%s8986_s10 + $0x149] sm:$0xff] }
 0x2b3   : > { %v2575_v42 = vpop.f32.mrf.mxu2  ;;  %v1932_v48 = vpop.f32.mrf.mxu0 }
 0x2b4   : > { %v2666_v4 = vadd.f32 %v2575_v42, %v2343_v44  ;;  %v2898_v55 = vpop.f32.mrf.mxu3  ;;  %v2021_v40 = vadd.f32 %v1932_v48, %v9256_v52  ;;  %v2255_v5 = vpop.f32.mrf.mxu1  ;;  %v2087_v42 = vld [vmem:[%s8986_s10 + $0x151] sm:$0xff] }
 0x2b5   : > { %v2733_v48 = vld [vmem:[%s8986_s10 + $0x153] sm:$0xff] }
 0x2b6   : > { %v9665_v36 = vadd.f32 %v2898_v55, %v2666_v4  ;;  %v2344_v0 = vadd.f32 %v2255_v5, %v2021_v40  ;;  %8229 = vmatmul.msk.bf16.gmra.mxu0 %vm671_vm1, %v1790_v45  ;;  %v2409_v45 = vld [vmem:[%s8986_s10 + $0x14a] sm:$0xff]  ;;  %v2410_v4 = vld [vmem:[%s8986_s10 + $0x152] sm:$0xff] }
 0x2b7   : > { %8254 = vmatmul.msk.bf16.gmra.mxu1 %vm671_vm1, %v2113_v61  ;;  %v2732_v55 = vld [vmem:[%s8986_s10 + $0x14b] sm:$0xff] }
 0x2b8   : > { %8279 = vmatmul.msk.bf16.gmra.mxu2 %vm671_vm1, %v2436_v16  ;;  %v1791_v16 = vpack.c.bf16 %v1764_v38, %v1763_v35 }
 0x2b9   : > { %8304 = vmatmul.msk.bf16.gmra.mxu3 %vm671_vm1, %v2759_v14 }
 0x2bb   : > { %v2578_v52 = vpop.f32.mrf.mxu2  ;;  %v1934_v2 = vpop.f32.mrf.mxu0 }
 0x2bc   : > { %v2667_v31 = vadd.f32 %v2578_v52, %v2344_v0  ;;  %v2901_v44 = vpop.f32.mrf.mxu3  ;;  %v2022_v12 = vadd.f32 %v1934_v2, %v9266_v15  ;;  %v2257_v57 = vpop.f32.mrf.mxu1  ;;  %v2114_v0 = vpack.c.bf16 %v2087_v42, %v2086_v20  ;;  %v2437_v52 = vpack.c.bf16 %v2410_v4, %v2409_v45  ;;  %v1765_v4 = vld [vmem:[%s8986_s10 + $0x158] sm:$0xff] }
 0x2be   : > { %v9672_v26 = vadd.f32 %v2901_v44, %v2667_v31  ;;  %v2345_v11 = vadd.f32 %v2257_v57, %v2022_v12  ;;  %v2760_v44 = vpack.c.bf16 %v2733_v48, %v2732_v55  ;;  %v1766_v55 = vld [vmem:[%s8986_s10 + $0x160] sm:$0xff] }
 0x2bf   : > { %v2088_v48 = vld [vmem:[%s8986_s10 + $0x159] sm:$0xff] }
 0x2c3   : > { %v2580_v61 = vpop.f32.mrf.mxu2  ;;  %v1937_v14 = vpop.f32.mrf.mxu0 }
 0x2c4   : > { %v2668_v40 = vadd.f32 %v2580_v61, %v2345_v11  ;;  %v2903_v5 = vpop.f32.mrf.mxu3  ;;  %v2023_v15 = vadd.f32 %v1937_v14, %v9272_v25  ;;  %v2260_v31 = vpop.f32.mrf.mxu1  ;;  %v2089_v61 = vld [vmem:[%s8986_s10 + $0x161] sm:$0xff] }
 0x2c5   : > { %v2735_v14 = vld [vmem:[%s8986_s10 + $0x163] sm:$0xff] }
 0x2c6   : > { %v9683_v2 = vadd.f32 %v2903_v5, %v2668_v40  ;;  %v2346_v12 = vadd.f32 %v2260_v31, %v2023_v15  ;;  %8230 = vmatmul.msk.bf16.gmra.mxu0 %vm671_vm1, %v1791_v16  ;;  %v2411_v16 = vld [vmem:[%s8986_s10 + $0x15a] sm:$0xff]  ;;  %v2412_v40 = vld [vmem:[%s8986_s10 + $0x162] sm:$0xff] }
 0x2c7   : > { %8255 = vmatmul.msk.bf16.gmra.mxu1 %vm671_vm1, %v2114_v0  ;;  %v2734_v5 = vld [vmem:[%s8986_s10 + $0x15b] sm:$0xff] }
 0x2c8   : > { %8280 = vmatmul.msk.bf16.gmra.mxu2 %vm671_vm1, %v2437_v52  ;;  %v1792_v52 = vpack.c.bf16 %v1766_v55, %v1765_v4 }
 0x2c9   : > { %8305 = vmatmul.msk.bf16.gmra.mxu3 %vm671_vm1, %v2760_v44 }
 0x2cb   : > { %v2583_v25 = vpop.f32.mrf.mxu2  ;;  %v1939_v35 = vpop.f32.mrf.mxu0 }
 0x2cc   : > { %v2669_v57 = vadd.f32 %v2583_v25, %v2346_v12  ;;  %v2906_v11 = vpop.f32.mrf.mxu3  ;;  %v2024_v38 = vadd.f32 %v1939_v35, %v9282_v54  ;;  %v2262_v20 = vpop.f32.mrf.mxu1  ;;  %v2115_v12 = vpack.c.bf16 %v2089_v61, %v2088_v48  ;;  %v2438_v25 = vpack.c.bf16 %v2412_v40, %v2411_v16  ;;  %v1767_v40 = vld [vmem:[%s8986_s10 + $0x168] sm:$0xff] }
 0x2ce   : > { %v9690_v42 = vadd.f32 %v2906_v11, %v2669_v57  ;;  %v2347_v45 = vadd.f32 %v2262_v20, %v2024_v38  ;;  %v2761_v11 = vpack.c.bf16 %v2735_v14, %v2734_v5  ;;  %v1768_v5 = vld [vmem:[%s8986_s10 + $0x170] sm:$0xff] }
 0x2cf   : > { %v2090_v14 = vld [vmem:[%s8986_s10 + $0x169] sm:$0xff] }
 0x2d3   : > { %v2585_v0 = vpop.f32.mrf.mxu2  ;;  %v1942_v44 = vpop.f32.mrf.mxu0 }
 0x2d4   : > { %v2670_v15 = vadd.f32 %v2585_v0, %v2347_v45  ;;  %v2908_v31 = vpop.f32.mrf.mxu3  ;;  %v2025_v54 = vadd.f32 %v1942_v44, %v9288_v62  ;;  %v2265_v57 = vpop.f32.mrf.mxu1  ;;  %v2091_v0 = vld [vmem:[%s8986_s10 + $0x171] sm:$0xff] }
 0x2d5   : > { %v2737_v44 = vld [vmem:[%s8986_s10 + $0x173] sm:$0xff] }
 0x2d6   : > { %v9701_v35 = vadd.f32 %v2908_v31, %v2670_v15  ;;  %v2348_v38 = vadd.f32 %v2265_v57, %v2025_v54  ;;  %8231 = vmatmul.msk.bf16.gmra.mxu0 %vm671_vm1, %v1792_v52  ;;  %v2413_v52 = vld [vmem:[%s8986_s10 + $0x16a] sm:$0xff]  ;;  %v2414_v15 = vld [vmem:[%s8986_s10 + $0x172] sm:$0xff] }
 0x2d7   : > { %8256 = vmatmul.msk.bf16.gmra.mxu1 %vm671_vm1, %v2115_v12  ;;  %v2736_v31 = vld [vmem:[%s8986_s10 + $0x16b] sm:$0xff] }
 0x2d8   : > { %8281 = vmatmul.msk.bf16.gmra.mxu2 %vm671_vm1, %v2438_v25  ;;  %v1793_v25 = vpack.c.bf16 %v1768_v5, %v1767_v40 }
 0x2d9   : > { %8306 = vmatmul.msk.bf16.gmra.mxu3 %vm671_vm1, %v2761_v11 }
 0x2db   : > { %v2588_v62 = vpop.f32.mrf.mxu2  ;;  %v1944_v4 = vpop.f32.mrf.mxu0 }
 0x2dc   : > { %v2671_v20 = vadd.f32 %v2588_v62, %v2348_v38  ;;  %v2911_v45 = vpop.f32.mrf.mxu3  ;;  %v2026_v55 = vadd.f32 %v1944_v4, %v9298_v29  ;;  %v2267_v48 = vpop.f32.mrf.mxu1  ;;  %v2116_v38 = vpack.c.bf16 %v2091_v0, %v2090_v14  ;;  %v2439_v62 = vpack.c.bf16 %v2414_v15, %v2413_v52  ;;  %v1769_v15 = vld [vmem:[%s8986_s10 + $0x178] sm:$0xff] }
 0x2de   : > { %v9708_v61 = vadd.f32 %v2911_v45, %v2671_v20  ;;  %v2349_v16 = vadd.f32 %v2267_v48, %v2026_v55  ;;  %v2762_v45 = vpack.c.bf16 %v2737_v44, %v2736_v31  ;;  %v1770_v31 = vld [vmem:[%s8986_s10 + $0x180] sm:$0xff] }
 0x2df   : > { %v2092_v44 = vld [vmem:[%s8986_s10 + $0x179] sm:$0xff] }
 0x2e3   : > { %v2590_v12 = vpop.f32.mrf.mxu2  ;;  %v1947_v11 = vpop.f32.mrf.mxu0 }
 0x2e4   : > { %v2672_v54 = vadd.f32 %v2590_v12, %v2349_v16  ;;  %v2913_v57 = vpop.f32.mrf.mxu3  ;;  %v2027_v29 = vadd.f32 %v1947_v11, %v9304_v39  ;;  %v2270_v20 = vpop.f32.mrf.mxu1  ;;  %v2093_v12 = vld [vmem:[%s8986_s10 + $0x181] sm:$0xff] }
 0x2e5   : > { %v2739_v11 = vld [vmem:[%s8986_s10 + $0x183] sm:$0xff] }
 0x2e6   : > { %v9719_v4 = vadd.f32 %v2913_v57, %v2672_v54  ;;  %v2350_v55 = vadd.f32 %v2270_v20, %v2027_v29  ;;  %8232 = vmatmul.msk.bf16.gmra.mxu0 %vm671_vm1, %v1793_v25  ;;  %v2415_v25 = vld [vmem:[%s8986_s10 + $0x17a] sm:$0xff]  ;;  %v2416_v54 = vld [vmem:[%s8986_s10 + $0x182] sm:$0xff] }
 0x2e7   : > { %8257 = vmatmul.msk.bf16.gmra.mxu1 %vm671_vm1, %v2116_v38  ;;  %v2738_v57 = vld [vmem:[%s8986_s10 + $0x17b] sm:$0xff] }
 0x2e8   : > { %8282 = vmatmul.msk.bf16.gmra.mxu2 %vm671_vm1, %v2439_v62  ;;  %v1794_v62 = vpack.c.bf16 %v1770_v31, %v1769_v15 }
 0x2e9   : > { %8307 = vmatmul.msk.bf16.gmra.mxu3 %vm671_vm1, %v2762_v45 }
 0x2eb   : > { %v2593_v39 = vpop.f32.mrf.mxu2  ;;  %v1949_v40 = vpop.f32.mrf.mxu0 }
 0x2ec   : > { %v2673_v48 = vadd.f32 %v2593_v39, %v2350_v55  ;;  %v2916_v16 = vpop.f32.mrf.mxu3  ;;  %v2028_v5 = vadd.f32 %v1949_v40, %v9314_v8  ;;  %v2272_v14 = vpop.f32.mrf.mxu1  ;;  %v2117_v55 = vpack.c.bf16 %v2093_v12, %v2092_v44  ;;  %v2440_v39 = vpack.c.bf16 %v2416_v54, %v2415_v25 }
 0x2ee   : > { %v9726_v0 = vadd.f32 %v2916_v16, %v2673_v48  ;;  %v2351_v52 = vadd.f32 %v2272_v14, %v2028_v5  ;;  %v2763_v16 = vpack.c.bf16 %v2739_v11, %v2738_v57  ;;  %v8807_v14 = vld [vmem:[%s11499_s3 + $0x28] sm:$0xff]  ;;  %v8805_v57 = vld [vmem:[%s11499_s3 + $0x18] sm:$0xff] }
 0x2ef   : > { %5229 = vmatpush.bf16.msrb.mxu2 %v8807_v14  ;;  %v8803_v11 = vld [vmem:[%s11499_s3 + $0x8] sm:$0xff]  ;;  %4707 = vmatpush.bf16.msrb.mxu0 %v8805_v57 }
 0x2f0   : > { %4928 = vmatpush.bf16.msrb.mxu1 %v8803_v11 }
 0x2f3   : > { %v2595_v38 = vpop.f32.mrf.mxu2  ;;  %v1952_v45 = vpop.f32.mrf.mxu0 }
 0x2f4   : > { %v2674_v29 = vadd.f32 %v2595_v38, %v2351_v52  ;;  %v2918_v20 = vpop.f32.mrf.mxu3  ;;  %v2029_v8 = vadd.f32 %v1952_v45, %v9328_v27  ;;  %v2275_v48 = vpop.f32.mrf.mxu1  ;;  %v8809_v27 = vld [vmem:[%s11499_s3 + $0x38] sm:$0xff]  ;;  %v2740_v45 = vld [vmem:[%s8986_s10 + $0x18b] sm:$0x7f] }
 0x2f5   : > { %5580 = vmatpush.bf16.msrb.mxu3 %v8809_v27 }
 0x2f6   : > { %v9737_v40 = vadd.f32 %v2918_v20, %v2674_v29  ;;  %v2352_v5 = vadd.f32 %v2275_v48, %v2029_v8  ;;  %8233 = vmatmul.msk.bf16.gmra.mxu0 %vm671_vm1, %v1794_v62  ;;  %v1771_v62 = vld [vmem:[%s8986_s10 + $0x188] sm:$0x7f] }
 0x2f7   : > { %8258 = vmatmul.msk.bf16.gmra.mxu1 %vm671_vm1, %v2117_v55  ;;  %v2094_v29 = vld [vmem:[%s8986_s10 + $0x189] sm:$0x7f] }
 0x2f8   : > { %8283 = vmatmul.msk.bf16.gmra.mxu2 %vm671_vm1, %v2440_v39  ;;  %v2417_v20 = vld [vmem:[%s8986_s10 + $0x18a] sm:$0x7f] }
 0x2f9   : > { %8308 = vmatmul.msk.bf16.gmra.mxu3 %vm671_vm1, %v2763_v16  ;;  %v2118_v16 = vpack.c.bf16 %v2094_v29, %v2094_v29  ;;  %v3017_v29 = vld [vmem:[%s8986_s10 + $0x30] sm:$0xff] }
 0x2fb   : > { %v2598_v52 = vpop.f32.mrf.mxu2  ;;  %v1954_v44 = vpop.f32.mrf.mxu0 }
 0x2fc   : > { %v2675_v15 = vadd.f32 %v2598_v52, %v2352_v5  ;;  %v2921_v31 = vpop.f32.mrf.mxu3  ;;  %v2030_v12 = vadd.f32 %v1954_v44, %v9342_v60  ;;  %v2277_v25 = vpop.f32.mrf.mxu1  ;;  %v1795_v60 = vpack.c.bf16 %v1771_v62, %v1771_v62  ;;  %v2441_v5 = vpack.c.bf16 %v2417_v20, %v2417_v20  ;;  %v3018_v20 = vld [vmem:[%s8986_s10 + $0x38] sm:$0xff] }
 0x2fd   : > { %v2764_v52 = vpack.c.bf16 %v2740_v45, %v2740_v45  ;;  %v3340_v45 = vld [vmem:[%s8986_s10 + $0x31] sm:$0xff] }
 0x2fe   : > { %v9750_v54 = vadd.f32 %v2921_v31, %v2675_v15  ;;  %v2353_v38 = vadd.f32 %v2277_v25, %v2030_v12 }
 0x303   : > { %v2600_v55 = vpop.f32.mrf.mxu2  ;;  %v1957_v48 = vpop.f32.mrf.mxu0 }
 0x304   : > { %v2676_v39 = vadd.f32 %v2600_v55, %v2353_v38  ;;  %v2923_v8 = vpop.f32.mrf.mxu3  ;;  %v2031_v14 = vadd.f32 %v1957_v48, %v9348_v9  ;;  %v2280_v27 = vpop.f32.mrf.mxu1  ;;  %v3341_v55 = vld [vmem:[%s8986_s10 + $0x39] sm:$0xff] }
 0x305   : > { %v3987_v48 = vld [vmem:[%s8986_s10 + $0x3b] sm:$0xff] }
 0x306   : > { %v9763_v15 = vadd.f32 %v2923_v8, %v2676_v39  ;;  %v2354_v31 = vadd.f32 %v2280_v27, %v2031_v14  ;;  %8234 = vmatmul.msk.bf16.gmra.mxu0 %vm671_vm1, %v1795_v60  ;;  %v3663_v60 = vld [vmem:[%s8986_s10 + $0x32] sm:$0xff]  ;;  %v3664_v39 = vld [vmem:[%s8986_s10 + $0x3a] sm:$0xff] }
 0x307   : > { %8259 = vmatmul.msk.bf16.gmra.mxu1 %vm671_vm1, %v2118_v16  ;;  %v3986_v8 = vld [vmem:[%s8986_s10 + $0x33] sm:$0xff] }
 0x308   : > { %8284 = vmatmul.msk.bf16.gmra.mxu2 %vm671_vm1, %v2441_v5  ;;  %v3064_v5 = vpack.c.bf16 %v3018_v20, %v3017_v29 }
 0x309   : > { %8309 = vmatmul.msk.bf16.gmra.mxu3 %vm671_vm1, %v2764_v52 }
 0x30b   : > { %v2603_v9 = vpop.f32.mrf.mxu2  ;;  %v1959_v25 = vpop.f32.mrf.mxu0 }
 0x30c   : > { %v2677_v44 = vadd.f32 %v2603_v9, %v2354_v31  ;;  %v2926_v12 = vpop.f32.mrf.mxu3  ;;  %v2032_v57 = vadd.f32 %v1959_v25, %v9358_v46  ;;  %v2282_v11 = vpop.f32.mrf.mxu1  ;;  %v3387_v31 = vpack.c.bf16 %v3341_v55, %v3340_v45  ;;  %v3710_v9 = vpack.c.bf16 %v3664_v39, %v3663_v60  ;;  %v3019_v39 = vld [vmem:[%s8986_s10 + $0x40] sm:$0xff] }
 0x30e   : > { %v9770_v38 = vadd.f32 %v2926_v12, %v2677_v44  ;;  %v2355_v62 = vadd.f32 %v2282_v11, %v2032_v57  ;;  %v4033_v12 = vpack.c.bf16 %v3987_v48, %v3986_v8  ;;  %v3020_v8 = vld [vmem:[%s8986_s10 + $0x48] sm:$0xff] }
 0x30f   : > { %v3342_v48 = vld [vmem:[%s8986_s10 + $0x41] sm:$0xff] }
 0x313   : > { %v2605_v16 = vpop.f32.mrf.mxu2  ;;  %v1962_v52 = vpop.f32.mrf.mxu0 }
 0x314   : > { %v2678_v14 = vadd.f32 %v2605_v16, %v2355_v62  ;;  %v2928_v27 = vpop.f32.mrf.mxu3  ;;  %v2033_v46 = vadd.f32 %v1962_v52, %v9364_v58  ;;  %v2285_v44 = vpop.f32.mrf.mxu1  ;;  %v3343_v16 = vld [vmem:[%s8986_s10 + $0x49] sm:$0xff] }
 0x315   : > { %v3989_v52 = vld [vmem:[%s8986_s10 + $0x4b] sm:$0xff] }
 0x316   : > { %v9781_v25 = vadd.f32 %v2928_v27, %v2678_v14  ;;  %v2356_v57 = vadd.f32 %v2285_v44, %v2033_v46  ;;  %8311 = vmatmul.msk.bf16.vlgmr.msra.gmra.mxu0 %vm671_vm1, %v3064_v5  ;;  %v3665_v5 = vld [vmem:[%s8986_s10 + $0x42] sm:$0xff]  ;;  %v3666_v14 = vld [vmem:[%s8986_s10 + $0x4a] sm:$0xff] }
 0x317   : > { %8336 = vmatmul.msk.bf16.vlgmr.msra.gmra.mxu1 %vm671_vm1, %v3387_v31  ;;  %v3988_v27 = vld [vmem:[%s8986_s10 + $0x43] sm:$0xff] }
 0x318   : > { %8361 = vmatmul.msk.bf16.vlgmr.msra.gmra.mxu2 %vm671_vm1, %v3710_v9  ;;  %v3065_v9 = vpack.c.bf16 %v3020_v8, %v3019_v39 }
 0x319   : > { %8386 = vmatmul.msk.bf16.vlgmr.msra.gmra.mxu3 %vm671_vm1, %v4033_v12 }
 0x31b   : > { %v2608_v58 = vpop.f32.mrf.mxu2  ;;  %v1964_v29 = vpop.f32.mrf.mxu0 }
 0x31c   : > { %v2679_v11 = vadd.f32 %v2608_v58, %v2356_v57  ;;  %v2931_v62 = vpop.f32.mrf.mxu3  ;;  %v2034_v20 = vadd.f32 %v1964_v29, %v9374_v32  ;;  %v2287_v45 = vpop.f32.mrf.mxu1  ;;  %v3388_v57 = vpack.c.bf16 %v3343_v16, %v3342_v48  ;;  %v3711_v58 = vpack.c.bf16 %v3666_v14, %v3665_v5  ;;  %v3021_v14 = vld [vmem:[%s8986_s10 + $0x50] sm:$0xff] }
 0x31e   : > { %v9788_v55 = vadd.f32 %v2931_v62, %v2679_v11  ;;  %v2357_v60 = vadd.f32 %v2287_v45, %v2034_v20  ;;  %v4034_v62 = vpack.c.bf16 %v3989_v52, %v3988_v27  ;;  %v3022_v27 = vld [vmem:[%s8986_s10 + $0x58] sm:$0xff] }
 0x31f   : > { %v3344_v52 = vld [vmem:[%s8986_s10 + $0x51] sm:$0xff] }
 0x323   : > { %v2610_v31 = vpop.f32.mrf.mxu2  ;;  %v1967_v12 = vpop.f32.mrf.mxu0 }
 0x324   : > { %v2680_v46 = vadd.f32 %v2610_v31, %v2357_v60  ;;  %v2933_v44 = vpop.f32.mrf.mxu3  ;;  %v2035_v32 = vadd.f32 %v1967_v12, %v9380_v47  ;;  %v2290_v11 = vpop.f32.mrf.mxu1  ;;  %v3345_v31 = vld [vmem:[%s8986_s10 + $0x59] sm:$0xff] }
 0x325   : > { %v3991_v12 = vld [vmem:[%s8986_s10 + $0x5b] sm:$0xff] }
 0x326   : > { %v9799_v29 = vadd.f32 %v2933_v44, %v2680_v46  ;;  %v2358_v20 = vadd.f32 %v2290_v11, %v2035_v32  ;;  %8312 = vmatmul.msk.bf16.gmra.mxu0 %vm671_vm1, %v3065_v9  ;;  %v3667_v9 = vld [vmem:[%s8986_s10 + $0x52] sm:$0xff]  ;;  %v3668_v46 = vld [vmem:[%s8986_s10 + $0x5a] sm:$0xff] }
 0x327   : > { %8337 = vmatmul.msk.bf16.gmra.mxu1 %vm671_vm1, %v3388_v57  ;;  %v3990_v44 = vld [vmem:[%s8986_s10 + $0x53] sm:$0xff] }
 0x328   : > { %8362 = vmatmul.msk.bf16.gmra.mxu2 %vm671_vm1, %v3711_v58  ;;  %v3066_v58 = vpack.c.bf16 %v3022_v27, %v3021_v14 }
 0x329   : > { %8387 = vmatmul.msk.bf16.gmra.mxu3 %vm671_vm1, %v4034_v62 }
 0x32b   : > { %v2613_v47 = vpop.f32.mrf.mxu2  ;;  %v1969_v39 = vpop.f32.mrf.mxu0 }
 0x32c   : > { %v2681_v45 = vadd.f32 %v2613_v47, %v2358_v20  ;;  %v2936_v60 = vpop.f32.mrf.mxu3  ;;  %v2036_v8 = vadd.f32 %v1969_v39, %v9390_v22  ;;  %v2292_v48 = vpop.f32.mrf.mxu1  ;;  %v3389_v20 = vpack.c.bf16 %v3345_v31, %v3344_v52  ;;  %v3712_v47 = vpack.c.bf16 %v3668_v46, %v3667_v9  ;;  %v3023_v46 = vld [vmem:[%s8986_s10 + $0x60] sm:$0xff] }
 0x32e   : > { %v9806_v16 = vadd.f32 %v2936_v60, %v2681_v45  ;;  %v2359_v5 = vadd.f32 %v2292_v48, %v2036_v8  ;;  %v4035_v60 = vpack.c.bf16 %v3991_v12, %v3990_v44  ;;  %v3024_v44 = vld [vmem:[%s8986_s10 + $0x68] sm:$0xff] }
 0x32f   : > { %v3346_v12 = vld [vmem:[%s8986_s10 + $0x61] sm:$0xff] }
 0x333   : > { %v2615_v57 = vpop.f32.mrf.mxu2  ;;  %v1972_v62 = vpop.f32.mrf.mxu0 }
 0x334   : > { %v2682_v32 = vadd.f32 %v2615_v57, %v2359_v5  ;;  %v2938_v11 = vpop.f32.mrf.mxu3  ;;  %v2037_v22 = vadd.f32 %v1972_v62, %v9396_v37  ;;  %v2295_v45 = vpop.f32.mrf.mxu1  ;;  %v3347_v57 = vld [vmem:[%s8986_s10 + $0x69] sm:$0xff] }
 0x335   : > { %v3993_v62 = vld [vmem:[%s8986_s10 + $0x6b] sm:$0xff] }
 0x336   : > { %v9817_v39 = vadd.f32 %v2938_v11, %v2682_v32  ;;  %v2360_v8 = vadd.f32 %v2295_v45, %v2037_v22  ;;  %8313 = vmatmul.msk.bf16.gmra.mxu0 %vm671_vm1, %v3066_v58  ;;  %v3669_v58 = vld [vmem:[%s8986_s10 + $0x62] sm:$0xff]  ;;  %v3670_v32 = vld [vmem:[%s8986_s10 + $0x6a] sm:$0xff] }
 0x337   : > { %8338 = vmatmul.msk.bf16.gmra.mxu1 %vm671_vm1, %v3389_v20  ;;  %v3992_v11 = vld [vmem:[%s8986_s10 + $0x63] sm:$0xff] }
 0x338   : > { %8363 = vmatmul.msk.bf16.gmra.mxu2 %vm671_vm1, %v3712_v47  ;;  %v3067_v47 = vpack.c.bf16 %v3024_v44, %v3023_v46 }
 0x339   : > { %8388 = vmatmul.msk.bf16.gmra.mxu3 %vm671_vm1, %v4035_v60 }
 0x33b   : > { %v2618_v37 = vpop.f32.mrf.mxu2  ;;  %v1974_v14 = vpop.f32.mrf.mxu0 }
 0x33c   : > { %v2683_v48 = vadd.f32 %v2618_v37, %v2360_v8  ;;  %v2941_v5 = vpop.f32.mrf.mxu3  ;;  %v2038_v27 = vadd.f32 %v1974_v14, %v9406_v18  ;;  %v2297_v52 = vpop.f32.mrf.mxu1  ;;  %v3390_v8 = vpack.c.bf16 %v3347_v57, %v3346_v12  ;;  %v3713_v37 = vpack.c.bf16 %v3670_v32, %v3669_v58  ;;  %v3025_v32 = vld [vmem:[%s8986_s10 + $0x70] sm:$0xff] }
 0x33e   : > { %v9824_v31 = vadd.f32 %v2941_v5, %v2683_v48  ;;  %v2361_v9 = vadd.f32 %v2297_v52, %v2038_v27  ;;  %v4036_v5 = vpack.c.bf16 %v3993_v62, %v3992_v11  ;;  %v3026_v11 = vld [vmem:[%s8986_s10 + $0x78] sm:$0xff] }
 0x33f   : > { %v3348_v62 = vld [vmem:[%s8986_s10 + $0x71] sm:$0xff] }
 0x343   : > { %v2620_v20 = vpop.f32.mrf.mxu2  ;;  %v1977_v60 = vpop.f32.mrf.mxu0 }
 0x344   : > { %v2684_v22 = vadd.f32 %v2620_v20, %v2361_v9  ;;  %v2943_v45 = vpop.f32.mrf.mxu3  ;;  %v2039_v18 = vadd.f32 %v1977_v60, %v9412_v33  ;;  %v2300_v48 = vpop.f32.mrf.mxu1  ;;  %v3349_v20 = vld [vmem:[%s8986_s10 + $0x79] sm:$0xff] }
 0x345   : > { %v3995_v60 = vld [vmem:[%s8986_s10 + $0x7b] sm:$0xff] }
 0x346   : > { %v9835_v14 = vadd.f32 %v2943_v45, %v2684_v22  ;;  %v2362_v27 = vadd.f32 %v2300_v48, %v2039_v18  ;;  %8314 = vmatmul.msk.bf16.gmra.mxu0 %vm671_vm1, %v3067_v47  ;;  %v3671_v47 = vld [vmem:[%s8986_s10 + $0x72] sm:$0xff]  ;;  %v3672_v22 = vld [vmem:[%s8986_s10 + $0x7a] sm:$0xff] }
 0x347   : > { %8339 = vmatmul.msk.bf16.gmra.mxu1 %vm671_vm1, %v3390_v8  ;;  %v3994_v45 = vld [vmem:[%s8986_s10 + $0x73] sm:$0xff] }
 0x348   : > { %8364 = vmatmul.msk.bf16.gmra.mxu2 %vm671_vm1, %v3713_v37  ;;  %v3068_v37 = vpack.c.bf16 %v3026_v11, %v3025_v32 }
 0x349   : > { %8389 = vmatmul.msk.bf16.gmra.mxu3 %vm671_vm1, %v4036_v5 }
 0x34b   : > { %v2623_v33 = vpop.f32.mrf.mxu2  ;;  %v1979_v46 = vpop.f32.mrf.mxu0 }
 0x34c   : > { %v2685_v52 = vadd.f32 %v2623_v33, %v2362_v27  ;;  %v2946_v9 = vpop.f32.mrf.mxu3  ;;  %v2040_v44 = vadd.f32 %v1979_v46, %v9422_v17  ;;  %v2302_v12 = vpop.f32.mrf.mxu1  ;;  %v3391_v27 = vpack.c.bf16 %v3349_v20, %v3348_v62  ;;  %v3714_v33 = vpack.c.bf16 %v3672_v22, %v3671_v47  ;;  %v3027_v22 = vld [vmem:[%s8986_s10 + $0x80] sm:$0xff] }
 0x34e   : > { %v9842_v57 = vadd.f32 %v2946_v9, %v2685_v52  ;;  %v2363_v58 = vadd.f32 %v2302_v12, %v2040_v44  ;;  %v4037_v9 = vpack.c.bf16 %v3995_v60, %v3994_v45  ;;  %v3028_v45 = vld [vmem:[%s8986_s10 + $0x88] sm:$0xff] }
 0x34f   : > { %v3350_v60 = vld [vmem:[%s8986_s10 + $0x81] sm:$0xff] }
 0x353   : > { %v2625_v8 = vpop.f32.mrf.mxu2  ;;  %v1982_v5 = vpop.f32.mrf.mxu0 }
 0x354   : > { %v2686_v18 = vadd.f32 %v2625_v8, %v2363_v58  ;;  %v2948_v48 = vpop.f32.mrf.mxu3  ;;  %v2041_v17 = vadd.f32 %v1982_v5, %v9428_v34  ;;  %v2305_v52 = vpop.f32.mrf.mxu1  ;;  %v3351_v8 = vld [vmem:[%s8986_s10 + $0x89] sm:$0xff] }
 0x355   : > { %v3997_v5 = vld [vmem:[%s8986_s10 + $0x8b] sm:$0xff] }
 0x356   : > { %v9853_v46 = vadd.f32 %v2948_v48, %v2686_v18  ;;  %v2364_v44 = vadd.f32 %v2305_v52, %v2041_v17  ;;  %8315 = vmatmul.msk.bf16.gmra.mxu0 %vm671_vm1, %v3068_v37  ;;  %v3673_v37 = vld [vmem:[%s8986_s10 + $0x82] sm:$0xff]  ;;  %v3674_v18 = vld [vmem:[%s8986_s10 + $0x8a] sm:$0xff] }
 0x357   : > { %8340 = vmatmul.msk.bf16.gmra.mxu1 %vm671_vm1, %v3391_v27  ;;  %v3996_v48 = vld [vmem:[%s8986_s10 + $0x83] sm:$0xff] }
 0x358   : > { %8365 = vmatmul.msk.bf16.gmra.mxu2 %vm671_vm1, %v3714_v33  ;;  %v3069_v33 = vpack.c.bf16 %v3028_v45, %v3027_v22  ;;  %v11516_v45 = vld [vmem:[#allocation5_spill] sm:$0xff] }
 0x359   : > { %8390 = vmatmul.msk.bf16.gmra.mxu3 %vm671_vm1, %v4037_v9 }
 0x35b   : > { %v2628_v34 = vpop.f32.mrf.mxu2  ;;  %v1984_v32 = vpop.f32.mrf.mxu0 }
 0x35c   : > { %v2687_v12 = vadd.f32 %v2628_v34, %v2364_v44  ;;  %v2951_v58 = vpop.f32.mrf.mxu3  ;;  %v2042_v11 = vadd.f32 %v1984_v32, %v9438_v21  ;;  %v2307_v62 = vpop.f32.mrf.mxu1  ;;  %v3392_v44 = vpack.c.bf16 %v3351_v8, %v3350_v60  ;;  %v3715_v34 = vpack.c.bf16 %v3674_v18, %v3673_v37 }
 0x35e   : > { %v9860_v20 = vadd.f32 %v2951_v58, %v2687_v12  ;;  %v2365_v47 = vadd.f32 %v2307_v62, %v2042_v11  ;;  %v4038_v58 = vpack.c.bf16 %v3997_v5, %v3996_v48  ;;  %v3029_v48 = vld [vmem:[%s8986_s10 + $0x90] sm:$0xff]  ;;  %v3030_v5 = vld [vmem:[%s8986_s10 + $0x98] sm:$0xff] }
 0x363   : > { %v2630_v27 = vpop.f32.mrf.mxu2  ;;  %v1987_v9 = vpop.f32.mrf.mxu0 }
 0x364   : > { %v2688_v17 = vadd.f32 %v2630_v27, %v2365_v47  ;;  %v2953_v52 = vpop.f32.mrf.mxu3  ;;  %v2043_v21 = vadd.f32 %v1987_v9, %v9444_v43  ;;  %v2310_v12 = vpop.f32.mrf.mxu1  ;;  %v3352_v27 = vld [vmem:[%s8986_s10 + $0x91] sm:$0xff] }
 0x365   : > { %v3998_v9 = vld [vmem:[%s8986_s10 + $0x93] sm:$0xff] }
 0x366   : > { %v9871_v32 = vadd.f32 %v2953_v52, %v2688_v17  ;;  %v2366_v11 = vadd.f32 %v2310_v12, %v2043_v21  ;;  %8316 = vmatmul.msk.bf16.gmra.mxu0 %vm671_vm1, %v3069_v33  ;;  %v3353_v33 = vld [vmem:[%s8986_s10 + $0x99] sm:$0xff]  ;;  %v3070_v21 = vpack.c.bf16 %v3030_v5, %v3029_v48 }
 0x367   : > { %8341 = vmatmul.msk.bf16.gmra.mxu1 %vm671_vm1, %v3392_v44  ;;  %v3675_v17 = vld [vmem:[%s8986_s10 + $0x92] sm:$0xff]  ;;  %v3676_v52 = vld [vmem:[%s8986_s10 + $0x9a] sm:$0xff] }
 0x368   : > { %11515 = vst [vmem:[#allocation9_spill] sm:$0xff] %v9871_v32  ;;  %8366 = vmatmul.msk.bf16.gmra.mxu2 %vm671_vm1, %v3715_v34  ;;  %v3999_v44 = vld [vmem:[%s8986_s10 + $0x9b] sm:$0xff]  ;;  %v3716_v32 = vpack.c.bf16 %v3676_v52, %v3675_v17 }
 0x369   : > { %8391 = vmatmul.msk.bf16.gmra.mxu3 %vm671_vm1, %v4038_v58 }
 0x36b   : > { %v2633_v43 = vpop.f32.mrf.mxu2  ;;  %v1989_v22 = vpop.f32.mrf.mxu0 }
 0x36c   : > { %v2689_v62 = vadd.f32 %v2633_v43, %v2366_v11  ;;  %v2956_v47 = vpop.f32.mrf.mxu3  ;;  %v2044_v60 = vadd.f32 %v1989_v22, %v11516_v45  ;;  %v2312_v8 = vpop.f32.mrf.mxu1  ;;  %v3393_v43 = vpack.c.bf16 %v3353_v33, %v3352_v27  ;;  %v11517_v22 = vld [vmem:[#allocation6_spill] sm:$0xff]  ;;  %v11519_v33 = vld [vmem:[#allocation7_spill] sm:$0xff] }
 0x36e   : > { %v9878_v37 = vadd.f32 %v2956_v47, %v2689_v62  ;;  %v2367_v18 = vadd.f32 %v2312_v8, %v2044_v60  ;;  %v4039_v47 = vpack.c.bf16 %v3999_v44, %v3998_v9  ;;  %v11509_v9 = vmov 0.0  }
 0x36f   : > { %417 = vst.msk [vmem:[#allocation2 + $0x18] sm:$0xff] %vm413_vm2, %v11509_v9 }
 0x370   : > { %414 = vst.msk [vmem:[#allocation2] sm:$0xff] %vm413_vm2, %v11509_v9 }
 0x371   : > { %415 = vst.msk [vmem:[#allocation2 + $0x8] sm:$0xff] %vm413_vm2, %v11509_v9 }
 0x372   : > { %416 = vst.msk [vmem:[#allocation2 + $0x10] sm:$0xff] %vm413_vm2, %v11509_v9 }
 0x373   : > { %v2635_v34 = vpop.f32.mrf.mxu2  ;;  %v1992_v11 = vpop.f32.mrf.mxu0  ;;  %418 = vst.msk [vmem:[#allocation2 + $0x20] sm:$0xff] %vm413_vm2, %v11509_v9 }
 0x374   : > { %v2690_v12 = vadd.f32 %v2635_v34, %v2367_v18  ;;  %v2958_v58 = vpop.f32.mrf.mxu3  ;;  %v2045_v45 = vadd.f32 %v1992_v11, %v11517_v22  ;;  %v2315_v62 = vpop.f32.mrf.mxu1  ;;  %v3031_v34 = vld [vmem:[%s8986_s10 + $0xa0] sm:$0xff]  ;;  %419 = vst.msk [vmem:[#allocation2 + $0x28] sm:$0xff] %vm413_vm2, %v11509_v9 }
 0x375   : > { %v3677_v11 = vld [vmem:[%s8986_s10 + $0xa2] sm:$0xff]  ;;  %420 = vst.msk [vmem:[#allocation2 + $0x30] sm:$0xff] %vm413_vm2, %v11509_v9 }
 0x376   : > { %v9889_v60 = vadd.f32 %v2958_v58, %v2690_v12  ;;  %v2368_v8 = vadd.f32 %v2315_v62, %v2045_v45  ;;  %8317 = vmatmul.msk.bf16.gmra.mxu0 %vm671_vm1, %v3070_v21  ;;  %v3032_v21 = vld [vmem:[%s8986_s10 + $0xa8] sm:$0xff]  ;;  %421 = vst.msk [vmem:[#allocation2 + $0x38] sm:$0xff] %vm413_vm2, %v11509_v9 }
 0x377   : > { %8342 = vmatmul.msk.bf16.gmra.mxu1 %vm671_vm1, %v3393_v43  ;;  %v3354_v12 = vld [vmem:[%s8986_s10 + $0xa1] sm:$0xff]  ;;  %v3355_v58 = vld [vmem:[%s8986_s10 + $0xa9] sm:$0xff]  ;;  %422 = vst.msk [vmem:[#allocation2 + $0x40] sm:$0xff] %vm413_vm2, %v11509_v9 }
 0x378   : > { %11518 = vst [vmem:[#allocation5_spill] sm:$0xff] %v9889_v60  ;;  %8367 = vmatmul.msk.bf16.gmra.mxu2 %vm671_vm1, %v3716_v32  ;;  %v3678_v43 = vld [vmem:[%s8986_s10 + $0xaa] sm:$0xff] }
 0x379   : > { %8392 = vmatmul.msk.bf16.gmra.mxu3 %vm671_vm1, %v4039_v47  ;;  %v4000_v22 = vld [vmem:[%s8986_s10 + $0xa3] sm:$0xff]  ;;  %v4001_v45 = vld [vmem:[%s8986_s10 + $0xab] sm:$0xff]  ;;  %v3071_v47 = vpack.c.bf16 %v3032_v21, %v3031_v34  ;;  %423 = vst.msk [vmem:[#allocation2 + $0x48] sm:$0xff] %vm413_vm2, %v11509_v9 }
 0x37a   : > { %424 = vst.msk [vmem:[#allocation2 + $0x50] sm:$0xff] %vm413_vm2, %v11509_v9 }
 0x37b   : > { %v2638_v18 = vpop.f32.mrf.mxu2  ;;  %v1994_v27 = vpop.f32.mrf.mxu0  ;;  %425 = vst.msk [vmem:[#allocation2 + $0x58] sm:$0xff] %vm413_vm2, %v11509_v9 }
 0x37c   : > { %v2691_v48 = vadd.f32 %v2638_v18, %v2368_v8  ;;  %v2961_v5 = vpop.f32.mrf.mxu3  ;;  %v2046_v17 = vadd.f32 %v1994_v27, %v11519_v33  ;;  %v2317_v52 = vpop.f32.mrf.mxu1  ;;  %v3717_v27 = vpack.c.bf16 %v3678_v43, %v3677_v11  ;;  %v11521_v33 = vld [vmem:[#allocation8_spill] sm:$0xff]  ;;  %426 = vst.msk [vmem:[#allocation2 + $0x60] sm:$0xff] %vm413_vm2, %v11509_v9 }
 0x37d   : > { %427 = vst.msk [vmem:[#allocation2 + $0x68] sm:$0xff] %vm413_vm2, %v11509_v9  ;;  %v3033_v43 = vld [vmem:[%s8986_s10 + $0xb0] sm:$0xff] }
 0x37e   : > { %v9898_v32 = vadd.f32 %v2961_v5, %v2691_v48  ;;  %v2369_v44 = vadd.f32 %v2317_v52, %v2046_v17  ;;  %v3394_v5 = vpack.c.bf16 %v3355_v58, %v3354_v12  ;;  %428 = vst.msk [vmem:[#allocation2 + $0x70] sm:$0xff] %vm413_vm2, %v11509_v9 }
 0x37f   : > { %429 = vst.msk [vmem:[#allocation2 + $0x78] sm:$0xff] %vm413_vm2, %v11509_v9 }
 0x380   : > { %11520 = vst [vmem:[#allocation6_spill] sm:$0xff] %v9898_v32  ;;  %v4040_v32 = vpack.c.bf16 %v4001_v45, %v4000_v22  ;;  %v3034_v22 = vld [vmem:[%s8986_s10 + $0xb8] sm:$0xff] }
 0x381   : > { %430 = vst.msk [vmem:[#allocation2 + $0x80] sm:$0xff] %vm413_vm2, %v11509_v9  ;;  %v3356_v45 = vld [vmem:[%s8986_s10 + $0xb1] sm:$0xff] }
 0x382   : > { %431 = vst.msk [vmem:[#allocation2 + $0x88] sm:$0xff] %vm413_vm2, %v11509_v9 }
 0x383   : > { %v2640_v62 = vpop.f32.mrf.mxu2  ;;  %v1997_v48 = vpop.f32.mrf.mxu0  ;;  %432 = vst.msk [vmem:[#allocation2 + $0x90] sm:$0xff] %vm413_vm2, %v11509_v9 }
 0x384   : > { %v2692_v8 = vadd.f32 %v2640_v62, %v2369_v44  ;;  %v2963_v18 = vpop.f32.mrf.mxu3  ;;  %v2047_v17 = vadd.f32 %v1997_v48, %v11521_v33  ;;  %v2320_v52 = vpop.f32.mrf.mxu1  ;;  %433 = vst.msk [vmem:[#allocation2 + $0x98] sm:$0xff] %vm413_vm2, %v11509_v9  ;;  %v3357_v62 = vld [vmem:[%s8986_s10 + $0xb9] sm:$0xff] }
 0x385   : > { %434 = vst.msk [vmem:[#allocation2 + $0xa0] sm:$0xff] %vm413_vm2, %v11509_v9  ;;  %v4003_v48 = vld [vmem:[%s8986_s10 + $0xbb] sm:$0xff] }
 0x386   : > { %v9925_v60 = vadd.f32 %v2963_v18, %v2692_v8  ;;  %v2370_v44 = vadd.f32 %v2320_v52, %v2047_v17  ;;  %8318 = vmatmul.msk.bf16.gmra.mxu0 %vm671_vm1, %v3071_v47  ;;  %v3679_v47 = vld [vmem:[%s8986_s10 + $0xb2] sm:$0xff]  ;;  %v3680_v8 = vld [vmem:[%s8986_s10 + $0xba] sm:$0xff]  ;;  %435 = vst.msk [vmem:[#allocation2 + $0xa8] sm:$0xff] %vm413_vm2, %v11509_v9  ;;  %v3395_v52 = vpack.c.bf16 %v3357_v62, %v3356_v45 }
 0x387   : > { %8343 = vmatmul.msk.bf16.gmra.mxu1 %vm671_vm1, %v3394_v5  ;;  %v4002_v18 = vld [vmem:[%s8986_s10 + $0xb3] sm:$0xff]  ;;  %436 = vst.msk [vmem:[#allocation2 + $0xb0] sm:$0xff] %vm413_vm2, %v11509_v9 }
 0x388   : > { %11522 = vst [vmem:[#allocation7_spill] sm:$0xff] %v9925_v60  ;;  %8368 = vmatmul.msk.bf16.gmra.mxu2 %vm671_vm1, %v3717_v27  ;;  %v3072_v27 = vpack.c.bf16 %v3034_v22, %v3033_v43  ;;  %v9993_v22 = vld [vmem:[%s11498_s2] ss:$0 sm:$0xff] }
 0x389   : > { %8393 = vmatmul.msk.bf16.gmra.mxu3 %vm671_vm1, %v4040_v32  ;;  %437 = vst.msk [vmem:[#allocation2 + $0xb8] sm:$0xff] %vm413_vm2, %v11509_v9 }
 0x38a   : > { %438 = vst.msk [vmem:[#allocation2 + $0xc0] sm:$0xff] %vm413_vm2, %v11509_v9 }
 0x38b   : > { %v2643_v34 = vpop.f32.mrf.mxu2  ;;  %v1999_v58 = vpop.f32.mrf.mxu0  ;;  %439 = vst.msk [vmem:[#allocation2 + $0xc8] sm:$0xff] %vm413_vm2, %v11509_v9 }
 0x38c   : > { %v2693_v21 = vadd.f32 %v2643_v34, %v2370_v44  ;;  %v2966_v12 = vpop.f32.mrf.mxu3  ;;  %v2322_v32 = vpop.f32.mrf.mxu1  ;;  %v3718_v44 = vpack.c.bf16 %v3680_v8, %v3679_v47  ;;  %440 = vst.msk [vmem:[#allocation2 + $0xd0] sm:$0xff] %vm413_vm2, %v11509_v9 }
 0x38d   : > { %441 = vst.msk [vmem:[#allocation2 + $0xd8] sm:$0xff] %vm413_vm2, %v11509_v9 }
 0x38e   : > { %v9947_v11 = vadd.f32 %v2966_v12, %v2693_v21  ;;  %v4041_v21 = vpack.c.bf16 %v4003_v48, %v4002_v18  ;;  %442 = vst.msk [vmem:[#allocation2 + $0xe0] sm:$0xff] %vm413_vm2, %v11509_v9  ;;  %v3035_v48 = vld [vmem:[%s8986_s10 + $0xc0] sm:$0xff] }
 0x38f   : > { %443 = vst.msk [vmem:[#allocation2 + $0xe8] sm:$0xff] %vm413_vm2, %v11509_v9 }
 0x390   : > { %11523 = vst [vmem:[#allocation8_spill] sm:$0xff] %v9947_v11 }
 0x391   : > { %444 = vst.msk [vmem:[#allocation2 + $0xf0] sm:$0xff] %vm413_vm2, %v11509_v9 }
 0x392   : > { %445 = vst.msk [vmem:[#allocation2 + $0xf8] sm:$0xff] %vm413_vm2, %v11509_v9 }
 0x393   : > { %v2645_v5 = vpop.f32.mrf.mxu2  ;;  %v3174_v17 = vpop.f32.mrf.mxu0  ;;  %446 = vst.msk [vmem:[#allocation2 + $0x100] sm:$0xff] %vm413_vm2, %v11509_v9 }
 0x394   : > { %v2968_v33 = vpop.f32.mrf.mxu3  ;;  %v3497_v34 = vpop.f32.mrf.mxu1  ;;  %v3293_v12 = vadd.f32 %v3174_v17, %v9492_v10  ;;  %447 = vst.msk [vmem:[#allocation2 + $0x108] sm:$0xff] %vm413_vm2, %v11509_v9  ;;  %v3036_v5 = vld [vmem:[%s8986_s10 + $0xc8] sm:$0xff] }
 0x395   : > { %448 = vst.msk [vmem:[#allocation2 + $0x110] sm:$0xff] %vm413_vm2, %v11509_v9  ;;  %v3359_v33 = vld [vmem:[%s8986_s10 + $0xc9] sm:$0xff] }
 0x396   : > { %8319 = vmatmul.msk.bf16.gmra.mxu0 %vm671_vm1, %v3072_v27  ;;  %v3616_v10 = vadd.f32 %v3497_v34, %v3293_v12  ;;  %449 = vst.msk [vmem:[#allocation2 + $0x118] sm:$0xff] %vm413_vm2, %v11509_v9  ;;  %v3358_v27 = vld [vmem:[%s8986_s10 + $0xc1] sm:$0xff] }
 0x397   : > { %8344 = vmatmul.msk.bf16.gmra.mxu1 %vm671_vm1, %v3395_v52  ;;  %450 = vst.msk [vmem:[#allocation2 + $0x120] sm:$0xff] %vm413_vm2, %v11509_v9  ;;  %v3681_v17 = vld [vmem:[%s8986_s10 + $0xc2] sm:$0xff]  ;;  %v3682_v52 = vld [vmem:[%s8986_s10 + $0xca] sm:$0xff] }
 0x398   : > { %8369 = vmatmul.msk.bf16.gmra.mxu2 %vm671_vm1, %v3718_v44  ;;  %451 = vst.msk [vmem:[#allocation2 + $0x128] sm:$0xff] %vm413_vm2, %v11509_v9  ;;  %v4004_v34 = vld [vmem:[%s8986_s10 + $0xc3] sm:$0xff] }
 0x399   : > { %8394 = vmatmul.msk.bf16.gmra.mxu3 %vm671_vm1, %v4041_v21  ;;  %v4005_v21 = vld [vmem:[%s8986_s10 + $0xcb] sm:$0xff]  ;;  %452 = vst.msk [vmem:[#allocation2 + $0x130] sm:$0xff] %vm413_vm2, %v11509_v9 }
 0x39a   : > { %453 = vst.msk [vmem:[#allocation2 + $0x138] sm:$0xff] %vm413_vm2, %v11509_v9  ;;  %v4042_v11 = vpack.c.bf16 %v4005_v21, %v4004_v34  ;;  %v3037_v21 = vld [vmem:[%s8986_s10 + $0xd0] sm:$0xff] }
 0x39b   : > { %v3820_v58 = vpop.f32.mrf.mxu2  ;;  %v3176_v45 = vpop.f32.mrf.mxu0  ;;  %454 = vst.msk [vmem:[#allocation2 + $0x140] sm:$0xff] %vm413_vm2, %v11509_v9 }
 0x39c   : > { %v3939_v32 = vadd.f32 %v3820_v58, %v3616_v10  ;;  %v4143_v43 = vpop.f32.mrf.mxu3  ;;  %v3499_v62 = vpop.f32.mrf.mxu1  ;;  %v3294_v8 = vadd.f32 %v3176_v45, %v9503_v1  ;;  %v3073_v10 = vpack.c.bf16 %v3036_v5, %v3035_v48  ;;  %v3396_v45 = vpack.c.bf16 %v3359_v33, %v3358_v27  ;;  %455 = vst.msk [vmem:[#allocation2 + $0x148] sm:$0xff] %vm413_vm2, %v11509_v9 }
 0x39d   : > { %456 = vst.msk [vmem:[#allocation2 + $0x150] sm:$0xff] %vm413_vm2, %v11509_v9 }
 0x39e   : > { %v4262_v47 = vadd.f32 %v4143_v43, %v3939_v32  ;;  %v3617_v1 = vadd.f32 %v3499_v62, %v3294_v8  ;;  %457 = vst.msk [vmem:[#allocation2 + $0x158] sm:$0xff] %vm413_vm2, %v11509_v9 }
 0x39f   : > { %458 = vst.msk [vmem:[#allocation2 + $0x160] sm:$0xff] %vm413_vm2, %v11509_v9 }
 0x3a0   : > { %v4313_v18 = vadd.f32 %v9993_v22, %v4262_v47  ;;  %v3719_v47 = vpack.c.bf16 %v3682_v52, %v3681_v17  ;;  %459 = vst.msk [vmem:[#allocation2 + $0x168] sm:$0xff] %vm413_vm2, %v11509_v9 }
 0x3a1   : > { %460 = vst.msk [vmem:[#allocation2 + $0x170] sm:$0xff] %vm413_vm2, %v11509_v9 }
 0x3a2   : > { %v4360_v44 = vmax.f32 %v4313_v18, 0.0  ;;  %461 = vst.msk [vmem:[#allocation2 + $0x178] sm:$0xff] %vm413_vm2, %v11509_v9 }
 0x3a3   : > { %v3822_v12 = vpop.f32.mrf.mxu2  ;;  %v3179_v43 = vpop.f32.mrf.mxu0  ;;  %462 = vst.msk [vmem:[#allocation2 + $0x180] sm:$0xff] %vm413_vm2, %v11509_v9 }
 0x3a4   : > { %4407 = vst.msk [vmem:[#allocation2 + $0x18] sm:$0xff] %vm413_vm2, %v4360_v44  ;;  %v3940_v58 = vadd.f32 %v3822_v12, %v3617_v1  ;;  %v4145_v32 = vpop.f32.mrf.mxu3  ;;  %v3502_v18 = vpop.f32.mrf.mxu1  ;;  %v3295_v62 = vadd.f32 %v3179_v43, %v9510_v28  ;;  %v3038_v12 = vld [vmem:[%s8986_s10 + $0xd8] sm:$0xff] }
 0x3a5   : > { %463 = vst.msk [vmem:[#allocation2 + $0x188] sm:$0xff] %vm413_vm2, %v11509_v9  ;;  %v3684_v43 = vld [vmem:[%s8986_s10 + $0xda] sm:$0xff] }
 0x3a6   : > { %8320 = vmatmul.msk.bf16.gmra.mxu0 %vm671_vm1, %v3073_v10  ;;  %v4263_v8 = vadd.f32 %v4145_v32, %v3940_v58  ;;  %v3618_v28 = vadd.f32 %v3502_v18, %v3295_v62  ;;  %464 = vst.msk [vmem:[#allocation2 + $0x190] sm:$0xff] %vm413_vm2, %v11509_v9  ;;  %v3360_v10 = vld [vmem:[%s8986_s10 + $0xd1] sm:$0xff]  ;;  %v3361_v58 = vld [vmem:[%s8986_s10 + $0xd9] sm:$0xff] }
 0x3a7   : > { %8345 = vmatmul.msk.bf16.gmra.mxu1 %vm671_vm1, %v3396_v45  ;;  %465 = vst.msk [vmem:[#allocation2 + $0x198] sm:$0xff] %vm413_vm2, %v11509_v9  ;;  %v3683_v32 = vld [vmem:[%s8986_s10 + $0xd2] sm:$0xff]  ;;  %v4007_v18 = vld [vmem:[%s8986_s10 + $0xdb] sm:$0xff] }
 0x3a8   : > { %8370 = vmatmul.msk.bf16.gmra.mxu2 %vm671_vm1, %v3719_v47  ;;  %v4314_v5 = vadd.f32 %v9993_v22, %v4263_v8  ;;  %466 = vst.msk [vmem:[#allocation2 + $0x1a0] sm:$0xff] %vm413_vm2, %v11509_v9  ;;  %v4006_v47 = vld [vmem:[%s8986_s10 + $0xd3] sm:$0xff]  ;;  %v3074_v8 = vpack.c.bf16 %v3038_v12, %v3037_v21 }
 0x3a9   : > { %8395 = vmatmul.msk.bf16.gmra.mxu3 %vm671_vm1, %v4042_v11 }
 0x3aa   : > { %v4361_v1 = vmax.f32 %v4314_v5, 0.0 }
 0x3ab   : > { %v3825_v48 = vpop.f32.mrf.mxu2  ;;  %v3181_v11 = vpop.f32.mrf.mxu0 }
 0x3ac   : > { %v3941_v27 = vadd.f32 %v3825_v48, %v3618_v28  ;;  %v4148_v33 = vpop.f32.mrf.mxu3  ;;  %v3504_v17 = vpop.f32.mrf.mxu1  ;;  %v3296_v44 = vadd.f32 %v3181_v11, %v9521_v19  ;;  %4408 = vst.msk [vmem:[#allocation2 + $0x20] sm:$0xff] %vm413_vm2, %v4361_v1 }
 0x3ae   : > { %v4264_v52 = vadd.f32 %v4148_v33, %v3941_v27  ;;  %v3619_v45 = vadd.f32 %v3504_v17, %v3296_v44  ;;  %v3397_v27 = vpack.c.bf16 %v3361_v58, %v3360_v10  ;;  %v3720_v33 = vpack.c.bf16 %v3684_v43, %v3683_v32  ;;  %v8806_v32 = vld [vmem:[%s11499_s3 + $0x20] sm:$0xff] }
 0x3af   : > { %5230 = vmatpush.bf16.msrb.mxu2 %v8806_v32 }
 0x3b0   : > { %v4315_v34 = vadd.f32 %v9993_v22, %v4264_v52  ;;  %v4043_v52 = vpack.c.bf16 %v4007_v18, %v4006_v47  ;;  %v3362_v47 = vld [vmem:[%s8986_s10 + $0xe1] sm:$0xff]  ;;  %v3363_v18 = vld [vmem:[%s8986_s10 + $0xe9] sm:$0xff] }
 0x3b2   : > { %v4362_v19 = vmax.f32 %v4315_v34, 0.0 }
 0x3b3   : > { %v3827_v62 = vpop.f32.mrf.mxu2  ;;  %v3184_v5 = vpop.f32.mrf.mxu0 }
 0x3b4   : > { %v3942_v28 = vadd.f32 %v3827_v62, %v3619_v45  ;;  %v4150_v48 = vpop.f32.mrf.mxu3  ;;  %4409 = vst.msk [vmem:[#allocation2 + $0x28] sm:$0xff] %vm413_vm2, %v4362_v19  ;;  %v3507_v11 = vpop.f32.mrf.mxu1  ;;  %v3297_v9 = vadd.f32 %v3184_v5, %v9528_v51  ;;  %v3039_v19 = vld [vmem:[%s8986_s10 + $0xe0] sm:$0xff]  ;;  %v3040_v45 = vld [vmem:[%s8986_s10 + $0xe8] sm:$0xff] }
 0x3b5   : > { %v3685_v62 = vld [vmem:[%s8986_s10 + $0xe2] sm:$0xff]  ;;  %v4009_v5 = vld [vmem:[%s8986_s10 + $0xeb] sm:$0xff] }
 0x3b6   : > { %v4265_v60 = vadd.f32 %v4150_v48, %v3942_v28  ;;  %8321 = vmatmul.msk.bf16.gmra.mxu0 %vm671_vm1, %v3074_v8  ;;  %v3620_v1 = vadd.f32 %v3507_v11, %v3297_v9  ;;  %v8808_v9 = vld [vmem:[%s11499_s3 + $0x30] sm:$0xff]  ;;  %v4008_v48 = vld [vmem:[%s8986_s10 + $0xe3] sm:$0xff] }
 0x3b7   : > { %8346 = vmatmul.msk.bf16.gmra.mxu1 %vm671_vm1, %v3397_v27  ;;  %v3686_v8 = vld [vmem:[%s8986_s10 + $0xea] sm:$0xff]  ;;  %5581 = vmatpush.bf16.msrb.mxu3 %v8808_v9 }
 0x3b8   : > { %v4316_v17 = vadd.f32 %v9993_v22, %v4265_v60  ;;  %8371 = vmatmul.msk.bf16.gmra.mxu2 %vm671_vm1, %v3720_v33  ;;  %v3075_v33 = vpack.c.bf16 %v3040_v45, %v3039_v19 }
 0x3b9   : > { %8396 = vmatmul.msk.bf16.gmra.mxu3 %vm671_vm1, %v4043_v52 }
 0x3ba   : > { %v4363_v44 = vmax.f32 %v4316_v17, 0.0 }
 0x3bb   : > { %v3830_v34 = vpop.f32.mrf.mxu2  ;;  %v3186_v60 = vpop.f32.mrf.mxu0 }
 0x3bc   : > { %4410 = vst.msk [vmem:[#allocation2 + $0x30] sm:$0xff] %vm413_vm2, %v4363_v44  ;;  %v3943_v51 = vadd.f32 %v3830_v34, %v3620_v1  ;;  %v4153_v21 = vpop.f32.mrf.mxu3  ;;  %v3509_v12 = vpop.f32.mrf.mxu1  ;;  %v3298_v58 = vadd.f32 %v3186_v60, %v9539_v56  ;;  %v3398_v44 = vpack.c.bf16 %v3363_v18, %v3362_v47  ;;  %v3721_v1 = vpack.c.bf16 %v3686_v8, %v3685_v62  ;;  %v8804_v34 = vld [vmem:[%s11499_s3 + $0x10] sm:$0xff] }
 0x3bd   : > { %v4044_v60 = vpack.c.bf16 %v4009_v5, %v4008_v48  ;;  %4708 = vmatpush.bf16.msrb.mxu0 %v8804_v34  ;;  %v3364_v48 = vld [vmem:[%s8986_s10 + $0xf1] sm:$0xff]  ;;  %v3365_v5 = vld [vmem:[%s8986_s10 + $0xf9] sm:$0xff] }
 0x3be   : > { %v4266_v10 = vadd.f32 %v4153_v21, %v3943_v51  ;;  %v3621_v56 = vadd.f32 %v3509_v12, %v3298_v58  ;;  %v8802_v51 = vld [vmem:[%s11499_s3] sm:$0xff] }
 0x3bf   : > { %4929 = vmatpush.bf16.msrb.mxu1 %v8802_v51 }
 0x3c0   : > { %v4317_v43 = vadd.f32 %v9993_v22, %v4266_v10 }
 0x3c2   : > { %v4364_v28 = vmax.f32 %v4317_v43, 0.0 }
 0x3c3   : > { %v3832_v27 = vpop.f32.mrf.mxu2  ;;  %v3189_v17 = vpop.f32.mrf.mxu0 }
 0x3c4   : > { %4411 = vst.msk [vmem:[#allocation2 + $0x38] sm:$0xff] %vm413_vm2, %v4364_v28  ;;  %v3944_v11 = vadd.f32 %v3832_v27, %v3621_v56  ;;  %v4155_v52 = vpop.f32.mrf.mxu3  ;;  %v3512_v21 = vpop.f32.mrf.mxu1  ;;  %v3299_v10 = vadd.f32 %v3189_v17, %v9546_v63  ;;  %v3041_v28 = vld [vmem:[%s8986_s10 + $0xf0] sm:$0xff]  ;;  %v3042_v56 = vld [vmem:[%s8986_s10 + $0xf8] sm:$0xff] }
 0x3c5   : > { %v3687_v27 = vld [vmem:[%s8986_s10 + $0xf2] sm:$0xff]  ;;  %v3076_v34 = vpack.c.bf16 %v3042_v56, %v3041_v28 }
 0x3c6   : > { %v4267_v12 = vadd.f32 %v4155_v52, %v3944_v11  ;;  %8322 = vmatmul.msk.bf16.gmra.mxu0 %vm671_vm1, %v3075_v33  ;;  %v3622_v63 = vadd.f32 %v3512_v21, %v3299_v10  ;;  %v3688_v33 = vld [vmem:[%s8986_s10 + $0xfa] sm:$0xff] }
 0x3c7   : > { %8347 = vmatmul.msk.bf16.gmra.mxu1 %vm671_vm1, %v3398_v44  ;;  %v4010_v17 = vld [vmem:[%s8986_s10 + $0xf3] sm:$0xff]  ;;  %v4011_v44 = vld [vmem:[%s8986_s10 + $0xfb] sm:$0xff] }
 0x3c8   : > { %v4318_v58 = vadd.f32 %v9993_v22, %v4267_v12  ;;  %8372 = vmatmul.msk.bf16.gmra.mxu2 %vm671_vm1, %v3721_v1  ;;  %v3722_v12 = vpack.c.bf16 %v3688_v33, %v3687_v27  ;;  %v3366_v27 = vld [vmem:[%s8986_s10 + $0x101] sm:$0xff]  ;;  %v3367_v33 = vld [vmem:[%s8986_s10 + $0x109] sm:$0xff] }
 0x3c9   : > { %8397 = vmatmul.msk.bf16.gmra.mxu3 %vm671_vm1, %v4044_v60 }
 0x3ca   : > { %v4365_v32 = vmax.f32 %v4318_v58, 0.0  ;;  %v4045_v58 = vpack.c.bf16 %v4011_v44, %v4010_v17 }
 0x3cb   : > { %v3835_v9 = vpop.f32.mrf.mxu2  ;;  %v3191_v45 = vpop.f32.mrf.mxu0 }
 0x3cc   : > { %4412 = vst.msk [vmem:[#allocation2 + $0x40] sm:$0xff] %vm413_vm2, %v4365_v32  ;;  %v3945_v43 = vadd.f32 %v3835_v9, %v3622_v63  ;;  %v4158_v19 = vpop.f32.mrf.mxu3  ;;  %v3514_v47 = vpop.f32.mrf.mxu1  ;;  %v3300_v62 = vadd.f32 %v3191_v45, %v9557_v3  ;;  %v3399_v3 = vpack.c.bf16 %v3365_v5, %v3364_v48  ;;  %v3043_v48 = vld [vmem:[%s8986_s10 + $0x100] sm:$0xff]  ;;  %v3044_v5 = vld [vmem:[%s8986_s10 + $0x108] sm:$0xff] }
 0x3ce   : > { %v4268_v18 = vadd.f32 %v4158_v19, %v3945_v43  ;;  %v3623_v52 = vadd.f32 %v3514_v47, %v3300_v62 }
 0x3d0   : > { %v4319_v8 = vadd.f32 %v9993_v22, %v4268_v18 }
 0x3d2   : > { %v4366_v11 = vmax.f32 %v4319_v8, 0.0 }
 0x3d3   : > { %v3837_v1 = vpop.f32.mrf.mxu2  ;;  %v3194_v60 = vpop.f32.mrf.mxu0 }
 0x3d4   : > { %4413 = vst.msk [vmem:[#allocation2 + $0x48] sm:$0xff] %vm413_vm2, %v4366_v11  ;;  %v3946_v51 = vadd.f32 %v3837_v1, %v3623_v52  ;;  %v4160_v21 = vpop.f32.mrf.mxu3  ;;  %v3517_v10 = vpop.f32.mrf.mxu1  ;;  %v3301_v63 = vadd.f32 %v3194_v60, %v9564_v7  ;;  %v3689_v11 = vld [vmem:[%s8986_s10 + $0x102] sm:$0xff]  ;;  %v3690_v52 = vld [vmem:[%s8986_s10 + $0x10a] sm:$0xff] }
 0x3d5   : > { %v4012_v1 = vld [vmem:[%s8986_s10 + $0x103] sm:$0xff] }
 0x3d6   : > { %v4269_v32 = vadd.f32 %v4160_v21, %v3946_v51  ;;  %8323 = vmatmul.msk.bf16.gmra.mxu0 %vm671_vm1, %v3076_v34  ;;  %v3624_v19 = vadd.f32 %v3517_v10, %v3301_v63  ;;  %v4013_v34 = vld [vmem:[%s8986_s10 + $0x10b] sm:$0xff]  ;;  %v3077_v21 = vpack.c.bf16 %v3044_v5, %v3043_v48  ;;  %v3723_v10 = vpack.c.bf16 %v3690_v52, %v3689_v11  ;;  %v3046_v5 = vld [vmem:[%s8986_s10 + $0x118] sm:$0xff] }
 0x3d7   : > { %8348 = vmatmul.msk.bf16.gmra.mxu1 %vm671_vm1, %v3399_v3  ;;  %v3045_v48 = vld [vmem:[%s8986_s10 + $0x110] sm:$0xff]  ;;  %v3692_v52 = vld [vmem:[%s8986_s10 + $0x11a] sm:$0xff] }
 0x3d8   : > { %v4320_v9 = vadd.f32 %v9993_v22, %v4269_v32  ;;  %8373 = vmatmul.msk.bf16.gmra.mxu2 %vm671_vm1, %v3722_v12  ;;  %v4046_v32 = vpack.c.bf16 %v4013_v34, %v4012_v1  ;;  %v3691_v11 = vld [vmem:[%s8986_s10 + $0x112] sm:$0xff]  ;;  %v4015_v34 = vld [vmem:[%s8986_s10 + $0x11b] sm:$0xff] }
 0x3d9   : > { %8398 = vmatmul.msk.bf16.gmra.mxu3 %vm671_vm1, %v4045_v58  ;;  %v4014_v1 = vld [vmem:[%s8986_s10 + $0x113] sm:$0xff] }
 0x3da   : > { %v4367_v43 = vmax.f32 %v4320_v9, 0.0 }
 0x3db   : > { %v3840_v45 = vpop.f32.mrf.mxu2  ;;  %v3196_v18 = vpop.f32.mrf.mxu0 }
 0x3dc   : > { %4414 = vst.msk [vmem:[#allocation2 + $0x50] sm:$0xff] %vm413_vm2, %v4367_v43  ;;  %v3947_v7 = vadd.f32 %v3840_v45, %v3624_v19  ;;  %v4163_v47 = vpop.f32.mrf.mxu3  ;;  %v3519_v62 = vpop.f32.mrf.mxu1  ;;  %v3302_v28 = vadd.f32 %v3196_v18, %v9575_v24  ;;  %v3400_v24 = vpack.c.bf16 %v3367_v33, %v3366_v27  ;;  %v3368_v27 = vld [vmem:[%s8986_s10 + $0x111] sm:$0xff]  ;;  %v3369_v33 = vld [vmem:[%s8986_s10 + $0x119] sm:$0xff] }
 0x3de   : > { %v4270_v8 = vadd.f32 %v4163_v47, %v3947_v7  ;;  %v3625_v44 = vadd.f32 %v3519_v62, %v3302_v28 }
 0x3e0   : > { %v4321_v56 = vadd.f32 %v9993_v22, %v4270_v8 }
 0x3e2   : > { %v4368_v17 = vmax.f32 %v4321_v56, 0.0 }
 0x3e3   : > { %v3842_v51 = vpop.f32.mrf.mxu2  ;;  %v3199_v12 = vpop.f32.mrf.mxu0 }
 0x3e4   : > { %4415 = vst.msk [vmem:[#allocation2 + $0x58] sm:$0xff] %vm413_vm2, %v4368_v17  ;;  %v3948_v60 = vadd.f32 %v3842_v51, %v3625_v44  ;;  %v4165_v3 = vpop.f32.mrf.mxu3  ;;  %v3522_v58 = vpop.f32.mrf.mxu1  ;;  %v3303_v9 = vadd.f32 %v3199_v12, %v9582_v23 }
 0x3e6   : > { %v4271_v63 = vadd.f32 %v4165_v3, %v3948_v60  ;;  %8324 = vmatmul.msk.bf16.gmra.mxu0 %vm671_vm1, %v3077_v21  ;;  %v3626_v45 = vadd.f32 %v3522_v58, %v3303_v9  ;;  %v3078_v21 = vpack.c.bf16 %v3046_v5, %v3045_v48  ;;  %v4047_v58 = vpack.c.bf16 %v4015_v34, %v4014_v1  ;;  %v3370_v48 = vld [vmem:[%s8986_s10 + $0x121] sm:$0xff]  ;;  %v3371_v5 = vld [vmem:[%s8986_s10 + $0x129] sm:$0xff] }
 0x3e7   : > { %8349 = vmatmul.msk.bf16.gmra.mxu1 %vm671_vm1, %v3400_v24  ;;  %v3724_v24 = vpack.c.bf16 %v3692_v52, %v3691_v11 }
 0x3e8   : > { %v4322_v43 = vadd.f32 %v9993_v22, %v4271_v63  ;;  %8374 = vmatmul.msk.bf16.gmra.mxu2 %vm671_vm1, %v3723_v10 }
 0x3e9   : > { %8399 = vmatmul.msk.bf16.gmra.mxu3 %vm671_vm1, %v4046_v32 }
 0x3ea   : > { %v4369_v19 = vmax.f32 %v4322_v43, 0.0 }
 0x3eb   : > { %v3845_v7 = vpop.f32.mrf.mxu2  ;;  %v3201_v18 = vpop.f32.mrf.mxu0 }
 0x3ec   : > { %4416 = vst.msk [vmem:[#allocation2 + $0x60] sm:$0xff] %vm413_vm2, %v4369_v19  ;;  %v3949_v23 = vadd.f32 %v3845_v7, %v3626_v45  ;;  %v4168_v47 = vpop.f32.mrf.mxu3  ;;  %v3524_v62 = vpop.f32.mrf.mxu1  ;;  %v3304_v28 = vadd.f32 %v3201_v18, %v9593_v50  ;;  %v3401_v50 = vpack.c.bf16 %v3369_v33, %v3368_v27  ;;  %v3693_v27 = vld [vmem:[%s8986_s10 + $0x122] sm:$0xff]  ;;  %v3694_v33 = vld [vmem:[%s8986_s10 + $0x12a] sm:$0xff] }
 0x3ee   : > { %v4272_v8 = vadd.f32 %v4168_v47, %v3949_v23  ;;  %v3627_v44 = vadd.f32 %v3524_v62, %v3304_v28  ;;  %v3047_v28 = vld [vmem:[%s8986_s10 + $0x120] sm:$0xff] }
 0x3f0   : > { %v4323_v56 = vadd.f32 %v9993_v22, %v4272_v8 }
 0x3f2   : > { %v4370_v17 = vmax.f32 %v4323_v56, 0.0  ;;  %v3048_v56 = vld [vmem:[%s8986_s10 + $0x128] sm:$0xff] }
 0x3f3   : > { %v3847_v51 = vpop.f32.mrf.mxu2  ;;  %v3204_v12 = vpop.f32.mrf.mxu0  ;;  %v3079_v34 = vpack.c.bf16 %v3048_v56, %v3047_v28  ;;  %v3695_v28 = vld [vmem:[%s8986_s10 + $0x132] sm:$0xff]  ;;  %v3696_v56 = vld [vmem:[%s8986_s10 + $0x13a] sm:$0xff] }
 0x3f4   : > { %4417 = vst.msk [vmem:[#allocation2 + $0x68] sm:$0xff] %vm413_vm2, %v4370_v17  ;;  %v3950_v60 = vadd.f32 %v3847_v51, %v3627_v44  ;;  %v4170_v3 = vpop.f32.mrf.mxu3  ;;  %v3527_v10 = vpop.f32.mrf.mxu1  ;;  %v3305_v63 = vadd.f32 %v3204_v12, %v9600_v49  ;;  %v4016_v17 = vld [vmem:[%s8986_s10 + $0x123] sm:$0xff]  ;;  %v4017_v44 = vld [vmem:[%s8986_s10 + $0x12b] sm:$0xff] }
 0x3f6   : > { %v4273_v32 = vadd.f32 %v4170_v3, %v3950_v60  ;;  %8325 = vmatmul.msk.bf16.gmra.mxu0 %vm671_vm1, %v3078_v21  ;;  %v3628_v19 = vadd.f32 %v3527_v10, %v3305_v63  ;;  %v3725_v3 = vpack.c.bf16 %v3694_v33, %v3693_v27  ;;  %v4018_v27 = vld [vmem:[%s8986_s10 + $0x133] sm:$0xff]  ;;  %v4019_v33 = vld [vmem:[%s8986_s10 + $0x13b] sm:$0xff] }
 0x3f7   : > { %8350 = vmatmul.msk.bf16.gmra.mxu1 %vm671_vm1, %v3401_v50  ;;  %v4048_v50 = vpack.c.bf16 %v4017_v44, %v4016_v17 }
 0x3f8   : > { %v4324_v9 = vadd.f32 %v9993_v22, %v4273_v32  ;;  %8375 = vmatmul.msk.bf16.gmra.mxu2 %vm671_vm1, %v3724_v24 }
 0x3f9   : > { %8400 = vmatmul.msk.bf16.gmra.mxu3 %vm671_vm1, %v4047_v58 }
 0x3fa   : > { %v4371_v43 = vmax.f32 %v4324_v9, 0.0 }
 0x3fb   : > { %v3850_v45 = vpop.f32.mrf.mxu2  ;;  %v3206_v23 = vpop.f32.mrf.mxu0 }
 0x3fc   : > { %4418 = vst.msk [vmem:[#allocation2 + $0x70] sm:$0xff] %vm413_vm2, %v4371_v43  ;;  %v3951_v49 = vadd.f32 %v3850_v45, %v3628_v19  ;;  %v4173_v7 = vpop.f32.mrf.mxu3  ;;  %v3529_v47 = vpop.f32.mrf.mxu1  ;;  %v3306_v62 = vadd.f32 %v3206_v23, %v9611_v13  ;;  %v3402_v13 = vpack.c.bf16 %v3371_v5, %v3370_v48 }
 0x3fe   : > { %v4274_v18 = vadd.f32 %v4173_v7, %v3951_v49  ;;  %v3629_v52 = vadd.f32 %v3529_v47, %v3306_v62  ;;  %v3049_v47 = vld [vmem:[%s8986_s10 + $0x130] sm:$0xff] }
 0x3ff   : > { %v3372_v62 = vld [vmem:[%s8986_s10 + $0x131] sm:$0xff] }
 0x400   : > { %v4325_v8 = vadd.f32 %v9993_v22, %v4274_v18  ;;  %v3050_v18 = vld [vmem:[%s8986_s10 + $0x138] sm:$0xff] }
 0x402   : > { %v4372_v11 = vmax.f32 %v4325_v8, 0.0  ;;  %v3373_v8 = vld [vmem:[%s8986_s10 + $0x139] sm:$0xff] }
 0x403   : > { %v3852_v1 = vpop.f32.mrf.mxu2  ;;  %v3209_v60 = vpop.f32.mrf.mxu0 }
 0x404   : > { %4419 = vst.msk [vmem:[#allocation2 + $0x78] sm:$0xff] %vm413_vm2, %v4372_v11  ;;  %v3952_v51 = vadd.f32 %v3852_v1, %v3629_v52  ;;  %v4175_v21 = vpop.f32.mrf.mxu3  ;;  %v3532_v12 = vpop.f32.mrf.mxu1  ;;  %v3307_v10 = vadd.f32 %v3209_v60, %v9618_v59  ;;  %v3080_v52 = vpack.c.bf16 %v3050_v18, %v3049_v47 }
 0x406   : > { %v4275_v24 = vadd.f32 %v4175_v21, %v3952_v51  ;;  %8326 = vmatmul.msk.bf16.gmra.mxu0 %vm671_vm1, %v3079_v34  ;;  %v3630_v63 = vadd.f32 %v3532_v12, %v3307_v10  ;;  %v3726_v34 = vpack.c.bf16 %v3696_v56, %v3695_v28  ;;  %v4049_v21 = vpack.c.bf16 %v4019_v33, %v4018_v27 }
 0x407   : > { %8351 = vmatmul.msk.bf16.gmra.mxu1 %vm671_vm1, %v3402_v13 }
 0x408   : > { %v4326_v58 = vadd.f32 %v9993_v22, %v4275_v24  ;;  %8376 = vmatmul.msk.bf16.gmra.mxu2 %vm671_vm1, %v3725_v3 }
 0x409   : > { %8401 = vmatmul.msk.bf16.gmra.mxu3 %vm671_vm1, %v4048_v50 }
 0x40a   : > { %v4373_v32 = vmax.f32 %v4326_v58, 0.0 }
 0x40b   : > { %v3855_v9 = vpop.f32.mrf.mxu2  ;;  %v3211_v19 = vpop.f32.mrf.mxu0 }
 0x40c   : > { %4420 = vst.msk [vmem:[#allocation2 + $0x80] sm:$0xff] %vm413_vm2, %v4373_v32  ;;  %v3953_v59 = vadd.f32 %v3855_v9, %v3630_v63  ;;  %v4178_v43 = vpop.f32.mrf.mxu3  ;;  %v3534_v45 = vpop.f32.mrf.mxu1  ;;  %v3308_v7 = vadd.f32 %v3211_v19, %v9629_v41  ;;  %v3403_v41 = vpack.c.bf16 %v3373_v8, %v3372_v62  ;;  %v3052_v19 = vld [vmem:[%s8986_s10 + $0x148] sm:$0xff] }
 0x40d   : > { %v4020_v62 = vld [vmem:[%s8986_s10 + $0x143] sm:$0xff]  ;;  %v4021_v8 = vld [vmem:[%s8986_s10 + $0x14b] sm:$0xff] }
 0x40e   : > { %v4276_v49 = vadd.f32 %v4178_v43, %v3953_v59  ;;  %v3631_v5 = vadd.f32 %v3534_v45, %v3308_v7  ;;  %v3051_v43 = vld [vmem:[%s8986_s10 + $0x140] sm:$0xff] }
 0x40f   : > { %v3374_v45 = vld [vmem:[%s8986_s10 + $0x141] sm:$0xff]  ;;  %v3081_v56 = vpack.c.bf16 %v3052_v19, %v3051_v43  ;;  %v4022_v43 = vld [vmem:[%s8986_s10 + $0x153] sm:$0xff] }
 0x410   : > { %v4327_v23 = vadd.f32 %v9993_v22, %v4276_v49  ;;  %v3375_v49 = vld [vmem:[%s8986_s10 + $0x149] sm:$0xff]  ;;  %v4023_v19 = vld [vmem:[%s8986_s10 + $0x15b] sm:$0xff] }
 0x411   : > { %v3697_v7 = vld [vmem:[%s8986_s10 + $0x142] sm:$0xff] }
 0x412   : > { %v4374_v48 = vmax.f32 %v4327_v23, 0.0  ;;  %v3698_v23 = vld [vmem:[%s8986_s10 + $0x14a] sm:$0xff] }
 0x413   : > { %v3857_v11 = vpop.f32.mrf.mxu2  ;;  %v3214_v1 = vpop.f32.mrf.mxu0  ;;  %v3727_v33 = vpack.c.bf16 %v3698_v23, %v3697_v7 }
 0x414   : > { %4421 = vst.msk [vmem:[#allocation2 + $0x88] sm:$0xff] %vm413_vm2, %v4374_v48  ;;  %v3954_v17 = vadd.f32 %v3857_v11, %v3631_v5  ;;  %v4180_v44 = vpop.f32.mrf.mxu3  ;;  %v3537_v51 = vpop.f32.mrf.mxu1  ;;  %v3309_v13 = vadd.f32 %v3214_v1, %v9636_v53 }
 0x416   : > { %v4277_v60 = vadd.f32 %v4180_v44, %v3954_v17  ;;  %8327 = vmatmul.msk.bf16.gmra.mxu0 %vm671_vm1, %v3080_v52  ;;  %v3632_v50 = vadd.f32 %v3537_v51, %v3309_v13  ;;  %v4050_v52 = vpack.c.bf16 %v4021_v8, %v4020_v62  ;;  %v4051_v8 = vpack.c.bf16 %v4023_v19, %v4022_v43 }
 0x417   : > { %8352 = vmatmul.msk.bf16.gmra.mxu1 %vm671_vm1, %v3403_v41 }
 0x418   : > { %v4328_v3 = vadd.f32 %v9993_v22, %v4277_v60  ;;  %8377 = vmatmul.msk.bf16.gmra.mxu2 %vm671_vm1, %v3726_v34 }
 0x419   : > { %8402 = vmatmul.msk.bf16.gmra.mxu3 %vm671_vm1, %v4049_v21 }
 0x41a   : > { %v4375_v12 = vmax.f32 %v4328_v3, 0.0 }
 0x41b   : > { %v3860_v24 = vpop.f32.mrf.mxu2  ;;  %v3216_v58 = vpop.f32.mrf.mxu0 }
 0x41c   : > { %4422 = vst.msk [vmem:[#allocation2 + $0x90] sm:$0xff] %vm413_vm2, %v4375_v12  ;;  %v3955_v53 = vadd.f32 %v3860_v24, %v3632_v50  ;;  %v4183_v10 = vpop.f32.mrf.mxu3  ;;  %v3539_v32 = vpop.f32.mrf.mxu1  ;;  %v3310_v9 = vadd.f32 %v3216_v58, %v9647_v6  ;;  %v3404_v6 = vpack.c.bf16 %v3375_v49, %v3374_v45  ;;  %v3053_v24 = vld [vmem:[%s8986_s10 + $0x150] sm:$0xff]  ;;  %v3377_v58 = vld [vmem:[%s8986_s10 + $0x159] sm:$0xff] }
 0x41e   : > { %v4278_v63 = vadd.f32 %v4183_v10, %v3955_v53  ;;  %v3633_v18 = vadd.f32 %v3539_v32, %v3310_v9  ;;  %v3054_v53 = vld [vmem:[%s8986_s10 + $0x158] sm:$0xff] }
 0x41f   : > { %v3376_v10 = vld [vmem:[%s8986_s10 + $0x151] sm:$0xff]  ;;  %v3082_v49 = vpack.c.bf16 %v3054_v53, %v3053_v24 }
 0x420   : > { %v4329_v59 = vadd.f32 %v9993_v22, %v4278_v63  ;;  %v3699_v32 = vld [vmem:[%s8986_s10 + $0x152] sm:$0xff]  ;;  %v3700_v63 = vld [vmem:[%s8986_s10 + $0x15a] sm:$0xff] }
 0x422   : > { %v4376_v47 = vmax.f32 %v4329_v59, 0.0 }
 0x423   : > { %v3862_v28 = vpop.f32.mrf.mxu2  ;;  %v3219_v27 = vpop.f32.mrf.mxu0 }
 0x424   : > { %4423 = vst.msk [vmem:[#allocation2 + $0x98] sm:$0xff] %vm413_vm2, %v4376_v47  ;;  %v3956_v48 = vadd.f32 %v3862_v28, %v3633_v18  ;;  %v4185_v5 = vpop.f32.mrf.mxu3  ;;  %v3542_v11 = vpop.f32.mrf.mxu1  ;;  %v3311_v44 = vadd.f32 %v3219_v27, %v9654_v30  ;;  %v3728_v18 = vpack.c.bf16 %v3700_v63, %v3699_v32 }
 0x426   : > { %v4279_v17 = vadd.f32 %v4185_v5, %v3956_v48  ;;  %8328 = vmatmul.msk.bf16.gmra.mxu0 %vm671_vm1, %v3081_v56  ;;  %v3634_v34 = vadd.f32 %v3542_v11, %v3311_v44 }
 0x427   : > { %8353 = vmatmul.msk.bf16.gmra.mxu1 %vm671_vm1, %v3404_v6 }
 0x428   : > { %v4330_v1 = vadd.f32 %v9993_v22, %v4279_v17  ;;  %8378 = vmatmul.msk.bf16.gmra.mxu2 %vm671_vm1, %v3727_v33 }
 0x429   : > { %8403 = vmatmul.msk.bf16.gmra.mxu3 %vm671_vm1, %v4050_v52 }
 0x42a   : > { %v4377_v41 = vmax.f32 %v4330_v1, 0.0 }
 0x42b   : > { %v3865_v51 = vpop.f32.mrf.mxu2  ;;  %v3221_v60 = vpop.f32.mrf.mxu0 }
 0x42c   : > { %4424 = vst.msk [vmem:[#allocation2 + $0xa0] sm:$0xff] %vm413_vm2, %v4377_v41  ;;  %v3957_v30 = vadd.f32 %v3865_v51, %v3634_v34  ;;  %v4188_v21 = vpop.f32.mrf.mxu3  ;;  %v3544_v13 = vpop.f32.mrf.mxu1  ;;  %v3312_v12 = vadd.f32 %v3221_v60, %v9665_v36  ;;  %v3405_v36 = vpack.c.bf16 %v3377_v58, %v3376_v10  ;;  %v3055_v41 = vld [vmem:[%s8986_s10 + $0x160] sm:$0xff]  ;;  %v3056_v34 = vld [vmem:[%s8986_s10 + $0x168] sm:$0xff] }
 0x42d   : > { %v3378_v51 = vld [vmem:[%s8986_s10 + $0x161] sm:$0xff]  ;;  %v3702_v60 = vld [vmem:[%s8986_s10 + $0x16a] sm:$0xff]  ;;  %v3083_v53 = vpack.c.bf16 %v3056_v34, %v3055_v41 }
 0x42e   : > { %v4280_v3 = vadd.f32 %v4188_v21, %v3957_v30  ;;  %v3635_v59 = vadd.f32 %v3544_v13, %v3312_v12  ;;  %v3379_v30 = vld [vmem:[%s8986_s10 + $0x169] sm:$0xff] }
 0x42f   : > { %v3701_v21 = vld [vmem:[%s8986_s10 + $0x162] sm:$0xff] }
 0x430   : > { %v4331_v50 = vadd.f32 %v9993_v22, %v4280_v3  ;;  %v4024_v12 = vld [vmem:[%s8986_s10 + $0x163] sm:$0xff]  ;;  %v3729_v63 = vpack.c.bf16 %v3702_v60, %v3701_v21 }
 0x432   : > { %v4378_v9 = vmax.f32 %v4331_v50, 0.0  ;;  %v4025_v50 = vld [vmem:[%s8986_s10 + $0x16b] sm:$0xff] }
 0x433   : > { %v3867_v45 = vpop.f32.mrf.mxu2  ;;  %v3224_v47 = vpop.f32.mrf.mxu0 }
 0x434   : > { %4425 = vst.msk [vmem:[#allocation2 + $0xa8] sm:$0xff] %vm413_vm2, %v4378_v9  ;;  %v3958_v7 = vadd.f32 %v3867_v45, %v3635_v59  ;;  %v4190_v23 = vpop.f32.mrf.mxu3  ;;  %v3547_v62 = vpop.f32.mrf.mxu1  ;;  %v3313_v56 = vadd.f32 %v3224_v47, %v9672_v26  ;;  %v4052_v59 = vpack.c.bf16 %v4025_v50, %v4024_v12 }
 0x436   : > { %v4281_v28 = vadd.f32 %v4190_v23, %v3958_v7  ;;  %8329 = vmatmul.msk.bf16.gmra.mxu0 %vm671_vm1, %v3082_v49  ;;  %v3636_v27 = vadd.f32 %v3547_v62, %v3313_v56  ;;  %v3057_v56 = vld [vmem:[%s8986_s10 + $0x170] sm:$0xff] }
 0x437   : > { %8354 = vmatmul.msk.bf16.gmra.mxu1 %vm671_vm1, %v3405_v36 }
 0x438   : > { %v4332_v48 = vadd.f32 %v9993_v22, %v4281_v28  ;;  %8379 = vmatmul.msk.bf16.gmra.mxu2 %vm671_vm1, %v3728_v18 }
 0x439   : > { %8404 = vmatmul.msk.bf16.gmra.mxu3 %vm671_vm1, %v4051_v8 }
 0x43a   : > { %v4379_v5 = vmax.f32 %v4332_v48, 0.0  ;;  %v3058_v48 = vld [vmem:[%s8986_s10 + $0x178] sm:$0xff] }
 0x43b   : > { %v3870_v6 = vpop.f32.mrf.mxu2  ;;  %v3226_v11 = vpop.f32.mrf.mxu0 }
 0x43c   : > { %4426 = vst.msk [vmem:[#allocation2 + $0xb0] sm:$0xff] %vm413_vm2, %v4379_v5  ;;  %v3959_v26 = vadd.f32 %v3870_v6, %v3636_v27  ;;  %v4193_v33 = vpop.f32.mrf.mxu3  ;;  %v3549_v52 = vpop.f32.mrf.mxu1  ;;  %v3314_v44 = vadd.f32 %v3226_v11, %v9683_v2  ;;  %v3406_v2 = vpack.c.bf16 %v3379_v30, %v3378_v51  ;;  %v3380_v5 = vld [vmem:[%s8986_s10 + $0x171] sm:$0xff]  ;;  %v3381_v27 = vld [vmem:[%s8986_s10 + $0x179] sm:$0xff] }
 0x43d   : > { %v3703_v6 = vld [vmem:[%s8986_s10 + $0x172] sm:$0xff] }
 0x43e   : > { %v4282_v17 = vadd.f32 %v4193_v33, %v3959_v26  ;;  %v3637_v3 = vadd.f32 %v3549_v52, %v3314_v44  ;;  %v3704_v26 = vld [vmem:[%s8986_s10 + $0x17a] sm:$0xff] }
 0x43f   : > { %v4026_v52 = vld [vmem:[%s8986_s10 + $0x173] sm:$0xff]  ;;  %v3730_v30 = vpack.c.bf16 %v3704_v26, %v3703_v6  ;;  %v10283_v26 = vld [vmem:[%s11498_s2] ss:$0 sm:$0xff] }
 0x440   : > { %v4333_v1 = vadd.f32 %v9993_v22, %v4282_v17  ;;  %v4027_v17 = vld [vmem:[%s8986_s10 + $0x17b] sm:$0xff] }
 0x441   : > { %v4053_v60 = vpack.c.bf16 %v4027_v17, %v4026_v52 }
 0x442   : > { %v4380_v13 = vmax.f32 %v4333_v1, 0.0  ;;  %v3084_v1 = vpack.c.bf16 %v3058_v48, %v3057_v56 }
 0x443   : > { %v3872_v24 = vpop.f32.mrf.mxu2  ;;  %v3229_v32 = vpop.f32.mrf.mxu0 }
 0x444   : > { %4427 = vst.msk [vmem:[#allocation2 + $0xb8] sm:$0xff] %vm413_vm2, %v4380_v13  ;;  %v3960_v10 = vadd.f32 %v3872_v24, %v3637_v3  ;;  %v4195_v58 = vpop.f32.mrf.mxu3  ;;  %v3552_v9 = vpop.f32.mrf.mxu1  ;;  %v3315_v19 = vadd.f32 %v3229_v32, %v9690_v42 }
 0x446   : > { %v4283_v43 = vadd.f32 %v4195_v58, %v3960_v10  ;;  %8330 = vmatmul.msk.bf16.gmra.mxu0 %vm671_vm1, %v3083_v53  ;;  %v3638_v7 = vadd.f32 %v3552_v9, %v3315_v19  ;;  %v3382_v19 = vld [vmem:[%s8986_s10 + $0x181] sm:$0xff] }
 0x447   : > { %8355 = vmatmul.msk.bf16.gmra.mxu1 %vm671_vm1, %v3406_v2 }
 0x448   : > { %v4334_v45 = vadd.f32 %v9993_v22, %v4283_v43  ;;  %8380 = vmatmul.msk.bf16.gmra.mxu2 %vm671_vm1, %v3729_v63  ;;  %v3060_v43 = vld [vmem:[%s8986_s10 + $0x188] sm:$0xff] }
 0x449   : > { %8405 = vmatmul.msk.bf16.gmra.mxu3 %vm671_vm1, %v4052_v59  ;;  %v3059_v59 = vld [vmem:[%s8986_s10 + $0x180] sm:$0xff] }
 0x44a   : > { %v4381_v49 = vmax.f32 %v4334_v45, 0.0  ;;  %v3383_v45 = vld [vmem:[%s8986_s10 + $0x189] sm:$0xff] }
 0x44b   : > { %v3875_v23 = vpop.f32.mrf.mxu2  ;;  %v3231_v36 = vpop.f32.mrf.mxu0 }
 0x44c   : > { %4428 = vst.msk [vmem:[#allocation2 + $0xc0] sm:$0xff] %vm413_vm2, %v4381_v49  ;;  %v3961_v42 = vadd.f32 %v3875_v23, %v3638_v7  ;;  %v4198_v47 = vpop.f32.mrf.mxu3  ;;  %v3554_v18 = vpop.f32.mrf.mxu1  ;;  %v3316_v8 = vadd.f32 %v3231_v36, %v9701_v35  ;;  %v3407_v35 = vpack.c.bf16 %v3381_v27, %v3380_v5  ;;  %v3705_v49 = vld [vmem:[%s8986_s10 + $0x182] sm:$0xff]  ;;  %v3706_v7 = vld [vmem:[%s8986_s10 + $0x18a] sm:$0xff] }
 0x44d   : > { %v4029_v36 = vld [vmem:[%s8986_s10 + $0x18b] sm:$0xff]  ;;  %v3731_v48 = vpack.c.bf16 %v3706_v7, %v3705_v49 }
 0x44e   : > { %v4284_v62 = vadd.f32 %v4198_v47, %v3961_v42  ;;  %v3639_v11 = vadd.f32 %v3554_v18, %v3316_v8  ;;  %v4028_v47 = vld [vmem:[%s8986_s10 + $0x183] sm:$0xff] }
 0x44f   : > { %v4054_v5 = vpack.c.bf16 %v4029_v36, %v4028_v47 }
 0x450   : > { %v4335_v28 = vadd.f32 %v9993_v22, %v4284_v62  ;;  %v3085_v62 = vpack.c.bf16 %v3060_v43, %v3059_v59 }
 0x452   : > { %v4382_v33 = vmax.f32 %v4335_v28, 0.0 }
 0x453   : > { %v3877_v44 = vpop.f32.mrf.mxu2  ;;  %v3234_v51 = vpop.f32.mrf.mxu0 }
 0x454   : > { %4429 = vst.msk [vmem:[#allocation2 + $0xc8] sm:$0xff] %vm413_vm2, %v4382_v33  ;;  %v3962_v41 = vadd.f32 %v3877_v44, %v3639_v11  ;;  %v4200_v34 = vpop.f32.mrf.mxu3  ;;  %v3557_v21 = vpop.f32.mrf.mxu1  ;;  %v3317_v3 = vadd.f32 %v3234_v51, %v9708_v61 }
 0x456   : > { %v4285_v13 = vadd.f32 %v4200_v34, %v3962_v41  ;;  %8331 = vmatmul.msk.bf16.gmra.mxu0 %vm671_vm1, %v3084_v1  ;;  %v3640_v24 = vadd.f32 %v3557_v21, %v3317_v3  ;;  %v3062_v21 = vld [vmem:[%s8986_s10 + $0x198] sm:$0xff] }
 0x457   : > { %8356 = vmatmul.msk.bf16.gmra.mxu1 %vm671_vm1, %v3407_v35  ;;  %v3707_v3 = vld [vmem:[%s8986_s10 + $0x192] sm:$0xff] }
 0x458   : > { %v4336_v12 = vadd.f32 %v9993_v22, %v4285_v13  ;;  %8381 = vmatmul.msk.bf16.gmra.mxu2 %vm671_vm1, %v3730_v30  ;;  %v3061_v30 = vld [vmem:[%s8986_s10 + $0x190] sm:$0xff]  ;;  %v3385_v13 = vld [vmem:[%s8986_s10 + $0x199] sm:$0xff] }
 0x459   : > { %8406 = vmatmul.msk.bf16.gmra.mxu3 %vm671_vm1, %v4053_v60  ;;  %v3384_v60 = vld [vmem:[%s8986_s10 + $0x191] sm:$0xff] }
 0x45a   : > { %v4383_v50 = vmax.f32 %v4336_v12, 0.0  ;;  %v3708_v12 = vld [vmem:[%s8986_s10 + $0x19a] sm:$0xff] }
 0x45b   : > { %v3880_v53 = vpop.f32.mrf.mxu2  ;;  %v3236_v58 = vpop.f32.mrf.mxu0 }
 0x45c   : > { %4430 = vst.msk [vmem:[#allocation2 + $0xd0] sm:$0xff] %vm413_vm2, %v4383_v50  ;;  %v3963_v61 = vadd.f32 %v3880_v53, %v3640_v24  ;;  %v4203_v10 = vpop.f32.mrf.mxu3  ;;  %v3559_v32 = vpop.f32.mrf.mxu1  ;;  %v3318_v63 = vadd.f32 %v3236_v58, %v9719_v4  ;;  %v3408_v4 = vpack.c.bf16 %v3383_v45, %v3382_v19  ;;  %v4030_v53 = vld [vmem:[%s8986_s10 + $0x193] sm:$0xff]  ;;  %v3086_v58 = vpack.c.bf16 %v3062_v21, %v3061_v30 }
 0x45e   : > { %v4286_v2 = vadd.f32 %v4203_v10, %v3963_v61  ;;  %v3641_v42 = vadd.f32 %v3559_v32, %v3318_v63  ;;  %v4031_v61 = vld [vmem:[%s8986_s10 + $0x19b] sm:$0xff] }
 0x45f   : > { %v4055_v43 = vpack.c.bf16 %v4031_v61, %v4030_v53 }
 0x460   : > { %v4337_v9 = vadd.f32 %v9993_v22, %v4286_v2 }
 0x462   : > { %v4384_v23 = vmax.f32 %v4337_v9, 0.0  ;;  %v3732_v9 = vpack.c.bf16 %v3708_v12, %v3707_v3 }
 0x463   : > { %v3882_v18 = vpop.f32.mrf.mxu2  ;;  %v3239_v56 = vpop.f32.mrf.mxu0 }
 0x464   : > { %4431 = vst.msk [vmem:[#allocation2 + $0xd8] sm:$0xff] %vm413_vm2, %v4384_v23  ;;  %v3964_v8 = vadd.f32 %v3882_v18, %v3641_v42  ;;  %v4205_v28 = vpop.f32.mrf.mxu3  ;;  %v3562_v22 = vpop.f32.mrf.mxu1  ;;  %v3319_v6 = vadd.f32 %v3239_v56, %v9726_v0 }
 0x466   : > { %v4287_v27 = vadd.f32 %v4205_v28, %v3964_v8  ;;  %8332 = vmatmul.msk.bf16.gmra.mxu0 %vm671_vm1, %v3085_v62  ;;  %v3642_v11 = vadd.f32 %v3562_v22, %v3319_v6  ;;  %v8821_v62 = vld [vmem:[%s11501_s5 + $0x58] sm:$0xff]  ;;  %v3386_v22 = vld [vmem:[%s8986_s10 + $0x1a1] sm:$0x7f] }
 0x467   : > { %8357 = vmatmul.msk.bf16.gmra.mxu1 %vm671_vm1, %v3408_v4  ;;  %v8825_v8 = vld [vmem:[%s11501_s5 + $0x78] sm:$0xff]  ;;  %6784 = vmatpush.bf16.msra.mxu2 %v8821_v62 }
 0x468   : > { %v4338_v33 = vadd.f32 %v10283_v26, %v4287_v27  ;;  %8382 = vmatmul.msk.bf16.gmra.mxu2 %vm671_vm1, %v3731_v48  ;;  %7174 = vmatpush.bf16.msra.mxu3 %v8825_v8  ;;  %v3063_v48 = vld [vmem:[%s8986_s10 + $0x1a0] sm:$0x7f] }
 0x469   : > { %8407 = vmatmul.msk.bf16.gmra.mxu3 %vm671_vm1, %v4054_v5  ;;  %v3709_v5 = vld [vmem:[%s8986_s10 + $0x1a2] sm:$0x7f]  ;;  %v5407_v8 = vld [vmem:[#allocation2 + $0x19] sm:$0xff] }
 0x46a   : > { %v4385_v0 = vmax.f32 %v4338_v33, 0.0  ;;  %v4032_v33 = vld [vmem:[%s8986_s10 + $0x1a3] sm:$0x7f] }
 0x46b   : > { %v3885_v52 = vpop.f32.mrf.mxu2  ;;  %v3241_v1 = vpop.f32.mrf.mxu0 }
 0x46c   : > { %4432 = vst.msk [vmem:[#allocation2 + $0xe0] sm:$0xff] %vm413_vm2, %v4385_v0  ;;  %v3965_v17 = vadd.f32 %v3885_v52, %v3642_v11  ;;  %v4208_v44 = vpop.f32.mrf.mxu3  ;;  %v3564_v41 = vpop.f32.mrf.mxu1  ;;  %v3320_v51 = vadd.f32 %v3241_v1, %v9737_v40  ;;  %v3409_v40 = vpack.c.bf16 %v3385_v13, %v3384_v60  ;;  %v3087_v11 = vpack.c.bf16 %v3063_v48, %v3063_v48 }
 0x46d   : > { %v3410_v1 = vpack.c.bf16 %v3386_v22, %v3386_v22 }
 0x46e   : > { %v4288_v34 = vadd.f32 %v4208_v44, %v3965_v17  ;;  %v3643_v24 = vadd.f32 %v3564_v41, %v3320_v51  ;;  %v3733_v41 = vpack.c.bf16 %v3709_v5, %v3709_v5 }
 0x470   : > { %v4339_v35 = vadd.f32 %v10283_v26, %v4288_v34  ;;  %v8813_v34 = vld [vmem:[%s11501_s5 + $0x18] sm:$0xff] }
 0x471   : > { %6447 = vmatpush.bf16.msra.mxu1 %v8813_v34 }
 0x472   : > { %v4386_v50 = vmax.f32 %v4339_v35, 0.0  ;;  %v4056_v35 = vpack.c.bf16 %v4032_v33, %v4032_v33 }
 0x473   : > { %v3887_v10 = vpop.f32.mrf.mxu2  ;;  %v3244_v63 = vpop.f32.mrf.mxu0 }
 0x474   : > { %4433 = vst.msk [vmem:[#allocation2 + $0xe8] sm:$0xff] %vm413_vm2, %v4386_v50  ;;  %v3966_v32 = vadd.f32 %v3887_v10, %v3643_v24  ;;  %v4210_v2 = vpop.f32.mrf.mxu3  ;;  %v3567_v59 = vpop.f32.mrf.mxu1  ;;  %v3321_v45 = vadd.f32 %v3244_v63, %v9750_v54  ;;  %v4455_v63 = vld [vmem:[#allocation2] sm:$0xff] }
 0x476   : > { %v4289_v19 = vadd.f32 %v4210_v2, %v3966_v32  ;;  %8333 = vmatmul.msk.bf16.gmra.mxu0 %vm671_vm1, %v3086_v58  ;;  %v3644_v23 = vadd.f32 %v3567_v59, %v3321_v45  ;;  %v4534_v32 = vld [vmem:[#allocation2 + $0x1] sm:$0xff]  ;;  %v4535_v2 = vld [vmem:[#allocation2 + $0x9] sm:$0xff] }
 0x477   : > { %8358 = vmatmul.msk.bf16.gmra.mxu1 %vm671_vm1, %v3409_v40  ;;  %v4456_v40 = vld [vmem:[#allocation2 + $0x8] sm:$0xff]  ;;  %v10336_v45 = vld [vmem:[#allocation2 + $0x20] sm:$0xff] }
 0x478   : > { %v4340_v49 = vadd.f32 %v10283_v26, %v4289_v19  ;;  %8383 = vmatmul.msk.bf16.gmra.mxu2 %vm671_vm1, %v3732_v9  ;;  %v4584_v19 = vpack.c.bf16 %v4535_v2, %v4534_v32 }
 0x479   : > { %8408 = vmatmul.msk.bf16.gmra.mxu3 %vm671_vm1, %v4055_v43 }
 0x47a   : > { %v4387_v7 = vmax.f32 %v4340_v49, 0.0 }
 0x47b   : > { %v3890_v42 = vpop.f32.mrf.mxu2  ;;  %v3246_v36 = vpop.f32.mrf.mxu0 }
 0x47c   : > { %4434 = vst.msk [vmem:[#allocation2 + $0xf0] sm:$0xff] %vm413_vm2, %v4387_v7  ;;  %v3967_v47 = vadd.f32 %v3890_v42, %v3644_v23  ;;  %v4213_v54 = vpop.f32.mrf.mxu3  ;;  %v3569_v18 = vpop.f32.mrf.mxu1  ;;  %v3322_v56 = vadd.f32 %v3246_v36, %v9763_v15  ;;  %v8817_v15 = vld [vmem:[%s11501_s5 + $0x38] sm:$0xff]  ;;  %v4505_v42 = vpack.c.bf16 %v4456_v40, %v4455_v63 }
 0x47d   : > { %6199 = vmatpush.bf16.msra.mxu0 %v8817_v15 }
 0x47e   : > { %v4290_v28 = vadd.f32 %v4213_v54, %v3967_v47  ;;  %v3645_v6 = vadd.f32 %v3569_v18, %v3322_v56  ;;  %v10339_v47 = vld [vmem:[#allocation2 + $0x21] sm:$0xff]  ;;  %v5056_v54 = vld [vmem:[#allocation2 + $0x18] sm:$0xff] }
 0x47f   : > { %v5106_v62 = vpack.c.bf16 %v10336_v45, %v5056_v54 }
 0x480   : > { %v4341_v4 = vadd.f32 %v10283_v26, %v4290_v28  ;;  %v5457_v28 = vpack.c.bf16 %v10339_v47, %v5407_v8 }
 0x482   : > { %v4388_v27 = vmax.f32 %v4341_v4, 0.0 }
 0x483   : > { %v3892_v0 = vpop.f32.mrf.mxu2  ;;  %v3249_v44 = vpop.f32.mrf.mxu0 }
 0x484   : > { %4435 = vst.msk [vmem:[#allocation2 + $0xf8] sm:$0xff] %vm413_vm2, %v4388_v27  ;;  %v3968_v52 = vadd.f32 %v3892_v0, %v3645_v6  ;;  %v4215_v17 = vpop.f32.mrf.mxu3  ;;  %v3572_v51 = vpop.f32.mrf.mxu1  ;;  %v3323_v21 = vadd.f32 %v3249_v44, %v9770_v38 }
 0x486   : > { %v4291_v30 = vadd.f32 %v4215_v17, %v3968_v52  ;;  %8334 = vmatmul.msk.bf16.gmra.mxu0 %vm671_vm1, %v3087_v11  ;;  %v3646_v3 = vadd.f32 %v3572_v51, %v3323_v21 }
 0x487   : > { %8359 = vmatmul.msk.bf16.gmra.mxu1 %vm671_vm1, %v3410_v1  ;;  %v4457_v1 = vld [vmem:[#allocation2 + $0x10] sm:$0xff] }
 0x488   : > { %v4342_v60 = vadd.f32 %v10283_v26, %v4291_v30  ;;  %8384 = vmatmul.msk.bf16.gmra.mxu2 %vm671_vm1, %v3733_v41  ;;  %v10352_v41 = vld [vmem:[#allocation2 + $0x30] sm:$0xff] }
 0x489   : > { %8409 = vmatmul.msk.bf16.gmra.mxu3 %vm671_vm1, %v4056_v35  ;;  %v4536_v35 = vld [vmem:[#allocation2 + $0x11] sm:$0xff] }
 0x48a   : > { %v4389_v13 = vmax.f32 %v4342_v60, 0.0  ;;  %v10355_v30 = vld [vmem:[#allocation2 + $0x31] sm:$0xff]  ;;  %v4585_v60 = vpack.c.bf16 %v5407_v8, %v4536_v35 }
 0x48b   : > { %v3895_v12 = vpop.f32.mrf.mxu2  ;;  %v3251_v38 = vpop.f32.mrf.mxu0  ;;  %v10389_v35 = vld [vmem:[#allocation2 + $0x51] sm:$0xff] }
 0x48c   : > { %4436 = vst.msk [vmem:[#allocation2 + $0x100] sm:$0xff] %vm413_vm2, %v4389_v13  ;;  %v3969_v50 = vadd.f32 %v3895_v12, %v3646_v3  ;;  %v4218_v24 = vpop.f32.mrf.mxu3  ;;  %v3574_v53 = vpop.f32.mrf.mxu1  ;;  %v3324_v10 = vadd.f32 %v3251_v38, %v9781_v25  ;;  %v5058_v13 = vld [vmem:[#allocation2 + $0x28] sm:$0xff]  ;;  %v4506_v12 = vpack.c.bf16 %v5056_v54, %v4457_v1  ;;  %v10386_v1 = vld [vmem:[#allocation2 + $0x50] sm:$0xff] }
 0x48d   : > { %v10371_v54 = vld [vmem:[#allocation2 + $0x41] sm:$0xff] }
 0x48e   : > { %v4292_v61 = vadd.f32 %v4218_v24, %v3969_v50  ;;  %v3647_v59 = vadd.f32 %v3574_v53, %v3324_v10  ;;  %v5107_v50 = vpack.c.bf16 %v10352_v41, %v5058_v13  ;;  %v5409_v24 = vld [vmem:[#allocation2 + $0x29] sm:$0xff] }
 0x48f   : > { %v5458_v38 = vpack.c.bf16 %v10355_v30, %v5409_v24 }
 0x490   : > { %v4343_v58 = vadd.f32 %v10283_v26, %v4292_v61 }
 0x492   : > { %v4390_v9 = vmax.f32 %v4343_v58, 0.0 }
 0x493   : > { %v3897_v43 = vpop.f32.mrf.mxu2  ;;  %v3254_v23 = vpop.f32.mrf.mxu0 }
 0x494   : > { %4437 = vst.msk [vmem:[#allocation2 + $0x108] sm:$0xff] %vm413_vm2, %v4390_v9  ;;  %v3970_v49 = vadd.f32 %v3897_v43, %v3647_v59  ;;  %v4220_v7 = vpop.f32.mrf.mxu3  ;;  %v3577_v25 = vpop.f32.mrf.mxu1  ;;  %v3325_v18 = vadd.f32 %v3254_v23, %v9788_v55 }
 0x496   : > { %v4293_v36 = vadd.f32 %v4220_v7, %v3970_v49  ;;  %8422 = vmatmul.msk.bf16.vlgmr.msrb.gmra.mxu0 %vm413_vm2, %v4584_v19  ;;  %v3648_v48 = vadd.f32 %v3577_v25, %v3325_v18  ;;  %v10368_v7 = vld [vmem:[#allocation2 + $0x40] sm:$0xff]  ;;  %v4586_v18 = vpack.c.bf16 %v5409_v24, %v10339_v47 }
 0x497   : > { %8455 = vmatmul.msk.bf16.vlgmr.msrb.gmra.mxu1 %vm413_vm2, %v4505_v42 }
 0x498   : > { %v4344_v56 = vadd.f32 %v10283_v26, %v4293_v36  ;;  %8492 = vmatmul.msk.bf16.vlgmr.msrb.gmra.mxu2 %vm413_vm2, %v5106_v62  ;;  %v5060_v62 = vld [vmem:[#allocation2 + $0x38] sm:$0xff] }
 0x499   : > { %8529 = vmatmul.msk.bf16.vlgmr.msrb.gmra.mxu3 %vm413_vm2, %v5457_v28  ;;  %v4507_v28 = vpack.c.bf16 %v5058_v13, %v10336_v45  ;;  %v5062_v13 = vld [vmem:[#allocation2 + $0x48] sm:$0xff] }
 0x49a   : > { %v4391_v4 = vmax.f32 %v4344_v56, 0.0  ;;  %v5108_v56 = vpack.c.bf16 %v10368_v7, %v5060_v62 }
 0x49b   : > { %v3900_v22 = vpop.f32.mrf.mxu2  ;;  %v3256_v27 = vpop.f32.mrf.mxu0 }
 0x49c   : > { %4438 = vst.msk [vmem:[#allocation2 + $0x110] sm:$0xff] %vm413_vm2, %v4391_v4  ;;  %v3971_v55 = vadd.f32 %v3900_v22, %v3648_v48  ;;  %v4223_v5 = vpop.f32.mrf.mxu3  ;;  %v3579_v6 = vpop.f32.mrf.mxu1  ;;  %v3326_v0 = vadd.f32 %v3256_v27, %v9799_v29  ;;  %v5411_v4 = vld [vmem:[#allocation2 + $0x39] sm:$0xff] }
 0x49d   : > { %v5459_v48 = vpack.c.bf16 %v10371_v54, %v5411_v4 }
 0x49e   : > { %v4294_v33 = vadd.f32 %v4223_v5, %v3971_v55  ;;  %v3649_v17 = vadd.f32 %v3579_v6, %v3326_v0 }
 0x4a0   : > { %v4345_v11 = vadd.f32 %v10283_v26, %v4294_v33 }
 0x4a2   : > { %v4392_v52 = vmax.f32 %v4345_v11, 0.0 }
 0x4a3   : > { %v3902_v44 = vpop.f32.mrf.mxu2  ;;  %v3259_v51 = vpop.f32.mrf.mxu0 }
 0x4a4   : > { %4439 = vst.msk [vmem:[#allocation2 + $0x118] sm:$0xff] %vm413_vm2, %v4392_v52  ;;  %v3972_v15 = vadd.f32 %v3902_v44, %v3649_v17  ;;  %v4225_v34 = vpop.f32.mrf.mxu3  ;;  %v3582_v21 = vpop.f32.mrf.mxu1  ;;  %v3327_v3 = vadd.f32 %v3259_v51, %v9806_v16 }
 0x4a6   : > { %v4295_v29 = vadd.f32 %v4225_v34, %v3972_v15  ;;  %8423 = vmatmul.msk.bf16.gmra.mxu0 %vm413_vm2, %v4585_v60  ;;  %v3650_v10 = vadd.f32 %v3582_v21, %v3327_v3  ;;  %v4587_v60 = vpack.c.bf16 %v5411_v4, %v10355_v30  ;;  %v4508_v3 = vpack.c.bf16 %v5060_v62, %v10352_v41 }
 0x4a7   : > { %8456 = vmatmul.msk.bf16.gmra.mxu1 %vm413_vm2, %v4506_v12  ;;  %v5109_v12 = vpack.c.bf16 %v10386_v1, %v5062_v13  ;;  %v4509_v62 = vpack.c.bf16 %v5062_v13, %v10368_v7  ;;  %v5066_v13 = vld [vmem:[#allocation2 + $0x68] sm:$0xff] }
 0x4a8   : > { %v4346_v53 = vadd.f32 %v10283_v26, %v4295_v29  ;;  %8493 = vmatmul.msk.bf16.gmra.mxu2 %vm413_vm2, %v5107_v50  ;;  %v5413_v50 = vld [vmem:[#allocation2 + $0x49] sm:$0xff] }
 0x4a9   : > { %8530 = vmatmul.msk.bf16.gmra.mxu3 %vm413_vm2, %v5458_v38  ;;  %v5460_v24 = vpack.c.bf16 %v10389_v35, %v5413_v50 }
 0x4aa   : > { %v4393_v61 = vmax.f32 %v4346_v53, 0.0 }
 0x4ab   : > { %v3905_v58 = vpop.f32.mrf.mxu2  ;;  %v3261_v2 = vpop.f32.mrf.mxu0 }
 0x4ac   : > { %4440 = vst.msk [vmem:[#allocation2 + $0x120] sm:$0xff] %vm413_vm2, %v4393_v61  ;;  %v3973_v16 = vadd.f32 %v3905_v58, %v3650_v10  ;;  %v4228_v32 = vpop.f32.mrf.mxu3  ;;  %v3584_v63 = vpop.f32.mrf.mxu1  ;;  %v3328_v9 = vadd.f32 %v3261_v2, %v9817_v39 }
 0x4ae   : > { %v4296_v40 = vadd.f32 %v4228_v32, %v3973_v16  ;;  %v3651_v19 = vadd.f32 %v3584_v63, %v3328_v9 }
 0x4b0   : > { %v4347_v59 = vadd.f32 %v10283_v26, %v4296_v40 }
 0x4b2   : > { %v4394_v43 = vmax.f32 %v4347_v59, 0.0  ;;  %v10404_v59 = vld [vmem:[#allocation2 + $0x60] sm:$0xff] }
 0x4b3   : > { %v3907_v49 = vpop.f32.mrf.mxu2  ;;  %v3264_v25 = vpop.f32.mrf.mxu0 }
 0x4b4   : > { %4441 = vst.msk [vmem:[#allocation2 + $0x128] sm:$0xff] %vm413_vm2, %v4394_v43  ;;  %v3974_v23 = vadd.f32 %v3907_v49, %v3651_v19  ;;  %v4230_v42 = vpop.f32.mrf.mxu3  ;;  %v3587_v36 = vpop.f32.mrf.mxu1  ;;  %v3329_v39 = vadd.f32 %v3264_v25, %v9824_v31  ;;  %v4588_v25 = vpack.c.bf16 %v5413_v50, %v10371_v54 }
 0x4b6   : > { %v4297_v8 = vadd.f32 %v4230_v42, %v3974_v23  ;;  %8424 = vmatmul.msk.bf16.gmra.mxu0 %vm413_vm2, %v4586_v18  ;;  %v3652_v55 = vadd.f32 %v3587_v36, %v3329_v39  ;;  %v10407_v23 = vld [vmem:[#allocation2 + $0x61] sm:$0xff]  ;;  %v5064_v36 = vld [vmem:[#allocation2 + $0x58] sm:$0xff] }
 0x4b7   : > { %8457 = vmatmul.msk.bf16.gmra.mxu1 %vm413_vm2, %v4507_v28  ;;  %v5415_v39 = vld [vmem:[#allocation2 + $0x59] sm:$0xff] }
 0x4b8   : > { %v4348_v22 = vadd.f32 %v10283_v26, %v4297_v8  ;;  %8494 = vmatmul.msk.bf16.gmra.mxu2 %vm413_vm2, %v5108_v56  ;;  %v5110_v8 = vpack.c.bf16 %v10404_v59, %v5064_v36  ;;  %v5461_v28 = vpack.c.bf16 %v10407_v23, %v5415_v39 }
 0x4b9   : > { %8531 = vmatmul.msk.bf16.gmra.mxu3 %vm413_vm2, %v5459_v48 }
 0x4ba   : > { %v4395_v47 = vmax.f32 %v4348_v22, 0.0 }
 0x4bb   : > { %v3910_v31 = vpop.f32.mrf.mxu2  ;;  %v3266_v27 = vpop.f32.mrf.mxu0 }
 0x4bc   : > { %4442 = vst.msk [vmem:[#allocation2 + $0x130] sm:$0xff] %vm413_vm2, %v4395_v47  ;;  %v3975_v45 = vadd.f32 %v3910_v31, %v3652_v55  ;;  %v4233_v5 = vpop.f32.mrf.mxu3  ;;  %v3589_v6 = vpop.f32.mrf.mxu1  ;;  %v3330_v0 = vadd.f32 %v3266_v27, %v9835_v14  ;;  %v11524_v31 = vld [vmem:[#allocation9_spill] sm:$0xff] }
 0x4be   : > { %v4298_v33 = vadd.f32 %v4233_v5, %v3975_v45  ;;  %v3653_v17 = vadd.f32 %v3589_v6, %v3330_v0  ;;  %v10422_v0 = vld [vmem:[#allocation2 + $0x70] sm:$0xff] }
 0x4bf   : > { %v5111_v50 = vpack.c.bf16 %v10422_v0, %v5066_v13 }
 0x4c0   : > { %v4349_v11 = vadd.f32 %v10283_v26, %v4298_v33 }
 0x4c2   : > { %v4396_v52 = vmax.f32 %v4349_v11, 0.0 }
 0x4c3   : > { %v3912_v44 = vpop.f32.mrf.mxu2  ;;  %v3269_v51 = vpop.f32.mrf.mxu0 }
 0x4c4   : > { %4443 = vst.msk [vmem:[#allocation2 + $0x138] sm:$0xff] %vm413_vm2, %v4396_v52  ;;  %v3976_v15 = vadd.f32 %v3912_v44, %v3653_v17  ;;  %v4235_v34 = vpop.f32.mrf.mxu3  ;;  %v3592_v21 = vpop.f32.mrf.mxu1  ;;  %v3331_v14 = vadd.f32 %v3269_v51, %v9842_v57  ;;  %v10425_v44 = vld [vmem:[#allocation2 + $0x71] sm:$0xff] }
 0x4c6   : > { %v4299_v29 = vadd.f32 %v4235_v34, %v3976_v15  ;;  %8425 = vmatmul.msk.bf16.gmra.mxu0 %vm413_vm2, %v4587_v60  ;;  %v3654_v53 = vadd.f32 %v3592_v21, %v3331_v14  ;;  %v8820_v15 = vld [vmem:[%s11501_s5 + $0x50] sm:$0xff]  ;;  %v4589_v21 = vpack.c.bf16 %v5415_v39, %v10389_v35  ;;  %v4510_v60 = vpack.c.bf16 %v5064_v36, %v10386_v1 }
 0x4c7   : > { %8458 = vmatmul.msk.bf16.gmra.mxu1 %vm413_vm2, %v4508_v3  ;;  %v8824_v34 = vld [vmem:[%s11501_s5 + $0x70] sm:$0xff]  ;;  %6785 = vmatpush.bf16.msra.mxu2 %v8820_v15  ;;  %v4511_v39 = vpack.c.bf16 %v5066_v13, %v10404_v59  ;;  %v5070_v13 = vld [vmem:[#allocation2 + $0x88] sm:$0xff] }
 0x4c8   : > { %v4350_v38 = vadd.f32 %v10283_v26, %v4299_v29  ;;  %8495 = vmatmul.msk.bf16.gmra.mxu2 %vm413_vm2, %v5109_v12  ;;  %v8816_v29 = vld [vmem:[%s11501_s5 + $0x30] sm:$0xff]  ;;  %7175 = vmatpush.bf16.msra.mxu3 %v8824_v34 }
 0x4c9   : > { %8532 = vmatmul.msk.bf16.gmra.mxu3 %vm413_vm2, %v5460_v24  ;;  %v8812_v14 = vld [vmem:[%s11501_s5 + $0x10] sm:$0xff]  ;;  %6200 = vmatpush.bf16.msra.mxu0 %v8816_v29 }
 0x4ca   : > { %v4397_v30 = vmax.f32 %v4350_v38, 0.0  ;;  %v5417_v24 = vld [vmem:[#allocation2 + $0x69] sm:$0xff]  ;;  %6448 = vmatpush.bf16.msra.mxu1 %v8812_v14  ;;  %v11529_v14 = vld [vmem:[#allocation8_spill] sm:$0xff] }
 0x4cb   : > { %v3915_v57 = vpop.f32.mrf.mxu2  ;;  %v3271_v10 = vpop.f32.mrf.mxu0  ;;  %v5462_v1 = vpack.c.bf16 %v10425_v44, %v5417_v24  ;;  %v4590_v36 = vpack.c.bf16 %v5417_v24, %v10407_v23  ;;  %v5421_v24 = vld [vmem:[#allocation2 + $0x89] sm:$0xff] }
 0x4cc   : > { %4444 = vst.msk [vmem:[#allocation2 + $0x140] sm:$0xff] %vm413_vm2, %v4397_v30  ;;  %v3977_v41 = vadd.f32 %v3915_v57, %v3654_v53  ;;  %v4238_v61 = vpop.f32.mrf.mxu3  ;;  %v3594_v58 = vpop.f32.mrf.mxu1  ;;  %v3332_v32 = vadd.f32 %v3271_v10, %v9853_v46 }
 0x4ce   : > { %v4300_v16 = vadd.f32 %v4238_v61, %v3977_v41  ;;  %v3655_v40 = vadd.f32 %v3594_v58, %v3332_v32  ;;  %v11525_v58 = vld [vmem:[#allocation5_spill] sm:$0xff] }
 0x4d0   : > { %v4351_v2 = vadd.f32 %v10283_v26, %v4300_v16 }
 0x4d2   : > { %v4398_v63 = vmax.f32 %v4351_v2, 0.0 }
 0x4d3   : > { %v3917_v9 = vpop.f32.mrf.mxu2  ;;  %v3274_v49 = vpop.f32.mrf.mxu0 }
 0x4d4   : > { %4445 = vst.msk [vmem:[#allocation2 + $0x148] sm:$0xff] %vm413_vm2, %v4398_v63  ;;  %v3978_v43 = vadd.f32 %v3917_v9, %v3655_v40  ;;  %v4240_v19 = vpop.f32.mrf.mxu3  ;;  %v3597_v42 = vpop.f32.mrf.mxu1  ;;  %v3333_v46 = vadd.f32 %v3274_v49, %v9860_v20  ;;  %v10452_v9 = vld [vmem:[#allocation2 + $0x80] sm:$0xff] }
 0x4d6   : > { %v4301_v18 = vadd.f32 %v4240_v19, %v3978_v43  ;;  %8426 = vmatmul.msk.bf16.gmra.mxu0 %vm413_vm2, %v4588_v25  ;;  %v3656_v4 = vadd.f32 %v3597_v42, %v3333_v46  ;;  %v10455_v42 = vld [vmem:[#allocation2 + $0x81] sm:$0xff] }
 0x4d7   : > { %8459 = vmatmul.msk.bf16.gmra.mxu1 %vm413_vm2, %v4509_v62  ;;  %v11526_v62 = vld [vmem:[#allocation6_spill] sm:$0xff] }
 0x4d8   : > { %v4352_v56 = vadd.f32 %v10283_v26, %v4301_v18  ;;  %8496 = vmatmul.msk.bf16.gmra.mxu2 %vm413_vm2, %v5110_v8  ;;  %v5068_v18 = vld [vmem:[#allocation2 + $0x78] sm:$0xff] }
 0x4d9   : > { %8533 = vmatmul.msk.bf16.gmra.mxu3 %vm413_vm2, %v5461_v28  ;;  %v5112_v28 = vpack.c.bf16 %v10452_v9, %v5068_v18 }
 0x4da   : > { %v4399_v54 = vmax.f32 %v4352_v56, 0.0  ;;  %v5419_v56 = vld [vmem:[#allocation2 + $0x79] sm:$0xff] }
 0x4db   : > { %v3920_v20 = vpop.f32.mrf.mxu2  ;;  %v3276_v22 = vpop.f32.mrf.mxu0 }
 0x4dc   : > { %4446 = vst.msk [vmem:[#allocation2 + $0x150] sm:$0xff] %vm413_vm2, %v4399_v54  ;;  %v3979_v7 = vadd.f32 %v3920_v20, %v3656_v4  ;;  %v4243_v48 = vpop.f32.mrf.mxu3  ;;  %v3599_v47 = vpop.f32.mrf.mxu1  ;;  %v3334_v45 = vadd.f32 %v3276_v22, %v11524_v31  ;;  %v5463_v54 = vpack.c.bf16 %v10455_v42, %v5419_v56 }
 0x4de   : > { %v4302_v55 = vadd.f32 %v4243_v48, %v3979_v7  ;;  %v3657_v6 = vadd.f32 %v3599_v47, %v3334_v45  ;;  %v11528_v45 = vld [vmem:[#allocation7_spill] sm:$0xff] }
 0x4e0   : > { %v4353_v5 = vadd.f32 %v10283_v26, %v4302_v55  ;;  %v11527_v55 = vmov 0.0  }
 0x4e1   : > { %472 = vst.msk [vmem:[#allocation3 + $0x18] sm:$0xff] %vm468_vm3, %v11527_v55 }
 0x4e2   : > { %v4400_v27 = vmax.f32 %v4353_v5, 0.0  ;;  %469 = vst.msk [vmem:[#allocation3] sm:$0xff] %vm468_vm3, %v11527_v55 }
 0x4e3   : > { %v3922_v33 = vpop.f32.mrf.mxu2  ;;  %v3279_v17 = vpop.f32.mrf.mxu0  ;;  %470 = vst.msk [vmem:[#allocation3 + $0x8] sm:$0xff] %vm468_vm3, %v11527_v55 }
 0x4e4   : > { %4447 = vst.msk [vmem:[#allocation2 + $0x158] sm:$0xff] %vm413_vm2, %v4400_v27  ;;  %v3980_v11 = vadd.f32 %v3922_v33, %v3657_v6  ;;  %v4245_v52 = vpop.f32.mrf.mxu3  ;;  %v3602_v51 = vpop.f32.mrf.mxu1  ;;  %v3335_v12 = vadd.f32 %v3279_v17, %v9878_v37 }
 0x4e5   : > { %471 = vst.msk [vmem:[#allocation3 + $0x10] sm:$0xff] %vm468_vm3, %v11527_v55 }
 0x4e6   : > { %v4303_v3 = vadd.f32 %v4245_v52, %v3980_v11  ;;  %8427 = vmatmul.msk.bf16.gmra.mxu0 %vm413_vm2, %v4589_v21  ;;  %v3658_v38 = vadd.f32 %v3602_v51, %v3335_v12  ;;  %473 = vst.msk [vmem:[#allocation3 + $0x20] sm:$0xff] %vm468_vm3, %v11527_v55  ;;  %v10482_v52 = vld [vmem:[#allocation2 + $0x90] sm:$0xff]  ;;  %v4512_v12 = vpack.c.bf16 %v5068_v18, %v10422_v0 }
 0x4e7   : > { %8460 = vmatmul.msk.bf16.gmra.mxu1 %vm413_vm2, %v4510_v60  ;;  %474 = vst.msk [vmem:[#allocation3 + $0x28] sm:$0xff] %vm468_vm3, %v11527_v55  ;;  %v10487_v51 = vld [vmem:[#allocation2 + $0x91] sm:$0xff]  ;;  %v4591_v60 = vpack.c.bf16 %v5419_v56, %v10425_v44 }
 0x4e8   : > { %v4354_v35 = vadd.f32 %v10283_v26, %v4303_v3  ;;  %8497 = vmatmul.msk.bf16.gmra.mxu2 %vm413_vm2, %v5111_v50  ;;  %475 = vst.msk [vmem:[#allocation3 + $0x30] sm:$0xff] %vm468_vm3, %v11527_v55  ;;  %v5113_v50 = vpack.c.bf16 %v10482_v52, %v5070_v13 }
 0x4e9   : > { %8534 = vmatmul.msk.bf16.gmra.mxu3 %vm413_vm2, %v5462_v1  ;;  %476 = vst.msk [vmem:[#allocation3 + $0x38] sm:$0xff] %vm468_vm3, %v11527_v55  ;;  %v5464_v1 = vpack.c.bf16 %v10487_v51, %v5421_v24 }
 0x4ea   : > { %v4401_v37 = vmax.f32 %v4354_v35, 0.0  ;;  %477 = vst.msk [vmem:[#allocation3 + $0x40] sm:$0xff] %vm468_vm3, %v11527_v55 }
 0x4eb   : > { %v3925_v30 = vpop.f32.mrf.mxu2  ;;  %v3281_v41 = vpop.f32.mrf.mxu0  ;;  %478 = vst.msk [vmem:[#allocation3 + $0x48] sm:$0xff] %vm468_vm3, %v11527_v55 }
 0x4ec   : > { %4448 = vst.msk [vmem:[#allocation2 + $0x160] sm:$0xff] %vm413_vm2, %v4401_v37  ;;  %v3981_v53 = vadd.f32 %v3925_v30, %v3658_v38  ;;  %v4248_v57 = vpop.f32.mrf.mxu3  ;;  %v3604_v61 = vpop.f32.mrf.mxu1  ;;  %v3336_v16 = vadd.f32 %v3281_v41, %v11525_v58 }
 0x4ed   : > { %479 = vst.msk [vmem:[#allocation3 + $0x50] sm:$0xff] %vm468_vm3, %v11527_v55 }
 0x4ee   : > { %v4304_v10 = vadd.f32 %v4248_v57, %v3981_v53  ;;  %v3659_v63 = vadd.f32 %v3604_v61, %v3336_v16  ;;  %480 = vst.msk [vmem:[#allocation3 + $0x58] sm:$0xff] %vm468_vm3, %v11527_v55  ;;  %v10527_v16 = vld [vmem:[#allocation2 + $0xa0] sm:$0xff] }
 0x4ef   : > { %481 = vst.msk [vmem:[#allocation3 + $0x60] sm:$0xff] %vm468_vm3, %v11527_v55 }
 0x4f0   : > { %v4355_v32 = vadd.f32 %v10283_v26, %v4304_v10  ;;  %482 = vst.msk [vmem:[#allocation3 + $0x68] sm:$0xff] %vm468_vm3, %v11527_v55 }
 0x4f1   : > { %483 = vst.msk [vmem:[#allocation3 + $0x70] sm:$0xff] %vm468_vm3, %v11527_v55 }
 0x4f2   : > { %v4402_v2 = vmax.f32 %v4355_v32, 0.0  ;;  %484 = vst.msk [vmem:[#allocation3 + $0x78] sm:$0xff] %vm468_vm3, %v11527_v55 }
 0x4f3   : > { %v3927_v40 = vpop.f32.mrf.mxu2  ;;  %v3284_v49 = vpop.f32.mrf.mxu0  ;;  %485 = vst.msk [vmem:[#allocation3 + $0x80] sm:$0xff] %vm468_vm3, %v11527_v55 }
 0x4f4   : > { %4449 = vst.msk [vmem:[#allocation2 + $0x168] sm:$0xff] %vm413_vm2, %v4402_v2  ;;  %v3982_v43 = vadd.f32 %v3927_v40, %v3659_v63  ;;  %v4250_v19 = vpop.f32.mrf.mxu3  ;;  %v3607_v25 = vpop.f32.mrf.mxu1  ;;  %v3337_v8 = vadd.f32 %v3284_v49, %v11526_v62  ;;  %v10531_v2 = vld [vmem:[#allocation2 + $0xa1] sm:$0xff]  ;;  %v4592_v40 = vpack.c.bf16 %v5421_v24, %v10455_v42  ;;  %v10558_v62 = vld [vmem:[%s11500_s4] ss:$0 sm:$0xff] }
 0x4f5   : > { %486 = vst.msk [vmem:[#allocation3 + $0x88] sm:$0xff] %vm468_vm3, %v11527_v55 }
 0x4f6   : > { %v4305_v46 = vadd.f32 %v4250_v19, %v3982_v43  ;;  %8428 = vmatmul.msk.bf16.gmra.mxu0 %vm413_vm2, %v4590_v36  ;;  %v3660_v20 = vadd.f32 %v3607_v25, %v3337_v8  ;;  %487 = vst.msk [vmem:[#allocation3 + $0x90] sm:$0xff] %vm468_vm3, %v11527_v55  ;;  %v5072_v43 = vld [vmem:[#allocation2 + $0x98] sm:$0xff]  ;;  %v4513_v19 = vpack.c.bf16 %v5070_v13, %v10452_v9 }
 0x4f7   : > { %8461 = vmatmul.msk.bf16.gmra.mxu1 %vm413_vm2, %v4511_v39  ;;  %488 = vst.msk [vmem:[#allocation3 + $0x98] sm:$0xff] %vm468_vm3, %v11527_v55  ;;  %v5114_v49 = vpack.c.bf16 %v10527_v16, %v5072_v43  ;;  %v5423_v25 = vld [vmem:[#allocation2 + $0x99] sm:$0xff] }
 0x4f8   : > { %v4356_v4 = vadd.f32 %v10283_v26, %v4305_v46  ;;  %8498 = vmatmul.msk.bf16.gmra.mxu2 %vm413_vm2, %v5112_v28  ;;  %489 = vst.msk [vmem:[#allocation3 + $0xa0] sm:$0xff] %vm468_vm3, %v11527_v55  ;;  %v5465_v36 = vpack.c.bf16 %v10531_v2, %v5423_v25 }
 0x4f9   : > { %8535 = vmatmul.msk.bf16.gmra.mxu3 %vm413_vm2, %v5463_v54  ;;  %490 = vst.msk [vmem:[#allocation3 + $0xa8] sm:$0xff] %vm468_vm3, %v11527_v55 }
 0x4fa   : > { %v4403_v23 = vmax.f32 %v4356_v4, 0.0  ;;  %491 = vst.msk [vmem:[#allocation3 + $0xb0] sm:$0xff] %vm468_vm3, %v11527_v55 }
 0x4fb   : > { %v3930_v7 = vpop.f32.mrf.mxu2  ;;  %v3286_v22 = vpop.f32.mrf.mxu0  ;;  %492 = vst.msk [vmem:[#allocation3 + $0xb8] sm:$0xff] %vm468_vm3, %v11527_v55 }
 0x4fc   : > { %4450 = vst.msk [vmem:[#allocation2 + $0x170] sm:$0xff] %vm413_vm2, %v4403_v23  ;;  %v3983_v59 = vadd.f32 %v3930_v7, %v3660_v20  ;;  %v4253_v48 = vpop.f32.mrf.mxu3  ;;  %v3609_v47 = vpop.f32.mrf.mxu1  ;;  %v3338_v5 = vadd.f32 %v3286_v22, %v11528_v45  ;;  %v10577_v23 = vld [vmem:[#allocation2 + $0xb0] sm:$0xff]  ;;  %v4593_v22 = vpack.c.bf16 %v5423_v25, %v10487_v51 }
 0x4fd   : > { %493 = vst.msk [vmem:[#allocation3 + $0xc0] sm:$0xff] %vm468_vm3, %v11527_v55 }
 0x4fe   : > { %v4306_v31 = vadd.f32 %v4253_v48, %v3983_v59  ;;  %v3661_v33 = vadd.f32 %v3609_v47, %v3338_v5  ;;  %494 = vst.msk [vmem:[#allocation3 + $0xc8] sm:$0xff] %vm468_vm3, %v11527_v55  ;;  %v10580_v59 = vld [vmem:[#allocation2 + $0xb1] sm:$0xff]  ;;  %v5074_v47 = vld [vmem:[#allocation2 + $0xa8] sm:$0xff] }
 0x4ff   : > { %495 = vst.msk [vmem:[#allocation3 + $0xd0] sm:$0xff] %vm468_vm3, %v11527_v55  ;;  %v5115_v45 = vpack.c.bf16 %v10577_v23, %v5074_v47  ;;  %v5425_v5 = vld [vmem:[#allocation2 + $0xa9] sm:$0xff] }
 0x500   : > { %v4357_v27 = vadd.f32 %v10283_v26, %v4306_v31  ;;  %496 = vst.msk [vmem:[#allocation3 + $0xd8] sm:$0xff] %vm468_vm3, %v11527_v55  ;;  %v4514_v31 = vpack.c.bf16 %v5072_v43, %v10482_v52 }
 0x501   : > { %497 = vst.msk [vmem:[#allocation3 + $0xe0] sm:$0xff] %vm468_vm3, %v11527_v55 }
 0x502   : > { %v4404_v6 = vmax.f32 %v4357_v27, 0.0  ;;  %498 = vst.msk [vmem:[#allocation3 + $0xe8] sm:$0xff] %vm468_vm3, %v11527_v55  ;;  %v5466_v27 = vpack.c.bf16 %v10580_v59, %v5425_v5 }
 0x503   : > { %v3932_v11 = vpop.f32.mrf.mxu2  ;;  %v3289_v34 = vpop.f32.mrf.mxu0  ;;  %499 = vst.msk [vmem:[#allocation3 + $0xf0] sm:$0xff] %vm468_vm3, %v11527_v55 }
 0x504   : > { %4451 = vst.msk [vmem:[#allocation2 + $0x178] sm:$0xff] %vm413_vm2, %v4404_v6  ;;  %v3984_v17 = vadd.f32 %v3932_v11, %v3661_v33  ;;  %v4255_v15 = vpop.f32.mrf.mxu3  ;;  %v3612_v21 = vpop.f32.mrf.mxu1  ;;  %v3339_v3 = vadd.f32 %v3289_v34, %v11529_v14 }
 0x505   : > { %500 = vst.msk [vmem:[#allocation3 + $0xf8] sm:$0xff] %vm468_vm3, %v11527_v55 }
 0x506   : > { %v4307_v29 = vadd.f32 %v4255_v15, %v3984_v17  ;;  %8429 = vmatmul.msk.bf16.gmra.mxu0 %vm413_vm2, %v4591_v60  ;;  %v3662_v35 = vadd.f32 %v3612_v21, %v3339_v3  ;;  %501 = vst.msk [vmem:[#allocation3 + $0x100] sm:$0xff] %vm468_vm3, %v11527_v55 }
 0x507   : > { %8462 = vmatmul.msk.bf16.gmra.mxu1 %vm413_vm2, %v4512_v12  ;;  %502 = vst.msk [vmem:[#allocation3 + $0x108] sm:$0xff] %vm468_vm3, %v11527_v55  ;;  %v10622_v12 = vld [vmem:[#allocation2 + $0xc0] sm:$0xff] }
 0x508   : > { %v4358_v44 = vadd.f32 %v10283_v26, %v4307_v29  ;;  %8499 = vmatmul.msk.bf16.gmra.mxu2 %vm413_vm2, %v5113_v50  ;;  %503 = vst.msk [vmem:[#allocation3 + $0x110] sm:$0xff] %vm468_vm3, %v11527_v55 }
 0x509   : > { %8536 = vmatmul.msk.bf16.gmra.mxu3 %vm413_vm2, %v5464_v1  ;;  %504 = vst.msk [vmem:[#allocation3 + $0x118] sm:$0xff] %vm468_vm3, %v11527_v55 }
 0x50a   : > { %v4405_v0 = vmax.f32 %v4358_v44, 0.0  ;;  %505 = vst.msk [vmem:[#allocation3 + $0x120] sm:$0xff] %vm468_vm3, %v11527_v55  ;;  %v10626_v44 = vld [vmem:[#allocation2 + $0xc1] sm:$0xff] }
 0x50b   : > { %v3935_v37 = vpop.f32.mrf.mxu2  ;;  %v3291_v53 = vpop.f32.mrf.mxu0  ;;  %506 = vst.msk [vmem:[#allocation3 + $0x128] sm:$0xff] %vm468_vm3, %v11527_v55 }
 0x50c   : > { %4452 = vst.msk [vmem:[#allocation2 + $0x180] sm:$0xff] %vm413_vm2, %v4405_v0  ;;  %v3985_v38 = vadd.f32 %v3935_v37, %v3662_v35  ;;  %v4258_v30 = vpop.f32.mrf.mxu3  ;;  %v3614_v57 = vpop.f32.mrf.mxu1  ;;  %v4594_v35 = vpack.c.bf16 %v5425_v5, %v10531_v2  ;;  %v5076_v37 = vld [vmem:[#allocation2 + $0xb8] sm:$0xff]  ;;  %v4515_v53 = vpack.c.bf16 %v5074_v47, %v10527_v16 }
 0x50d   : > { %507 = vst.msk [vmem:[#allocation3 + $0x130] sm:$0xff] %vm468_vm3, %v11527_v55  ;;  %v5116_v57 = vpack.c.bf16 %v10622_v12, %v5076_v37 }
 0x50e   : > { %v4308_v41 = vadd.f32 %v4258_v30, %v3985_v38  ;;  %508 = vst.msk [vmem:[#allocation3 + $0x138] sm:$0xff] %vm468_vm3, %v11527_v55 }
 0x50f   : > { %509 = vst.msk [vmem:[#allocation3 + $0x140] sm:$0xff] %vm468_vm3, %v11527_v55 }
 0x510   : > { %v4359_v61 = vadd.f32 %v10283_v26, %v4308_v41  ;;  %510 = vst.msk [vmem:[#allocation3 + $0x148] sm:$0xff] %vm468_vm3, %v11527_v55  ;;  %v5427_v41 = vld [vmem:[#allocation2 + $0xb9] sm:$0xff] }
 0x511   : > { %511 = vst.msk [vmem:[#allocation3 + $0x150] sm:$0xff] %vm468_vm3, %v11527_v55 }
 0x512   : > { %v4406_v10 = vmax.f32 %v4359_v61, 0.0  ;;  %512 = vst.msk [vmem:[#allocation3 + $0x158] sm:$0xff] %vm468_vm3, %v11527_v55 }
 0x513   : > { %v3937_v58 = vpop.f32.mrf.mxu2  ;;  %v4710_v26 = vpop.f32.mrf.mxu0  ;;  %513 = vst.msk [vmem:[#allocation3 + $0x160] sm:$0xff] %vm468_vm3, %v11527_v55 }
 0x514   : > { %4454 = vst.msk [vmem:[#allocation2 + $0x188] sm:$0x7f] %vm4453_vm4, %v4406_v10  ;;  %v4260_v32 = vpop.f32.mrf.mxu3  ;;  %v4931_v63 = vpop.f32.mrf.mxu1  ;;  %v5467_v10 = vpack.c.bf16 %v10626_v44, %v5427_v41 }
 0x515   : > { %v4932_v42 = vadd.f32 %v4931_v63, %v4710_v26  ;;  %514 = vst.msk [vmem:[#allocation3 + $0x168] sm:$0xff] %vm468_vm3, %v11527_v55 }
 0x516   : > { %8430 = vmatmul.msk.bf16.gmra.mxu0 %vm413_vm2, %v4592_v40  ;;  %515 = vst.msk [vmem:[#allocation3 + $0x170] sm:$0xff] %vm468_vm3, %v11527_v55 }
 0x517   : > { %8463 = vmatmul.msk.bf16.gmra.mxu1 %vm413_vm2, %v4513_v19  ;;  %516 = vst.msk [vmem:[#allocation3 + $0x178] sm:$0xff] %vm468_vm3, %v11527_v55 }
 0x518   : > { %8500 = vmatmul.msk.bf16.gmra.mxu2 %vm413_vm2, %v5114_v49  ;;  %517 = vst.msk [vmem:[#allocation3 + $0x180] sm:$0xff] %vm468_vm3, %v11527_v55 }
 0x519   : > { %8537 = vmatmul.msk.bf16.gmra.mxu3 %vm413_vm2, %v5465_v36  ;;  %518 = vst.msk [vmem:[#allocation3 + $0x188] sm:$0xff] %vm468_vm3, %v11527_v55 }
 0x51a   : > { %519 = vst.msk [vmem:[#allocation3 + $0x190] sm:$0xff] %vm468_vm3, %v11527_v55 }
 0x51b   : > { %v5232_v9 = vpop.f32.mrf.mxu2  ;;  %v4712_v8 = vpop.f32.mrf.mxu0  ;;  %520 = vst.msk [vmem:[#allocation3 + $0x198] sm:$0xff] %vm468_vm3, %v11527_v55 }
 0x51c   : > { %v5357_v18 = vadd.f32 %v5232_v9, %v4932_v42  ;;  %v5583_v46 = vpop.f32.mrf.mxu3  ;;  %v4933_v39 = vpop.f32.mrf.mxu1  ;;  %521 = vst.msk [vmem:[#allocation3 + $0x1a0] sm:$0xff] %vm468_vm3, %v11527_v55  ;;  %v10649_v42 = vld [vmem:[#allocation2 + $0xd0] sm:$0xff] }
 0x51d   : > { %v4934_v6 = vadd.f32 %v4933_v39, %v4712_v8  ;;  %522 = vst.msk [vmem:[#allocation3 + $0x1a8] sm:$0xff] %vm468_vm3, %v11527_v55  ;;  %v10652_v8 = vld [vmem:[#allocation2 + $0xd1] sm:$0xff]  ;;  %v8819_v39 = vld [vmem:[%s11501_s5 + $0x48] sm:$0xff] }
 0x51e   : > { %v5708_v28 = vadd.f32 %v5583_v46, %v5357_v18  ;;  %523 = vst.msk [vmem:[#allocation3 + $0x1b0] sm:$0xff] %vm468_vm3, %v11527_v55  ;;  %6786 = vmatpush.bf16.msra.mxu2 %v8819_v39 }
 0x51f   : > { %524 = vst.msk [vmem:[#allocation3 + $0x1b8] sm:$0xff] %vm468_vm3, %v11527_v55 }
 0x520   : > { %v5762_v56 = vadd.f32 %v10558_v62, %v5708_v28  ;;  %v8823_v28 = vld [vmem:[%s11501_s5 + $0x68] sm:$0xff] }
 0x521   : > { %7176 = vmatpush.bf16.msra.mxu3 %v8823_v28  ;;  %v5433_v28 = vld [vmem:[#allocation2 + $0xe9] sm:$0xff] }
 0x522   : > { %v5812_v54 = vmax.f32 %v5762_v56, 0.0 }
 0x523   : > { %v5234_v4 = vpop.f32.mrf.mxu2  ;;  %v4715_v7 = vpop.f32.mrf.mxu0 }
 0x524   : > { %5862 = vst.msk [vmem:[#allocation3 + $0x18] sm:$0xff] %vm468_vm3, %v5812_v54  ;;  %v5585_v20 = vpop.f32.mrf.mxu3  ;;  %v4936_v48 = vpop.f32.mrf.mxu1  ;;  %v5358_v33 = vadd.f32 %v5234_v4, %v4934_v6  ;;  %v4595_v54 = vpack.c.bf16 %v5427_v41, %v10580_v59  ;;  %v5078_v4 = vld [vmem:[#allocation2 + $0xc8] sm:$0xff] }
 0x525   : > { %v4937_v11 = vadd.f32 %v4936_v48, %v4715_v7  ;;  %v4516_v7 = vpack.c.bf16 %v5076_v37, %v10577_v23  ;;  %v5117_v48 = vpack.c.bf16 %v10649_v42, %v5078_v4 }
 0x526   : > { %8431 = vmatmul.msk.bf16.gmra.mxu0 %vm413_vm2, %v4593_v22  ;;  %v5709_v21 = vadd.f32 %v5585_v20, %v5358_v33  ;;  %v5429_v22 = vld [vmem:[#allocation2 + $0xc9] sm:$0xff] }
 0x527   : > { %8464 = vmatmul.msk.bf16.gmra.mxu1 %vm413_vm2, %v4514_v31  ;;  %v5468_v47 = vpack.c.bf16 %v10652_v8, %v5429_v22  ;;  %v8815_v33 = vld [vmem:[%s11501_s5 + $0x28] sm:$0xff] }
 0x528   : > { %8501 = vmatmul.msk.bf16.gmra.mxu2 %vm413_vm2, %v5115_v45  ;;  %v5763_v13 = vadd.f32 %v10558_v62, %v5709_v21  ;;  %6201 = vmatpush.bf16.msra.mxu0 %v8815_v33 }
 0x529   : > { %8538 = vmatmul.msk.bf16.gmra.mxu3 %vm413_vm2, %v5466_v27 }
 0x52a   : > { %v5813_v38 = vmax.f32 %v5763_v13, 0.0 }
 0x52b   : > { %v5237_v52 = vpop.f32.mrf.mxu2  ;;  %v4717_v34 = vpop.f32.mrf.mxu0 }
 0x52c   : > { %v5359_v17 = vadd.f32 %v5237_v52, %v4937_v11  ;;  %v5588_v15 = vpop.f32.mrf.mxu3  ;;  %v4938_v51 = vpop.f32.mrf.mxu1  ;;  %5863 = vst.msk [vmem:[#allocation3 + $0x20] sm:$0xff] %vm468_vm3, %v5813_v38  ;;  %v8811_v11 = vld [vmem:[%s11501_s5 + $0x8] sm:$0xff]  ;;  %v5431_v38 = vld [vmem:[#allocation2 + $0xd9] sm:$0xff] }
 0x52d   : > { %v4939_v29 = vadd.f32 %v4938_v51, %v4717_v34  ;;  %6449 = vmatpush.bf16.msra.mxu1 %v8811_v11  ;;  %v10712_v11 = vld [vmem:[#allocation2 + $0x101] sm:$0xff] }
 0x52e   : > { %v5710_v60 = vadd.f32 %v5588_v15, %v5359_v17 }
 0x530   : > { %v5764_v14 = vadd.f32 %v10558_v62, %v5710_v60  ;;  %v10677_v60 = vld [vmem:[#allocation2 + $0xe0] sm:$0xff] }
 0x532   : > { %v5814_v61 = vmax.f32 %v5764_v14, 0.0 }
 0x533   : > { %v5239_v3 = vpop.f32.mrf.mxu2  ;;  %v4720_v1 = vpop.f32.mrf.mxu0 }
 0x534   : > { %v5360_v50 = vadd.f32 %v5239_v3, %v4939_v29  ;;  %v5590_v24 = vpop.f32.mrf.mxu3  ;;  %v4941_v0 = vpop.f32.mrf.mxu1  ;;  %5864 = vst.msk [vmem:[#allocation3 + $0x28] sm:$0xff] %vm468_vm3, %v5814_v61  ;;  %v10680_v3 = vld [vmem:[#allocation2 + $0xe1] sm:$0xff] }
 0x535   : > { %v4942_v32 = vadd.f32 %v4941_v0, %v4720_v1  ;;  %v5080_v1 = vld [vmem:[#allocation2 + $0xd8] sm:$0xff] }
 0x536   : > { %v5711_v30 = vadd.f32 %v5590_v24, %v5360_v50  ;;  %8432 = vmatmul.msk.bf16.gmra.mxu0 %vm413_vm2, %v4594_v35  ;;  %v4596_v24 = vpack.c.bf16 %v5429_v22, %v10626_v44  ;;  %v4517_v35 = vpack.c.bf16 %v5078_v4, %v10622_v12  ;;  %v5118_v37 = vpack.c.bf16 %v10677_v60, %v5080_v1 }
 0x537   : > { %8465 = vmatmul.msk.bf16.gmra.mxu1 %vm413_vm2, %v4515_v53 }
 0x538   : > { %v5765_v58 = vadd.f32 %v10558_v62, %v5711_v30  ;;  %8502 = vmatmul.msk.bf16.gmra.mxu2 %vm413_vm2, %v5116_v57  ;;  %v5469_v30 = vpack.c.bf16 %v10680_v3, %v5431_v38 }
 0x539   : > { %8539 = vmatmul.msk.bf16.gmra.mxu3 %vm413_vm2, %v5467_v10 }
 0x53a   : > { %v5815_v16 = vmax.f32 %v5765_v58, 0.0 }
 0x53b   : > { %v5242_v26 = vpop.f32.mrf.mxu2  ;;  %v4722_v55 = vpop.f32.mrf.mxu0 }
 0x53c   : > { %5865 = vst.msk [vmem:[#allocation3 + $0x30] sm:$0xff] %vm468_vm3, %v5815_v16  ;;  %v5361_v2 = vadd.f32 %v5242_v26, %v4942_v32  ;;  %v5593_v63 = vpop.f32.mrf.mxu3  ;;  %v4943_v40 = vpop.f32.mrf.mxu1 }
 0x53d   : > { %v4944_v25 = vadd.f32 %v4943_v40, %v4722_v55  ;;  %v10693_v55 = vld [vmem:[#allocation2 + $0xf0] sm:$0xff] }
 0x53e   : > { %v5712_v43 = vadd.f32 %v5593_v63, %v5361_v2 }
 0x540   : > { %v5766_v19 = vadd.f32 %v10558_v62, %v5712_v43 }
 0x542   : > { %v5816_v49 = vmax.f32 %v5766_v19, 0.0 }
 0x543   : > { %v5244_v36 = vpop.f32.mrf.mxu2  ;;  %v4725_v46 = vpop.f32.mrf.mxu0 }
 0x544   : > { %5866 = vst.msk [vmem:[#allocation3 + $0x38] sm:$0xff] %vm468_vm3, %v5816_v49  ;;  %v5362_v9 = vadd.f32 %v5244_v36, %v4944_v25  ;;  %v5595_v18 = vpop.f32.mrf.mxu3  ;;  %v4946_v56 = vpop.f32.mrf.mxu1  ;;  %v10696_v49 = vld [vmem:[#allocation2 + $0xf1] sm:$0xff]  ;;  %v4597_v36 = vpack.c.bf16 %v5431_v38, %v10652_v8 }
 0x545   : > { %v4947_v45 = vadd.f32 %v4946_v56, %v4725_v46  ;;  %v4518_v46 = vpack.c.bf16 %v5080_v1, %v10649_v42  ;;  %v5470_v56 = vpack.c.bf16 %v10696_v49, %v5433_v28 }
 0x546   : > { %v5713_v20 = vadd.f32 %v5595_v18, %v5362_v9  ;;  %8433 = vmatmul.msk.bf16.gmra.mxu0 %vm413_vm2, %v4595_v54  ;;  %v5082_v9 = vld [vmem:[#allocation2 + $0xe8] sm:$0xff] }
 0x547   : > { %8466 = vmatmul.msk.bf16.gmra.mxu1 %vm413_vm2, %v4516_v7  ;;  %v5119_v39 = vpack.c.bf16 %v10693_v55, %v5082_v9 }
 0x548   : > { %v5767_v31 = vadd.f32 %v10558_v62, %v5713_v20  ;;  %8503 = vmatmul.msk.bf16.gmra.mxu2 %vm413_vm2, %v5117_v48 }
 0x549   : > { %8540 = vmatmul.msk.bf16.gmra.mxu3 %vm413_vm2, %v5468_v47 }
 0x54a   : > { %v5817_v59 = vmax.f32 %v5767_v31, 0.0 }
 0x54b   : > { %v5247_v23 = vpop.f32.mrf.mxu2  ;;  %v4727_v6 = vpop.f32.mrf.mxu0 }
 0x54c   : > { %5867 = vst.msk [vmem:[#allocation3 + $0x40] sm:$0xff] %vm468_vm3, %v5817_v59  ;;  %v5363_v5 = vadd.f32 %v5247_v23, %v4947_v45  ;;  %v5598_v27 = vpop.f32.mrf.mxu3  ;;  %v4948_v52 = vpop.f32.mrf.mxu1 }
 0x54d   : > { %v4949_v51 = vadd.f32 %v4948_v52, %v4727_v6 }
 0x54e   : > { %v5714_v17 = vadd.f32 %v5598_v27, %v5363_v5  ;;  %v10709_v5 = vld [vmem:[#allocation2 + $0x100] sm:$0xff] }
 0x550   : > { %v5768_v15 = vadd.f32 %v10558_v62, %v5714_v17  ;;  %v4598_v17 = vpack.c.bf16 %v5433_v28, %v10680_v3 }
 0x552   : > { %v5818_v34 = vmax.f32 %v5768_v15, 0.0  ;;  %v5084_v15 = vld [vmem:[#allocation2 + $0xf8] sm:$0xff] }
 0x553   : > { %v5249_v21 = vpop.f32.mrf.mxu2  ;;  %v4730_v14 = vpop.f32.mrf.mxu0 }
 0x554   : > { %5868 = vst.msk [vmem:[#allocation3 + $0x48] sm:$0xff] %vm468_vm3, %v5818_v34  ;;  %v5364_v13 = vadd.f32 %v5249_v21, %v4949_v51  ;;  %v5600_v29 = vpop.f32.mrf.mxu3  ;;  %v4951_v50 = vpop.f32.mrf.mxu1  ;;  %v4519_v51 = vpack.c.bf16 %v5082_v9, %v10677_v60  ;;  %v5120_v21 = vpack.c.bf16 %v10709_v5, %v5084_v15 }
 0x555   : > { %v4952_v57 = vadd.f32 %v4951_v50, %v4730_v14 }
 0x556   : > { %v5715_v0 = vadd.f32 %v5600_v29, %v5364_v13  ;;  %8434 = vmatmul.msk.bf16.gmra.mxu0 %vm413_vm2, %v4596_v24  ;;  %v5435_v13 = vld [vmem:[#allocation2 + $0xf9] sm:$0xff] }
 0x557   : > { %8467 = vmatmul.msk.bf16.gmra.mxu1 %vm413_vm2, %v4517_v35  ;;  %v5471_v29 = vpack.c.bf16 %v10712_v11, %v5435_v13 }
 0x558   : > { %v5769_v53 = vadd.f32 %v10558_v62, %v5715_v0  ;;  %8504 = vmatmul.msk.bf16.gmra.mxu2 %vm413_vm2, %v5118_v37 }
 0x559   : > { %8541 = vmatmul.msk.bf16.gmra.mxu3 %vm413_vm2, %v5469_v30 }
 0x55a   : > { %v5819_v44 = vmax.f32 %v5769_v53, 0.0 }
 0x55b   : > { %v5252_v41 = vpop.f32.mrf.mxu2  ;;  %v4732_v10 = vpop.f32.mrf.mxu0 }
 0x55c   : > { %5869 = vst.msk [vmem:[#allocation3 + $0x50] sm:$0xff] %vm468_vm3, %v5819_v44  ;;  %v5365_v12 = vadd.f32 %v5252_v41, %v4952_v57  ;;  %v5603_v61 = vpop.f32.mrf.mxu3  ;;  %v4953_v58 = vpop.f32.mrf.mxu1  ;;  %v10725_v57 = vld [vmem:[#allocation2 + $0x110] sm:$0xff] }
 0x55d   : > { %v4954_v2 = vadd.f32 %v4953_v58, %v4732_v10  ;;  %v10728_v10 = vld [vmem:[#allocation2 + $0x111] sm:$0xff] }
 0x55e   : > { %v5716_v16 = vadd.f32 %v5603_v61, %v5365_v12 }
 0x560   : > { %v5770_v32 = vadd.f32 %v10558_v62, %v5716_v16  ;;  %v4599_v16 = vpack.c.bf16 %v5435_v13, %v10696_v49 }
 0x562   : > { %v5820_v26 = vmax.f32 %v5770_v32, 0.0  ;;  %v5086_v32 = vld [vmem:[#allocation2 + $0x108] sm:$0xff] }
 0x563   : > { %v5254_v63 = vpop.f32.mrf.mxu2  ;;  %v4735_v19 = vpop.f32.mrf.mxu0 }
 0x564   : > { %5870 = vst.msk [vmem:[#allocation3 + $0x58] sm:$0xff] %vm468_vm3, %v5820_v26  ;;  %v5366_v40 = vadd.f32 %v5254_v63, %v4954_v2  ;;  %v5605_v43 = vpop.f32.mrf.mxu3  ;;  %v4956_v25 = vpop.f32.mrf.mxu1  ;;  %v4520_v2 = vpack.c.bf16 %v5084_v15, %v10693_v55  ;;  %v5121_v63 = vpack.c.bf16 %v10725_v57, %v5086_v32 }
 0x565   : > { %v4957_v4 = vadd.f32 %v4956_v25, %v4735_v19 }
 0x566   : > { %v5717_v18 = vadd.f32 %v5605_v43, %v5366_v40  ;;  %8435 = vmatmul.msk.bf16.gmra.mxu0 %vm413_vm2, %v4597_v36  ;;  %v5437_v40 = vld [vmem:[#allocation2 + $0x109] sm:$0xff] }
 0x567   : > { %8468 = vmatmul.msk.bf16.gmra.mxu1 %vm413_vm2, %v4518_v46  ;;  %v5472_v43 = vpack.c.bf16 %v10728_v10, %v5437_v40 }
 0x568   : > { %v5771_v54 = vadd.f32 %v10558_v62, %v5717_v18  ;;  %8505 = vmatmul.msk.bf16.gmra.mxu2 %vm413_vm2, %v5119_v39 }
 0x569   : > { %8542 = vmatmul.msk.bf16.gmra.mxu3 %vm413_vm2, %v5470_v56 }
 0x56a   : > { %v5821_v8 = vmax.f32 %v5771_v54, 0.0 }
 0x56b   : > { %v5257_v20 = vpop.f32.mrf.mxu2  ;;  %v4737_v48 = vpop.f32.mrf.mxu0 }
 0x56c   : > { %5871 = vst.msk [vmem:[#allocation3 + $0x60] sm:$0xff] %vm468_vm3, %v5821_v8  ;;  %v5367_v42 = vadd.f32 %v5257_v20, %v4957_v4  ;;  %v5608_v7 = vpop.f32.mrf.mxu3  ;;  %v4958_v22 = vpop.f32.mrf.mxu1  ;;  %v10741_v4 = vld [vmem:[#allocation2 + $0x120] sm:$0xff] }
 0x56d   : > { %v4959_v45 = vadd.f32 %v4958_v22, %v4737_v48  ;;  %v10744_v48 = vld [vmem:[#allocation2 + $0x121] sm:$0xff] }
 0x56e   : > { %v5718_v47 = vadd.f32 %v5608_v7, %v5367_v42 }
 0x570   : > { %v5772_v31 = vadd.f32 %v10558_v62, %v5718_v47  ;;  %v4600_v47 = vpack.c.bf16 %v5437_v40, %v10712_v11  ;;  %v8814_v40 = vld [vmem:[%s11501_s5 + $0x20] sm:$0xff] }
 0x571   : > { %6202 = vmatpush.bf16.msra.mxu0 %v8814_v40 }
 0x572   : > { %v5822_v59 = vmax.f32 %v5772_v31, 0.0  ;;  %v5088_v31 = vld [vmem:[#allocation2 + $0x118] sm:$0xff] }
 0x573   : > { %v5259_v23 = vpop.f32.mrf.mxu2  ;;  %v4740_v33 = vpop.f32.mrf.mxu0 }
 0x574   : > { %5872 = vst.msk [vmem:[#allocation3 + $0x68] sm:$0xff] %vm468_vm3, %v5822_v59  ;;  %v5368_v27 = vadd.f32 %v5259_v23, %v4959_v45  ;;  %v5610_v6 = vpop.f32.mrf.mxu3  ;;  %v4961_v52 = vpop.f32.mrf.mxu1  ;;  %v4521_v45 = vpack.c.bf16 %v5086_v32, %v10709_v5  ;;  %v5122_v23 = vpack.c.bf16 %v10741_v4, %v5088_v31 }
 0x575   : > { %v4962_v50 = vadd.f32 %v4961_v52, %v4740_v33 }
 0x576   : > { %v5719_v34 = vadd.f32 %v5610_v6, %v5368_v27  ;;  %8436 = vmatmul.msk.bf16.gmra.mxu0 %vm413_vm2, %v4598_v17  ;;  %v5439_v27 = vld [vmem:[#allocation2 + $0x119] sm:$0xff] }
 0x577   : > { %8469 = vmatmul.msk.bf16.gmra.mxu1 %vm413_vm2, %v4519_v51  ;;  %v5473_v6 = vpack.c.bf16 %v10744_v48, %v5439_v27 }
 0x578   : > { %v5773_v14 = vadd.f32 %v10558_v62, %v5719_v34  ;;  %8506 = vmatmul.msk.bf16.gmra.mxu2 %vm413_vm2, %v5120_v21 }
 0x579   : > { %8543 = vmatmul.msk.bf16.gmra.mxu3 %vm413_vm2, %v5471_v29 }
 0x57a   : > { %v5823_v3 = vmax.f32 %v5773_v14, 0.0 }
 0x57b   : > { %v5262_v24 = vpop.f32.mrf.mxu2  ;;  %v4742_v0 = vpop.f32.mrf.mxu0 }
 0x57c   : > { %5873 = vst.msk [vmem:[#allocation3 + $0x70] sm:$0xff] %vm468_vm3, %v5823_v3  ;;  %v5369_v60 = vadd.f32 %v5262_v24, %v4962_v50  ;;  %v5613_v1 = vpop.f32.mrf.mxu3  ;;  %v4963_v35 = vpop.f32.mrf.mxu1  ;;  %v10757_v50 = vld [vmem:[#allocation2 + $0x130] sm:$0xff] }
 0x57d   : > { %v4964_v53 = vadd.f32 %v4963_v35, %v4742_v0  ;;  %v10760_v0 = vld [vmem:[#allocation2 + $0x131] sm:$0xff] }
 0x57e   : > { %v5720_v37 = vadd.f32 %v5613_v1, %v5369_v60 }
 0x580   : > { %v5774_v38 = vadd.f32 %v10558_v62, %v5720_v37  ;;  %v4601_v37 = vpack.c.bf16 %v5439_v27, %v10728_v10 }
 0x582   : > { %v5824_v30 = vmax.f32 %v5774_v38, 0.0  ;;  %v5090_v38 = vld [vmem:[#allocation2 + $0x128] sm:$0xff] }
 0x583   : > { %v5264_v44 = vpop.f32.mrf.mxu2  ;;  %v4745_v61 = vpop.f32.mrf.mxu0 }
 0x584   : > { %5874 = vst.msk [vmem:[#allocation3 + $0x78] sm:$0xff] %vm468_vm3, %v5824_v30  ;;  %v5370_v41 = vadd.f32 %v5264_v44, %v4964_v53  ;;  %v5615_v12 = vpop.f32.mrf.mxu3  ;;  %v4966_v58 = vpop.f32.mrf.mxu1  ;;  %v4522_v53 = vpack.c.bf16 %v5088_v31, %v10725_v57  ;;  %v5123_v44 = vpack.c.bf16 %v10757_v50, %v5090_v38 }
 0x585   : > { %v4967_v25 = vadd.f32 %v4966_v58, %v4745_v61 }
 0x586   : > { %v5721_v26 = vadd.f32 %v5615_v12, %v5370_v41  ;;  %8437 = vmatmul.msk.bf16.gmra.mxu0 %vm413_vm2, %v4599_v16  ;;  %v5441_v41 = vld [vmem:[#allocation2 + $0x129] sm:$0xff] }
 0x587   : > { %8470 = vmatmul.msk.bf16.gmra.mxu1 %vm413_vm2, %v4520_v2  ;;  %v5474_v12 = vpack.c.bf16 %v10760_v0, %v5441_v41  ;;  %v8818_v2 = vld [vmem:[%s11501_s5 + $0x40] sm:$0xff] }
 0x588   : > { %v5775_v19 = vadd.f32 %v10558_v62, %v5721_v26  ;;  %8507 = vmatmul.msk.bf16.gmra.mxu2 %vm413_vm2, %v5121_v63  ;;  %v8822_v63 = vld [vmem:[%s11501_s5 + $0x60] sm:$0xff] }
 0x589   : > { %8544 = vmatmul.msk.bf16.gmra.mxu3 %vm413_vm2, %v5472_v43  ;;  %6787 = vmatpush.bf16.msra.mxu2 %v8818_v2 }
 0x58a   : > { %v5825_v49 = vmax.f32 %v5775_v19, 0.0  ;;  %v8810_v19 = vld [vmem:[%s11501_s5] sm:$0xff]  ;;  %7177 = vmatpush.bf16.msra.mxu3 %v8822_v63 }
 0x58b   : > { %v5267_v36 = vpop.f32.mrf.mxu2  ;;  %v4747_v18 = vpop.f32.mrf.mxu0  ;;  %6450 = vmatpush.bf16.msra.mxu1 %v8810_v19 }
 0x58c   : > { %5875 = vst.msk [vmem:[#allocation3 + $0x80] sm:$0xff] %vm468_vm3, %v5825_v49  ;;  %v5371_v55 = vadd.f32 %v5267_v36, %v4967_v25  ;;  %v5618_v9 = vpop.f32.mrf.mxu3  ;;  %v4968_v46 = vpop.f32.mrf.mxu1 }
 0x58d   : > { %v4969_v54 = vadd.f32 %v4968_v46, %v4747_v18  ;;  %v10785_v18 = vld [vmem:[#allocation2 + $0x140] sm:$0xff] }
 0x58e   : > { %v5722_v39 = vadd.f32 %v5618_v9, %v5371_v55 }
 0x590   : > { %v5776_v28 = vadd.f32 %v10558_v62, %v5722_v39 }
 0x592   : > { %v5826_v56 = vmax.f32 %v5776_v28, 0.0 }
 0x593   : > { %v5269_v8 = vpop.f32.mrf.mxu2  ;;  %v4750_v7 = vpop.f32.mrf.mxu0 }
 0x594   : > { %5876 = vst.msk [vmem:[#allocation3 + $0x88] sm:$0xff] %vm468_vm3, %v5826_v56  ;;  %v5372_v20 = vadd.f32 %v5269_v8, %v4969_v54  ;;  %v5620_v42 = vpop.f32.mrf.mxu3  ;;  %v4971_v22 = vpop.f32.mrf.mxu1  ;;  %v10788_v56 = vld [vmem:[#allocation2 + $0x141] sm:$0xff]  ;;  %v4602_v8 = vpack.c.bf16 %v5441_v41, %v10744_v48 }
 0x595   : > { %v4972_v52 = vadd.f32 %v4971_v22, %v4750_v7  ;;  %v4523_v7 = vpack.c.bf16 %v5090_v38, %v10741_v4 }
 0x596   : > { %v5723_v59 = vadd.f32 %v5620_v42, %v5372_v20  ;;  %8438 = vmatmul.msk.bf16.gmra.mxu0 %vm413_vm2, %v4600_v47  ;;  %v5092_v20 = vld [vmem:[#allocation2 + $0x138] sm:$0xff] }
 0x597   : > { %8471 = vmatmul.msk.bf16.gmra.mxu1 %vm413_vm2, %v4521_v45  ;;  %v5124_v22 = vpack.c.bf16 %v10785_v18, %v5092_v20  ;;  %v5443_v47 = vld [vmem:[#allocation2 + $0x139] sm:$0xff] }
 0x598   : > { %v5777_v33 = vadd.f32 %v10558_v62, %v5723_v59  ;;  %8508 = vmatmul.msk.bf16.gmra.mxu2 %vm413_vm2, %v5122_v23  ;;  %v5475_v31 = vpack.c.bf16 %v10788_v56, %v5443_v47 }
 0x599   : > { %8545 = vmatmul.msk.bf16.gmra.mxu3 %vm413_vm2, %v5473_v6 }
 0x59a   : > { %v5827_v11 = vmax.f32 %v5777_v33, 0.0 }
 0x59b   : > { %v5272_v17 = vpop.f32.mrf.mxu2  ;;  %v4752_v34 = vpop.f32.mrf.mxu0 }
 0x59c   : > { %5877 = vst.msk [vmem:[#allocation3 + $0x90] sm:$0xff] %vm468_vm3, %v5827_v11  ;;  %v5373_v5 = vadd.f32 %v5272_v17, %v4972_v52  ;;  %v5623_v15 = vpop.f32.mrf.mxu3  ;;  %v4973_v51 = vpop.f32.mrf.mxu1 }
 0x59d   : > { %v4974_v14 = vadd.f32 %v4973_v51, %v4752_v34  ;;  %v10801_v34 = vld [vmem:[#allocation2 + $0x150] sm:$0xff] }
 0x59e   : > { %v5724_v21 = vadd.f32 %v5623_v15, %v5373_v5 }
 0x5a0   : > { %v5778_v13 = vadd.f32 %v10558_v62, %v5724_v21 }
 0x5a2   : > { %v5828_v29 = vmax.f32 %v5778_v13, 0.0 }
 0x5a3   : > { %v5274_v3 = vpop.f32.mrf.mxu2  ;;  %v4755_v1 = vpop.f32.mrf.mxu0 }
 0x5a4   : > { %5878 = vst.msk [vmem:[#allocation3 + $0x98] sm:$0xff] %vm468_vm3, %v5828_v29  ;;  %v5374_v24 = vadd.f32 %v5274_v3, %v4974_v14  ;;  %v5625_v60 = vpop.f32.mrf.mxu3  ;;  %v4976_v35 = vpop.f32.mrf.mxu1  ;;  %v10804_v29 = vld [vmem:[#allocation2 + $0x151] sm:$0xff]  ;;  %v4603_v3 = vpack.c.bf16 %v5443_v47, %v10760_v0 }
 0x5a5   : > { %v4977_v58 = vadd.f32 %v4976_v35, %v4755_v1  ;;  %v4524_v1 = vpack.c.bf16 %v5092_v20, %v10757_v50 }
 0x5a6   : > { %v5725_v30 = vadd.f32 %v5625_v60, %v5374_v24  ;;  %8439 = vmatmul.msk.bf16.gmra.mxu0 %vm413_vm2, %v4601_v37  ;;  %v5094_v24 = vld [vmem:[#allocation2 + $0x148] sm:$0xff] }
 0x5a7   : > { %8472 = vmatmul.msk.bf16.gmra.mxu1 %vm413_vm2, %v4522_v53  ;;  %v5125_v35 = vpack.c.bf16 %v10801_v34, %v5094_v24  ;;  %v5445_v37 = vld [vmem:[#allocation2 + $0x149] sm:$0xff] }
 0x5a8   : > { %v5779_v61 = vadd.f32 %v10558_v62, %v5725_v30  ;;  %8509 = vmatmul.msk.bf16.gmra.mxu2 %vm413_vm2, %v5123_v44  ;;  %v5476_v38 = vpack.c.bf16 %v10804_v29, %v5445_v37 }
 0x5a9   : > { %8546 = vmatmul.msk.bf16.gmra.mxu3 %vm413_vm2, %v5474_v12 }
 0x5aa   : > { %v5829_v10 = vmax.f32 %v5779_v61, 0.0 }
 0x5ab   : > { %v5277_v16 = vpop.f32.mrf.mxu2  ;;  %v4757_v26 = vpop.f32.mrf.mxu0 }
 0x5ac   : > { %5879 = vst.msk [vmem:[#allocation3 + $0xa0] sm:$0xff] %vm468_vm3, %v5829_v10  ;;  %v5375_v57 = vadd.f32 %v5277_v16, %v4977_v58  ;;  %v5628_v32 = vpop.f32.mrf.mxu3  ;;  %v4978_v43 = vpop.f32.mrf.mxu1 }
 0x5ad   : > { %v4979_v55 = vadd.f32 %v4978_v43, %v4757_v26  ;;  %v10817_v26 = vld [vmem:[#allocation2 + $0x160] sm:$0xff] }
 0x5ae   : > { %v5726_v49 = vadd.f32 %v5628_v32, %v5375_v57  ;;  %v10820_v43 = vld [vmem:[#allocation2 + $0x161] sm:$0xff] }
 0x5b0   : > { %v5780_v25 = vadd.f32 %v10558_v62, %v5726_v49  ;;  %v4604_v49 = vpack.c.bf16 %v5445_v37, %v10788_v56 }
 0x5b2   : > { %v5830_v36 = vmax.f32 %v5780_v25, 0.0  ;;  %v5096_v25 = vld [vmem:[#allocation2 + $0x158] sm:$0xff] }
 0x5b3   : > { %v5279_v9 = vpop.f32.mrf.mxu2  ;;  %v4760_v28 = vpop.f32.mrf.mxu0 }
 0x5b4   : > { %5880 = vst.msk [vmem:[#allocation3 + $0xa8] sm:$0xff] %vm468_vm3, %v5830_v36  ;;  %v5376_v46 = vadd.f32 %v5279_v9, %v4979_v55  ;;  %v5630_v39 = vpop.f32.mrf.mxu3  ;;  %v4981_v54 = vpop.f32.mrf.mxu1  ;;  %v4525_v55 = vpack.c.bf16 %v5094_v24, %v10785_v18  ;;  %v5126_v9 = vpack.c.bf16 %v10817_v26, %v5096_v25 }
 0x5b5   : > { %v4982_v45 = vadd.f32 %v4981_v54, %v4760_v28 }
 0x5b6   : > { %v5727_v42 = vadd.f32 %v5630_v39, %v5376_v46  ;;  %8440 = vmatmul.msk.bf16.gmra.mxu0 %vm413_vm2, %v4602_v8  ;;  %v5447_v46 = vld [vmem:[#allocation2 + $0x159] sm:$0xff] }
 0x5b7   : > { %8473 = vmatmul.msk.bf16.gmra.mxu1 %vm413_vm2, %v4523_v7  ;;  %v5477_v39 = vpack.c.bf16 %v10820_v43, %v5447_v46 }
 0x5b8   : > { %v5781_v59 = vadd.f32 %v10558_v62, %v5727_v42  ;;  %8510 = vmatmul.msk.bf16.gmra.mxu2 %vm413_vm2, %v5124_v22 }
 0x5b9   : > { %8547 = vmatmul.msk.bf16.gmra.mxu3 %vm413_vm2, %v5475_v31 }
 0x5ba   : > { %v5831_v48 = vmax.f32 %v5781_v59, 0.0 }
 0x5bb   : > { %v5282_v23 = vpop.f32.mrf.mxu2  ;;  %v4762_v6 = vpop.f32.mrf.mxu0 }
 0x5bc   : > { %5881 = vst.msk [vmem:[#allocation3 + $0xb0] sm:$0xff] %vm468_vm3, %v5831_v48  ;;  %v5377_v4 = vadd.f32 %v5282_v23, %v4982_v45  ;;  %v5633_v27 = vpop.f32.mrf.mxu3  ;;  %v4983_v33 = vpop.f32.mrf.mxu1  ;;  %v10833_v45 = vld [vmem:[#allocation2 + $0x170] sm:$0xff] }
 0x5bd   : > { %v4984_v5 = vadd.f32 %v4983_v33, %v4762_v6  ;;  %v10836_v6 = vld [vmem:[#allocation2 + $0x171] sm:$0xff] }
 0x5be   : > { %v5728_v11 = vadd.f32 %v5633_v27, %v5377_v4 }
 0x5c0   : > { %v5782_v52 = vadd.f32 %v10558_v62, %v5728_v11  ;;  %v4605_v11 = vpack.c.bf16 %v5447_v46, %v10804_v29 }
 0x5c2   : > { %v5832_v17 = vmax.f32 %v5782_v52, 0.0  ;;  %v5098_v52 = vld [vmem:[#allocation2 + $0x168] sm:$0xff] }
 0x5c3   : > { %v5284_v15 = vpop.f32.mrf.mxu2  ;;  %v4765_v13 = vpop.f32.mrf.mxu0 }
 0x5c4   : > { %5882 = vst.msk [vmem:[#allocation3 + $0xb8] sm:$0xff] %vm468_vm3, %v5832_v17  ;;  %v5378_v51 = vadd.f32 %v5284_v15, %v4984_v5  ;;  %v5635_v21 = vpop.f32.mrf.mxu3  ;;  %v4986_v14 = vpop.f32.mrf.mxu1  ;;  %v4526_v5 = vpack.c.bf16 %v5096_v25, %v10801_v34  ;;  %v5127_v15 = vpack.c.bf16 %v10833_v45, %v5098_v52 }
 0x5c5   : > { %v4987_v53 = vadd.f32 %v4986_v14, %v4765_v13 }
 0x5c6   : > { %v5729_v60 = vadd.f32 %v5635_v21, %v5378_v51  ;;  %8441 = vmatmul.msk.bf16.gmra.mxu0 %vm413_vm2, %v4603_v3  ;;  %v5449_v51 = vld [vmem:[#allocation2 + $0x169] sm:$0xff] }
 0x5c7   : > { %8474 = vmatmul.msk.bf16.gmra.mxu1 %vm413_vm2, %v4524_v1  ;;  %v5478_v21 = vpack.c.bf16 %v10836_v6, %v5449_v51 }
 0x5c8   : > { %v5783_v30 = vadd.f32 %v10558_v62, %v5729_v60  ;;  %8511 = vmatmul.msk.bf16.gmra.mxu2 %vm413_vm2, %v5125_v35 }
 0x5c9   : > { %8548 = vmatmul.msk.bf16.gmra.mxu3 %vm413_vm2, %v5476_v38 }
 0x5ca   : > { %v5833_v0 = vmax.f32 %v5783_v30, 0.0 }
 0x5cb   : > { %v5287_v44 = vpop.f32.mrf.mxu2  ;;  %v4767_v12 = vpop.f32.mrf.mxu0 }
 0x5cc   : > { %5883 = vst.msk [vmem:[#allocation3 + $0xc0] sm:$0xff] %vm468_vm3, %v5833_v0  ;;  %v5379_v50 = vadd.f32 %v5287_v44, %v4987_v53  ;;  %v5638_v41 = vpop.f32.mrf.mxu3  ;;  %v4988_v61 = vpop.f32.mrf.mxu1  ;;  %v10849_v53 = vld [vmem:[#allocation2 + $0x180] sm:$0xff] }
 0x5cd   : > { %v4989_v57 = vadd.f32 %v4988_v61, %v4767_v12  ;;  %v10852_v12 = vld [vmem:[#allocation2 + $0x181] sm:$0xff] }
 0x5ce   : > { %v5730_v10 = vadd.f32 %v5638_v41, %v5379_v50 }
 0x5d0   : > { %v5784_v58 = vadd.f32 %v10558_v62, %v5730_v10  ;;  %v4606_v10 = vpack.c.bf16 %v5449_v51, %v10820_v43 }
 0x5d2   : > { %v5834_v16 = vmax.f32 %v5784_v58, 0.0  ;;  %v5100_v58 = vld [vmem:[#allocation2 + $0x178] sm:$0xff] }
 0x5d3   : > { %v5289_v32 = vpop.f32.mrf.mxu2  ;;  %v4770_v40 = vpop.f32.mrf.mxu0 }
 0x5d4   : > { %5884 = vst.msk [vmem:[#allocation3 + $0xc8] sm:$0xff] %vm468_vm3, %v5834_v16  ;;  %v5380_v2 = vadd.f32 %v5289_v32, %v4989_v57  ;;  %v5640_v63 = vpop.f32.mrf.mxu3  ;;  %v4991_v19 = vpop.f32.mrf.mxu1  ;;  %v4527_v57 = vpack.c.bf16 %v5098_v52, %v10817_v26  ;;  %v5128_v32 = vpack.c.bf16 %v10849_v53, %v5100_v58 }
 0x5d5   : > { %v4992_v54 = vadd.f32 %v4991_v19, %v4770_v40 }
 0x5d6   : > { %v5731_v36 = vadd.f32 %v5640_v63, %v5380_v2  ;;  %8442 = vmatmul.msk.bf16.gmra.mxu0 %vm413_vm2, %v4604_v49  ;;  %v5451_v2 = vld [vmem:[#allocation2 + $0x179] sm:$0xff] }
 0x5d7   : > { %8475 = vmatmul.msk.bf16.gmra.mxu1 %vm413_vm2, %v4525_v55  ;;  %v5479_v63 = vpack.c.bf16 %v10852_v12, %v5451_v2 }
 0x5d8   : > { %v5785_v28 = vadd.f32 %v10558_v62, %v5731_v36  ;;  %8512 = vmatmul.msk.bf16.gmra.mxu2 %vm413_vm2, %v5126_v9 }
 0x5d9   : > { %8549 = vmatmul.msk.bf16.gmra.mxu3 %vm413_vm2, %v5477_v39 }
 0x5da   : > { %v5835_v56 = vmax.f32 %v5785_v28, 0.0 }
 0x5db   : > { %v5292_v8 = vpop.f32.mrf.mxu2  ;;  %v4772_v42 = vpop.f32.mrf.mxu0 }
 0x5dc   : > { %5885 = vst.msk [vmem:[#allocation3 + $0xd0] sm:$0xff] %vm468_vm3, %v5835_v56  ;;  %v5381_v18 = vadd.f32 %v5292_v8, %v4992_v54  ;;  %v5643_v20 = vpop.f32.mrf.mxu3  ;;  %v4993_v7 = vpop.f32.mrf.mxu1  ;;  %v5102_v54 = vld [vmem:[#allocation2 + $0x188] sm:$0xff]  ;;  %v5103_v8 = vld [vmem:[#allocation2 + $0x190] sm:$0xff] }
 0x5dd   : > { %v4994_v59 = vadd.f32 %v4993_v7, %v4772_v42  ;;  %v5453_v7 = vld [vmem:[#allocation2 + $0x189] sm:$0xff] }
 0x5de   : > { %v5732_v22 = vadd.f32 %v5643_v20, %v5381_v18 }
 0x5e0   : > { %v5786_v47 = vadd.f32 %v10558_v62, %v5732_v22  ;;  %v5454_v22 = vld [vmem:[#allocation2 + $0x191] sm:$0xff] }
 0x5e2   : > { %v5836_v31 = vmax.f32 %v5786_v47, 0.0 }
 0x5e3   : > { %v5294_v48 = vpop.f32.mrf.mxu2  ;;  %v4775_v27 = vpop.f32.mrf.mxu0 }
 0x5e4   : > { %5886 = vst.msk [vmem:[#allocation3 + $0xd8] sm:$0xff] %vm468_vm3, %v5836_v31  ;;  %v5382_v23 = vadd.f32 %v5294_v48, %v4994_v59  ;;  %v5645_v4 = vpop.f32.mrf.mxu3  ;;  %v4996_v33 = vpop.f32.mrf.mxu1  ;;  %v4607_v31 = vpack.c.bf16 %v5451_v2, %v10836_v6  ;;  %v4528_v48 = vpack.c.bf16 %v5100_v58, %v10833_v45 }
 0x5e5   : > { %v4997_v14 = vadd.f32 %v4996_v33, %v4775_v27 }
 0x5e6   : > { %v5733_v17 = vadd.f32 %v5645_v4, %v5382_v23  ;;  %8443 = vmatmul.msk.bf16.gmra.mxu0 %vm413_vm2, %v4605_v11  ;;  %v5129_v23 = vpack.c.bf16 %v5103_v8, %v5102_v54  ;;  %v10872_v4 = vld [vmem:[%s11500_s4] ss:$0 sm:$0xff]  ;;  %v10893_v8 = vld [vmem:[#allocation3 + $0x21] sm:$0xff] }
 0x5e7   : > { %8476 = vmatmul.msk.bf16.gmra.mxu1 %vm413_vm2, %v4526_v5 }
 0x5e8   : > { %v5787_v13 = vadd.f32 %v10558_v62, %v5733_v17  ;;  %8513 = vmatmul.msk.bf16.gmra.mxu2 %vm413_vm2, %v5127_v15 }
 0x5e9   : > { %8550 = vmatmul.msk.bf16.gmra.mxu3 %vm413_vm2, %v5478_v21  ;;  %v5104_v21 = vld [vmem:[#allocation2 + $0x198] sm:$0xff] }
 0x5ea   : > { %v5837_v29 = vmax.f32 %v5787_v13, 0.0  ;;  %v5105_v13 = vld [vmem:[#allocation2 + $0x1a0] sm:$0x3f] }
 0x5eb   : > { %v5297_v3 = vpop.f32.mrf.mxu2  ;;  %v4777_v60 = vpop.f32.mrf.mxu0 }
 0x5ec   : > { %5887 = vst.msk [vmem:[#allocation3 + $0xe0] sm:$0xff] %vm468_vm3, %v5837_v29  ;;  %v5383_v34 = vadd.f32 %v5297_v3, %v4997_v14  ;;  %v5648_v24 = vpop.f32.mrf.mxu3  ;;  %v4998_v1 = vpop.f32.mrf.mxu1  ;;  %v4583_v3 = vld [vmem:[#allocation2 + $0x189] sm:$0x3f] }
 0x5ed   : > { %v4999_v30 = vadd.f32 %v4998_v1, %v4777_v60  ;;  %v4504_v1 = vld [vmem:[#allocation2 + $0x188] sm:$0x3f] }
 0x5ee   : > { %v5734_v35 = vadd.f32 %v5648_v24, %v5383_v34  ;;  %v5455_v34 = vld [vmem:[#allocation2 + $0x199] sm:$0xff]  ;;  %v5456_v24 = vld [vmem:[#allocation2 + $0x1a1] sm:$0x3f] }
 0x5f0   : > { %v5788_v37 = vadd.f32 %v10558_v62, %v5734_v35 }
 0x5f2   : > { %v5838_v38 = vmax.f32 %v5788_v37, 0.0 }
 0x5f3   : > { %v5299_v0 = vpop.f32.mrf.mxu2  ;;  %v4780_v41 = vpop.f32.mrf.mxu0 }
 0x5f4   : > { %5888 = vst.msk [vmem:[#allocation3 + $0xe8] sm:$0xff] %vm468_vm3, %v5838_v38  ;;  %v5384_v44 = vadd.f32 %v5299_v0, %v4999_v30  ;;  %v5650_v50 = vpop.f32.mrf.mxu3  ;;  %v5001_v61 = vpop.f32.mrf.mxu1  ;;  %v5130_v30 = vpack.c.bf16 %v5105_v13, %v5104_v21  ;;  %v5915_v13 = vld [vmem:[#allocation3 + $0x10] sm:$0xff] }
 0x5f5   : > { %v5002_v19 = vadd.f32 %v5001_v61, %v4780_v41  ;;  %v4529_v61 = vpack.c.bf16 %v4504_v1, %v10849_v53  ;;  %v7478_v1 = vld [vmem:[%s11507_s11 + $0x10] sm:$0xff] }
 0x5f6   : > { %v5735_v16 = vadd.f32 %v5650_v50, %v5384_v44  ;;  %8444 = vmatmul.msk.bf16.gmra.mxu0 %vm413_vm2, %v4606_v10  ;;  %v4608_v44 = vpack.c.bf16 %v4583_v3, %v10852_v12  ;;  %v5481_v50 = vpack.c.bf16 %v5456_v24, %v5455_v34  ;;  %v6003_v24 = vld [vmem:[#allocation3 + $0x11] sm:$0xff] }
 0x5f7   : > { %8477 = vmatmul.msk.bf16.gmra.mxu1 %vm413_vm2, %v4527_v57 }
 0x5f8   : > { %v5789_v40 = vadd.f32 %v10558_v62, %v5735_v16  ;;  %8514 = vmatmul.msk.bf16.gmra.mxu2 %vm413_vm2, %v5128_v32 }
 0x5f9   : > { %8551 = vmatmul.msk.bf16.gmra.mxu3 %vm413_vm2, %v5479_v63 }
 0x5fa   : > { %v5839_v43 = vmax.f32 %v5789_v40, 0.0 }
 0x5fb   : > { %v5302_v49 = vpop.f32.mrf.mxu2  ;;  %v4782_v36 = vpop.f32.mrf.mxu0 }
 0x5fc   : > { %5889 = vst.msk [vmem:[#allocation3 + $0xf0] sm:$0xff] %vm468_vm3, %v5839_v43  ;;  %v5385_v26 = vadd.f32 %v5302_v49, %v5002_v19  ;;  %v5653_v25 = vpop.f32.mrf.mxu3  ;;  %v5003_v55 = vpop.f32.mrf.mxu1  ;;  %v6001_v43 = vld [vmem:[#allocation3 + $0x1] sm:$0xff]  ;;  %v6002_v19 = vld [vmem:[#allocation3 + $0x9] sm:$0xff] }
 0x5fd   : > { %v5004_v28 = vadd.f32 %v5003_v55, %v4782_v36  ;;  %v5913_v49 = vld [vmem:[#allocation3] sm:$0xff] }
 0x5fe   : > { %v5736_v9 = vadd.f32 %v5653_v25, %v5385_v26  ;;  %v5914_v26 = vld [vmem:[#allocation3 + $0x8] sm:$0xff] }
 0x5ff   : > { %v5966_v54 = vpack.c.bf16 %v5914_v26, %v5913_v49  ;;  %v10930_v26 = vld [vmem:[#allocation3 + $0x40] sm:$0xff] }
 0x600   : > { %v5790_v46 = vadd.f32 %v10558_v62, %v5736_v9  ;;  %v5480_v62 = vpack.c.bf16 %v5454_v22, %v5453_v7  ;;  %v6054_v9 = vpack.c.bf16 %v6002_v19, %v6001_v43  ;;  %v8871_v7 = vmov 0  }
 0x601   : > { %8849 = vset.pattern.permute.xlu0 %v8871_v7  ;;  %8850 = vset.pattern.permute.xlu1 %v8871_v7 }
 0x602   : > { %v5840_v39 = vmax.f32 %v5790_v46, 0.0  ;;  %v10890_v46 = vld [vmem:[#allocation3 + $0x20] sm:$0xff]  ;;  %8851 = vset.pattern.permute.xlu2 %v8871_v7  ;;  %7541 = vperm.xlu1 %8850, %v7478_v1   ;;  %v6982_v1 = vld [vmem:[#allocation3 + $0x49] sm:$0xff] }
 0x603   : > { %v5304_v56 = vpop.f32.mrf.mxu2  ;;  %v4785_v42 = vpop.f32.mrf.mxu0 }
 0x604   : > { %5890 = vst.msk [vmem:[#allocation3 + $0xf8] sm:$0xff] %vm468_vm3, %v5840_v39  ;;  %v5386_v18 = vadd.f32 %v5304_v56, %v5004_v28  ;;  %v5655_v20 = vpop.f32.mrf.mxu3  ;;  %v5006_v47 = vpop.f32.mrf.mxu1 }
 0x605   : > { %v5007_v33 = vadd.f32 %v5006_v47, %v4785_v42  ;;  %v6586_v42 = vld [vmem:[#allocation3 + $0x18] sm:$0xff] }
 0x606   : > { %v5737_v59 = vadd.f32 %v5655_v20, %v5386_v18  ;;  %8445 = vmatmul.msk.bf16.gmra.mxu0 %vm413_vm2, %v4607_v31  ;;  %v7476_v18 = vld [vmem:[%s11507_s11] sm:$0xff]  ;;  %v6639_v47 = vpack.c.bf16 %v10890_v46, %v6586_v42  ;;  %v6976_v31 = vld [vmem:[#allocation3 + $0x19] sm:$0xff] }
 0x607   : > { %8478 = vmatmul.msk.bf16.gmra.mxu1 %vm413_vm2, %v4528_v48  ;;  %7531 = vperm.xlu0 %8849, %v7476_v18  }
 0x608   : > { %v5791_v27 = vadd.f32 %v10872_v4, %v5737_v59  ;;  %8515 = vmatmul.msk.bf16.gmra.mxu2 %vm413_vm2, %v5129_v23  ;;  %v7029_v59 = vpack.c.bf16 %v10893_v8, %v6976_v31 }
 0x609   : > { %8552 = vmatmul.msk.bf16.gmra.mxu3 %vm413_vm2, %v5480_v62 }
 0x60a   : > { %v5841_v6 = vmax.f32 %v5791_v27, 0.0 }
 0x60b   : > { %v5307_v45 = vpop.f32.mrf.mxu2  ;;  %v4787_v17 = vpop.f32.mrf.mxu0 }
 0x60c   : > { %5891 = vst.msk [vmem:[#allocation3 + $0x100] sm:$0xff] %vm468_vm3, %v5841_v6  ;;  %v5387_v11 = vadd.f32 %v5307_v45, %v5007_v33  ;;  %v5658_v52 = vpop.f32.mrf.mxu3  ;;  %v5008_v5 = vpop.f32.mrf.mxu1 }
 0x60d   : > { %v5009_v14 = vadd.f32 %v5008_v5, %v4787_v17 }
 0x60e   : > { %v5738_v15 = vadd.f32 %v5658_v52, %v5387_v11  ;;  %v7477_v11 = vld [vmem:[%s11507_s11 + $0x8] sm:$0xff] }
 0x60f   : > { %7536 = vperm.xlu0 %8849, %v7477_v11   ;;  %v10946_v11 = vld [vmem:[#allocation3 + $0x50] sm:$0xff] }
 0x610   : > { %v5792_v51 = vadd.f32 %v10872_v4, %v5738_v15 }
 0x612   : > { %v5842_v29 = vmax.f32 %v5792_v51, 0.0 }
 0x613   : > { %v5309_v60 = vpop.f32.mrf.mxu2  ;;  %v4790_v38 = vpop.f32.mrf.mxu0 }
 0x614   : > { %5892 = vst.msk [vmem:[#allocation3 + $0x108] sm:$0xff] %vm468_vm3, %v5842_v29  ;;  %v5388_v35 = vadd.f32 %v5309_v60, %v5009_v14  ;;  %v5660_v37 = vpop.f32.mrf.mxu3  ;;  %v5011_v0 = vpop.f32.mrf.mxu1  ;;  %v10910_v29 = vld [vmem:[#allocation3 + $0x30] sm:$0xff] }
 0x615   : > { %v5012_v16 = vadd.f32 %v5011_v0, %v4790_v38  ;;  %v10913_v60 = vld [vmem:[#allocation3 + $0x31] sm:$0xff]  ;;  %v6588_v38 = vld [vmem:[#allocation3 + $0x28] sm:$0xff]  ;;  %v5967_v0 = vpack.c.bf16 %v6586_v42, %v5915_v13  ;;  %v6980_v42 = vld [vmem:[#allocation3 + $0x39] sm:$0xff] }
 0x616   : > { %v5739_v41 = vadd.f32 %v5660_v37, %v5388_v35  ;;  %8446 = vmatmul.msk.bf16.gmra.mxu0 %vm413_vm2, %v4608_v44  ;;  %v6055_v37 = vpack.c.bf16 %v6976_v31, %v6003_v24  ;;  %v6640_v44 = vpack.c.bf16 %v10910_v29, %v6588_v38  ;;  %v5968_v18 = vpack.c.bf16 %v6588_v38, %v10890_v46 }
 0x617   : > { %8479 = vmatmul.msk.bf16.gmra.mxu1 %vm413_vm2, %v4529_v61  ;;  %v6057_v13 = vpack.c.bf16 %v6980_v42, %v10913_v60 }
 0x618   : > { %v5793_v10 = vadd.f32 %v10872_v4, %v5739_v41  ;;  %8516 = vmatmul.msk.bf16.gmra.mxu2 %vm413_vm2, %v5130_v30 }
 0x619   : > { %8553 = vmatmul.msk.bf16.gmra.mxu3 %vm413_vm2, %v5481_v50  ;;  %v6978_v50 = vld [vmem:[#allocation3 + $0x29] sm:$0xff] }
 0x61a   : > { %v5843_v58 = vmax.f32 %v5793_v10, 0.0  ;;  %v7030_v41 = vpack.c.bf16 %v10913_v60, %v6978_v50 }
 0x61b   : > { %v5312_v57 = vpop.f32.mrf.mxu2  ;;  %v4792_v2 = vpop.f32.mrf.mxu0 }
 0x61c   : > { %5893 = vst.msk [vmem:[#allocation3 + $0x110] sm:$0xff] %vm468_vm3, %v5843_v58  ;;  %v5389_v12 = vadd.f32 %v5312_v57, %v5012_v16  ;;  %v5663_v32 = vpop.f32.mrf.mxu3  ;;  %v5013_v63 = vpop.f32.mrf.mxu1 }
 0x61d   : > { %v5014_v36 = vadd.f32 %v5013_v63, %v4792_v2  ;;  %v7479_v2 = vld [vmem:[%s11507_s11 + $0x18] sm:$0xff] }
 0x61e   : > { %v5740_v53 = vadd.f32 %v5663_v32, %v5389_v12  ;;  %7546 = vperm.xlu1 %8850, %v7479_v2  }
 0x620   : > { %v5794_v40 = vadd.f32 %v10872_v4, %v5740_v53 }
 0x622   : > { %v5844_v25 = vmax.f32 %v5794_v40, 0.0 }
 0x623   : > { %v5314_v55 = vpop.f32.mrf.mxu2  ;;  %v4795_v56 = vpop.f32.mrf.mxu0 }
 0x624   : > { %5894 = vst.msk [vmem:[#allocation3 + $0x118] sm:$0xff] %vm468_vm3, %v5844_v25  ;;  %v5390_v39 = vadd.f32 %v5314_v55, %v5014_v36  ;;  %v5665_v28 = vpop.f32.mrf.mxu3  ;;  %v5016_v20 = vpop.f32.mrf.mxu1 }
 0x625   : > { %v5017_v62 = vadd.f32 %v5016_v20, %v4795_v56  ;;  %v6590_v56 = vld [vmem:[#allocation3 + $0x38] sm:$0xff] }
 0x626   : > { %v5741_v22 = vadd.f32 %v5665_v28, %v5390_v39  ;;  %8578 = vmatmul.msk.bf16.vlgmr.msra.gmra.mxu0 %vm468_vm3, %v6054_v9  ;;  %v10933_v9 = vld [vmem:[#allocation3 + $0x41] sm:$0xff]  ;;  %v6056_v28 = vpack.c.bf16 %v6978_v50, %v10893_v8  ;;  %v6641_v20 = vpack.c.bf16 %v10930_v26, %v6590_v56  ;;  %v7480_v50 = vld [vmem:[%s11507_s11 + $0x20] sm:$0xff] }
 0x627   : > { %8621 = vmatmul.msk.bf16.vlgmr.msra.gmra.mxu1 %vm468_vm3, %v5966_v54  ;;  %v7031_v7 = vpack.c.bf16 %v10933_v9, %v6980_v42  ;;  %7551 = vperm.xlu2 %8851, %v7480_v50  }
 0x628   : > { %v5795_v48 = vadd.f32 %v10872_v4, %v5741_v22  ;;  %8672 = vmatmul.msk.bf16.vlgmr.msra.gmra.mxu2 %vm468_vm3, %v6639_v47 }
 0x629   : > { %8723 = vmatmul.msk.bf16.vlgmr.msra.gmra.mxu3 %vm468_vm3, %v7029_v59 }
 0x62a   : > { %v5845_v23 = vmax.f32 %v5795_v48, 0.0 }
 0x62b   : > { %v5317_v27 = vpop.f32.mrf.mxu2  ;;  %v4797_v45 = vpop.f32.mrf.mxu0 }
 0x62c   : > { %5895 = vst.msk [vmem:[#allocation3 + $0x120] sm:$0xff] %vm468_vm3, %v5845_v23  ;;  %v5391_v6 = vadd.f32 %v5317_v27, %v5017_v62  ;;  %v5668_v33 = vpop.f32.mrf.mxu3  ;;  %v5018_v52 = vpop.f32.mrf.mxu1 }
 0x62d   : > { %v5019_v51 = vadd.f32 %v5018_v52, %v4797_v45 }
 0x62e   : > { %v5742_v17 = vadd.f32 %v5668_v33, %v5391_v6 }
 0x630   : > { %v5796_v5 = vadd.f32 %v10872_v4, %v5742_v17 }
 0x632   : > { %v5846_v15 = vmax.f32 %v5796_v5, 0.0 }
 0x633   : > { %v5319_v21 = vpop.f32.mrf.mxu2  ;;  %v4800_v34 = vpop.f32.mrf.mxu0 }
 0x634   : > { %5896 = vst.msk [vmem:[#allocation3 + $0x128] sm:$0xff] %vm468_vm3, %v5846_v15  ;;  %v5392_v14 = vadd.f32 %v5319_v21, %v5019_v51  ;;  %v5670_v3 = vpop.f32.mrf.mxu3  ;;  %v5021_v35 = vpop.f32.mrf.mxu1  ;;  %v10949_v15 = vld [vmem:[#allocation3 + $0x51] sm:$0xff]  ;;  %v7482_v51 = vld [vmem:[%s11507_s11 + $0x30] sm:$0xff] }
 0x635   : > { %v5022_v58 = vadd.f32 %v5021_v35, %v4800_v34  ;;  %7561 = vperm.xlu0 %8849, %v7482_v51   ;;  %v5969_v34 = vpack.c.bf16 %v6590_v56, %v10910_v29  ;;  %v7032_v35 = vpack.c.bf16 %v10949_v15, %v6982_v1 }
 0x636   : > { %v5743_v30 = vadd.f32 %v5670_v3, %v5392_v14  ;;  %8579 = vmatmul.msk.bf16.gmra.mxu0 %vm468_vm3, %v6055_v37  ;;  %v6592_v14 = vld [vmem:[#allocation3 + $0x48] sm:$0xff] }
 0x637   : > { %8622 = vmatmul.msk.bf16.gmra.mxu1 %vm468_vm3, %v5967_v0  ;;  %v6642_v24 = vpack.c.bf16 %v10946_v11, %v6592_v14 }
 0x638   : > { %v5797_v61 = vadd.f32 %v10872_v4, %v5743_v30  ;;  %8673 = vmatmul.msk.bf16.gmra.mxu2 %vm468_vm3, %v6640_v44 }
 0x639   : > { %8724 = vmatmul.msk.bf16.gmra.mxu3 %vm468_vm3, %v7030_v41  ;;  %v7483_v41 = vld [vmem:[%s11507_s11 + $0x38] sm:$0xff] }
 0x63a   : > { %v5847_v10 = vmax.f32 %v5797_v61, 0.0  ;;  %7566 = vperm.xlu1 %8850, %v7483_v41   ;;  %v11015_v41 = vld [vmem:[#allocation3 + $0x80] sm:$0xff] }
 0x63b   : > { %v5322_v16 = vpop.f32.mrf.mxu2  ;;  %v4802_v32 = vpop.f32.mrf.mxu0 }
 0x63c   : > { %5897 = vst.msk [vmem:[#allocation3 + $0x130] sm:$0xff] %vm468_vm3, %v5847_v10  ;;  %v5393_v57 = vadd.f32 %v5322_v16, %v5022_v58  ;;  %v5673_v12 = vpop.f32.mrf.mxu3  ;;  %v5023_v63 = vpop.f32.mrf.mxu1 }
 0x63d   : > { %v5024_v19 = vadd.f32 %v5023_v63, %v4802_v32  ;;  %v10971_v32 = vld [vmem:[#allocation3 + $0x60] sm:$0xff] }
 0x63e   : > { %v5744_v53 = vadd.f32 %v5673_v12, %v5393_v57 }
 0x640   : > { %v5798_v40 = vadd.f32 %v10872_v4, %v5744_v53 }
 0x642   : > { %v5848_v43 = vmax.f32 %v5798_v40, 0.0  ;;  %v10974_v40 = vld [vmem:[#allocation3 + $0x61] sm:$0xff] }
 0x643   : > { %v5324_v49 = vpop.f32.mrf.mxu2  ;;  %v4805_v55 = vpop.f32.mrf.mxu0 }
 0x644   : > { %5898 = vst.msk [vmem:[#allocation3 + $0x138] sm:$0xff] %vm468_vm3, %v5848_v43  ;;  %v5394_v25 = vadd.f32 %v5324_v49, %v5024_v19  ;;  %v5675_v36 = vpop.f32.mrf.mxu3  ;;  %v5026_v39 = vpop.f32.mrf.mxu1  ;;  %v7481_v43 = vld [vmem:[%s11507_s11 + $0x28] sm:$0xff]  ;;  %v6058_v49 = vpack.c.bf16 %v6982_v1, %v10933_v9 }
 0x645   : > { %v5027_v47 = vadd.f32 %v5026_v39, %v4805_v55  ;;  %7556 = vperm.xlu2 %8851, %v7481_v43   ;;  %v5970_v55 = vpack.c.bf16 %v6592_v14, %v10930_v26  ;;  %v6986_v14 = vld [vmem:[#allocation3 + $0x69] sm:$0xff] }
 0x646   : > { %v5745_v54 = vadd.f32 %v5675_v36, %v5394_v25  ;;  %8580 = vmatmul.msk.bf16.gmra.mxu0 %vm468_vm3, %v6056_v28  ;;  %v6594_v25 = vld [vmem:[#allocation3 + $0x58] sm:$0xff] }
 0x647   : > { %8623 = vmatmul.msk.bf16.gmra.mxu1 %vm468_vm3, %v5968_v18  ;;  %v6643_v39 = vpack.c.bf16 %v10971_v32, %v6594_v25  ;;  %v6984_v28 = vld [vmem:[#allocation3 + $0x59] sm:$0xff] }
 0x648   : > { %v5799_v22 = vadd.f32 %v10872_v4, %v5745_v54  ;;  %8674 = vmatmul.msk.bf16.gmra.mxu2 %vm468_vm3, %v6641_v20  ;;  %v7033_v56 = vpack.c.bf16 %v10974_v40, %v6984_v28 }
 0x649   : > { %8725 = vmatmul.msk.bf16.gmra.mxu3 %vm468_vm3, %v7031_v7 }
 0x64a   : > { %v5849_v8 = vmax.f32 %v5799_v22, 0.0  ;;  %v7485_v22 = vld [vmem:[%s11507_s11 + $0x48] sm:$0xff] }
 0x64b   : > { %v5327_v31 = vpop.f32.mrf.mxu2  ;;  %v4807_v48 = vpop.f32.mrf.mxu0  ;;  %7576 = vperm.xlu0 %8849, %v7485_v22  }
 0x64c   : > { %5899 = vst.msk [vmem:[#allocation3 + $0x140] sm:$0xff] %vm468_vm3, %v5849_v8  ;;  %v5395_v46 = vadd.f32 %v5327_v31, %v5027_v47  ;;  %v5678_v59 = vpop.f32.mrf.mxu3  ;;  %v5028_v23 = vpop.f32.mrf.mxu1 }
 0x64d   : > { %v5029_v33 = vadd.f32 %v5028_v23, %v4807_v48  ;;  %v10993_v23 = vld [vmem:[#allocation3 + $0x70] sm:$0xff] }
 0x64e   : > { %v5746_v62 = vadd.f32 %v5678_v59, %v5395_v46 }
 0x650   : > { %v5800_v27 = vadd.f32 %v10872_v4, %v5746_v62 }
 0x652   : > { %v5850_v6 = vmax.f32 %v5800_v27, 0.0 }
 0x653   : > { %v5329_v45 = vpop.f32.mrf.mxu2  ;;  %v4810_v5 = vpop.f32.mrf.mxu0 }
 0x654   : > { %5900 = vst.msk [vmem:[#allocation3 + $0x148] sm:$0xff] %vm468_vm3, %v5850_v6  ;;  %v5396_v52 = vadd.f32 %v5329_v45, %v5029_v33  ;;  %v5680_v17 = vpop.f32.mrf.mxu3  ;;  %v5031_v21 = vpop.f32.mrf.mxu1  ;;  %v10996_v33 = vld [vmem:[#allocation3 + $0x71] sm:$0xff]  ;;  %v7486_v45 = vld [vmem:[%s11507_s11 + $0x50] sm:$0xff] }
 0x655   : > { %v5032_v38 = vadd.f32 %v5031_v21, %v4810_v5  ;;  %v6596_v5 = vld [vmem:[#allocation3 + $0x68] sm:$0xff]  ;;  %7581 = vperm.xlu1 %8850, %v7486_v45   ;;  %v5971_v21 = vpack.c.bf16 %v6594_v25, %v10946_v11 }
 0x656   : > { %v5747_v3 = vadd.f32 %v5680_v17, %v5396_v52  ;;  %8581 = vmatmul.msk.bf16.gmra.mxu0 %vm468_vm3, %v6057_v13  ;;  %v6059_v17 = vpack.c.bf16 %v6984_v28, %v10949_v15  ;;  %v6644_v13 = vpack.c.bf16 %v10993_v23, %v6596_v5  ;;  %v5972_v43 = vpack.c.bf16 %v6596_v5, %v10971_v32  ;;  %v8833_v5 = vld [vmem:[%s11503_s7 + $0x38] sm:$0xff] }
 0x657   : > { %8624 = vmatmul.msk.bf16.gmra.mxu1 %vm468_vm3, %v5969_v34  ;;  %7973 = vmatpush.bf16.msrb.mxu0 %v8833_v5 }
 0x658   : > { %v5801_v37 = vadd.f32 %v10872_v4, %v5747_v3  ;;  %8675 = vmatmul.msk.bf16.gmra.mxu2 %vm468_vm3, %v6642_v24  ;;  %v7034_v3 = vpack.c.bf16 %v10996_v33, %v6986_v14 }
 0x659   : > { %8726 = vmatmul.msk.bf16.gmra.mxu3 %vm468_vm3, %v7032_v35 }
 0x65a   : > { %v5851_v60 = vmax.f32 %v5801_v37, 0.0 }
 0x65b   : > { %v5332_v30 = vpop.f32.mrf.mxu2  ;;  %v4812_v44 = vpop.f32.mrf.mxu0 }
 0x65c   : > { %5901 = vst.msk [vmem:[#allocation3 + $0x150] sm:$0xff] %vm468_vm3, %v5851_v60  ;;  %v5397_v29 = vadd.f32 %v5332_v30, %v5032_v38  ;;  %v5683_v0 = vpop.f32.mrf.mxu3  ;;  %v5033_v61 = vpop.f32.mrf.mxu1  ;;  %v7484_v60 = vld [vmem:[%s11507_s11 + $0x40] sm:$0xff] }
 0x65d   : > { %v5034_v57 = vadd.f32 %v5033_v61, %v4812_v44  ;;  %7571 = vperm.xlu2 %8851, %v7484_v60  }
 0x65e   : > { %v5748_v10 = vadd.f32 %v5683_v0, %v5397_v29 }
 0x660   : > { %v5802_v58 = vadd.f32 %v10872_v4, %v5748_v10 }
 0x662   : > { %v5852_v16 = vmax.f32 %v5802_v58, 0.0 }
 0x663   : > { %v5334_v12 = vpop.f32.mrf.mxu2  ;;  %v4815_v53 = vpop.f32.mrf.mxu0 }
 0x664   : > { %5902 = vst.msk [vmem:[#allocation3 + $0x158] sm:$0xff] %vm468_vm3, %v5852_v16  ;;  %v5398_v2 = vadd.f32 %v5334_v12, %v5034_v57  ;;  %v5685_v63 = vpop.f32.mrf.mxu3  ;;  %v5036_v19 = vpop.f32.mrf.mxu1  ;;  %v11018_v16 = vld [vmem:[#allocation3 + $0x81] sm:$0xff]  ;;  %v7488_v57 = vld [vmem:[%s11507_s11 + $0x60] sm:$0xff] }
 0x665   : > { %v5037_v18 = vadd.f32 %v5036_v19, %v4815_v53  ;;  %7591 = vperm.xlu0 %8849, %v7488_v57  }
 0x666   : > { %v5749_v36 = vadd.f32 %v5685_v63, %v5398_v2  ;;  %8582 = vmatmul.msk.bf16.gmra.mxu0 %vm468_vm3, %v6058_v49  ;;  %v6060_v2 = vpack.c.bf16 %v6986_v14, %v10974_v40  ;;  %v6598_v63 = vld [vmem:[#allocation3 + $0x78] sm:$0xff] }
 0x667   : > { %8625 = vmatmul.msk.bf16.gmra.mxu1 %vm468_vm3, %v5970_v55  ;;  %v6645_v19 = vpack.c.bf16 %v11015_v41, %v6598_v63  ;;  %v6988_v49 = vld [vmem:[#allocation3 + $0x79] sm:$0xff]  ;;  %v5973_v45 = vpack.c.bf16 %v6598_v63, %v10993_v23  ;;  %v7491_v23 = vld [vmem:[%s11507_s11 + $0x78] sm:$0xff] }
 0x668   : > { %v5803_v54 = vadd.f32 %v10872_v4, %v5749_v36  ;;  %8676 = vmatmul.msk.bf16.gmra.mxu2 %vm468_vm3, %v6643_v39  ;;  %v7035_v25 = vpack.c.bf16 %v11018_v16, %v6988_v49 }
 0x669   : > { %8727 = vmatmul.msk.bf16.gmra.mxu3 %vm468_vm3, %v7033_v56 }
 0x66a   : > { %v5853_v9 = vmax.f32 %v5803_v54, 0.0  ;;  %v7489_v54 = vld [vmem:[%s11507_s11 + $0x68] sm:$0xff] }
 0x66b   : > { %v5337_v20 = vpop.f32.mrf.mxu2  ;;  %v4817_v7 = vpop.f32.mrf.mxu0  ;;  %7596 = vperm.xlu1 %8850, %v7489_v54  }
 0x66c   : > { %5903 = vst.msk [vmem:[#allocation3 + $0x160] sm:$0xff] %vm468_vm3, %v5853_v9  ;;  %v5399_v26 = vadd.f32 %v5337_v20, %v5037_v18  ;;  %v5688_v42 = vpop.f32.mrf.mxu3  ;;  %v5038_v8 = vpop.f32.mrf.mxu1 }
 0x66d   : > { %v5039_v59 = vadd.f32 %v5038_v8, %v4817_v7  ;;  %v11040_v8 = vld [vmem:[#allocation3 + $0x90] sm:$0xff]  ;;  %7606 = vperm.xlu0 %8849, %v7491_v23  }
 0x66e   : > { %v5750_v47 = vadd.f32 %v5688_v42, %v5399_v26  ;;  %v7487_v26 = vld [vmem:[%s11507_s11 + $0x58] sm:$0xff] }
 0x66f   : > { %7586 = vperm.xlu2 %8851, %v7487_v26  }
 0x670   : > { %v5804_v31 = vadd.f32 %v10872_v4, %v5750_v47 }
 0x672   : > { %v5854_v46 = vmax.f32 %v5804_v31, 0.0 }
 0x673   : > { %v5339_v48 = vpop.f32.mrf.mxu2  ;;  %v4820_v6 = vpop.f32.mrf.mxu0 }
 0x674   : > { %5904 = vst.msk [vmem:[#allocation3 + $0x168] sm:$0xff] %vm468_vm3, %v5854_v46  ;;  %v5400_v62 = vadd.f32 %v5339_v48, %v5039_v59  ;;  %v5690_v27 = vpop.f32.mrf.mxu3  ;;  %v5041_v52 = vpop.f32.mrf.mxu1  ;;  %v11043_v59 = vld [vmem:[#allocation3 + $0x91] sm:$0xff] }
 0x675   : > { %v5042_v24 = vadd.f32 %v5041_v52, %v4820_v6 }
 0x676   : > { %v5751_v51 = vadd.f32 %v5690_v27, %v5400_v62  ;;  %8583 = vmatmul.msk.bf16.gmra.mxu0 %vm468_vm3, %v6059_v17  ;;  %v6061_v62 = vpack.c.bf16 %v6988_v49, %v10996_v33  ;;  %v6600_v27 = vld [vmem:[#allocation3 + $0x88] sm:$0xff] }
 0x677   : > { %8626 = vmatmul.msk.bf16.gmra.mxu1 %vm468_vm3, %v5971_v21  ;;  %v6646_v52 = vpack.c.bf16 %v11040_v8, %v6600_v27  ;;  %v6990_v17 = vld [vmem:[#allocation3 + $0x89] sm:$0xff] }
 0x678   : > { %v5805_v34 = vadd.f32 %v10872_v4, %v5751_v51  ;;  %8677 = vmatmul.msk.bf16.gmra.mxu2 %vm468_vm3, %v6644_v13  ;;  %v7036_v51 = vpack.c.bf16 %v11043_v59, %v6990_v17 }
 0x679   : > { %8728 = vmatmul.msk.bf16.gmra.mxu3 %vm468_vm3, %v7034_v3 }
 0x67a   : > { %v5855_v15 = vmax.f32 %v5805_v34, 0.0 }
 0x67b   : > { %v5342_v1 = vpop.f32.mrf.mxu2  ;;  %v4822_v37 = vpop.f32.mrf.mxu0 }
 0x67c   : > { %5905 = vst.msk [vmem:[#allocation3 + $0x170] sm:$0xff] %vm468_vm3, %v5855_v15  ;;  %v5401_v11 = vadd.f32 %v5342_v1, %v5042_v24  ;;  %v5693_v35 = vpop.f32.mrf.mxu3  ;;  %v5043_v38 = vpop.f32.mrf.mxu1 }
 0x67d   : > { %v5044_v44 = vadd.f32 %v5043_v38, %v4822_v37 }
 0x67e   : > { %v5752_v30 = vadd.f32 %v5693_v35, %v5401_v11  ;;  %v7492_v35 = vld [vmem:[%s11507_s11 + $0x80] sm:$0xff] }
 0x67f   : > { %7611 = vperm.xlu1 %8850, %v7492_v35   ;;  %v7493_v35 = vld [vmem:[%s11507_s11 + $0x88] sm:$0xff] }
 0x680   : > { %v5806_v29 = vadd.f32 %v10872_v4, %v5752_v30  ;;  %v11065_v30 = vld [vmem:[#allocation3 + $0xa0] sm:$0xff] }
 0x682   : > { %v5856_v0 = vmax.f32 %v5806_v29, 0.0 }
 0x683   : > { %v5344_v50 = vpop.f32.mrf.mxu2  ;;  %v4825_v58 = vpop.f32.mrf.mxu0 }
 0x684   : > { %5906 = vst.msk [vmem:[#allocation3 + $0x178] sm:$0xff] %vm468_vm3, %v5856_v0  ;;  %v5402_v61 = vadd.f32 %v5344_v50, %v5044_v44  ;;  %v5695_v10 = vpop.f32.mrf.mxu3  ;;  %v5046_v12 = vpop.f32.mrf.mxu1  ;;  %v11068_v50 = vld [vmem:[#allocation3 + $0xa1] sm:$0xff] }
 0x685   : > { %v5047_v55 = vadd.f32 %v5046_v12, %v4825_v58  ;;  %v6602_v58 = vld [vmem:[#allocation3 + $0x98] sm:$0xff] }
 0x686   : > { %v5753_v53 = vadd.f32 %v5695_v10, %v5402_v61  ;;  %8584 = vmatmul.msk.bf16.gmra.mxu0 %vm468_vm3, %v6060_v2  ;;  %v6062_v10 = vpack.c.bf16 %v6990_v17, %v11018_v16  ;;  %v5974_v2 = vpack.c.bf16 %v6600_v27, %v11015_v41  ;;  %v6647_v63 = vpack.c.bf16 %v11065_v30, %v6602_v58  ;;  %v7490_v41 = vld [vmem:[%s11507_s11 + $0x70] sm:$0xff] }
 0x687   : > { %8627 = vmatmul.msk.bf16.gmra.mxu1 %vm468_vm3, %v5972_v43  ;;  %7601 = vperm.xlu2 %8851, %v7490_v41   ;;  %v6996_v41 = vld [vmem:[#allocation3 + $0xb9] sm:$0xff] }
 0x688   : > { %v5807_v36 = vadd.f32 %v10872_v4, %v5753_v53  ;;  %8678 = vmatmul.msk.bf16.gmra.mxu2 %vm468_vm3, %v6645_v19  ;;  %v6992_v53 = vld [vmem:[#allocation3 + $0x99] sm:$0xff] }
 0x689   : > { %8729 = vmatmul.msk.bf16.gmra.mxu3 %vm468_vm3, %v7035_v25  ;;  %v7037_v43 = vpack.c.bf16 %v11068_v50, %v6992_v53 }
 0x68a   : > { %v5857_v40 = vmax.f32 %v5807_v36, 0.0 }
 0x68b   : > { %v5347_v39 = vpop.f32.mrf.mxu2  ;;  %v4827_v56 = vpop.f32.mrf.mxu0 }
 0x68c   : > { %5907 = vst.msk [vmem:[#allocation3 + $0x180] sm:$0xff] %vm468_vm3, %v5857_v40  ;;  %v5403_v32 = vadd.f32 %v5347_v39, %v5047_v55  ;;  %v5698_v28 = vpop.f32.mrf.mxu3  ;;  %v5048_v9 = vpop.f32.mrf.mxu1 }
 0x68d   : > { %v5049_v7 = vadd.f32 %v5048_v9, %v4827_v56  ;;  %v7494_v56 = vld [vmem:[%s11507_s11 + $0x90] sm:$0xff]  ;;  %v11090_v9 = vld [vmem:[#allocation3 + $0xb0] sm:$0xff] }
 0x68e   : > { %v5754_v18 = vadd.f32 %v5698_v28, %v5403_v32  ;;  %v7532_v32 = vpop.permute.xlu0 %7531  ;;  %v11085_v28 = vld [vmem:[%s11502_s6] ss:$0 sm:$0xff]  ;;  %7621 = vperm.xlu0 %8849, %v7494_v56  }
 0x68f   : > { %7616 = vperm.xlu2 %8851, %v7493_v35  }
 0x690   : > { %v5808_v20 = vadd.f32 %v10872_v4, %v5754_v18 }
 0x692   : > { %v5858_v42 = vmax.f32 %v5808_v20, 0.0 }
 0x693   : > { %v5349_v22 = vpop.f32.mrf.mxu2  ;;  %v4830_v46 = vpop.f32.mrf.mxu0 }
 0x694   : > { %5908 = vst.msk [vmem:[#allocation3 + $0x188] sm:$0xff] %vm468_vm3, %v5858_v42  ;;  %v5404_v47 = vadd.f32 %v5349_v22, %v5049_v7  ;;  %v5700_v31 = vpop.f32.mrf.mxu3  ;;  %v5051_v48 = vpop.f32.mrf.mxu1  ;;  %v11093_v7 = vld [vmem:[#allocation3 + $0xb1] sm:$0xff] }
 0x695   : > { %v5052_v13 = vadd.f32 %v5051_v48, %v4830_v46 }
 0x696   : > { %v5755_v6 = vadd.f32 %v5700_v31, %v5404_v47  ;;  %8585 = vmatmul.msk.bf16.gmra.mxu0 %vm468_vm3, %v6061_v62  ;;  %v6063_v47 = vpack.c.bf16 %v6992_v53, %v11043_v59  ;;  %v6604_v31 = vld [vmem:[#allocation3 + $0xa8] sm:$0xff]  ;;  %v5975_v62 = vpack.c.bf16 %v6602_v58, %v11040_v8  ;;  %v7537_v59 = vpop.permute.xlu0 %7536 }
 0x697   : > { %8628 = vmatmul.msk.bf16.gmra.mxu1 %vm468_vm3, %v5973_v45  ;;  %v6648_v27 = vpack.c.bf16 %v11090_v9, %v6604_v31  ;;  %v7495_v8 = vld [vmem:[%s11507_s11 + $0x98] sm:$0xff] }
 0x698   : > { %v5809_v21 = vadd.f32 %v10872_v4, %v5755_v6  ;;  %8679 = vmatmul.msk.bf16.gmra.mxu2 %vm468_vm3, %v6646_v52  ;;  %v6994_v6 = vld [vmem:[#allocation3 + $0xa9] sm:$0xff]  ;;  %7626 = vperm.xlu1 %8850, %v7495_v8  }
 0x699   : > { %8730 = vmatmul.msk.bf16.gmra.mxu3 %vm468_vm3, %v7036_v51  ;;  %v7038_v45 = vpack.c.bf16 %v11093_v7, %v6994_v6  ;;  %v6608_v8 = vld [vmem:[#allocation3 + $0xc8] sm:$0xff] }
 0x69a   : > { %v5859_v33 = vmax.f32 %v5809_v21, 0.0 }
 0x69b   : > { %v5352_v14 = vpop.f32.mrf.mxu2  ;;  %v4832_v15 = vpop.f32.mrf.mxu0 }
 0x69c   : > { %5909 = vst.msk [vmem:[#allocation3 + $0x190] sm:$0xff] %vm468_vm3, %v5859_v33  ;;  %v5405_v3 = vadd.f32 %v5352_v14, %v5052_v13  ;;  %v5703_v34 = vpop.f32.mrf.mxu3  ;;  %v5053_v24 = vpop.f32.mrf.mxu1 }
 0x69d   : > { %v5054_v60 = vadd.f32 %v5053_v24, %v4832_v15 }
 0x69e   : > { %v5756_v1 = vadd.f32 %v5703_v34, %v5405_v3 }
 0x6a0   : > { %v5810_v11 = vadd.f32 %v10872_v4, %v5756_v1  ;;  %v7542_v1 = vpop.permute.xlu1 %7541 }
 0x6a2   : > { %v5860_v37 = vmax.f32 %v5810_v11, 0.0 }
 0x6a3   : > { %v5354_v38 = vpop.f32.mrf.mxu2  ;;  %v6204_v44 = vpop.f32.mrf.mxu0 }
 0x6a4   : > { %5910 = vst.msk [vmem:[#allocation3 + $0x198] sm:$0xff] %vm468_vm3, %v5860_v37  ;;  %v5406_v29 = vadd.f32 %v5354_v38, %v5054_v60  ;;  %v5705_v0 = vpop.f32.mrf.mxu3  ;;  %v6452_v61 = vpop.f32.mrf.mxu1  ;;  %v11111_v38 = vld [vmem:[#allocation3 + $0xc0] sm:$0xff] }
 0x6a5   : > { %v6453_v12 = vadd.f32 %v6452_v61, %v6204_v44 }
 0x6a6   : > { %v5757_v57 = vadd.f32 %v5705_v0, %v5406_v29  ;;  %8586 = vmatmul.msk.bf16.gmra.mxu0 %vm468_vm3, %v6062_v10  ;;  %v11113_v10 = vld [vmem:[#allocation3 + $0xc1] sm:$0xff] }
 0x6a7   : > { %8629 = vmatmul.msk.bf16.gmra.mxu1 %vm468_vm3, %v5974_v2  ;;  %v6606_v2 = vld [vmem:[#allocation3 + $0xb8] sm:$0xff] }
 0x6a8   : > { %v5811_v19 = vadd.f32 %v10872_v4, %v5757_v57  ;;  %8680 = vmatmul.msk.bf16.gmra.mxu2 %vm468_vm3, %v6647_v63  ;;  %v6064_v57 = vpack.c.bf16 %v6994_v6, %v11068_v50  ;;  %v7497_v50 = vld [vmem:[%s11507_s11 + $0xa8] sm:$0xff] }
 0x6a9   : > { %8731 = vmatmul.msk.bf16.gmra.mxu3 %vm468_vm3, %v7037_v43  ;;  %7636 = vperm.xlu0 %8849, %v7497_v50  }
 0x6aa   : > { %v5861_v16 = vmax.f32 %v5811_v19, 0.0  ;;  %v6649_v19 = vpack.c.bf16 %v11111_v38, %v6606_v2 }
 0x6ab   : > { %v6789_v49 = vpop.f32.mrf.mxu2  ;;  %v6206_v40 = vpop.f32.mrf.mxu0 }
 0x6ac   : > { %5912 = vst.msk [vmem:[#allocation3 + $0x1a0] sm:$0x3f] %vm5911_vm5, %v5861_v16  ;;  %v6923_v25 = vadd.f32 %v6789_v49, %v6453_v12  ;;  %v7179_v36 = vpop.f32.mrf.mxu3  ;;  %v6454_v55 = vpop.f32.mrf.mxu1  ;;  %v5976_v12 = vpack.c.bf16 %v6604_v31, %v11065_v30  ;;  %v7039_v16 = vpack.c.bf16 %v11113_v10, %v6996_v41 }
 0x6ad   : > { %v6455_v39 = vadd.f32 %v6454_v55, %v6206_v40  ;;  %v7547_v30 = vpop.permute.xlu1 %7546 }
 0x6ae   : > { %v7313_v4 = vadd.f32 %v7179_v36, %v6923_v25 }
 0x6b0   : > { %v7370_v18 = vadd.f32 %v11085_v28, %v7313_v4 }
 0x6b2   : > { %v7423_v52 = vmax.f32 %v7370_v18, 0.0 }
 0x6b3   : > { %v6791_v54 = vpop.f32.mrf.mxu2  ;;  %v6209_v42 = vpop.f32.mrf.mxu0 }
 0x6b4   : > { %v6924_v20 = vadd.f32 %v6791_v54, %v6455_v39  ;;  %v7181_v26 = vpop.f32.mrf.mxu3  ;;  %v6457_v22 = vpop.f32.mrf.mxu1  ;;  %v7794_v21 = vmul.f32 %v7532_v32, %v7423_v52 }
 0x6b5   : > { %v6458_v48 = vadd.f32 %v6457_v22, %v6209_v42  ;;  %v8832_v42 = vld [vmem:[%s11503_s7 + $0x30] sm:$0xff] }
 0x6b6   : > { %v7314_v46 = vadd.f32 %v7181_v26, %v6924_v20  ;;  %8587 = vmatmul.msk.bf16.gmra.mxu0 %vm468_vm3, %v6063_v47  ;;  %v7552_v20 = vpop.permute.xlu2 %7551  ;;  %v7498_v22 = vld [vmem:[%s11507_s11 + $0xb0] sm:$0xff] }
 0x6b7   : > { %8630 = vmatmul.msk.bf16.gmra.mxu1 %vm468_vm3, %v5975_v62  ;;  %7641 = vperm.xlu1 %8850, %v7498_v22  }
 0x6b8   : > { %8681 = vmatmul.msk.bf16.gmra.mxu2 %vm468_vm3, %v6648_v27  ;;  %v7371_v17 = vadd.f32 %v11085_v28, %v7314_v46  ;;  %7974 = vmatpush.bf16.msrb.mxu0 %v8832_v42  ;;  %v11134_v46 = vld [vmem:[#allocation3 + $0xd0] sm:$0xff] }
 0x6b9   : > { %8732 = vmatmul.msk.bf16.gmra.mxu3 %vm468_vm3, %v7038_v45  ;;  %v11136_v45 = vld [vmem:[#allocation3 + $0xd1] sm:$0xff] }
 0x6ba   : > { %v7424_v5 = vmax.f32 %v7371_v17, 0.0  ;;  %v6065_v17 = vpack.c.bf16 %v6996_v41, %v11093_v7  ;;  %v7496_v7 = vld [vmem:[%s11507_s11 + $0xa0] sm:$0xff] }
 0x6bb   : > { %v6794_v51 = vpop.f32.mrf.mxu2  ;;  %v6211_v14 = vpop.f32.mrf.mxu0  ;;  %7631 = vperm.xlu2 %8851, %v7496_v7  }
 0x6bc   : > { %v7795_v23 = vmul.f32 %v7537_v59, %v7424_v5  ;;  %v6925_v33 = vadd.f32 %v6794_v51, %v6458_v48  ;;  %v7184_v13 = vpop.f32.mrf.mxu3  ;;  %v6459_v3 = vpop.f32.mrf.mxu1  ;;  %v5977_v59 = vpack.c.bf16 %v6606_v2, %v11090_v9 }
 0x6bd   : > { %v6460_v24 = vadd.f32 %v6459_v3, %v6211_v14 }
 0x6be   : > { %v7847_v34 = vadd.f32 %v7795_v23, %v7794_v21  ;;  %v7315_v15 = vadd.f32 %v7184_v13, %v6925_v33  ;;  %v6650_v23 = vpack.c.bf16 %v11134_v46, %v6608_v8  ;;  %v6998_v33 = vld [vmem:[#allocation3 + $0xc9] sm:$0xff]  ;;  %v7557_v9 = vpop.permute.xlu2 %7556 }
 0x6bf   : > { %v7040_v13 = vpack.c.bf16 %v11136_v45, %v6998_v33 }
 0x6c0   : > { %v7372_v11 = vadd.f32 %v11085_v28, %v7315_v15 }
 0x6c2   : > { %v7425_v37 = vmax.f32 %v7372_v11, 0.0 }
 0x6c3   : > { %v6796_v60 = vpop.f32.mrf.mxu2  ;;  %v6214_v61 = vpop.f32.mrf.mxu0 }
 0x6c4   : > { %v7796_v29 = vmul.f32 %v7542_v1, %v7425_v37  ;;  %v6926_v0 = vadd.f32 %v6796_v60, %v6460_v24  ;;  %v7186_v44 = vpop.f32.mrf.mxu3  ;;  %v6462_v58 = vpop.f32.mrf.mxu1 }
 0x6c5   : > { %v6463_v43 = vadd.f32 %v6462_v58, %v6214_v61  ;;  %v7562_v61 = vpop.permute.xlu0 %7561 }
 0x6c6   : > { %v7848_v63 = vadd.f32 %v7847_v34, %v7796_v29  ;;  %v7316_v53 = vadd.f32 %v7186_v44, %v6926_v0  ;;  %8588 = vmatmul.msk.bf16.gmra.mxu0 %vm468_vm3, %v6064_v57  ;;  %v7500_v44 = vld [vmem:[%s11507_s11 + $0xc0] sm:$0xff] }
 0x6c7   : > { %8631 = vmatmul.msk.bf16.gmra.mxu1 %vm468_vm3, %v5976_v12  ;;  %7651 = vperm.xlu0 %8849, %v7500_v44   ;;  %v11154_v12 = vld [vmem:[#allocation3 + $0xe0] sm:$0xff] }
 0x6c8   : > { %8682 = vmatmul.msk.bf16.gmra.mxu2 %vm468_vm3, %v6649_v19  ;;  %v7373_v49 = vadd.f32 %v11085_v28, %v7316_v53  ;;  %v11156_v19 = vld [vmem:[#allocation3 + $0xe1] sm:$0xff] }
 0x6c9   : > { %8733 = vmatmul.msk.bf16.gmra.mxu3 %vm468_vm3, %v7039_v16  ;;  %v6066_v16 = vpack.c.bf16 %v6998_v33, %v11113_v10  ;;  %v7501_v10 = vld [vmem:[%s11507_s11 + $0xc8] sm:$0xff] }
 0x6ca   : > { %v7426_v25 = vmax.f32 %v7373_v49, 0.0  ;;  %v5978_v49 = vpack.c.bf16 %v6608_v8, %v11111_v38  ;;  %v7567_v38 = vpop.permute.xlu1 %7566  ;;  %7656 = vperm.xlu1 %8850, %v7501_v10   ;;  %v6614_v10 = vld [vmem:[#allocation3 + $0xf8] sm:$0xff] }
 0x6cb   : > { %v6799_v36 = vpop.f32.mrf.mxu2  ;;  %v6216_v39 = vpop.f32.mrf.mxu0 }
 0x6cc   : > { %v7797_v40 = vmul.f32 %v7547_v30, %v7426_v25  ;;  %v6927_v55 = vadd.f32 %v6799_v36, %v6463_v43  ;;  %v7189_v4 = vpop.f32.mrf.mxu3  ;;  %v6464_v32 = vpop.f32.mrf.mxu1  ;;  %v6610_v30 = vld [vmem:[#allocation3 + $0xd8] sm:$0xff] }
 0x6cd   : > { %v6465_v18 = vadd.f32 %v6464_v32, %v6216_v39 }
 0x6ce   : > { %v7849_v56 = vadd.f32 %v7848_v63, %v7797_v40  ;;  %v7317_v54 = vadd.f32 %v7189_v4, %v6927_v55  ;;  %v6651_v40 = vpack.c.bf16 %v11154_v12, %v6610_v30  ;;  %v7000_v55 = vld [vmem:[#allocation3 + $0xd9] sm:$0xff] }
 0x6cf   : > { %v7041_v4 = vpack.c.bf16 %v11156_v19, %v7000_v55  ;;  %v6067_v33 = vpack.c.bf16 %v7000_v55, %v11136_v45  ;;  %v7577_v45 = vpop.permute.xlu0 %7576  ;;  %v11202_v55 = vld [vmem:[#allocation3 + $0x101] sm:$0xff] }
 0x6d0   : > { %v7374_v26 = vadd.f32 %v11085_v28, %v7317_v54 }
 0x6d2   : > { %v7427_v47 = vmax.f32 %v7374_v26, 0.0 }
 0x6d3   : > { %v6801_v31 = vpop.f32.mrf.mxu2  ;;  %v6219_v6 = vpop.f32.mrf.mxu0 }
 0x6d4   : > { %v7798_v48 = vmul.f32 %v7552_v20, %v7427_v47  ;;  %v6928_v62 = vadd.f32 %v6801_v31, %v6465_v18  ;;  %v7191_v27 = vpop.f32.mrf.mxu3  ;;  %v6467_v52 = vpop.f32.mrf.mxu1 }
 0x6d5   : > { %v6468_v21 = vadd.f32 %v6467_v52, %v6219_v6 }
 0x6d6   : > { %v7850_v5 = vadd.f32 %v7849_v56, %v7798_v48  ;;  %v7318_v51 = vadd.f32 %v7191_v27, %v6928_v62  ;;  %8589 = vmatmul.msk.bf16.gmra.mxu0 %vm468_vm3, %v6065_v17  ;;  %v7499_v62 = vld [vmem:[%s11507_s11 + $0xb8] sm:$0xff]  ;;  %v7572_v27 = vpop.permute.xlu2 %7571  ;;  %v11174_v17 = vld [vmem:[#allocation3 + $0xf0] sm:$0xff] }
 0x6d7   : > { %8632 = vmatmul.msk.bf16.gmra.mxu1 %vm468_vm3, %v5977_v59  ;;  %7646 = vperm.xlu2 %8851, %v7499_v62  }
 0x6d8   : > { %8683 = vmatmul.msk.bf16.gmra.mxu2 %vm468_vm3, %v6650_v23  ;;  %v7375_v14 = vadd.f32 %v11085_v28, %v7318_v51 }
 0x6d9   : > { %8734 = vmatmul.msk.bf16.gmra.mxu3 %vm468_vm3, %v7040_v13  ;;  %v5979_v13 = vpack.c.bf16 %v6610_v30, %v11134_v46  ;;  %v11200_v30 = vld [vmem:[#allocation3 + $0x100] sm:$0xff] }
 0x6da   : > { %v7428_v3 = vmax.f32 %v7375_v14, 0.0  ;;  %v6612_v14 = vld [vmem:[#allocation3 + $0xe8] sm:$0xff] }
 0x6db   : > { %v6804_v34 = vpop.f32.mrf.mxu2  ;;  %v6221_v11 = vpop.f32.mrf.mxu0 }
 0x6dc   : > { %v7799_v15 = vmul.f32 %v7557_v9, %v7428_v3  ;;  %v6929_v24 = vadd.f32 %v6804_v34, %v6468_v21  ;;  %v7194_v1 = vpop.f32.mrf.mxu3  ;;  %v6469_v35 = vpop.f32.mrf.mxu1  ;;  %v11176_v21 = vld [vmem:[#allocation3 + $0xf1] sm:$0xff]  ;;  %v6652_v34 = vpack.c.bf16 %v11174_v17, %v6612_v14 }
 0x6dd   : > { %v6470_v29 = vadd.f32 %v6469_v35, %v6221_v11  ;;  %v7504_v11 = vld [vmem:[%s11507_s11 + $0xe0] sm:$0xff] }
 0x6de   : > { %v7851_v37 = vadd.f32 %v7850_v5, %v7799_v15  ;;  %v7319_v60 = vadd.f32 %v7194_v1, %v6929_v24  ;;  %v7002_v15 = vld [vmem:[#allocation3 + $0xe9] sm:$0xff]  ;;  %7671 = vperm.xlu1 %8850, %v7504_v11  }
 0x6df   : > { %v7503_v24 = vld [vmem:[%s11507_s11 + $0xd8] sm:$0xff]  ;;  %v7042_v1 = vpack.c.bf16 %v11176_v21, %v7002_v15 }
 0x6e0   : > { %v7376_v0 = vadd.f32 %v11085_v28, %v7319_v60  ;;  %7666 = vperm.xlu0 %8849, %v7503_v24  }
 0x6e2   : > { %v7429_v58 = vmax.f32 %v7376_v0, 0.0 }
 0x6e3   : > { %v6806_v57 = vpop.f32.mrf.mxu2  ;;  %v6224_v43 = vpop.f32.mrf.mxu0 }
 0x6e4   : > { %v7800_v2 = vmul.f32 %v7562_v61, %v7429_v58  ;;  %v6930_v63 = vadd.f32 %v6806_v57, %v6470_v29  ;;  %v7196_v53 = vpop.f32.mrf.mxu3  ;;  %v6472_v41 = vpop.f32.mrf.mxu1 }
 0x6e5   : > { %v6473_v36 = vadd.f32 %v6472_v41, %v6224_v43  ;;  %v7507_v43 = vld [vmem:[%s11507_s11 + $0xf8] sm:$0xff]  ;;  %v7582_v41 = vpop.permute.xlu1 %7581 }
 0x6e6   : > { %v7852_v50 = vadd.f32 %v7851_v37, %v7800_v2  ;;  %v7320_v25 = vadd.f32 %v7196_v53, %v6930_v63  ;;  %8590 = vmatmul.msk.bf16.gmra.mxu0 %vm468_vm3, %v6066_v16  ;;  %v7506_v53 = vld [vmem:[%s11507_s11 + $0xf0] sm:$0xff]  ;;  %7686 = vperm.xlu1 %8850, %v7507_v43  }
 0x6e7   : > { %8633 = vmatmul.msk.bf16.gmra.mxu1 %vm468_vm3, %v5978_v49 }
 0x6e8   : > { %8684 = vmatmul.msk.bf16.gmra.mxu2 %vm468_vm3, %v6651_v40  ;;  %v7377_v39 = vadd.f32 %v11085_v28, %v7320_v25  ;;  %7681 = vperm.xlu0 %8849, %v7506_v53  }
 0x6e9   : > { %8735 = vmatmul.msk.bf16.gmra.mxu3 %vm468_vm3, %v7041_v4 }
 0x6ea   : > { %v7430_v32 = vmax.f32 %v7377_v39, 0.0  ;;  %v6068_v39 = vpack.c.bf16 %v7002_v15, %v11156_v19  ;;  %v7509_v19 = vld [vmem:[%s11507_s11 + $0x108] sm:$0xff] }
 0x6eb   : > { %v6809_v56 = vpop.f32.mrf.mxu2  ;;  %v6226_v26 = vpop.f32.mrf.mxu0 }
 0x6ec   : > { %v7801_v54 = vmul.f32 %v7567_v38, %v7430_v32  ;;  %v6931_v18 = vadd.f32 %v6809_v56, %v6473_v36  ;;  %v7199_v20 = vpop.f32.mrf.mxu3  ;;  %v6474_v42 = vpop.f32.mrf.mxu1  ;;  %v5980_v38 = vpack.c.bf16 %v6612_v14, %v11154_v12  ;;  %v7513_v14 = vld [vmem:[%s11507_s11 + $0x128] sm:$0xff] }
 0x6ed   : > { %v6475_v31 = vadd.f32 %v6474_v42, %v6226_v26  ;;  %v8831_v26 = vld [vmem:[%s11503_s7 + $0x28] sm:$0xff] }
 0x6ee   : > { %v7853_v22 = vadd.f32 %v7852_v50, %v7801_v54  ;;  %v7321_v47 = vadd.f32 %v7199_v20, %v6931_v18  ;;  %v6653_v18 = vpack.c.bf16 %v11200_v30, %v6614_v10  ;;  %v7004_v20 = vld [vmem:[#allocation3 + $0xf9] sm:$0xff]  ;;  %7975 = vmatpush.bf16.msrb.mxu0 %v8831_v26 }
 0x6ef   : > { %v7043_v42 = vpack.c.bf16 %v11202_v55, %v7004_v20  ;;  %v11264_v26 = vld [vmem:[#allocation3 + $0x120] sm:$0xff] }
 0x6f0   : > { %v7378_v48 = vadd.f32 %v11085_v28, %v7321_v47  ;;  %v7502_v47 = vld [vmem:[%s11507_s11 + $0xd0] sm:$0xff]  ;;  %7696 = vperm.xlu0 %8849, %v7509_v19  }
 0x6f1   : > { %7661 = vperm.xlu2 %8851, %v7502_v47   ;;  %v11266_v47 = vld [vmem:[#allocation3 + $0x121] sm:$0xff] }
 0x6f2   : > { %v7431_v6 = vmax.f32 %v7378_v48, 0.0 }
 0x6f3   : > { %v6811_v52 = vpop.f32.mrf.mxu2  ;;  %v6229_v51 = vpop.f32.mrf.mxu0 }
 0x6f4   : > { %v7802_v59 = vmul.f32 %v7572_v27, %v7431_v6  ;;  %v6932_v8 = vadd.f32 %v6811_v52, %v6475_v31  ;;  %v7201_v5 = vpop.f32.mrf.mxu3  ;;  %v6477_v23 = vpop.f32.mrf.mxu1  ;;  %v7510_v31 = vld [vmem:[%s11507_s11 + $0x110] sm:$0xff] }
 0x6f5   : > { %v6478_v3 = vadd.f32 %v6477_v23, %v6229_v51  ;;  %7701 = vperm.xlu1 %8850, %v7510_v31  }
 0x6f6   : > { %v7854_v9 = vadd.f32 %v7853_v22, %v7802_v59  ;;  %v7322_v7 = vadd.f32 %v7201_v5, %v6932_v8  ;;  %8591 = vmatmul.msk.bf16.gmra.mxu0 %vm468_vm3, %v6067_v33  ;;  %v7587_v22 = vpop.permute.xlu2 %7586 }
 0x6f7   : > { %8634 = vmatmul.msk.bf16.gmra.mxu1 %vm468_vm3, %v5979_v13  ;;  %v7512_v13 = vld [vmem:[%s11507_s11 + $0x120] sm:$0xff] }
 0x6f8   : > { %8685 = vmatmul.msk.bf16.gmra.mxu2 %vm468_vm3, %v6652_v34  ;;  %v7379_v46 = vadd.f32 %v11085_v28, %v7322_v7  ;;  %7711 = vperm.xlu0 %8849, %v7512_v13   ;;  %v11232_v34 = vld [vmem:[#allocation3 + $0x110] sm:$0xff]  ;;  %v7522_v13 = vld [vmem:[%s11507_s11 + $0x170] sm:$0xff] }
 0x6f9   : > { %8736 = vmatmul.msk.bf16.gmra.mxu3 %vm468_vm3, %v7042_v1 }
 0x6fa   : > { %v7432_v35 = vmax.f32 %v7379_v46, 0.0 }
 0x6fb   : > { %v6814_v37 = vpop.f32.mrf.mxu2  ;;  %v6231_v44 = vpop.f32.mrf.mxu0 }
 0x6fc   : > { %v7803_v60 = vmul.f32 %v7577_v45, %v7432_v35  ;;  %v6933_v29 = vadd.f32 %v6814_v37, %v6478_v3  ;;  %v7204_v0 = vpop.f32.mrf.mxu3  ;;  %v6479_v61 = vpop.f32.mrf.mxu1  ;;  %v11234_v45 = vld [vmem:[#allocation3 + $0x111] sm:$0xff]  ;;  %v6069_v35 = vpack.c.bf16 %v7004_v20, %v11176_v21  ;;  %v5981_v37 = vpack.c.bf16 %v6614_v10, %v11174_v17 }
 0x6fd   : > { %v6480_v2 = vadd.f32 %v6479_v61, %v6231_v44  ;;  %7716 = vperm.xlu1 %8850, %v7513_v14   ;;  %v7597_v21 = vpop.permute.xlu1 %7596  ;;  %v7505_v10 = vld [vmem:[%s11507_s11 + $0xe8] sm:$0xff] }
 0x6fe   : > { %v7855_v58 = vadd.f32 %v7854_v9, %v7803_v60  ;;  %v7323_v57 = vadd.f32 %v7204_v0, %v6933_v29  ;;  %v7592_v9 = vpop.permute.xlu0 %7591  ;;  %v6616_v60 = vld [vmem:[#allocation3 + $0x108] sm:$0xff]  ;;  %7676 = vperm.xlu2 %8851, %v7505_v10  }
 0x6ff   : > { %v6654_v61 = vpack.c.bf16 %v11232_v34, %v6616_v60 }
 0x700   : > { %v7380_v63 = vadd.f32 %v11085_v28, %v7323_v57 }
 0x702   : > { %v7433_v16 = vmax.f32 %v7380_v63, 0.0  ;;  %v7516_v63 = vld [vmem:[%s11507_s11 + $0x140] sm:$0xff] }
 0x703   : > { %v6816_v49 = vpop.f32.mrf.mxu2  ;;  %v6234_v40 = vpop.f32.mrf.mxu0 }
 0x704   : > { %v7804_v50 = vmul.f32 %v7582_v41, %v7433_v16  ;;  %v6934_v25 = vadd.f32 %v6816_v49, %v6480_v2  ;;  %v7206_v36 = vpop.f32.mrf.mxu3  ;;  %v6482_v4 = vpop.f32.mrf.mxu1  ;;  %v7515_v2 = vld [vmem:[%s11507_s11 + $0x138] sm:$0xff] }
 0x705   : > { %v6483_v54 = vadd.f32 %v6482_v4, %v6234_v40  ;;  %7726 = vperm.xlu0 %8849, %v7515_v2   ;;  %7731 = vperm.xlu1 %8850, %v7516_v63  }
 0x706   : > { %v7856_v32 = vadd.f32 %v7855_v58, %v7804_v50  ;;  %v7324_v56 = vadd.f32 %v7206_v36, %v6934_v25  ;;  %8592 = vmatmul.msk.bf16.gmra.mxu0 %vm468_vm3, %v6068_v39  ;;  %v7006_v58 = vld [vmem:[#allocation3 + $0x109] sm:$0xff] }
 0x707   : > { %8635 = vmatmul.msk.bf16.gmra.mxu1 %vm468_vm3, %v5980_v38  ;;  %v7044_v57 = vpack.c.bf16 %v11234_v45, %v7006_v58  ;;  %v8837_v38 = vld [vmem:[%s11505_s9 + $0x18] sm:$0xff] }
 0x708   : > { %8686 = vmatmul.msk.bf16.gmra.mxu2 %vm468_vm3, %v6653_v18  ;;  %v7381_v12 = vadd.f32 %v11085_v28, %v7324_v56  ;;  %v7602_v56 = vpop.permute.xlu2 %7601  ;;  %8028 = vmatpush.bf16.msrb.mxu1 %v8837_v38 }
 0x709   : > { %8737 = vmatmul.msk.bf16.gmra.mxu3 %vm468_vm3, %v7043_v42 }
 0x70a   : > { %v7434_v48 = vmax.f32 %v7381_v12, 0.0 }
 0x70b   : > { %v6819_v62 = vpop.f32.mrf.mxu2  ;;  %v6236_v59 = vpop.f32.mrf.mxu0 }
 0x70c   : > { %v7805_v27 = vmul.f32 %v7587_v22, %v7434_v48  ;;  %v6935_v6 = vadd.f32 %v6819_v62, %v6483_v54  ;;  %v7209_v52 = vpop.f32.mrf.mxu3  ;;  %v6484_v8 = vpop.f32.mrf.mxu1  ;;  %v7519_v54 = vld [vmem:[%s11507_s11 + $0x158] sm:$0xff]  ;;  %v6070_v48 = vpack.c.bf16 %v7006_v58, %v11202_v55  ;;  %v5982_v62 = vpack.c.bf16 %v6616_v60, %v11200_v30  ;;  %v7521_v55 = vld [vmem:[%s11507_s11 + $0x168] sm:$0xff] }
 0x70d   : > { %v6485_v23 = vadd.f32 %v6484_v8, %v6236_v59  ;;  %7746 = vperm.xlu1 %8850, %v7519_v54   ;;  %v7511_v60 = vld [vmem:[%s11507_s11 + $0x118] sm:$0xff] }
 0x70e   : > { %v7857_v5 = vadd.f32 %v7856_v32, %v7805_v27  ;;  %v7325_v51 = vadd.f32 %v7209_v52, %v6935_v6  ;;  %v7518_v32 = vld [vmem:[%s11507_s11 + $0x150] sm:$0xff]  ;;  %v6618_v27 = vld [vmem:[#allocation3 + $0x118] sm:$0xff] }
 0x70f   : > { %7741 = vperm.xlu0 %8849, %v7518_v32   ;;  %v6655_v8 = vpack.c.bf16 %v11264_v26, %v6618_v27  ;;  %v7528_v32 = vld [vmem:[%s11507_s11 + $0x1a0] sm:$0x1f] }
 0x710   : > { %v7382_v33 = vadd.f32 %v11085_v28, %v7325_v51  ;;  %v7508_v51 = vld [vmem:[%s11507_s11 + $0x100] sm:$0xff]  ;;  %v7617_v10 = vpop.permute.xlu2 %7616 }
 0x711   : > { %7691 = vperm.xlu2 %8851, %v7508_v51  }
 0x712   : > { %v7435_v7 = vmax.f32 %v7382_v33, 0.0  ;;  %v7607_v33 = vpop.permute.xlu0 %7606 }
 0x713   : > { %v6821_v3 = vpop.f32.mrf.mxu2  ;;  %v6239_v46 = vpop.f32.mrf.mxu0 }
 0x714   : > { %v7806_v15 = vmul.f32 %v7592_v9, %v7435_v7  ;;  %v6936_v24 = vadd.f32 %v6821_v3, %v6485_v23  ;;  %v7211_v1 = vpop.f32.mrf.mxu3  ;;  %v6487_v11 = vpop.f32.mrf.mxu1 }
 0x715   : > { %v6488_v44 = vadd.f32 %v6487_v11, %v6239_v46  ;;  %7761 = vperm.xlu1 %8850, %v7522_v13  }
 0x716   : > { %v7858_v29 = vadd.f32 %v7857_v5, %v7806_v15  ;;  %v7326_v0 = vadd.f32 %v7211_v1, %v6936_v24  ;;  %8593 = vmatmul.msk.bf16.gmra.mxu0 %vm468_vm3, %v6069_v35  ;;  %v7008_v5 = vld [vmem:[#allocation3 + $0x119] sm:$0xff] }
 0x717   : > { %8636 = vmatmul.msk.bf16.gmra.mxu1 %vm468_vm3, %v5981_v37  ;;  %v7045_v23 = vpack.c.bf16 %v11266_v47, %v7008_v5  ;;  %7756 = vperm.xlu0 %8849, %v7521_v55  }
 0x718   : > { %8687 = vmatmul.msk.bf16.gmra.mxu2 %vm468_vm3, %v6654_v61  ;;  %v7383_v17 = vadd.f32 %v11085_v28, %v7326_v0  ;;  %v7525_v0 = vld [vmem:[%s11507_s11 + $0x188] sm:$0xff] }
 0x719   : > { %8738 = vmatmul.msk.bf16.gmra.mxu3 %vm468_vm3, %v7044_v57  ;;  %7706 = vperm.xlu2 %8851, %v7511_v60   ;;  %v11296_v57 = vld [vmem:[#allocation3 + $0x130] sm:$0xff] }
 0x71a   : > { %v7436_v53 = vmax.f32 %v7383_v17, 0.0 }
 0x71b   : > { %v6824_v43 = vpop.f32.mrf.mxu2  ;;  %v6241_v50 = vpop.f32.mrf.mxu0 }
 0x71c   : > { %v7807_v41 = vmul.f32 %v7597_v21, %v7436_v53  ;;  %v6937_v16 = vadd.f32 %v6824_v43, %v6488_v44  ;;  %v7214_v49 = vpop.f32.mrf.mxu3  ;;  %v6489_v25 = vpop.f32.mrf.mxu1  ;;  %v11298_v53 = vld [vmem:[#allocation3 + $0x131] sm:$0xff] }
 0x71d   : > { %v6490_v4 = vadd.f32 %v6489_v25, %v6241_v50  ;;  %v7612_v44 = vpop.permute.xlu1 %7611  ;;  %7776 = vperm.xlu1 %8850, %v7525_v0  }
 0x71e   : > { %v7859_v36 = vadd.f32 %v7858_v29, %v7807_v41  ;;  %v7327_v40 = vadd.f32 %v7214_v49, %v6937_v16  ;;  %v7524_v29 = vld [vmem:[%s11507_s11 + $0x180] sm:$0xff]  ;;  %v6071_v41 = vpack.c.bf16 %v7008_v5, %v11234_v45  ;;  %v5983_v16 = vpack.c.bf16 %v6618_v27, %v11232_v34  ;;  %v6620_v49 = vld [vmem:[#allocation3 + $0x128] sm:$0xff]  ;;  %v11325_v5 = vld [vmem:[#allocation3 + $0x140] sm:$0xff] }
 0x71f   : > { %7771 = vperm.xlu0 %8849, %v7524_v29   ;;  %v7527_v45 = vld [vmem:[%s11507_s11 + $0x198] sm:$0xff] }
 0x720   : > { %v7384_v39 = vadd.f32 %v11085_v28, %v7327_v40  ;;  %v6656_v40 = vpack.c.bf16 %v11296_v57, %v6620_v49 }
 0x722   : > { %v7437_v18 = vmax.f32 %v7384_v39, 0.0  ;;  %v7514_v39 = vld [vmem:[%s11507_s11 + $0x130] sm:$0xff] }
 0x723   : > { %v6826_v20 = vpop.f32.mrf.mxu2  ;;  %v6244_v22 = vpop.f32.mrf.mxu0  ;;  %7721 = vperm.xlu2 %8851, %v7514_v39   ;;  %v11347_v39 = vld [vmem:[#allocation3 + $0x151] sm:$0xff] }
 0x724   : > { %v7808_v42 = vmul.f32 %v7602_v56, %v7437_v18  ;;  %v6938_v19 = vadd.f32 %v6826_v20, %v6490_v4  ;;  %v7216_v12 = vpop.f32.mrf.mxu3  ;;  %v6492_v31 = vpop.f32.mrf.mxu1  ;;  %v7010_v4 = vld [vmem:[#allocation3 + $0x129] sm:$0xff] }
 0x725   : > { %v6493_v59 = vadd.f32 %v6492_v31, %v6244_v22  ;;  %v7046_v38 = vpack.c.bf16 %v11298_v53, %v7010_v4  ;;  %v8830_v56 = vld [vmem:[%s11503_s7 + $0x20] sm:$0xff]  ;;  %7791 = vperm.xlu1 %8850, %v7528_v32  }
 0x726   : > { %v7860_v6 = vadd.f32 %v7859_v36, %v7808_v42  ;;  %v7328_v52 = vadd.f32 %v7216_v12, %v6938_v19  ;;  %8594 = vmatmul.msk.bf16.gmra.mxu0 %vm468_vm3, %v6070_v48 }
 0x727   : > { %8637 = vmatmul.msk.bf16.gmra.mxu1 %vm468_vm3, %v5982_v62  ;;  %7786 = vperm.xlu0 %8849, %v7527_v45  }
 0x728   : > { %8688 = vmatmul.msk.bf16.gmra.mxu2 %vm468_vm3, %v6655_v8  ;;  %v7385_v30 = vadd.f32 %v11085_v28, %v7328_v52  ;;  %7976 = vmatpush.bf16.msrb.mxu0 %v8830_v56  ;;  %v7622_v52 = vpop.permute.xlu0 %7621 }
 0x729   : > { %8739 = vmatmul.msk.bf16.gmra.mxu3 %vm468_vm3, %v7045_v23 }
 0x72a   : > { %v7438_v14 = vmax.f32 %v7385_v30, 0.0 }
 0x72b   : > { %v6829_v9 = vpop.f32.mrf.mxu2  ;;  %v6246_v24 = vpop.f32.mrf.mxu0 }
 0x72c   : > { %v7809_v7 = vmul.f32 %v7607_v33, %v7438_v14  ;;  %v6939_v3 = vadd.f32 %v6829_v9, %v6493_v59  ;;  %v7219_v15 = vpop.f32.mrf.mxu3  ;;  %v6494_v1 = vpop.f32.mrf.mxu1  ;;  %v11327_v33 = vld [vmem:[#allocation3 + $0x141] sm:$0xff]  ;;  %v6072_v14 = vpack.c.bf16 %v7010_v4, %v11266_v47  ;;  %v5984_v9 = vpack.c.bf16 %v6620_v49, %v11264_v26 }
 0x72d   : > { %v6495_v35 = vadd.f32 %v6494_v1, %v6246_v24  ;;  %v7627_v47 = vpop.permute.xlu1 %7626 }
 0x72e   : > { %v7861_v46 = vadd.f32 %v7860_v6, %v7809_v7  ;;  %v7329_v11 = vadd.f32 %v7219_v15, %v6939_v3  ;;  %v7517_v6 = vld [vmem:[%s11507_s11 + $0x148] sm:$0xff] }
 0x72f   : > { %7736 = vperm.xlu2 %8851, %v7517_v6   ;;  %v6622_v7 = vld [vmem:[#allocation3 + $0x138] sm:$0xff] }
 0x730   : > { %v7386_v37 = vadd.f32 %v11085_v28, %v7329_v11  ;;  %v6657_v1 = vpack.c.bf16 %v11325_v5, %v6622_v7  ;;  %v7520_v11 = vld [vmem:[%s11507_s11 + $0x160] sm:$0xff] }
 0x732   : > { %v7439_v61 = vmax.f32 %v7386_v37, 0.0 }
 0x733   : > { %v6831_v58 = vpop.f32.mrf.mxu2  ;;  %v6249_v63 = vpop.f32.mrf.mxu0 }
 0x734   : > { %v7810_v2 = vmul.f32 %v7612_v44, %v7439_v61  ;;  %v6940_v17 = vadd.f32 %v6831_v58, %v6495_v35  ;;  %v7221_v21 = vpop.f32.mrf.mxu3  ;;  %v6497_v43 = vpop.f32.mrf.mxu1 }
 0x735   : > { %v6498_v36 = vadd.f32 %v6497_v43, %v6249_v63  ;;  %v7523_v43 = vld [vmem:[%s11507_s11 + $0x178] sm:$0xff] }
 0x736   : > { %v7862_v50 = vadd.f32 %v7861_v46, %v7810_v2  ;;  %v7330_v25 = vadd.f32 %v7221_v21, %v6940_v17  ;;  %8595 = vmatmul.msk.bf16.gmra.mxu0 %vm468_vm3, %v6071_v41  ;;  %v7012_v46 = vld [vmem:[#allocation3 + $0x139] sm:$0xff]  ;;  %v7632_v41 = vpop.permute.xlu2 %7631 }
 0x737   : > { %8638 = vmatmul.msk.bf16.gmra.mxu1 %vm468_vm3, %v5983_v16  ;;  %v7047_v35 = vpack.c.bf16 %v11327_v33, %v7012_v46  ;;  %7751 = vperm.xlu2 %8851, %v7520_v11   ;;  %v6073_v45 = vpack.c.bf16 %v7012_v46, %v11298_v53  ;;  %v7637_v53 = vpop.permute.xlu0 %7636  ;;  %v6626_v11 = vld [vmem:[#allocation3 + $0x158] sm:$0xff] }
 0x738   : > { %8689 = vmatmul.msk.bf16.gmra.mxu2 %vm468_vm3, %v6656_v40  ;;  %v7387_v34 = vadd.f32 %v11085_v28, %v7330_v25 }
 0x739   : > { %8740 = vmatmul.msk.bf16.gmra.mxu3 %vm468_vm3, %v7046_v38 }
 0x73a   : > { %v7440_v54 = vmax.f32 %v7387_v34, 0.0  ;;  %v5985_v34 = vpack.c.bf16 %v6622_v7, %v11296_v57 }
 0x73b   : > { %v6834_v18 = vpop.f32.mrf.mxu2  ;;  %v6251_v12 = vpop.f32.mrf.mxu0 }
 0x73c   : > { %v7811_v20 = vmul.f32 %v7617_v10, %v7440_v54  ;;  %v6941_v42 = vadd.f32 %v6834_v18, %v6498_v36  ;;  %v7224_v19 = vpop.f32.mrf.mxu3  ;;  %v6499_v22 = vpop.f32.mrf.mxu1  ;;  %v6624_v10 = vld [vmem:[#allocation3 + $0x148] sm:$0xff] }
 0x73d   : > { %v6500_v62 = vadd.f32 %v6499_v22, %v6251_v12  ;;  %v5986_v46 = vpack.c.bf16 %v6624_v10, %v11325_v5 }
 0x73e   : > { %v7863_v31 = vadd.f32 %v7862_v50, %v7811_v20  ;;  %v7331_v48 = vadd.f32 %v7224_v19, %v6941_v42  ;;  %v11345_v50 = vld [vmem:[#allocation3 + $0x150] sm:$0xff]  ;;  %v7526_v42 = vld [vmem:[%s11507_s11 + $0x190] sm:$0xff]  ;;  %v7647_v5 = vpop.permute.xlu2 %7646 }
 0x73f   : > { %7766 = vperm.xlu2 %8851, %v7523_v43   ;;  %v6658_v18 = vpack.c.bf16 %v11345_v50, %v6624_v10  ;;  %v7014_v20 = vld [vmem:[#allocation3 + $0x149] sm:$0xff]  ;;  %v11378_v10 = vld [vmem:[#allocation3 + $0x171] sm:$0xff] }
 0x740   : > { %v7388_v27 = vadd.f32 %v11085_v28, %v7331_v48  ;;  %v7048_v19 = vpack.c.bf16 %v11347_v39, %v7014_v20 }
 0x742   : > { %v7441_v59 = vmax.f32 %v7388_v27, 0.0 }
 0x743   : > { %v6836_v8 = vpop.f32.mrf.mxu2  ;;  %v6254_v30 = vpop.f32.mrf.mxu0 }
 0x744   : > { %v7812_v51 = vmul.f32 %v7622_v52, %v7441_v59  ;;  %v6942_v23 = vadd.f32 %v6836_v8, %v6500_v62  ;;  %v7226_v55 = vpop.f32.mrf.mxu3  ;;  %v6502_v13 = vpop.f32.mrf.mxu1 }
 0x745   : > { %v6503_v24 = vadd.f32 %v6502_v13, %v6254_v30  ;;  %v11362_v13 = vld [vmem:[#allocation3 + $0x160] sm:$0xff] }
 0x746   : > { %v7864_v3 = vadd.f32 %v7863_v31, %v7812_v51  ;;  %v7332_v15 = vadd.f32 %v7226_v55, %v6942_v23  ;;  %8596 = vmatmul.msk.bf16.gmra.mxu0 %vm468_vm3, %v6072_v14  ;;  %v7642_v23 = vpop.permute.xlu1 %7641 }
 0x747   : > { %8639 = vmatmul.msk.bf16.gmra.mxu1 %vm468_vm3, %v5984_v9  ;;  %7781 = vperm.xlu2 %8851, %v7526_v42  }
 0x748   : > { %8690 = vmatmul.msk.bf16.gmra.mxu2 %vm468_vm3, %v6657_v1  ;;  %v7389_v26 = vadd.f32 %v11085_v28, %v7332_v15  ;;  %v11364_v15 = vld [vmem:[#allocation3 + $0x161] sm:$0xff]  ;;  %v6074_v1 = vpack.c.bf16 %v7014_v20, %v11327_v33 }
 0x749   : > { %8741 = vmatmul.msk.bf16.gmra.mxu3 %vm468_vm3, %v7047_v35 }
 0x74a   : > { %v7442_v37 = vmax.f32 %v7389_v26, 0.0 }
 0x74b   : > { %v6839_v60 = vpop.f32.mrf.mxu2  ;;  %v6256_v61 = vpop.f32.mrf.mxu0 }
 0x74c   : > { %v7813_v29 = vmul.f32 %v7627_v47, %v7442_v37  ;;  %v6943_v0 = vadd.f32 %v6839_v60, %v6503_v24  ;;  %v7229_v44 = vpop.f32.mrf.mxu3  ;;  %v6504_v58 = vpop.f32.mrf.mxu1  ;;  %v6659_v37 = vpack.c.bf16 %v11362_v13, %v6626_v11  ;;  %v7016_v60 = vld [vmem:[#allocation3 + $0x159] sm:$0xff] }
 0x74d   : > { %v6505_v21 = vadd.f32 %v6504_v58, %v6256_v61 }
 0x74e   : > { %v7865_v2 = vadd.f32 %v7864_v3, %v7813_v29  ;;  %v7333_v17 = vadd.f32 %v7229_v44, %v6943_v0  ;;  %v7049_v29 = vpack.c.bf16 %v11364_v15, %v7016_v60 }
 0x750   : > { %v7390_v63 = vadd.f32 %v11085_v28, %v7333_v17 }
 0x752   : > { %v7443_v16 = vmax.f32 %v7390_v63, 0.0 }
 0x753   : > { %v6841_v49 = vpop.f32.mrf.mxu2  ;;  %v6259_v4 = vpop.f32.mrf.mxu0 }
 0x754   : > { %v7814_v25 = vmul.f32 %v7632_v41, %v7443_v16  ;;  %v6944_v36 = vadd.f32 %v6841_v49, %v6505_v21  ;;  %v7231_v40 = vpop.f32.mrf.mxu3  ;;  %v6507_v38 = vpop.f32.mrf.mxu1 }
 0x755   : > { %v6508_v54 = vadd.f32 %v6507_v38, %v6259_v4  ;;  %v7652_v49 = vpop.permute.xlu0 %7651 }
 0x756   : > { %v7866_v32 = vadd.f32 %v7865_v2, %v7814_v25  ;;  %v7334_v56 = vadd.f32 %v7231_v40, %v6944_v36  ;;  %8597 = vmatmul.msk.bf16.gmra.mxu0 %vm468_vm3, %v6073_v45  ;;  %v11376_v40 = vld [vmem:[#allocation3 + $0x170] sm:$0xff] }
 0x757   : > { %8640 = vmatmul.msk.bf16.gmra.mxu1 %vm468_vm3, %v5985_v34 }
 0x758   : > { %8691 = vmatmul.msk.bf16.gmra.mxu2 %vm468_vm3, %v6658_v18  ;;  %v7391_v57 = vadd.f32 %v11085_v28, %v7334_v56  ;;  %v6628_v18 = vld [vmem:[#allocation3 + $0x168] sm:$0xff] }
 0x759   : > { %8742 = vmatmul.msk.bf16.gmra.mxu3 %vm468_vm3, %v7048_v19 }
 0x75a   : > { %v7444_v12 = vmax.f32 %v7391_v57, 0.0  ;;  %v6660_v57 = vpack.c.bf16 %v11376_v40, %v6628_v18 }
 0x75b   : > { %v6844_v22 = vpop.f32.mrf.mxu2  ;;  %v6261_v27 = vpop.f32.mrf.mxu0 }
 0x75c   : > { %v7815_v31 = vmul.f32 %v7637_v53, %v7444_v12  ;;  %v6945_v48 = vadd.f32 %v6844_v22, %v6508_v54  ;;  %v7234_v62 = vpop.f32.mrf.mxu3  ;;  %v6509_v6 = vpop.f32.mrf.mxu1  ;;  %v6075_v54 = vpack.c.bf16 %v7016_v60, %v11347_v39  ;;  %v7018_v53 = vld [vmem:[#allocation3 + $0x169] sm:$0xff] }
 0x75d   : > { %v6510_v8 = vadd.f32 %v6509_v6, %v6261_v27  ;;  %v7050_v12 = vpack.c.bf16 %v11378_v10, %v7018_v53  ;;  %v7657_v22 = vpop.permute.xlu1 %7656 }
 0x75e   : > { %v7867_v52 = vadd.f32 %v7866_v32, %v7815_v31  ;;  %v7335_v59 = vadd.f32 %v7234_v62, %v6945_v48  ;;  %v8829_v32 = vld [vmem:[%s11503_s7 + $0x18] sm:$0xff] }
 0x75f   : > { %7977 = vmatpush.bf16.msrb.mxu0 %v8829_v32 }
 0x760   : > { %v7392_v51 = vadd.f32 %v11085_v28, %v7335_v59 }
 0x762   : > { %v7445_v55 = vmax.f32 %v7392_v51, 0.0 }
 0x763   : > { %v6846_v30 = vpop.f32.mrf.mxu2  ;;  %v6264_v3 = vpop.f32.mrf.mxu0 }
 0x764   : > { %v7816_v14 = vmul.f32 %v7642_v23, %v7445_v55  ;;  %v6946_v9 = vadd.f32 %v6846_v30, %v6510_v8  ;;  %v7236_v7 = vpop.f32.mrf.mxu3  ;;  %v6512_v24 = vpop.f32.mrf.mxu1 }
 0x765   : > { %v6513_v47 = vadd.f32 %v6512_v24, %v6264_v3  ;;  %v7662_v30 = vpop.permute.xlu2 %7661 }
 0x766   : > { %v7868_v35 = vadd.f32 %v7867_v52, %v7816_v14  ;;  %v7336_v26 = vadd.f32 %v7236_v7, %v6946_v9  ;;  %8598 = vmatmul.msk.bf16.gmra.mxu0 %vm468_vm3, %v6074_v1  ;;  %v11398_v7 = vld [vmem:[#allocation3 + $0x180] sm:$0xff] }
 0x767   : > { %8641 = vmatmul.msk.bf16.gmra.mxu1 %vm468_vm3, %v5986_v46 }
 0x768   : > { %8692 = vmatmul.msk.bf16.gmra.mxu2 %vm468_vm3, %v6659_v37  ;;  %v7393_v0 = vadd.f32 %v11085_v28, %v7336_v26  ;;  %v6076_v26 = vpack.c.bf16 %v7018_v53, %v11364_v15  ;;  %v6630_v37 = vld [vmem:[#allocation3 + $0x178] sm:$0xff] }
 0x769   : > { %8743 = vmatmul.msk.bf16.gmra.mxu3 %vm468_vm3, %v7049_v29 }
 0x76a   : > { %v7446_v33 = vmax.f32 %v7393_v0, 0.0 }
 0x76b   : > { %v6849_v44 = vpop.f32.mrf.mxu2  ;;  %v6266_v17 = vpop.f32.mrf.mxu0 }
 0x76c   : > { %v7817_v61 = vmul.f32 %v7647_v5, %v7446_v33  ;;  %v6947_v58 = vadd.f32 %v6849_v44, %v6513_v47  ;;  %v7239_v2 = vpop.f32.mrf.mxu3  ;;  %v6514_v21 = vpop.f32.mrf.mxu1  ;;  %v5988_v47 = vpack.c.bf16 %v6628_v18, %v11362_v13  ;;  %v6661_v5 = vpack.c.bf16 %v11398_v7, %v6630_v37  ;;  %v7020_v33 = vld [vmem:[#allocation3 + $0x179] sm:$0xff]  ;;  %v11417_v18 = vld [vmem:[#allocation3 + $0x191] sm:$0xff] }
 0x76d   : > { %v6515_v41 = vadd.f32 %v6514_v21, %v6266_v17  ;;  %v7667_v13 = vpop.permute.xlu0 %7666 }
 0x76e   : > { %v7869_v63 = vadd.f32 %v7868_v35, %v7817_v61  ;;  %v7337_v43 = vadd.f32 %v7239_v2, %v6947_v58 }
 0x770   : > { %v7394_v16 = vadd.f32 %v11085_v28, %v7337_v43  ;;  %v5987_v28 = vpack.c.bf16 %v6626_v11, %v11345_v50  ;;  %v11393_v50 = vld [vmem:[%s11502_s6] ss:$0 sm:$0xff]  ;;  %v11400_v11 = vld [vmem:[#allocation3 + $0x181] sm:$0xff] }
 0x771   : > { %v7051_v44 = vpack.c.bf16 %v11400_v11, %v7020_v33 }
 0x772   : > { %v7447_v25 = vmax.f32 %v7394_v16, 0.0 }
 0x773   : > { %v6851_v36 = vpop.f32.mrf.mxu2  ;;  %v6269_v34 = vpop.f32.mrf.mxu0 }
 0x774   : > { %v7818_v4 = vmul.f32 %v7652_v49, %v7447_v25  ;;  %v6948_v38 = vadd.f32 %v6851_v36, %v6515_v41  ;;  %v7241_v45 = vpop.f32.mrf.mxu3  ;;  %v6517_v56 = vpop.f32.mrf.mxu1  ;;  %v8836_v25 = vld [vmem:[%s11505_s9 + $0x10] sm:$0xff] }
 0x775   : > { %v6518_v19 = vadd.f32 %v6517_v56, %v6269_v34  ;;  %8029 = vmatpush.bf16.msrb.mxu1 %v8836_v25  ;;  %v11415_v34 = vld [vmem:[#allocation3 + $0x190] sm:$0xff] }
 0x776   : > { %v7870_v20 = vadd.f32 %v7869_v63, %v7818_v4  ;;  %v7338_v42 = vadd.f32 %v7241_v45, %v6948_v38  ;;  %8599 = vmatmul.msk.bf16.gmra.mxu0 %vm468_vm3, %v6075_v54  ;;  %v7672_v38 = vpop.permute.xlu1 %7671 }
 0x777   : > { %8642 = vmatmul.msk.bf16.gmra.mxu1 %vm468_vm3, %v5987_v28 }
 0x778   : > { %8693 = vmatmul.msk.bf16.gmra.mxu2 %vm468_vm3, %v6660_v57  ;;  %v7395_v39 = vadd.f32 %v11393_v50, %v7338_v42  ;;  %v6077_v42 = vpack.c.bf16 %v7020_v33, %v11378_v10  ;;  %v6632_v57 = vld [vmem:[#allocation3 + $0x188] sm:$0xff]  ;;  %v7677_v10 = vpop.permute.xlu2 %7676  ;;  %v6634_v33 = vld [vmem:[#allocation3 + $0x198] sm:$0xff] }
 0x779   : > { %8744 = vmatmul.msk.bf16.gmra.mxu3 %vm468_vm3, %v7050_v12 }
 0x77a   : > { %v7448_v31 = vmax.f32 %v7395_v39, 0.0 }
 0x77b   : > { %v6854_v48 = vpop.f32.mrf.mxu2  ;;  %v6271_v52 = vpop.f32.mrf.mxu0 }
 0x77c   : > { %v7819_v62 = vmul.f32 %v7657_v22, %v7448_v31  ;;  %v6949_v27 = vadd.f32 %v6854_v48, %v6518_v19  ;;  %v7244_v6 = vpop.f32.mrf.mxu3  ;;  %v6519_v59 = vpop.f32.mrf.mxu1  ;;  %v5989_v19 = vpack.c.bf16 %v6630_v37, %v11376_v40  ;;  %v6662_v22 = vpack.c.bf16 %v11415_v34, %v6632_v57  ;;  %v7022_v31 = vld [vmem:[#allocation3 + $0x189] sm:$0xff]  ;;  %v7024_v37 = vld [vmem:[#allocation3 + $0x199] sm:$0xff] }
 0x77d   : > { %v6520_v23 = vadd.f32 %v6519_v59, %v6271_v52  ;;  %v7052_v48 = vpack.c.bf16 %v11417_v18, %v7022_v31 }
 0x77e   : > { %v7871_v8 = vadd.f32 %v7870_v20, %v7819_v62  ;;  %v7339_v51 = vadd.f32 %v7244_v6, %v6949_v27 }
 0x780   : > { %v7396_v55 = vadd.f32 %v11393_v50, %v7339_v51 }
 0x782   : > { %v7449_v14 = vmax.f32 %v7396_v55, 0.0 }
 0x783   : > { %v6856_v9 = vpop.f32.mrf.mxu2  ;;  %v6274_v46 = vpop.f32.mrf.mxu0 }
 0x784   : > { %v7820_v3 = vmul.f32 %v7662_v30, %v7449_v14  ;;  %v6950_v24 = vadd.f32 %v6856_v9, %v6520_v23  ;;  %v7246_v1 = vpop.f32.mrf.mxu3  ;;  %v6522_v35 = vpop.f32.mrf.mxu1 }
 0x785   : > { %v6523_v0 = vadd.f32 %v6522_v35, %v6274_v46 }
 0x786   : > { %v7872_v60 = vadd.f32 %v7871_v8, %v7820_v3  ;;  %v7340_v29 = vadd.f32 %v7246_v1, %v6950_v24  ;;  %8600 = vmatmul.msk.bf16.gmra.mxu0 %vm468_vm3, %v6076_v26  ;;  %v7682_v3 = vpop.permute.xlu0 %7681  ;;  %v6635_v1 = vld [vmem:[#allocation3 + $0x1a0] sm:$0xff] }
 0x787   : > { %8643 = vmatmul.msk.bf16.gmra.mxu1 %vm468_vm3, %v5988_v47 }
 0x788   : > { %8694 = vmatmul.msk.bf16.gmra.mxu2 %vm468_vm3, %v6661_v5  ;;  %v7397_v61 = vadd.f32 %v11393_v50, %v7340_v29  ;;  %v5990_v5 = vpack.c.bf16 %v6632_v57, %v11398_v7 }
 0x789   : > { %8745 = vmatmul.msk.bf16.gmra.mxu3 %vm468_vm3, %v7051_v44 }
 0x78a   : > { %v7450_v15 = vmax.f32 %v7397_v61, 0.0 }
 0x78b   : > { %v6859_v58 = vpop.f32.mrf.mxu2  ;;  %v6276_v63 = vpop.f32.mrf.mxu0 }
 0x78c   : > { %v7821_v2 = vmul.f32 %v7667_v13, %v7450_v15  ;;  %v6951_v17 = vadd.f32 %v6859_v58, %v6523_v0  ;;  %v7249_v21 = vpop.f32.mrf.mxu3  ;;  %v6524_v43 = vpop.f32.mrf.mxu1  ;;  %v6078_v0 = vpack.c.bf16 %v7022_v31, %v11400_v11  ;;  %v6663_v15 = vpack.c.bf16 %v6635_v1, %v6634_v33 }
 0x78d   : > { %v6525_v49 = vadd.f32 %v6524_v43, %v6276_v63  ;;  %v7687_v11 = vpop.permute.xlu1 %7686  ;;  %v6079_v31 = vpack.c.bf16 %v7024_v37, %v11417_v18 }
 0x78e   : > { %v7873_v41 = vadd.f32 %v7872_v60, %v7821_v2  ;;  %v7341_v16 = vadd.f32 %v7249_v21, %v6951_v17  ;;  %v7025_v60 = vld [vmem:[#allocation3 + $0x1a1] sm:$0xff] }
 0x78f   : > { %v7053_v58 = vpack.c.bf16 %v7025_v60, %v7024_v37  ;;  %v5965_v37 = vld [vmem:[#allocation3 + $0x1a0] sm:$0x1f] }
 0x790   : > { %v7398_v36 = vadd.f32 %v11393_v50, %v7341_v16 }
 0x792   : > { %v7451_v4 = vmax.f32 %v7398_v36, 0.0 }
 0x793   : > { %v6861_v45 = vpop.f32.mrf.mxu2  ;;  %v6279_v28 = vpop.f32.mrf.mxu0 }
 0x794   : > { %v7822_v32 = vmul.f32 %v7672_v38, %v7451_v4  ;;  %v6952_v56 = vadd.f32 %v6861_v45, %v6525_v49  ;;  %v7251_v54 = vpop.f32.mrf.mxu3  ;;  %v6527_v20 = vpop.f32.mrf.mxu1  ;;  %v8828_v4 = vld [vmem:[%s11503_s7 + $0x10] sm:$0xff]  ;;  %v6636_v45 = vld [vmem:[#allocation3 + $0x1a8] sm:$0xff] }
 0x795   : > { %v6528_v12 = vadd.f32 %v6527_v20, %v6279_v28  ;;  %7978 = vmatpush.bf16.msrb.mxu0 %v8828_v4  ;;  %v7027_v28 = vld [vmem:[#allocation3 + $0x1b1] sm:$0xff]  ;;  %v7692_v20 = vpop.permute.xlu2 %7691 }
 0x796   : > { %v7342_v53 = vadd.f32 %v7251_v54, %v6952_v56  ;;  %v7874_v39 = vadd.f32 %v7873_v41, %v7822_v32  ;;  %8601 = vmatmul.msk.bf16.gmra.mxu0 %vm468_vm3, %v6077_v42  ;;  %v6637_v32 = vld [vmem:[#allocation3 + $0x1b0] sm:$0xff] }
 0x797   : > { %8644 = vmatmul.msk.bf16.gmra.mxu1 %vm468_vm3, %v5989_v19  ;;  %v7026_v54 = vld [vmem:[#allocation3 + $0x1a9] sm:$0xff] }
 0x798   : > { %v7399_v62 = vadd.f32 %v11393_v50, %v7342_v53  ;;  %8695 = vmatmul.msk.bf16.gmra.mxu2 %vm468_vm3, %v6662_v22 }
 0x799   : > { %8746 = vmatmul.msk.bf16.gmra.mxu3 %vm468_vm3, %v7052_v48  ;;  %v7054_v48 = vpack.c.bf16 %v7027_v28, %v7026_v54 }
 0x79a   : > { %v7452_v40 = vmax.f32 %v7399_v62, 0.0 }
 0x79b   : > { %v6864_v27 = vpop.f32.mrf.mxu2  ;;  %v6281_v8 = vpop.f32.mrf.mxu0 }
 0x79c   : > { %v7823_v6 = vmul.f32 %v7677_v10, %v7452_v40  ;;  %v6953_v52 = vadd.f32 %v6864_v27, %v6528_v12  ;;  %v7254_v59 = vpop.f32.mrf.mxu3  ;;  %v6529_v51 = vpop.f32.mrf.mxu1  ;;  %v5991_v27 = vpack.c.bf16 %v6634_v33, %v11415_v34 }
 0x79d   : > { %v6530_v9 = vadd.f32 %v6529_v51, %v6281_v8 }
 0x79e   : > { %v7875_v23 = vadd.f32 %v7874_v39, %v7823_v6  ;;  %v7343_v55 = vadd.f32 %v7254_v59, %v6953_v52  ;;  %v6664_v39 = vpack.c.bf16 %v6637_v32, %v6636_v45  ;;  %v7697_v59 = vpop.permute.xlu0 %7696 }
 0x7a0   : > { %v7400_v30 = vadd.f32 %v11393_v50, %v7343_v55 }
 0x7a2   : > { %v7453_v14 = vmax.f32 %v7400_v30, 0.0 }
 0x7a3   : > { %v6866_v24 = vpop.f32.mrf.mxu2  ;;  %v6284_v47 = vpop.f32.mrf.mxu0 }
 0x7a4   : > { %v7824_v46 = vmul.f32 %v7682_v3, %v7453_v14  ;;  %v6954_v35 = vadd.f32 %v6866_v24, %v6530_v9  ;;  %v7256_v26 = vpop.f32.mrf.mxu3  ;;  %v6532_v29 = vpop.f32.mrf.mxu1  ;;  %v6638_v24 = vld [vmem:[#allocation3 + $0x1b8] sm:$0x1f] }
 0x7a5   : > { %v6533_v13 = vadd.f32 %v6532_v29, %v6284_v47  ;;  %v6665_v33 = vpack.c.bf16 %v6638_v24, %v6638_v24 }
 0x7a6   : > { %v7876_v44 = vadd.f32 %v7875_v23, %v7824_v46  ;;  %v7344_v61 = vadd.f32 %v7256_v26, %v6954_v35  ;;  %8602 = vmatmul.msk.bf16.gmra.mxu0 %vm468_vm3, %v6078_v0  ;;  %v6053_v46 = vld [vmem:[#allocation3 + $0x1a1] sm:$0x1f]  ;;  %v7028_v35 = vld [vmem:[#allocation3 + $0x1b9] sm:$0x1f]  ;;  %v7702_v26 = vpop.permute.xlu1 %7701 }
 0x7a7   : > { %8645 = vmatmul.msk.bf16.gmra.mxu1 %vm468_vm3, %v5990_v5 }
 0x7a8   : > { %v7401_v2 = vadd.f32 %v11393_v50, %v7344_v61  ;;  %8696 = vmatmul.msk.bf16.gmra.mxu2 %vm468_vm3, %v6663_v15  ;;  %v6080_v61 = vpack.c.bf16 %v6053_v46, %v6053_v46 }
 0x7a9   : > { %8747 = vmatmul.msk.bf16.gmra.mxu3 %vm468_vm3, %v7053_v58 }
 0x7aa   : > { %v7454_v17 = vmax.f32 %v7401_v2, 0.0 }
 0x7ab   : > { %v6869_v21 = vpop.f32.mrf.mxu2  ;;  %v6286_v41 = vpop.f32.mrf.mxu0 }
 0x7ac   : > { %v7825_v7 = vmul.f32 %v7687_v11, %v7454_v17  ;;  %v6955_v63 = vadd.f32 %v6869_v21, %v6533_v13  ;;  %v7259_v43 = vpop.f32.mrf.mxu3  ;;  %v6534_v16 = vpop.f32.mrf.mxu1  ;;  %v7055_v13 = vpack.c.bf16 %v7028_v35, %v7028_v35  ;;  %v5992_v17 = vpack.c.bf16 %v5965_v37, %v5965_v37 }
 0x7ad   : > { %v6535_v36 = vadd.f32 %v6534_v16, %v6286_v41 }
 0x7ae   : > { %v7877_v49 = vadd.f32 %v7876_v44, %v7825_v7  ;;  %v7345_v25 = vadd.f32 %v7259_v43, %v6955_v63  ;;  %v7707_v7 = vpop.permute.xlu2 %7706 }
 0x7b0   : > { %v7402_v38 = vadd.f32 %v11393_v50, %v7345_v25 }
 0x7b2   : > { %v7455_v56 = vmax.f32 %v7402_v38, 0.0 }
 0x7b3   : > { %v6871_v42 = vpop.f32.mrf.mxu2  ;;  %v6289_v12 = vpop.f32.mrf.mxu0 }
 0x7b4   : > { %v7826_v19 = vmul.f32 %v7692_v20, %v7455_v56  ;;  %v6956_v57 = vadd.f32 %v6871_v42, %v6535_v36  ;;  %v7261_v53 = vpop.f32.mrf.mxu3  ;;  %v6537_v22 = vpop.f32.mrf.mxu1 }
 0x7b5   : > { %v6538_v10 = vadd.f32 %v6537_v22, %v6289_v12  ;;  %v7712_v56 = vpop.permute.xlu0 %7711 }
 0x7b6   : > { %v7878_v62 = vadd.f32 %v7877_v49, %v7826_v19  ;;  %v7346_v40 = vadd.f32 %v7261_v53, %v6956_v57  ;;  %8603 = vmatmul.msk.bf16.gmra.mxu0 %vm468_vm3, %v6079_v31 }
 0x7b7   : > { %8646 = vmatmul.msk.bf16.gmra.mxu1 %vm468_vm3, %v5991_v27 }
 0x7b8   : > { %v7403_v6 = vadd.f32 %v11393_v50, %v7346_v40  ;;  %8697 = vmatmul.msk.bf16.gmra.mxu2 %vm468_vm3, %v6664_v39 }
 0x7b9   : > { %8748 = vmatmul.msk.bf16.gmra.mxu3 %vm468_vm3, %v7054_v48  ;;  %v7717_v48 = vpop.permute.xlu1 %7716 }
 0x7ba   : > { %v7456_v52 = vmax.f32 %v7403_v6, 0.0 }
 0x7bb   : > { %v6874_v8 = vpop.f32.mrf.mxu2  ;;  %v6291_v55 = vpop.f32.mrf.mxu0 }
 0x7bc   : > { %v7827_v18 = vmul.f32 %v7697_v59, %v7456_v52  ;;  %v6957_v51 = vadd.f32 %v6874_v8, %v6538_v10  ;;  %v7264_v23 = vpop.f32.mrf.mxu3  ;;  %v6539_v30 = vpop.f32.mrf.mxu1 }
 0x7bd   : > { %v6540_v9 = vadd.f32 %v6539_v30, %v6291_v55  ;;  %v7722_v55 = vpop.permute.xlu2 %7721 }
 0x7be   : > { %v7879_v14 = vadd.f32 %v7878_v62, %v7827_v18  ;;  %v7347_v34 = vadd.f32 %v7264_v23, %v6957_v51 }
 0x7c0   : > { %v7404_v3 = vadd.f32 %v11393_v50, %v7347_v34 }
 0x7c2   : > { %v7457_v1 = vmax.f32 %v7404_v3, 0.0 }
 0x7c3   : > { %v6876_v47 = vpop.f32.mrf.mxu2  ;;  %v6294_v5 = vpop.f32.mrf.mxu0 }
 0x7c4   : > { %v7828_v60 = vmul.f32 %v7702_v26, %v7457_v1  ;;  %v6958_v29 = vadd.f32 %v6876_v47, %v6540_v9  ;;  %v7266_v0 = vpop.f32.mrf.mxu3  ;;  %v6542_v44 = vpop.f32.mrf.mxu1  ;;  %v8827_v26 = vld [vmem:[%s11503_s7 + $0x8] sm:$0xff] }
 0x7c5   : > { %v6543_v2 = vadd.f32 %v6542_v44, %v6294_v5  ;;  %7979 = vmatpush.bf16.msrb.mxu0 %v8827_v26 }
 0x7c6   : > { %v7880_v15 = vadd.f32 %v7879_v14, %v7828_v60  ;;  %v7348_v58 = vadd.f32 %v7266_v0, %v6958_v29  ;;  %8604 = vmatmul.msk.bf16.gmra.mxu0 %vm468_vm3, %v6080_v61  ;;  %v7727_v60 = vpop.permute.xlu0 %7726 }
 0x7c7   : > { %8647 = vmatmul.msk.bf16.gmra.mxu1 %vm468_vm3, %v5992_v17 }
 0x7c8   : > { %v7405_v11 = vadd.f32 %v11393_v50, %v7348_v58  ;;  %8698 = vmatmul.msk.bf16.gmra.mxu2 %vm468_vm3, %v6665_v33 }
 0x7c9   : > { %8749 = vmatmul.msk.bf16.gmra.mxu3 %vm468_vm3, %v7055_v13 }
 0x7ca   : > { %v7458_v21 = vmax.f32 %v7405_v11, 0.0  ;;  %v7732_v11 = vpop.permute.xlu1 %7731 }
 0x7cb   : > { %v6879_v63 = vpop.f32.mrf.mxu2  ;;  %v6296_v49 = vpop.f32.mrf.mxu0 }
 0x7cc   : > { %v7829_v43 = vmul.f32 %v7707_v7, %v7458_v21  ;;  %v6959_v41 = vadd.f32 %v6879_v63, %v6543_v2  ;;  %v7269_v16 = vpop.f32.mrf.mxu3  ;;  %v6544_v25 = vpop.f32.mrf.mxu1 }
 0x7cd   : > { %v6545_v38 = vadd.f32 %v6544_v25, %v6296_v49 }
 0x7ce   : > { %v7881_v36 = vadd.f32 %v7880_v15, %v7829_v43  ;;  %v7349_v4 = vadd.f32 %v7269_v16, %v6959_v41 }
 0x7d0   : > { %v7406_v45 = vadd.f32 %v11393_v50, %v7349_v4 }
 0x7d2   : > { %v7459_v32 = vmax.f32 %v7406_v45, 0.0  ;;  %v7737_v45 = vpop.permute.xlu2 %7736 }
 0x7d3   : > { %v6881_v54 = vpop.f32.mrf.mxu2  ;;  %v6299_v19 = vpop.f32.mrf.mxu0 }
 0x7d4   : > { %v7830_v28 = vmul.f32 %v7712_v56, %v7459_v32  ;;  %v6960_v20 = vadd.f32 %v6881_v54, %v6545_v38  ;;  %v7271_v42 = vpop.f32.mrf.mxu3  ;;  %v6547_v57 = vpop.f32.mrf.mxu1 }
 0x7d5   : > { %v6548_v39 = vadd.f32 %v6547_v57, %v6299_v19 }
 0x7d6   : > { %v7882_v53 = vadd.f32 %v7881_v36, %v7830_v28  ;;  %v7350_v12 = vadd.f32 %v7271_v42, %v6960_v20 }
 0x7d8   : > { %v7407_v22 = vadd.f32 %v11393_v50, %v7350_v12 }
 0x7da   : > { %v7460_v31 = vmax.f32 %v7407_v22, 0.0  ;;  %v7742_v22 = vpop.permute.xlu0 %7741 }
 0x7db   : > { %v6884_v62 = vpop.f32.mrf.mxu2  ;;  %v6301_v6 = vpop.f32.mrf.mxu0 }
 0x7dc   : > { %v7831_v40 = vmul.f32 %v7717_v48, %v7460_v31  ;;  %v6961_v10 = vadd.f32 %v6884_v62, %v6548_v39  ;;  %v7274_v27 = vpop.f32.mrf.mxu3  ;;  %v6549_v52 = vpop.f32.mrf.mxu1 }
 0x7dd   : > { %v6550_v18 = vadd.f32 %v6549_v52, %v6301_v6 }
 0x7de   : > { %v7883_v59 = vadd.f32 %v7882_v53, %v7831_v40  ;;  %v7351_v8 = vadd.f32 %v7274_v27, %v6961_v10  ;;  %v8835_v53 = vld [vmem:[%s11505_s9 + $0x8] sm:$0xff] }
 0x7df   : > { %8030 = vmatpush.bf16.msrb.mxu1 %v8835_v53 }
 0x7e0   : > { %v7408_v51 = vadd.f32 %v11393_v50, %v7351_v8 }
 0x7e2   : > { %v7461_v23 = vmax.f32 %v7408_v51, 0.0 }
 0x7e3   : > { %v6886_v30 = vpop.f32.mrf.mxu2  ;;  %v6304_v3 = vpop.f32.mrf.mxu0 }
 0x7e4   : > { %v7832_v14 = vmul.f32 %v7722_v55, %v7461_v23  ;;  %v6962_v34 = vadd.f32 %v6886_v30, %v6550_v18  ;;  %v7276_v9 = vpop.f32.mrf.mxu3  ;;  %v6552_v24 = vpop.f32.mrf.mxu1  ;;  %v8826_v30 = vld [vmem:[%s11503_s7] sm:$0xff] }
 0x7e5   : > { %v6553_v35 = vadd.f32 %v6552_v24, %v6304_v3  ;;  %7980 = vmatpush.bf16.msrb.mxu0 %v8826_v30 }
 0x7e6   : > { %v7884_v1 = vadd.f32 %v7883_v59, %v7832_v14  ;;  %v7352_v46 = vadd.f32 %v7276_v9, %v6962_v34 }
 0x7e8   : > { %v7409_v47 = vadd.f32 %v11393_v50, %v7352_v46 }
 0x7ea   : > { %v7462_v37 = vmax.f32 %v7409_v47, 0.0 }
 0x7eb   : > { %v6889_v29 = vpop.f32.mrf.mxu2  ;;  %v6306_v44 = vpop.f32.mrf.mxu0 }
 0x7ec   : > { %v7833_v0 = vmul.f32 %v7727_v60, %v7462_v37  ;;  %v6963_v5 = vadd.f32 %v6889_v29, %v6553_v35  ;;  %v7279_v33 = vpop.f32.mrf.mxu3  ;;  %v6554_v61 = vpop.f32.mrf.mxu1 }
 0x7ed   : > { %v6555_v58 = vadd.f32 %v6554_v61, %v6306_v44 }
 0x7ee   : > { %v7885_v13 = vadd.f32 %v7884_v1, %v7833_v0  ;;  %v7353_v15 = vadd.f32 %v7279_v33, %v6963_v5 }
 0x7f0   : > { %v7410_v2 = vadd.f32 %v11393_v50, %v7353_v15 }
 0x7f2   : > { %v7463_v17 = vmax.f32 %v7410_v2, 0.0  ;;  %v7747_v2 = vpop.permute.xlu1 %7746 }
 0x7f3   : > { %v6891_v21 = vpop.f32.mrf.mxu2  ;;  %v6309_v41 = vpop.f32.mrf.mxu0 }
 0x7f4   : > { %v7834_v7 = vmul.f32 %v7732_v11, %v7463_v17  ;;  %v6964_v63 = vadd.f32 %v6891_v21, %v6555_v58  ;;  %v7281_v43 = vpop.f32.mrf.mxu3  ;;  %v6557_v16 = vpop.f32.mrf.mxu1 }
 0x7f5   : > { %v6558_v36 = vadd.f32 %v6557_v16, %v6309_v41  ;;  %v7752_v16 = vpop.permute.xlu2 %7751 }
 0x7f6   : > { %v7886_v49 = vadd.f32 %v7885_v13, %v7834_v7  ;;  %v7354_v25 = vadd.f32 %v7281_v43, %v6964_v63 }
 0x7f8   : > { %v7411_v4 = vadd.f32 %v11393_v50, %v7354_v25 }
 0x7fa   : > { %v7464_v38 = vmax.f32 %v7411_v4, 0.0  ;;  %v7757_v4 = vpop.permute.xlu0 %7756 }
 0x7fb   : > { %v6894_v32 = vpop.f32.mrf.mxu2  ;;  %v6311_v20 = vpop.f32.mrf.mxu0 }
 0x7fc   : > { %v7835_v56 = vmul.f32 %v7737_v45, %v7464_v38  ;;  %v6965_v54 = vadd.f32 %v6894_v32, %v6558_v36  ;;  %v7284_v28 = vpop.f32.mrf.mxu3  ;;  %v6559_v42 = vpop.f32.mrf.mxu1 }
 0x7fd   : > { %v6560_v29 = vadd.f32 %v6559_v42, %v6311_v20 }
 0x7fe   : > { %v7887_v19 = vadd.f32 %v7886_v49, %v7835_v56  ;;  %v7355_v57 = vadd.f32 %v7284_v28, %v6965_v54 }
 0x800   : > { %v7412_v12 = vadd.f32 %v11393_v50, %v7355_v57 }
 0x802   : > { %v7465_v39 = vmax.f32 %v7412_v12, 0.0 }
 0x803   : > { %v6896_v31 = vpop.f32.mrf.mxu2  ;;  %v6314_v40 = vpop.f32.mrf.mxu0 }
 0x804   : > { %v7836_v48 = vmul.f32 %v7742_v22, %v7465_v39  ;;  %v7286_v62 = vpop.f32.mrf.mxu3  ;;  %v6562_v10 = vpop.f32.mrf.mxu1  ;;  %v6966_v0 = vadd.f32 %v6896_v31, %v6560_v29 }
 0x805   : > { %v6563_v5 = vadd.f32 %v6562_v10, %v6314_v40  ;;  %v7762_v22 = vpop.permute.xlu1 %7761 }
 0x806   : > { %v11466_v27 = vadd.f32 %v7887_v19, %v7836_v48  ;;  %v7356_v13 = vadd.f32 %v7286_v62, %v6966_v0 }
 0x808   : > { %v7413_v41 = vadd.f32 %v11393_v50, %v7356_v13 }
 0x80a   : > { %v7466_v28 = vmax.f32 %v7413_v41, 0.0 }
 0x80b   : > { %v6899_v6 = vpop.f32.mrf.mxu2  ;;  %v6316_v59 = vpop.f32.mrf.mxu0 }
 0x80c   : > { %v7289_v52 = vpop.f32.mrf.mxu3  ;;  %v6564_v8 = vpop.f32.mrf.mxu1  ;;  %v6967_v33 = vadd.f32 %v6899_v6, %v6563_v5  ;;  %v7837_v10 = vmul.f32 %v7747_v2, %v7466_v28 }
 0x80d   : > { %v6565_v44 = vadd.f32 %v6564_v8, %v6316_v59 }
 0x80e   : > { %v7357_v7 = vadd.f32 %v7289_v52, %v6967_v33  ;;  %v8834_v33 = vld [vmem:[%s11505_s9] sm:$0xff] }
 0x80f   : > { %8031 = vmatpush.bf16.msrb.mxu1 %v8834_v33 }
 0x810   : > { %v7414_v38 = vadd.f32 %v11393_v50, %v7357_v7 }
 0x812   : > { %v7467_v31 = vmax.f32 %v7414_v38, 0.0 }
 0x813   : > { %v6901_v18 = vpop.f32.mrf.mxu2  ;;  %v6319_v23 = vpop.f32.mrf.mxu0 }
 0x814   : > { %v7291_v51 = vpop.f32.mrf.mxu3  ;;  %v6567_v55 = vpop.f32.mrf.mxu1  ;;  %v6968_v17 = vadd.f32 %v6901_v18, %v6565_v44 }
 0x815   : > { %v6568_v11 = vadd.f32 %v6567_v55, %v6319_v23  ;;  %v7767_v18 = vpop.permute.xlu2 %7766  ;;  %v7777_v44 = vpop.permute.xlu1 %7776 }
 0x816   : > { %v7358_v49 = vadd.f32 %v7291_v51, %v6968_v17  ;;  %v7838_v51 = vmul.f32 %v7752_v16, %v7467_v31 }
 0x818   : > { %v7415_v19 = vadd.f32 %v11393_v50, %v7358_v49 }
 0x81a   : > { %v7468_v6 = vmax.f32 %v7415_v19, 0.0 }
 0x81b   : > { %v6904_v14 = vpop.f32.mrf.mxu2  ;;  %v6321_v9 = vpop.f32.mrf.mxu0 }
 0x81c   : > { %v7294_v34 = vpop.f32.mrf.mxu3  ;;  %v6569_v3 = vpop.f32.mrf.mxu1  ;;  %v6969_v63 = vadd.f32 %v6904_v14, %v6568_v11 }
 0x81d   : > { %v6570_v43 = vadd.f32 %v6569_v3, %v6321_v9 }
 0x81e   : > { %v7359_v45 = vadd.f32 %v7294_v34, %v6969_v63 }
 0x820   : > { %v7416_v48 = vadd.f32 %v11393_v50, %v7359_v45 }
 0x822   : > { %v7469_v23 = vmax.f32 %v7416_v48, 0.0 }
 0x823   : > { %v6906_v24 = vpop.f32.mrf.mxu2  ;;  %v6324_v46 = vpop.f32.mrf.mxu0 }
 0x824   : > { %v7296_v1 = vpop.f32.mrf.mxu3  ;;  %v6572_v35 = vpop.f32.mrf.mxu1  ;;  %v6970_v25 = vadd.f32 %v6906_v24, %v6570_v43  ;;  %v7889_v24 = vadd.f32 %v11466_v27, %v7837_v10  ;;  %v7840_v29 = vmul.f32 %v7762_v22, %v7469_v23 }
 0x825   : > { %v6573_v36 = vadd.f32 %v6572_v35, %v6324_v46 }
 0x826   : > { %v7360_v57 = vadd.f32 %v7296_v1, %v6970_v25  ;;  %v7839_v1 = vmul.f32 %v7757_v4, %v7468_v6 }
 0x828   : > { %v7417_v52 = vadd.f32 %v11393_v50, %v7360_v57 }
 0x82a   : > { %v7470_v46 = vmax.f32 %v7417_v52, 0.0 }
 0x82b   : > { %v6909_v26 = vpop.f32.mrf.mxu2  ;;  %v6326_v37 = vpop.f32.mrf.mxu0 }
 0x82c   : > { %v7299_v47 = vpop.f32.mrf.mxu3  ;;  %v6574_v60 = vpop.f32.mrf.mxu1  ;;  %v6971_v32 = vadd.f32 %v6909_v26, %v6573_v36  ;;  %v7841_v13 = vmul.f32 %v7767_v18, %v7470_v46 }
 0x82d   : > { %v6575_v56 = vadd.f32 %v6574_v60, %v6326_v37  ;;  %v7890_v60 = vadd.f32 %v7889_v24, %v7838_v51  ;;  %v7782_v36 = vpop.permute.xlu2 %7781 }
 0x82e   : > { %v7361_v62 = vadd.f32 %v7299_v47, %v6971_v32  ;;  %v7772_v47 = vpop.permute.xlu0 %7771 }
 0x830   : > { %v7418_v55 = vadd.f32 %v11393_v50, %v7361_v62 }
 0x832   : > { %v7471_v0 = vmax.f32 %v7418_v55, 0.0 }
 0x833   : > { %v6911_v61 = vpop.f32.mrf.mxu2  ;;  %v6329_v58 = vpop.f32.mrf.mxu0 }
 0x834   : > { %v7301_v15 = vpop.f32.mrf.mxu3  ;;  %v6577_v21 = vpop.f32.mrf.mxu1  ;;  %v6972_v53 = vadd.f32 %v6911_v61, %v6575_v56  ;;  %v7891_v61 = vadd.f32 %v7890_v60, %v7839_v1  ;;  %v7842_v17 = vmul.f32 %v7772_v47, %v7471_v0 }
 0x835   : > { %v6578_v12 = vadd.f32 %v6577_v21, %v6329_v58 }
 0x836   : > { %v7362_v59 = vadd.f32 %v7301_v15, %v6972_v53  ;;  %v7892_v2 = vadd.f32 %v7891_v61, %v7840_v29  ;;  %v7787_v32 = vpop.permute.xlu0 %7786 }
 0x838   : > { %v7419_v35 = vadd.f32 %v11393_v50, %v7362_v59  ;;  %v7893_v41 = vadd.f32 %v7892_v2, %v7841_v13 }
 0x83a   : > { %v7472_v27 = vmax.f32 %v7419_v35, 0.0  ;;  %v7894_v38 = vadd.f32 %v7893_v41, %v7842_v17 }
 0x83b   : > { %v6914_v54 = vpop.f32.mrf.mxu2  ;;  %v6331_v42 = vpop.f32.mrf.mxu0 }
 0x83c   : > { %v7304_v20 = vpop.f32.mrf.mxu3  ;;  %v6579_v39 = vpop.f32.mrf.mxu1  ;;  %v6973_v40 = vadd.f32 %v6914_v54, %v6578_v12  ;;  %v7843_v16 = vmul.f32 %v7777_v44, %v7472_v27 }
 0x83d   : > { %v6580_v8 = vadd.f32 %v6579_v39, %v6331_v42  ;;  %v7792_v42 = vpop.permute.xlu1 %7791 }
 0x83e   : > { %v7363_v30 = vadd.f32 %v7304_v20, %v6973_v40  ;;  %v7895_v54 = vadd.f32 %v7894_v38, %v7843_v16 }
 0x840   : > { %v7420_v5 = vadd.f32 %v11393_v50, %v7363_v30  ;;  %v7996_v30 = vld [vmem:[#allocation4] sm:$0x1] }
 0x842   : > { %v7473_v11 = vmax.f32 %v7420_v5, 0.0 }
 0x843   : > { %v6916_v14 = vpop.f32.mrf.mxu2  ;;  %v6334_v3 = vpop.f32.mrf.mxu0 }
 0x844   : > { %v6974_v34 = vadd.f32 %v6916_v14, %v6580_v8  ;;  %v7306_v9 = vpop.f32.mrf.mxu3  ;;  %v6582_v26 = vpop.f32.mrf.mxu1  ;;  %v7844_v45 = vmul.f32 %v7782_v36, %v7473_v11 }
 0x845   : > { %v6583_v58 = vadd.f32 %v6582_v26, %v6334_v3 }
 0x846   : > { %v7364_v37 = vadd.f32 %v7306_v9, %v6974_v34  ;;  %v7896_v19 = vadd.f32 %v7895_v54, %v7844_v45 }
 0x848   : > { %v7421_v15 = vadd.f32 %v11393_v50, %v7364_v37 }
 0x84a   : > { %v7474_v49 = vmax.f32 %v7421_v15, 0.0 }
 0x84b   : > { %v6919_v21 = vpop.f32.mrf.mxu2  ;;  %v6336_v43 = vpop.f32.mrf.mxu0 }
 0x84c   : > { %v6975_v7 = vadd.f32 %v6919_v21, %v6583_v58  ;;  %v7309_v63 = vpop.f32.mrf.mxu3  ;;  %v6584_v25 = vpop.f32.mrf.mxu1  ;;  %v7845_v28 = vmul.f32 %v7787_v32, %v7474_v49 }
 0x84e   : > { %v7365_v4 = vadd.f32 %v7309_v63, %v6975_v7  ;;  %v7897_v39 = vadd.f32 %v7896_v19, %v7845_v28 }
 0x850   : > { %v7422_v56 = vadd.f32 %v11393_v50, %v7365_v4  ;;  %v7924_v50 = vld [vmem:[%s11504_s8] sm:$0x1] }
 0x852   : > { %v7475_v20 = vmax.f32 %v7422_v56, 0.0 }
 0x853   : > { %v6921_v57 = vpop.f32.mrf.mxu2 }
 0x854   : > { %v7846_v53 = vmul.f32 %v7792_v42, %v7475_v20  ;;  %v7311_v12 = vpop.f32.mrf.mxu3 }
 0x856   : > { %v7899_v22 = vsel %vm7898_vm6, %v7846_v53, 0.0 }
 0x857   : > { %v7900_v31 = vadd.f32 %v7899_v22, %v7897_v39 }
 0x859   : > { %v7901_v48 = vrot.slane %v7900_v31, 4 }
 0x85b   : > { %v7902_v62 = vadd.f32 %v7901_v48, %v7900_v31 }
 0x85d   : > { %v7903_v40 = vrot.slane %v7902_v62, 2 }
 0x85f   : > { %v7904_v10 = vadd.f32 %v7903_v40, %v7902_v62 }
 0x861   : > { %v7905_v6 = vrot.slane %v7904_v10, 1 }
 0x863   : > { %v7906_v52 = vadd.f32 %v7905_v6, %v7904_v10 }
 0x865   : > { %v7907_v59 = vpack.c.bf16 %v7906_v52, %v7906_v52 }
 0x867   : > { %7981 = vmatmul.bf16.vlgmr.msrb.gmra.mxu0 %v7907_v59 }
 0x8e4   : > { %v7982_v8 = vpop.f32.mrf.mxu0 }
 0x8e5   : > { %v7983_v18 = vadd.f32 %v7982_v8, %v7924_v50 }
 0x8e7   : > { %v7986_v51 = vmax.f32 %v7983_v18, 0.0 }
 0x8e9   : > { %v7987_v23 = vpack.c.bf16 %v7986_v51, %v7986_v51 }
 0x8eb   : > { %8798 = vmatmul.msk.bf16.vlgmr.msrb.gmra.mxu1 %vm468_vm3, %v7987_v23 }
 0x8ec   : > { %v7984_v55 = vpop.f32.mrf.mxu0 }
 0x968   : > { %v8033_v14 = vpop.f32.mrf.mxu1 }
 0x969   : > { %v8034_v34 = vadd.f32 %v8033_v14, %v7996_v30 }
 0x96b   : > { %v8799_v9 = vmul.f32 -1.442695, %v8034_v34 }
 0x96d   : > { %8855 = vpow2.f32 %v8799_v9 }
 0x970   : > { %v8035_v3 = vpop.f32.mrf.mxu1 }
 0x973   : > { %v8856_v24 = vpop.eup %8855 }
 0x974   : > { %v8040_v1 = vadd.f32 1.0, %v8856_v24 }
 0x976   : > { %8857 = vrcp.f32 %v8040_v1  ;;  %v8052_v47 = vand.u32 2147483648, %v8040_v1  ;;  %v8050_v60 = vand.u32 2147483647, %v8040_v1  ;;  %vm8046_vm8 = vweird.f32 %v8040_v1 }
 0x978   : > { %v8053_v0 = vor.u32 1.1754944e-38, %v8052_v47  ;;  %vm8051_vm11 = vcmp.eq.f32.partialorder %v8050_v60, 8.507059e+37 }
 0x97c   : > { %v8858_v46 = vpop.eup %8857 }
 0x97d   : > { %v8042_v35 = vmul.f32 %v8858_v46, %v8040_v1  ;;  %vm8047_vm7 = vweird.f32 %v8858_v46 }
 0x97e   : > { %vm8048_vm9 = vmor %vm8046_vm8, %vm8047_vm7 }
 0x97f   : > { %v8043_v26 = vsub.f32 1.0, %v8042_v35 }
 0x981   : > { %v8044_v37 = vmul.f32 %v8858_v46, %v8043_v26 }
 0x983   : > { %v8045_v29 = vadd.f32 %v8858_v46, %v8044_v37 }
 0x985   : > { %v8049_v5 = vsel %vm8048_vm9, %v8858_v46, %v8045_v29 }
 0x986   : > { %v8054_v33 = vsel %vm8051_vm11, %v8053_v0, %v8049_v5 }
 0x987   : > { %8057 = vst.msk [vmem:[%s411_s27] sm:$0x1] %vm8056_vm10, %v8054_v33 }
 0x988 PF: > { %s24_s23 = sadd.s32 1, %s8868_s23  }
 0x989   : > { %p21_p4 = scmp.ge.s32.totalorder %s24_s23, 4  }
 0x98b   :  { %23 = sbr.rel (!%p21_p4) target bundleno = 3 (0x3), region = 115 }

</bundles_post_ra>
